<compile_context>
chip_gen: v7x
topology: tpu7x:2x2x1
jax: 0.10.0
libtpu: 0.0.40
codegen_flags: <defaults>
</compile_context>

<pallas_src>
import jax
import jax.numpy as jnp
from jax import lax
from jax.experimental import pallas as pl
from jax.experimental.pallas import tpu as pltpu

FILTER1 = 128
FILTER2 = 32
SEQ_LEN = 244            # forced by fc1.in_features = filter2 * 61  ->  244 / 2 / 2 = 61
L_OUT = SEQ_LEN // 4     # 61 (spatial length after both pools)
FC_HIDDEN = 128
BN_EPS = 1e-5

# Matmul operand dtype (accumulation is always f32).  Use jnp.bfloat16 on v6e/v7x for
# higher MXU throughput; keep f32 elementwise math regardless (v5e VPU/EUP are f32-only).
MXU_DTYPE = jnp.float32


# ---------------------------------------------------------------------------
# Fused Pallas kernel (one grid step == one block of BLOCK_B samples, l-major rows)
# ---------------------------------------------------------------------------
def _cnn_fused_kernel(xs_ref, w1_ref, sc1_ref, sh1_ref, w96_ref, sc2_ref, sh2_ref,
                      wf1_ref, fb1_ref, wf2_ref, fb2_ref, out_ref):
    f32 = jnp.float32
    B = out_ref.shape[-1]                           # samples per block (multiple of 8)
    R = L_OUT * B                                   # rows, l-major: row = l*B + b

    xs = xs_ref[0]                                  # (R, 6): xs[l*B+b, u] = x_pad[b, 4l+u]
    sc1 = sc1_ref[...]                              # (1, 128) folded BN1 scale
    sh1 = sh1_ref[...]                              # (1, 128) folded BN1 shift (incl. conv1 bias)
    w1k = [w1_ref[k:k + 1, :] for k in range(3)]    # 3 x (1, 128) conv1 taps

    def conv1_bn_relu(s):
        # conv1+BN1+ReLU at spatial position 4l+s for every (l, b) row (VPU, C_in=1, K=3).
        h = (xs[:, s + 0:s + 1] * w1k[0]
             + xs[:, s + 1:s + 2] * w1k[1]
             + xs[:, s + 2:s + 3] * w1k[2])          # (R, 128) via lane broadcast MACs
        return jnp.maximum(h * sc1 + sh1, 0.0)

    # pool1 fused into conv1's epilogue: only 4 conv1 evaluations are ever materialized.
    p1_e = jnp.maximum(conv1_bn_relu(0), conv1_bn_relu(1))    # p1[2l]   (R, 128)
    p1_o = jnp.maximum(conv1_bn_relu(2), conv1_bn_relu(3))    # p1[2l+1] (R, 128)

    # conv2: three taps concatenated into one (128, 96) RHS -> two (R,128)@(128,96) matmuls.
    w96 = w96_ref[...]
    y_e = jnp.dot(p1_e.astype(MXU_DTYPE), w96, preferred_element_type=f32)    # (R, 96)
    y_o = jnp.dot(p1_o.astype(MXU_DTYPE), w96, preferred_element_type=f32)    # (R, 96)

    C2 = FILTER2
    zero_blk = jnp.zeros((B, C2), f32)
    # h2[2l]   = p1[2l-1]@W0 + p1[2l]@W1   + p1[2l+1]@W2
    # h2[2l+1] = p1[2l]@W0   + p1[2l+1]@W1 + p1[2l+2]@W2
    # p1[2l-1] / p1[2l+2] come from aligned +-B row shifts of the 32-lane partial products;
    # the inserted zero rows are exactly conv2's zero padding (l-major -> no cross-sample leak).
    prev_o0 = jnp.concatenate([zero_blk, y_o[:R - B, 0:C2]], axis=0)           # p1_o[l-1] @ W0
    next_e2 = jnp.concatenate([y_e[B:, 2 * C2:3 * C2], zero_blk], axis=0)      # p1_e[l+1] @ W2

    sc2 = sc2_ref[...]                              # (1, 32) folded BN2 scale
    sh2 = sh2_ref[...]                              # (1, 32) folded BN2 shift (incl. conv2 bias)
    h2_even = prev_o0 + y_e[:, C2:2 * C2] + y_o[:, 2 * C2:3 * C2]
    h2_odd = y_e[:, 0:C2] + y_o[:, C2:2 * C2] + next_e2
    h2_even = jnp.maximum(h2_even * sc2 + sh2, 0.0)
    h2_odd = jnp.maximum(h2_odd * sc2 + sh2, 0.0)
    p2 = jnp.maximum(h2_even, h2_odd)               # (R, 32), pool2 fused

    # fc1 on the MXU: 61 aligned (B,32)@(32,128) dots into 4 independent f32 partials.
    p2m = p2.astype(MXU_DTYPE)
    accs = [jnp.zeros((B, FC_HIDDEN), f32) for _ in range(4)]
    for l in range(L_OUT):
        slab = p2m[l * B:(l + 1) * B, :]            # 8-aligned static row slab (B, 32)
        accs[l % 4] = accs[l % 4] + jnp.dot(slab, wf1_ref[l], preferred_element_type=f32)
    fc1 = (accs[0] + accs[1]) + (accs[2] + accs[3]) + fb1_ref[...]
    fc1 = jnp.maximum(fc1, 0.0)                     # (B, 128)

    # fc2 as a transposed dot -> lane-dense (1, B) output row (no narrow masked stores).
    out_row = lax.dot_general(wf2_ref[...], fc1, (((1,), (1,)), ((), ())),
                              preferred_element_type=f32) + fb2_ref[...]       # (1, B)
    out_ref[0] = out_row


# ---------------------------------------------------------------------------
# Wrapper: parameter folding / input prep + pallas_call
# ---------------------------------------------------------------------------
def _fold_bn(conv_bias, gamma, beta, mean, var, eps=BN_EPS):
    s = gamma / jnp.sqrt(var + eps)
    return s, (conv_bias - mean) * s + beta


def _prep_weights(params):
    s1, t1 = _fold_bn(params["b1"], params["bn1_g"], params["bn1_b"],
                      params["bn1_m"], params["bn1_v"])
    s2, t2 = _fold_bn(params["b2"], params["bn2_g"], params["bn2_b"],
                      params["bn2_m"], params["bn2_v"])
    w1mat = params["w1"][:, 0, :].T                                            # (3, 128) [tap, c_out]
    # conv2 taps concatenated along lanes: w96[c, k*32 + o] = w2[o, c, k]
    w96 = jnp.transpose(params["w2"], (1, 2, 0)).reshape(FILTER1, 3 * FILTER2)
    # fc1 weight rearranged to (l, c, o): wf1[l, c, o] = fc1_w[o, c*61 + l]  (torch .view flatten)
    wf1 = params["fc1_w"].reshape(FC_HIDDEN, FILTER2, L_OUT).transpose(2, 1, 0)
    return (w1mat.astype(jnp.float32),
            s1.reshape(1, FILTER1), t1.reshape(1, FILTER1),
            w96.astype(MXU_DTYPE),
            s2.reshape(1, FILTER2), t2.reshape(1, FILTER2),
            wf1.astype(MXU_DTYPE),
            params["fc1_b"].reshape(1, FC_HIDDEN),
            params["fc2_w"].reshape(1, FC_HIDDEN),
            params["fc2_b"].reshape(1, 1))


def _prep_input(x, block_b, num_blocks):
    # x: (N, 1, 244) -> per-block, l-major tap matrix xs[blk, l*B + b, u] = x_pad[n, 4l + u]
    # where x_pad is the conv1 zero-padded signal and n = blk*B + b.  Tiny: 24 B/row.
    n = x.shape[0]
    x_pad = jnp.pad(x[:, 0, :], ((0, 0), (1, 1)))                              # (N, 246)
    cols = jnp.stack([x_pad[:, u:u + 4 * (L_OUT - 1) + 1:4] for u in range(6)],
                     axis=-1)                                                  # (N, 61, 6)
    n_pad = num_blocks * block_b
    cols = jnp.pad(cols, ((0, n_pad - n), (0, 0), (0, 0)))
    cols = cols.reshape(num_blocks, block_b, L_OUT, 6).transpose(0, 2, 1, 3)
    return cols.reshape(num_blocks, L_OUT * block_b, 6)


def cnn_forward(params, x, *, block_b=16):
    """x: (N, 1, 244) float32 -> (N, 1) float32 (PyTorch CNN.forward, eval mode)."""
    n = x.shape[0]
    assert x.shape[1:] == (1, SEQ_LEN)
    # Samples per grid step: multiple of 8 (keeps row shifts / slabs sublane-aligned),
    # capped at block_b so larger batches still launch >=2 blocks (feeds both v7x TCs).
    b = min(block_b, max(8, -(-n // 8) * 8))
    assert b % 8 == 0
    num_blocks = -(-n // b)
    rows = L_OUT * b

    weights = _prep_weights(params)
    xs = _prep_input(x, b, num_blocks)

    const2 = lambda i: (0, 0)
    const3 = lambda i: (0, 0, 0)
    out = pl.pallas_call(
        _cnn_fused_kernel,
        out_shape=jax.ShapeDtypeStruct((num_blocks, 1, b), jnp.float32),
        grid=(num_blocks,),
        in_specs=[
            pl.BlockSpec((1, rows, 6), lambda i: (i, 0, 0)),          # per-block conv1 taps
            pl.BlockSpec((3, FILTER1), const2),                       # conv1 weight taps
            pl.BlockSpec((1, FILTER1), const2),                       # folded BN1 scale
            pl.BlockSpec((1, FILTER1), const2),                       # folded BN1 shift
            pl.BlockSpec((FILTER1, 3 * FILTER2), const2),             # conv2 taps, concat RHS
            pl.BlockSpec((1, FILTER2), const2),                       # folded BN2 scale
            pl.BlockSpec((1, FILTER2), const2),                       # folded BN2 shift
            pl.BlockSpec((L_OUT, FILTER2, FC_HIDDEN), const3),        # fc1 weight (l, c, o)
            pl.BlockSpec((1, FC_HIDDEN), const2),                     # fc1 bias
            pl.BlockSpec((1, FC_HIDDEN), const2),                     # fc2 weight
            pl.BlockSpec((1, 1), const2),                             # fc2 bias
        ],
        out_specs=pl.BlockSpec((1, 1, b), lambda i: (i, 0, 0)),       # lane-dense output row
        compiler_params=pltpu.CompilerParams(
            dimension_semantics=("parallel",),       # batch-block axis -> both TCs on v7x
            vmem_limit_bytes=32 * 1024 * 1024,       # explicit, portable across v5e/v6e/v7x
        ),
    )(xs, *weights)
    return out.reshape(num_blocks * b, 1)[:n]


# ---------------------------------------------------------------------------
# Parameter init (PyTorch-style defaults) and a pure-JAX reference for self-check
# ---------------------------------------------------------------------------
def init_params(key):
    ks = jax.random.split(key, 8)

    def u(k, shape, fan_in):
        bound = 1.0 / jnp.sqrt(jnp.float32(fan_in))
        return jax.random.uniform(k, shape, jnp.float32, -bound, bound)

    return {
        "w1": u(ks[0], (FILTER1, 1, 3), 1 * 3),
        "b1": u(ks[1], (FILTER1,), 1 * 3),
        "w2": u(ks[2], (FILTER2, FILTER1, 3), FILTER1 * 3),
        "b2": u(ks[3], (FILTER2,), FILTER1 * 3),
        "fc1_w": u(ks[4], (FC_HIDDEN, FILTER2 * L_OUT), FILTER2 * L_OUT),
        "fc1_b": u(ks[5], (FC_HIDDEN,), FILTER2 * L_OUT),
        "fc2_w": u(ks[6], (1, FC_HIDDEN), FC_HIDDEN),
        "fc2_b": u(ks[7], (1,), FC_HIDDEN),
        "bn1_g": jnp.ones((FILTER1,), jnp.float32),
        "bn1_b": jnp.zeros((FILTER1,), jnp.float32),
        "bn1_m": jnp.zeros((FILTER1,), jnp.float32),
        "bn1_v": jnp.ones((FILTER1,), jnp.float32),
        "bn2_g": jnp.ones((FILTER2,), jnp.float32),
        "bn2_b": jnp.zeros((FILTER2,), jnp.float32),
        "bn2_m": jnp.zeros((FILTER2,), jnp.float32),
        "bn2_v": jnp.ones((FILTER2,), jnp.float32),
    }


def reference_forward(params, x):
    # Pure-JAX mirror of the PyTorch module (eval mode); used only for the self-check.
    def conv1d_p1(h, w, b):
        L = h.shape[2]
        hp = jnp.pad(h, ((0, 0), (0, 0), (1, 1)))
        cols = jnp.stack([hp[:, :, k:k + L] for k in range(3)], axis=-1)   # (N, Ci, L, 3)
        return jnp.einsum("nclk,ock->nol", cols, w) + b[None, :, None]

    def bn(h, g, b, m, v):
        inv = g / jnp.sqrt(v + BN_EPS)
        return (h - m[None, :, None]) * inv[None, :, None] + b[None, :, None]

    def pool(h):
        L = h.shape[2] // 2
        return jnp.maximum(h[:, :, 0:2 * L:2], h[:, :, 1:2 * L:2])

    h = pool(jax.nn.relu(bn(conv1d_p1(x, params["w1"], params["b1"]),
                            params["bn1_g"], params["bn1_b"],
                            params["bn1_m"], params["bn1_v"])))
    h = pool(jax.nn.relu(bn(conv1d_p1(h, params["w2"], params["b2"]),
                            params["bn2_g"], params["bn2_b"],
                            params["bn2_m"], params["bn2_v"])))
    h = h.reshape(h.shape[0], -1)
    h = jax.nn.relu(h @ params["fc1_w"].T + params["fc1_b"])
    return h @ params["fc2_w"].T + params["fc2_b"]


if __name__ == "__main__":
    key = jax.random.PRNGKey(0)
    k_param, k_x = jax.random.split(key)
    params = init_params(k_param)
    x = jax.random.normal(k_x, (2, 1, SEQ_LEN), jnp.float32)

    out = jax.jit(cnn_forward)(params, x)
    out = jax.block_until_ready(out)
    assert out.shape == (2, 1)

    ref = reference_forward(params, x)
    max_err = float(jnp.max(jnp.abs(out - ref)))
    assert max_err < 2e-3, f"mismatch vs pure-JAX reference: {max_err}"
    # TODO(synk): training-mode Dropout / batch-statistic BatchNorm are not implemented
    # (eval-mode inference semantics only).
    print("KERNEL_OK")
</pallas_src>

<mosaic_0001>
module attributes {stable_mosaic.version = 11 : i64} {
  func.func @_cnn_fused_kernel(%arg0: i32, %arg1: memref<1x488x6xf32, #tpu.memory_space<vmem>>, %arg2: memref<3x128xf32, #tpu.memory_space<vmem>>, %arg3: memref<1x128xf32, #tpu.memory_space<vmem>>, %arg4: memref<1x128xf32, #tpu.memory_space<vmem>>, %arg5: memref<128x96xf32, #tpu.memory_space<vmem>>, %arg6: memref<1x32xf32, #tpu.memory_space<vmem>>, %arg7: memref<1x32xf32, #tpu.memory_space<vmem>>, %arg8: memref<61x32x128xf32, #tpu.memory_space<vmem>>, %arg9: memref<1x128xf32, #tpu.memory_space<vmem>>, %arg10: memref<1x128xf32, #tpu.memory_space<vmem>>, %arg11: memref<1x1xf32, #tpu.memory_space<vmem>>, %arg12: memref<1x1x8xf32, #tpu.memory_space<vmem>>) attributes {dimension_semantics = [#tpu.dimension_semantics<parallel>], iteration_bounds = array<i64: 1>, scalar_prefetch = 0 : i64, scratch_operands = 0 : i64, tpu.core_type = #tpu.core_type<tc>, window_params = [{transform_indices = @transform_0, window_bounds = array<i64: 1, 488, 6>}, {pipeline_mode = #tpu.pipeline_mode<synchronous>, transform_indices = @transform_1, window_bounds = array<i64: 3, 128>}, {pipeline_mode = #tpu.pipeline_mode<synchronous>, transform_indices = @transform_2, window_bounds = array<i64: 1, 128>}, {pipeline_mode = #tpu.pipeline_mode<synchronous>, transform_indices = @transform_3, window_bounds = array<i64: 1, 128>}, {pipeline_mode = #tpu.pipeline_mode<synchronous>, transform_indices = @transform_4, window_bounds = array<i64: 128, 96>}, {pipeline_mode = #tpu.pipeline_mode<synchronous>, transform_indices = @transform_5, window_bounds = array<i64: 1, 32>}, {pipeline_mode = #tpu.pipeline_mode<synchronous>, transform_indices = @transform_6, window_bounds = array<i64: 1, 32>}, {pipeline_mode = #tpu.pipeline_mode<synchronous>, transform_indices = @transform_7, window_bounds = array<i64: 61, 32, 128>}, {pipeline_mode = #tpu.pipeline_mode<synchronous>, transform_indices = @transform_8, window_bounds = array<i64: 1, 128>}, {pipeline_mode = #tpu.pipeline_mode<synchronous>, transform_indices = @transform_9, window_bounds = array<i64: 1, 128>}, {pipeline_mode = #tpu.pipeline_mode<synchronous>, transform_indices = @transform_10, window_bounds = array<i64: 1, 1>}, {transform_indices = @transform_11, window_bounds = array<i64: 1, 1, 8>}]} {
    %c0 = arith.constant 0 : index
    %c0_0 = arith.constant 0 : index
    %c0_1 = arith.constant 0 : index
    %0 = vector.load %arg1[%c0, %c0_0, %c0_1] : memref<1x488x6xf32, #tpu.memory_space<vmem>>, vector<1x488x6xf32>
    %1 = vector.shape_cast %0 : vector<1x488x6xf32> to vector<488x6xf32>
    %c0_2 = arith.constant 0 : index
    %c0_3 = arith.constant 0 : index
    %2 = vector.load %arg3[%c0_2, %c0_3] : memref<1x128xf32, #tpu.memory_space<vmem>>, vector<1x128xf32>
    %c0_4 = arith.constant 0 : index
    %c0_5 = arith.constant 0 : index
    %3 = vector.load %arg4[%c0_4, %c0_5] : memref<1x128xf32, #tpu.memory_space<vmem>>, vector<1x128xf32>
    %c0_6 = arith.constant 0 : index
    %c0_7 = arith.constant 0 : index
    %4 = vector.load %arg2[%c0_6, %c0_7] : memref<3x128xf32, #tpu.memory_space<vmem>>, vector<1x128xf32>
    %c1 = arith.constant 1 : index
    %c0_8 = arith.constant 0 : index
    %5 = vector.load %arg2[%c1, %c0_8] : memref<3x128xf32, #tpu.memory_space<vmem>>, vector<1x128xf32>
    %c2 = arith.constant 2 : index
    %c0_9 = arith.constant 0 : index
    %6 = vector.load %arg2[%c2, %c0_9] : memref<3x128xf32, #tpu.memory_space<vmem>>, vector<1x128xf32>
    %7 = vector.extract_strided_slice %1 {offsets = [0, 0], sizes = [488, 1], strides = [1, 1]} : vector<488x6xf32> to vector<488x1xf32>
    %8 = vector.broadcast %7 : vector<488x1xf32> to vector<488x128xf32>
    %9 = vector.broadcast %4 : vector<1x128xf32> to vector<488x128xf32>
    %10 = arith.mulf %8, %9 : vector<488x128xf32>
    %11 = vector.extract_strided_slice %1 {offsets = [0, 1], sizes = [488, 1], strides = [1, 1]} : vector<488x6xf32> to vector<488x1xf32>
    %12 = vector.broadcast %11 : vector<488x1xf32> to vector<488x128xf32>
    %13 = vector.broadcast %5 : vector<1x128xf32> to vector<488x128xf32>
    %14 = arith.mulf %12, %13 : vector<488x128xf32>
    %15 = arith.addf %10, %14 : vector<488x128xf32>
    %16 = vector.extract_strided_slice %1 {offsets = [0, 2], sizes = [488, 1], strides = [1, 1]} : vector<488x6xf32> to vector<488x1xf32>
    %17 = vector.broadcast %16 : vector<488x1xf32> to vector<488x128xf32>
    %18 = vector.broadcast %6 : vector<1x128xf32> to vector<488x128xf32>
    %19 = arith.mulf %17, %18 : vector<488x128xf32>
    %20 = arith.addf %15, %19 : vector<488x128xf32>
    %21 = vector.broadcast %2 : vector<1x128xf32> to vector<488x128xf32>
    %22 = arith.mulf %20, %21 : vector<488x128xf32>
    %23 = vector.broadcast %3 : vector<1x128xf32> to vector<488x128xf32>
    %24 = arith.addf %22, %23 : vector<488x128xf32>
    %cst = arith.constant 0.000000e+00 : f32
    %25 = vector.broadcast %cst : f32 to vector<488x128xf32>
    %26 = arith.maximumf %24, %25 : vector<488x128xf32>
    %27 = vector.extract_strided_slice %1 {offsets = [0, 1], sizes = [488, 1], strides = [1, 1]} : vector<488x6xf32> to vector<488x1xf32>
    %28 = vector.broadcast %27 : vector<488x1xf32> to vector<488x128xf32>
    %29 = vector.broadcast %4 : vector<1x128xf32> to vector<488x128xf32>
    %30 = arith.mulf %28, %29 : vector<488x128xf32>
    %31 = vector.extract_strided_slice %1 {offsets = [0, 2], sizes = [488, 1], strides = [1, 1]} : vector<488x6xf32> to vector<488x1xf32>
    %32 = vector.broadcast %31 : vector<488x1xf32> to vector<488x128xf32>
    %33 = vector.broadcast %5 : vector<1x128xf32> to vector<488x128xf32>
    %34 = arith.mulf %32, %33 : vector<488x128xf32>
    %35 = arith.addf %30, %34 : vector<488x128xf32>
    %36 = vector.extract_strided_slice %1 {offsets = [0, 3], sizes = [488, 1], strides = [1, 1]} : vector<488x6xf32> to vector<488x1xf32>
    %37 = vector.broadcast %36 : vector<488x1xf32> to vector<488x128xf32>
    %38 = vector.broadcast %6 : vector<1x128xf32> to vector<488x128xf32>
    %39 = arith.mulf %37, %38 : vector<488x128xf32>
    %40 = arith.addf %35, %39 : vector<488x128xf32>
    %41 = vector.broadcast %2 : vector<1x128xf32> to vector<488x128xf32>
    %42 = arith.mulf %40, %41 : vector<488x128xf32>
    %43 = vector.broadcast %3 : vector<1x128xf32> to vector<488x128xf32>
    %44 = arith.addf %42, %43 : vector<488x128xf32>
    %cst_10 = arith.constant 0.000000e+00 : f32
    %45 = vector.broadcast %cst_10 : f32 to vector<488x128xf32>
    %46 = arith.maximumf %44, %45 : vector<488x128xf32>
    %47 = arith.maximumf %26, %46 : vector<488x128xf32>
    %48 = vector.extract_strided_slice %1 {offsets = [0, 2], sizes = [488, 1], strides = [1, 1]} : vector<488x6xf32> to vector<488x1xf32>
    %49 = vector.broadcast %48 : vector<488x1xf32> to vector<488x128xf32>
    %50 = vector.broadcast %4 : vector<1x128xf32> to vector<488x128xf32>
    %51 = arith.mulf %49, %50 : vector<488x128xf32>
    %52 = vector.extract_strided_slice %1 {offsets = [0, 3], sizes = [488, 1], strides = [1, 1]} : vector<488x6xf32> to vector<488x1xf32>
    %53 = vector.broadcast %52 : vector<488x1xf32> to vector<488x128xf32>
    %54 = vector.broadcast %5 : vector<1x128xf32> to vector<488x128xf32>
    %55 = arith.mulf %53, %54 : vector<488x128xf32>
    %56 = arith.addf %51, %55 : vector<488x128xf32>
    %57 = vector.extract_strided_slice %1 {offsets = [0, 4], sizes = [488, 1], strides = [1, 1]} : vector<488x6xf32> to vector<488x1xf32>
    %58 = vector.broadcast %57 : vector<488x1xf32> to vector<488x128xf32>
    %59 = vector.broadcast %6 : vector<1x128xf32> to vector<488x128xf32>
    %60 = arith.mulf %58, %59 : vector<488x128xf32>
    %61 = arith.addf %56, %60 : vector<488x128xf32>
    %62 = vector.broadcast %2 : vector<1x128xf32> to vector<488x128xf32>
    %63 = arith.mulf %61, %62 : vector<488x128xf32>
    %64 = vector.broadcast %3 : vector<1x128xf32> to vector<488x128xf32>
    %65 = arith.addf %63, %64 : vector<488x128xf32>
    %cst_11 = arith.constant 0.000000e+00 : f32
    %66 = vector.broadcast %cst_11 : f32 to vector<488x128xf32>
    %67 = arith.maximumf %65, %66 : vector<488x128xf32>
    %68 = vector.extract_strided_slice %1 {offsets = [0, 3], sizes = [488, 1], strides = [1, 1]} : vector<488x6xf32> to vector<488x1xf32>
    %69 = vector.broadcast %68 : vector<488x1xf32> to vector<488x128xf32>
    %70 = vector.broadcast %4 : vector<1x128xf32> to vector<488x128xf32>
    %71 = arith.mulf %69, %70 : vector<488x128xf32>
    %72 = vector.extract_strided_slice %1 {offsets = [0, 4], sizes = [488, 1], strides = [1, 1]} : vector<488x6xf32> to vector<488x1xf32>
    %73 = vector.broadcast %72 : vector<488x1xf32> to vector<488x128xf32>
    %74 = vector.broadcast %5 : vector<1x128xf32> to vector<488x128xf32>
    %75 = arith.mulf %73, %74 : vector<488x128xf32>
    %76 = arith.addf %71, %75 : vector<488x128xf32>
    %77 = vector.extract_strided_slice %1 {offsets = [0, 5], sizes = [488, 1], strides = [1, 1]} : vector<488x6xf32> to vector<488x1xf32>
    %78 = vector.broadcast %77 : vector<488x1xf32> to vector<488x128xf32>
    %79 = vector.broadcast %6 : vector<1x128xf32> to vector<488x128xf32>
    %80 = arith.mulf %78, %79 : vector<488x128xf32>
    %81 = arith.addf %76, %80 : vector<488x128xf32>
    %82 = vector.broadcast %2 : vector<1x128xf32> to vector<488x128xf32>
    %83 = arith.mulf %81, %82 : vector<488x128xf32>
    %84 = vector.broadcast %3 : vector<1x128xf32> to vector<488x128xf32>
    %85 = arith.addf %83, %84 : vector<488x128xf32>
    %cst_12 = arith.constant 0.000000e+00 : f32
    %86 = vector.broadcast %cst_12 : f32 to vector<488x128xf32>
    %87 = arith.maximumf %85, %86 : vector<488x128xf32>
    %88 = arith.maximumf %67, %87 : vector<488x128xf32>
    %c0_13 = arith.constant 0 : index
    %c0_14 = arith.constant 0 : index
    %89 = vector.load %arg5[%c0_13, %c0_14] : memref<128x96xf32, #tpu.memory_space<vmem>>, vector<128x96xf32>
    %cst_15 = arith.constant dense<0.000000e+00> : vector<488x96xf32>
    %90 = tpu.matmul %47, %89, %cst_15 {dimension_numbers = #tpu.dot_dimension_numbers<[1], [0], [0], [1], [0, 0, 1, 1], [], []>} : vector<488x128xf32>, vector<128x96xf32>, vector<488x96xf32> -> vector<488x96xf32>
    %cst_16 = arith.constant dense<0.000000e+00> : vector<488x96xf32>
    %91 = tpu.matmul %88, %89, %cst_16 {dimension_numbers = #tpu.dot_dimension_numbers<[1], [0], [0], [1], [0, 0, 1, 1], [], []>} : vector<488x128xf32>, vector<128x96xf32>, vector<488x96xf32> -> vector<488x96xf32>
    %cst_17 = arith.constant 0.000000e+00 : f32
    %92 = vector.broadcast %cst_17 : f32 to vector<8x32xf32>
    %93 = vector.extract_strided_slice %91 {offsets = [0, 0], sizes = [480, 32], strides = [1, 1]} : vector<488x96xf32> to vector<480x32xf32>
    %94 = tpu.concatenate %92, %93 in 0 : vector<8x32xf32>, vector<480x32xf32> -> vector<488x32xf32>
    %95 = vector.extract_strided_slice %90 {offsets = [8, 64], sizes = [480, 32], strides = [1, 1]} : vector<488x96xf32> to vector<480x32xf32>
    %96 = tpu.concatenate %95, %92 in 0 : vector<480x32xf32>, vector<8x32xf32> -> vector<488x32xf32>
    %c0_18 = arith.constant 0 : index
    %c0_19 = arith.constant 0 : index
    %97 = vector.load %arg6[%c0_18, %c0_19] : memref<1x32xf32, #tpu.memory_space<vmem>>, vector<1x32xf32>
    %c0_20 = arith.constant 0 : index
    %c0_21 = arith.constant 0 : index
    %98 = vector.load %arg7[%c0_20, %c0_21] : memref<1x32xf32, #tpu.memory_space<vmem>>, vector<1x32xf32>
    %99 = vector.extract_strided_slice %90 {offsets = [0, 32], sizes = [488, 32], strides = [1, 1]} : vector<488x96xf32> to vector<488x32xf32>
    %100 = arith.addf %94, %99 : vector<488x32xf32>
    %101 = vector.extract_strided_slice %91 {offsets = [0, 64], sizes = [488, 32], strides = [1, 1]} : vector<488x96xf32> to vector<488x32xf32>
    %102 = arith.addf %100, %101 : vector<488x32xf32>
    %103 = vector.extract_strided_slice %90 {offsets = [0, 0], sizes = [488, 32], strides = [1, 1]} : vector<488x96xf32> to vector<488x32xf32>
    %104 = vector.extract_strided_slice %91 {offsets = [0, 32], sizes = [488, 32], strides = [1, 1]} : vector<488x96xf32> to vector<488x32xf32>
    %105 = arith.addf %103, %104 : vector<488x32xf32>
    %106 = arith.addf %105, %96 : vector<488x32xf32>
    %107 = vector.broadcast %97 : vector<1x32xf32> to vector<488x32xf32>
    %108 = arith.mulf %102, %107 : vector<488x32xf32>
    %109 = vector.broadcast %98 : vector<1x32xf32> to vector<488x32xf32>
    %110 = arith.addf %108, %109 : vector<488x32xf32>
    %cst_22 = arith.constant 0.000000e+00 : f32
    %111 = vector.broadcast %cst_22 : f32 to vector<488x32xf32>
    %112 = arith.maximumf %110, %111 : vector<488x32xf32>
    %113 = vector.broadcast %97 : vector<1x32xf32> to vector<488x32xf32>
    %114 = arith.mulf %106, %113 : vector<488x32xf32>
    %115 = vector.broadcast %98 : vector<1x32xf32> to vector<488x32xf32>
    %116 = arith.addf %114, %115 : vector<488x32xf32>
    %cst_23 = arith.constant 0.000000e+00 : f32
    %117 = vector.broadcast %cst_23 : f32 to vector<488x32xf32>
    %118 = arith.maximumf %116, %117 : vector<488x32xf32>
    %119 = arith.maximumf %112, %118 : vector<488x32xf32>
    %cst_24 = arith.constant 0.000000e+00 : f32
    %120 = vector.broadcast %cst_24 : f32 to vector<8x128xf32>
    %cst_25 = arith.constant 0.000000e+00 : f32
    %121 = vector.broadcast %cst_25 : f32 to vector<8x128xf32>
    %cst_26 = arith.constant 0.000000e+00 : f32
    %122 = vector.broadcast %cst_26 : f32 to vector<8x128xf32>
    %cst_27 = arith.constant 0.000000e+00 : f32
    %123 = vector.broadcast %cst_27 : f32 to vector<8x128xf32>
    %124 = vector.extract_strided_slice %119 {offsets = [0, 0], sizes = [8, 32], strides = [1, 1]} : vector<488x32xf32> to vector<8x32xf32>
    %c0_28 = arith.constant 0 : index
    %c0_29 = arith.constant 0 : index
    %c0_30 = arith.constant 0 : index
    %125 = vector.load %arg8[%c0_28, %c0_29, %c0_30] : memref<61x32x128xf32, #tpu.memory_space<vmem>>, vector<1x32x128xf32>
    %126 = vector.shape_cast %125 : vector<1x32x128xf32> to vector<32x128xf32>
    %cst_31 = arith.constant dense<0.000000e+00> : vector<8x128xf32>
    %127 = tpu.matmul %124, %126, %cst_31 {dimension_numbers = #tpu.dot_dimension_numbers<[1], [0], [0], [1], [0, 0, 1, 1], [], []>} : vector<8x32xf32>, vector<32x128xf32>, vector<8x128xf32> -> vector<8x128xf32>
    %128 = arith.addf %120, %127 : vector<8x128xf32>
    %129 = vector.extract_strided_slice %119 {offsets = [8, 0], sizes = [8, 32], strides = [1, 1]} : vector<488x32xf32> to vector<8x32xf32>
    %c1_32 = arith.constant 1 : index
    %c0_33 = arith.constant 0 : index
    %c0_34 = arith.constant 0 : index
    %130 = vector.load %arg8[%c1_32, %c0_33, %c0_34] : memref<61x32x128xf32, #tpu.memory_space<vmem>>, vector<1x32x128xf32>
    %131 = vector.shape_cast %130 : vector<1x32x128xf32> to vector<32x128xf32>
    %cst_35 = arith.constant dense<0.000000e+00> : vector<8x128xf32>
    %132 = tpu.matmul %129, %131, %cst_35 {dimension_numbers = #tpu.dot_dimension_numbers<[1], [0], [0], [1], [0, 0, 1, 1], [], []>} : vector<8x32xf32>, vector<32x128xf32>, vector<8x128xf32> -> vector<8x128xf32>
    %133 = arith.addf %121, %132 : vector<8x128xf32>
    %134 = vector.extract_strided_slice %119 {offsets = [16, 0], sizes = [8, 32], strides = [1, 1]} : vector<488x32xf32> to vector<8x32xf32>
    %c2_36 = arith.constant 2 : index
    %c0_37 = arith.constant 0 : index
    %c0_38 = arith.constant 0 : index
    %135 = vector.load %arg8[%c2_36, %c0_37, %c0_38] : memref<61x32x128xf32, #tpu.memory_space<vmem>>, vector<1x32x128xf32>
    %136 = vector.shape_cast %135 : vector<1x32x128xf32> to vector<32x128xf32>
    %cst_39 = arith.constant dense<0.000000e+00> : vector<8x128xf32>
    %137 = tpu.matmul %134, %136, %cst_39 {dimension_numbers = #tpu.dot_dimension_numbers<[1], [0], [0], [1], [0, 0, 1, 1], [], []>} : vector<8x32xf32>, vector<32x128xf32>, vector<8x128xf32> -> vector<8x128xf32>
    %138 = arith.addf %122, %137 : vector<8x128xf32>
    %139 = vector.extract_strided_slice %119 {offsets = [24, 0], sizes = [8, 32], strides = [1, 1]} : vector<488x32xf32> to vector<8x32xf32>
    %c3 = arith.constant 3 : index
    %c0_40 = arith.constant 0 : index
    %c0_41 = arith.constant 0 : index
    %140 = vector.load %arg8[%c3, %c0_40, %c0_41] : memref<61x32x128xf32, #tpu.memory_space<vmem>>, vector<1x32x128xf32>
    %141 = vector.shape_cast %140 : vector<1x32x128xf32> to vector<32x128xf32>
    %cst_42 = arith.constant dense<0.000000e+00> : vector<8x128xf32>
    %142 = tpu.matmul %139, %141, %cst_42 {dimension_numbers = #tpu.dot_dimension_numbers<[1], [0], [0], [1], [0, 0, 1, 1], [], []>} : vector<8x32xf32>, vector<32x128xf32>, vector<8x128xf32> -> vector<8x128xf32>
    %143 = arith.addf %123, %142 : vector<8x128xf32>
    %144 = vector.extract_strided_slice %119 {offsets = [32, 0], sizes = [8, 32], strides = [1, 1]} : vector<488x32xf32> to vector<8x32xf32>
    %c4 = arith.constant 4 : index
    %c0_43 = arith.constant 0 : index
    %c0_44 = arith.constant 0 : index
    %145 = vector.load %arg8[%c4, %c0_43, %c0_44] : memref<61x32x128xf32, #tpu.memory_space<vmem>>, vector<1x32x128xf32>
    %146 = vector.shape_cast %145 : vector<1x32x128xf32> to vector<32x128xf32>
    %cst_45 = arith.constant dense<0.000000e+00> : vector<8x128xf32>
    %147 = tpu.matmul %144, %146, %cst_45 {dimension_numbers = #tpu.dot_dimension_numbers<[1], [0], [0], [1], [0, 0, 1, 1], [], []>} : vector<8x32xf32>, vector<32x128xf32>, vector<8x128xf32> -> vector<8x128xf32>
    %148 = arith.addf %128, %147 : vector<8x128xf32>
    %149 = vector.extract_strided_slice %119 {offsets = [40, 0], sizes = [8, 32], strides = [1, 1]} : vector<488x32xf32> to vector<8x32xf32>
    %c5 = arith.constant 5 : index
    %c0_46 = arith.constant 0 : index
    %c0_47 = arith.constant 0 : index
    %150 = vector.load %arg8[%c5, %c0_46, %c0_47] : memref<61x32x128xf32, #tpu.memory_space<vmem>>, vector<1x32x128xf32>
    %151 = vector.shape_cast %150 : vector<1x32x128xf32> to vector<32x128xf32>
    %cst_48 = arith.constant dense<0.000000e+00> : vector<8x128xf32>
    %152 = tpu.matmul %149, %151, %cst_48 {dimension_numbers = #tpu.dot_dimension_numbers<[1], [0], [0], [1], [0, 0, 1, 1], [], []>} : vector<8x32xf32>, vector<32x128xf32>, vector<8x128xf32> -> vector<8x128xf32>
    %153 = arith.addf %133, %152 : vector<8x128xf32>
    %154 = vector.extract_strided_slice %119 {offsets = [48, 0], sizes = [8, 32], strides = [1, 1]} : vector<488x32xf32> to vector<8x32xf32>
    %c6 = arith.constant 6 : index
    %c0_49 = arith.constant 0 : index
    %c0_50 = arith.constant 0 : index
    %155 = vector.load %arg8[%c6, %c0_49, %c0_50] : memref<61x32x128xf32, #tpu.memory_space<vmem>>, vector<1x32x128xf32>
    %156 = vector.shape_cast %155 : vector<1x32x128xf32> to vector<32x128xf32>
    %cst_51 = arith.constant dense<0.000000e+00> : vector<8x128xf32>
    %157 = tpu.matmul %154, %156, %cst_51 {dimension_numbers = #tpu.dot_dimension_numbers<[1], [0], [0], [1], [0, 0, 1, 1], [], []>} : vector<8x32xf32>, vector<32x128xf32>, vector<8x128xf32> -> vector<8x128xf32>
    %158 = arith.addf %138, %157 : vector<8x128xf32>
    %159 = vector.extract_strided_slice %119 {offsets = [56, 0], sizes = [8, 32], strides = [1, 1]} : vector<488x32xf32> to vector<8x32xf32>
    %c7 = arith.constant 7 : index
    %c0_52 = arith.constant 0 : index
    %c0_53 = arith.constant 0 : index
    %160 = vector.load %arg8[%c7, %c0_52, %c0_53] : memref<61x32x128xf32, #tpu.memory_space<vmem>>, vector<1x32x128xf32>
    %161 = vector.shape_cast %160 : vector<1x32x128xf32> to vector<32x128xf32>
    %cst_54 = arith.constant dense<0.000000e+00> : vector<8x128xf32>
    %162 = tpu.matmul %159, %161, %cst_54 {dimension_numbers = #tpu.dot_dimension_numbers<[1], [0], [0], [1], [0, 0, 1, 1], [], []>} : vector<8x32xf32>, vector<32x128xf32>, vector<8x128xf32> -> vector<8x128xf32>
    %163 = arith.addf %143, %162 : vector<8x128xf32>
    %164 = vector.extract_strided_slice %119 {offsets = [64, 0], sizes = [8, 32], strides = [1, 1]} : vector<488x32xf32> to vector<8x32xf32>
    %c8 = arith.constant 8 : index
    %c0_55 = arith.constant 0 : index
    %c0_56 = arith.constant 0 : index
    %165 = vector.load %arg8[%c8, %c0_55, %c0_56] : memref<61x32x128xf32, #tpu.memory_space<vmem>>, vector<1x32x128xf32>
    %166 = vector.shape_cast %165 : vector<1x32x128xf32> to vector<32x128xf32>
    %cst_57 = arith.constant dense<0.000000e+00> : vector<8x128xf32>
    %167 = tpu.matmul %164, %166, %cst_57 {dimension_numbers = #tpu.dot_dimension_numbers<[1], [0], [0], [1], [0, 0, 1, 1], [], []>} : vector<8x32xf32>, vector<32x128xf32>, vector<8x128xf32> -> vector<8x128xf32>
    %168 = arith.addf %148, %167 : vector<8x128xf32>
    %169 = vector.extract_strided_slice %119 {offsets = [72, 0], sizes = [8, 32], strides = [1, 1]} : vector<488x32xf32> to vector<8x32xf32>
    %c9 = arith.constant 9 : index
    %c0_58 = arith.constant 0 : index
    %c0_59 = arith.constant 0 : index
    %170 = vector.load %arg8[%c9, %c0_58, %c0_59] : memref<61x32x128xf32, #tpu.memory_space<vmem>>, vector<1x32x128xf32>
    %171 = vector.shape_cast %170 : vector<1x32x128xf32> to vector<32x128xf32>
    %cst_60 = arith.constant dense<0.000000e+00> : vector<8x128xf32>
    %172 = tpu.matmul %169, %171, %cst_60 {dimension_numbers = #tpu.dot_dimension_numbers<[1], [0], [0], [1], [0, 0, 1, 1], [], []>} : vector<8x32xf32>, vector<32x128xf32>, vector<8x128xf32> -> vector<8x128xf32>
    %173 = arith.addf %153, %172 : vector<8x128xf32>
    %174 = vector.extract_strided_slice %119 {offsets = [80, 0], sizes = [8, 32], strides = [1, 1]} : vector<488x32xf32> to vector<8x32xf32>
    %c10 = arith.constant 10 : index
    %c0_61 = arith.constant 0 : index
    %c0_62 = arith.constant 0 : index
    %175 = vector.load %arg8[%c10, %c0_61, %c0_62] : memref<61x32x128xf32, #tpu.memory_space<vmem>>, vector<1x32x128xf32>
    %176 = vector.shape_cast %175 : vector<1x32x128xf32> to vector<32x128xf32>
    %cst_63 = arith.constant dense<0.000000e+00> : vector<8x128xf32>
    %177 = tpu.matmul %174, %176, %cst_63 {dimension_numbers = #tpu.dot_dimension_numbers<[1], [0], [0], [1], [0, 0, 1, 1], [], []>} : vector<8x32xf32>, vector<32x128xf32>, vector<8x128xf32> -> vector<8x128xf32>
    %178 = arith.addf %158, %177 : vector<8x128xf32>
    %179 = vector.extract_strided_slice %119 {offsets = [88, 0], sizes = [8, 32], strides = [1, 1]} : vector<488x32xf32> to vector<8x32xf32>
    %c11 = arith.constant 11 : index
    %c0_64 = arith.constant 0 : index
    %c0_65 = arith.constant 0 : index
    %180 = vector.load %arg8[%c11, %c0_64, %c0_65] : memref<61x32x128xf32, #tpu.memory_space<vmem>>, vector<1x32x128xf32>
    %181 = vector.shape_cast %180 : vector<1x32x128xf32> to vector<32x128xf32>
    %cst_66 = arith.constant dense<0.000000e+00> : vector<8x128xf32>
    %182 = tpu.matmul %179, %181, %cst_66 {dimension_numbers = #tpu.dot_dimension_numbers<[1], [0], [0], [1], [0, 0, 1, 1], [], []>} : vector<8x32xf32>, vector<32x128xf32>, vector<8x128xf32> -> vector<8x128xf32>
    %183 = arith.addf %163, %182 : vector<8x128xf32>
    %184 = vector.extract_strided_slice %119 {offsets = [96, 0], sizes = [8, 32], strides = [1, 1]} : vector<488x32xf32> to vector<8x32xf32>
    %c12 = arith.constant 12 : index
    %c0_67 = arith.constant 0 : index
    %c0_68 = arith.constant 0 : index
    %185 = vector.load %arg8[%c12, %c0_67, %c0_68] : memref<61x32x128xf32, #tpu.memory_space<vmem>>, vector<1x32x128xf32>
    %186 = vector.shape_cast %185 : vector<1x32x128xf32> to vector<32x128xf32>
    %cst_69 = arith.constant dense<0.000000e+00> : vector<8x128xf32>
    %187 = tpu.matmul %184, %186, %cst_69 {dimension_numbers = #tpu.dot_dimension_numbers<[1], [0], [0], [1], [0, 0, 1, 1], [], []>} : vector<8x32xf32>, vector<32x128xf32>, vector<8x128xf32> -> vector<8x128xf32>
    %188 = arith.addf %168, %187 : vector<8x128xf32>
    %189 = vector.extract_strided_slice %119 {offsets = [104, 0], sizes = [8, 32], strides = [1, 1]} : vector<488x32xf32> to vector<8x32xf32>
    %c13 = arith.constant 13 : index
    %c0_70 = arith.constant 0 : index
    %c0_71 = arith.constant 0 : index
    %190 = vector.load %arg8[%c13, %c0_70, %c0_71] : memref<61x32x128xf32, #tpu.memory_space<vmem>>, vector<1x32x128xf32>
    %191 = vector.shape_cast %190 : vector<1x32x128xf32> to vector<32x128xf32>
    %cst_72 = arith.constant dense<0.000000e+00> : vector<8x128xf32>
    %192 = tpu.matmul %189, %191, %cst_72 {dimension_numbers = #tpu.dot_dimension_numbers<[1], [0], [0], [1], [0, 0, 1, 1], [], []>} : vector<8x32xf32>, vector<32x128xf32>, vector<8x128xf32> -> vector<8x128xf32>
    %193 = arith.addf %173, %192 : vector<8x128xf32>
    %194 = vector.extract_strided_slice %119 {offsets = [112, 0], sizes = [8, 32], strides = [1, 1]} : vector<488x32xf32> to vector<8x32xf32>
    %c14 = arith.constant 14 : index
    %c0_73 = arith.constant 0 : index
    %c0_74 = arith.constant 0 : index
    %195 = vector.load %arg8[%c14, %c0_73, %c0_74] : memref<61x32x128xf32, #tpu.memory_space<vmem>>, vector<1x32x128xf32>
    %196 = vector.shape_cast %195 : vector<1x32x128xf32> to vector<32x128xf32>
    %cst_75 = arith.constant dense<0.000000e+00> : vector<8x128xf32>
    %197 = tpu.matmul %194, %196, %cst_75 {dimension_numbers = #tpu.dot_dimension_numbers<[1], [0], [0], [1], [0, 0, 1, 1], [], []>} : vector<8x32xf32>, vector<32x128xf32>, vector<8x128xf32> -> vector<8x128xf32>
    %198 = arith.addf %178, %197 : vector<8x128xf32>
    %199 = vector.extract_strided_slice %119 {offsets = [120, 0], sizes = [8, 32], strides = [1, 1]} : vector<488x32xf32> to vector<8x32xf32>
    %c15 = arith.constant 15 : index
    %c0_76 = arith.constant 0 : index
    %c0_77 = arith.constant 0 : index
    %200 = vector.load %arg8[%c15, %c0_76, %c0_77] : memref<61x32x128xf32, #tpu.memory_space<vmem>>, vector<1x32x128xf32>
    %201 = vector.shape_cast %200 : vector<1x32x128xf32> to vector<32x128xf32>
    %cst_78 = arith.constant dense<0.000000e+00> : vector<8x128xf32>
    %202 = tpu.matmul %199, %201, %cst_78 {dimension_numbers = #tpu.dot_dimension_numbers<[1], [0], [0], [1], [0, 0, 1, 1], [], []>} : vector<8x32xf32>, vector<32x128xf32>, vector<8x128xf32> -> vector<8x128xf32>
    %203 = arith.addf %183, %202 : vector<8x128xf32>
    %204 = vector.extract_strided_slice %119 {offsets = [128, 0], sizes = [8, 32], strides = [1, 1]} : vector<488x32xf32> to vector<8x32xf32>
    %c16 = arith.constant 16 : index
    %c0_79 = arith.constant 0 : index
    %c0_80 = arith.constant 0 : index
    %205 = vector.load %arg8[%c16, %c0_79, %c0_80] : memref<61x32x128xf32, #tpu.memory_space<vmem>>, vector<1x32x128xf32>
    %206 = vector.shape_cast %205 : vector<1x32x128xf32> to vector<32x128xf32>
    %cst_81 = arith.constant dense<0.000000e+00> : vector<8x128xf32>
    %207 = tpu.matmul %204, %206, %cst_81 {dimension_numbers = #tpu.dot_dimension_numbers<[1], [0], [0], [1], [0, 0, 1, 1], [], []>} : vector<8x32xf32>, vector<32x128xf32>, vector<8x128xf32> -> vector<8x128xf32>
    %208 = arith.addf %188, %207 : vector<8x128xf32>
    %209 = vector.extract_strided_slice %119 {offsets = [136, 0], sizes = [8, 32], strides = [1, 1]} : vector<488x32xf32> to vector<8x32xf32>
    %c17 = arith.constant 17 : index
    %c0_82 = arith.constant 0 : index
    %c0_83 = arith.constant 0 : index
    %210 = vector.load %arg8[%c17, %c0_82, %c0_83] : memref<61x32x128xf32, #tpu.memory_space<vmem>>, vector<1x32x128xf32>
    %211 = vector.shape_cast %210 : vector<1x32x128xf32> to vector<32x128xf32>
    %cst_84 = arith.constant dense<0.000000e+00> : vector<8x128xf32>
    %212 = tpu.matmul %209, %211, %cst_84 {dimension_numbers = #tpu.dot_dimension_numbers<[1], [0], [0], [1], [0, 0, 1, 1], [], []>} : vector<8x32xf32>, vector<32x128xf32>, vector<8x128xf32> -> vector<8x128xf32>
    %213 = arith.addf %193, %212 : vector<8x128xf32>
    %214 = vector.extract_strided_slice %119 {offsets = [144, 0], sizes = [8, 32], strides = [1, 1]} : vector<488x32xf32> to vector<8x32xf32>
    %c18 = arith.constant 18 : index
    %c0_85 = arith.constant 0 : index
    %c0_86 = arith.constant 0 : index
    %215 = vector.load %arg8[%c18, %c0_85, %c0_86] : memref<61x32x128xf32, #tpu.memory_space<vmem>>, vector<1x32x128xf32>
    %216 = vector.shape_cast %215 : vector<1x32x128xf32> to vector<32x128xf32>
    %cst_87 = arith.constant dense<0.000000e+00> : vector<8x128xf32>
    %217 = tpu.matmul %214, %216, %cst_87 {dimension_numbers = #tpu.dot_dimension_numbers<[1], [0], [0], [1], [0, 0, 1, 1], [], []>} : vector<8x32xf32>, vector<32x128xf32>, vector<8x128xf32> -> vector<8x128xf32>
    %218 = arith.addf %198, %217 : vector<8x128xf32>
    %219 = vector.extract_strided_slice %119 {offsets = [152, 0], sizes = [8, 32], strides = [1, 1]} : vector<488x32xf32> to vector<8x32xf32>
    %c19 = arith.constant 19 : index
    %c0_88 = arith.constant 0 : index
    %c0_89 = arith.constant 0 : index
    %220 = vector.load %arg8[%c19, %c0_88, %c0_89] : memref<61x32x128xf32, #tpu.memory_space<vmem>>, vector<1x32x128xf32>
    %221 = vector.shape_cast %220 : vector<1x32x128xf32> to vector<32x128xf32>
    %cst_90 = arith.constant dense<0.000000e+00> : vector<8x128xf32>
    %222 = tpu.matmul %219, %221, %cst_90 {dimension_numbers = #tpu.dot_dimension_numbers<[1], [0], [0], [1], [0, 0, 1, 1], [], []>} : vector<8x32xf32>, vector<32x128xf32>, vector<8x128xf32> -> vector<8x128xf32>
    %223 = arith.addf %203, %222 : vector<8x128xf32>
    %224 = vector.extract_strided_slice %119 {offsets = [160, 0], sizes = [8, 32], strides = [1, 1]} : vector<488x32xf32> to vector<8x32xf32>
    %c20 = arith.constant 20 : index
    %c0_91 = arith.constant 0 : index
    %c0_92 = arith.constant 0 : index
    %225 = vector.load %arg8[%c20, %c0_91, %c0_92] : memref<61x32x128xf32, #tpu.memory_space<vmem>>, vector<1x32x128xf32>
    %226 = vector.shape_cast %225 : vector<1x32x128xf32> to vector<32x128xf32>
    %cst_93 = arith.constant dense<0.000000e+00> : vector<8x128xf32>
    %227 = tpu.matmul %224, %226, %cst_93 {dimension_numbers = #tpu.dot_dimension_numbers<[1], [0], [0], [1], [0, 0, 1, 1], [], []>} : vector<8x32xf32>, vector<32x128xf32>, vector<8x128xf32> -> vector<8x128xf32>
    %228 = arith.addf %208, %227 : vector<8x128xf32>
    %229 = vector.extract_strided_slice %119 {offsets = [168, 0], sizes = [8, 32], strides = [1, 1]} : vector<488x32xf32> to vector<8x32xf32>
    %c21 = arith.constant 21 : index
    %c0_94 = arith.constant 0 : index
    %c0_95 = arith.constant 0 : index
    %230 = vector.load %arg8[%c21, %c0_94, %c0_95] : memref<61x32x128xf32, #tpu.memory_space<vmem>>, vector<1x32x128xf32>
    %231 = vector.shape_cast %230 : vector<1x32x128xf32> to vector<32x128xf32>
    %cst_96 = arith.constant dense<0.000000e+00> : vector<8x128xf32>
    %232 = tpu.matmul %229, %231, %cst_96 {dimension_numbers = #tpu.dot_dimension_numbers<[1], [0], [0], [1], [0, 0, 1, 1], [], []>} : vector<8x32xf32>, vector<32x128xf32>, vector<8x128xf32> -> vector<8x128xf32>
    %233 = arith.addf %213, %232 : vector<8x128xf32>
    %234 = vector.extract_strided_slice %119 {offsets = [176, 0], sizes = [8, 32], strides = [1, 1]} : vector<488x32xf32> to vector<8x32xf32>
    %c22 = arith.constant 22 : index
    %c0_97 = arith.constant 0 : index
    %c0_98 = arith.constant 0 : index
    %235 = vector.load %arg8[%c22, %c0_97, %c0_98] : memref<61x32x128xf32, #tpu.memory_space<vmem>>, vector<1x32x128xf32>
    %236 = vector.shape_cast %235 : vector<1x32x128xf32> to vector<32x128xf32>
    %cst_99 = arith.constant dense<0.000000e+00> : vector<8x128xf32>
    %237 = tpu.matmul %234, %236, %cst_99 {dimension_numbers = #tpu.dot_dimension_numbers<[1], [0], [0], [1], [0, 0, 1, 1], [], []>} : vector<8x32xf32>, vector<32x128xf32>, vector<8x128xf32> -> vector<8x128xf32>
    %238 = arith.addf %218, %237 : vector<8x128xf32>
    %239 = vector.extract_strided_slice %119 {offsets = [184, 0], sizes = [8, 32], strides = [1, 1]} : vector<488x32xf32> to vector<8x32xf32>
    %c23 = arith.constant 23 : index
    %c0_100 = arith.constant 0 : index
    %c0_101 = arith.constant 0 : index
    %240 = vector.load %arg8[%c23, %c0_100, %c0_101] : memref<61x32x128xf32, #tpu.memory_space<vmem>>, vector<1x32x128xf32>
    %241 = vector.shape_cast %240 : vector<1x32x128xf32> to vector<32x128xf32>
    %cst_102 = arith.constant dense<0.000000e+00> : vector<8x128xf32>
    %242 = tpu.matmul %239, %241, %cst_102 {dimension_numbers = #tpu.dot_dimension_numbers<[1], [0], [0], [1], [0, 0, 1, 1], [], []>} : vector<8x32xf32>, vector<32x128xf32>, vector<8x128xf32> -> vector<8x128xf32>
    %243 = arith.addf %223, %242 : vector<8x128xf32>
    %244 = vector.extract_strided_slice %119 {offsets = [192, 0], sizes = [8, 32], strides = [1, 1]} : vector<488x32xf32> to vector<8x32xf32>
    %c24 = arith.constant 24 : index
    %c0_103 = arith.constant 0 : index
    %c0_104 = arith.constant 0 : index
    %245 = vector.load %arg8[%c24, %c0_103, %c0_104] : memref<61x32x128xf32, #tpu.memory_space<vmem>>, vector<1x32x128xf32>
    %246 = vector.shape_cast %245 : vector<1x32x128xf32> to vector<32x128xf32>
    %cst_105 = arith.constant dense<0.000000e+00> : vector<8x128xf32>
    %247 = tpu.matmul %244, %246, %cst_105 {dimension_numbers = #tpu.dot_dimension_numbers<[1], [0], [0], [1], [0, 0, 1, 1], [], []>} : vector<8x32xf32>, vector<32x128xf32>, vector<8x128xf32> -> vector<8x128xf32>
    %248 = arith.addf %228, %247 : vector<8x128xf32>
    %249 = vector.extract_strided_slice %119 {offsets = [200, 0], sizes = [8, 32], strides = [1, 1]} : vector<488x32xf32> to vector<8x32xf32>
    %c25 = arith.constant 25 : index
    %c0_106 = arith.constant 0 : index
    %c0_107 = arith.constant 0 : index
    %250 = vector.load %arg8[%c25, %c0_106, %c0_107] : memref<61x32x128xf32, #tpu.memory_space<vmem>>, vector<1x32x128xf32>
    %251 = vector.shape_cast %250 : vector<1x32x128xf32> to vector<32x128xf32>
    %cst_108 = arith.constant dense<0.000000e+00> : vector<8x128xf32>
    %252 = tpu.matmul %249, %251, %cst_108 {dimension_numbers = #tpu.dot_dimension_numbers<[1], [0], [0], [1], [0, 0, 1, 1], [], []>} : vector<8x32xf32>, vector<32x128xf32>, vector<8x128xf32> -> vector<8x128xf32>
    %253 = arith.addf %233, %252 : vector<8x128xf32>
    %254 = vector.extract_strided_slice %119 {offsets = [208, 0], sizes = [8, 32], strides = [1, 1]} : vector<488x32xf32> to vector<8x32xf32>
    %c26 = arith.constant 26 : index
    %c0_109 = arith.constant 0 : index
    %c0_110 = arith.constant 0 : index
    %255 = vector.load %arg8[%c26, %c0_109, %c0_110] : memref<61x32x128xf32, #tpu.memory_space<vmem>>, vector<1x32x128xf32>
    %256 = vector.shape_cast %255 : vector<1x32x128xf32> to vector<32x128xf32>
    %cst_111 = arith.constant dense<0.000000e+00> : vector<8x128xf32>
    %257 = tpu.matmul %254, %256, %cst_111 {dimension_numbers = #tpu.dot_dimension_numbers<[1], [0], [0], [1], [0, 0, 1, 1], [], []>} : vector<8x32xf32>, vector<32x128xf32>, vector<8x128xf32> -> vector<8x128xf32>
    %258 = arith.addf %238, %257 : vector<8x128xf32>
    %259 = vector.extract_strided_slice %119 {offsets = [216, 0], sizes = [8, 32], strides = [1, 1]} : vector<488x32xf32> to vector<8x32xf32>
    %c27 = arith.constant 27 : index
    %c0_112 = arith.constant 0 : index
    %c0_113 = arith.constant 0 : index
    %260 = vector.load %arg8[%c27, %c0_112, %c0_113] : memref<61x32x128xf32, #tpu.memory_space<vmem>>, vector<1x32x128xf32>
    %261 = vector.shape_cast %260 : vector<1x32x128xf32> to vector<32x128xf32>
    %cst_114 = arith.constant dense<0.000000e+00> : vector<8x128xf32>
    %262 = tpu.matmul %259, %261, %cst_114 {dimension_numbers = #tpu.dot_dimension_numbers<[1], [0], [0], [1], [0, 0, 1, 1], [], []>} : vector<8x32xf32>, vector<32x128xf32>, vector<8x128xf32> -> vector<8x128xf32>
    %263 = arith.addf %243, %262 : vector<8x128xf32>
    %264 = vector.extract_strided_slice %119 {offsets = [224, 0], sizes = [8, 32], strides = [1, 1]} : vector<488x32xf32> to vector<8x32xf32>
    %c28 = arith.constant 28 : index
    %c0_115 = arith.constant 0 : index
    %c0_116 = arith.constant 0 : index
    %265 = vector.load %arg8[%c28, %c0_115, %c0_116] : memref<61x32x128xf32, #tpu.memory_space<vmem>>, vector<1x32x128xf32>
    %266 = vector.shape_cast %265 : vector<1x32x128xf32> to vector<32x128xf32>
    %cst_117 = arith.constant dense<0.000000e+00> : vector<8x128xf32>
    %267 = tpu.matmul %264, %266, %cst_117 {dimension_numbers = #tpu.dot_dimension_numbers<[1], [0], [0], [1], [0, 0, 1, 1], [], []>} : vector<8x32xf32>, vector<32x128xf32>, vector<8x128xf32> -> vector<8x128xf32>
    %268 = arith.addf %248, %267 : vector<8x128xf32>
    %269 = vector.extract_strided_slice %119 {offsets = [232, 0], sizes = [8, 32], strides = [1, 1]} : vector<488x32xf32> to vector<8x32xf32>
    %c29 = arith.constant 29 : index
    %c0_118 = arith.constant 0 : index
    %c0_119 = arith.constant 0 : index
    %270 = vector.load %arg8[%c29, %c0_118, %c0_119] : memref<61x32x128xf32, #tpu.memory_space<vmem>>, vector<1x32x128xf32>
    %271 = vector.shape_cast %270 : vector<1x32x128xf32> to vector<32x128xf32>
    %cst_120 = arith.constant dense<0.000000e+00> : vector<8x128xf32>
    %272 = tpu.matmul %269, %271, %cst_120 {dimension_numbers = #tpu.dot_dimension_numbers<[1], [0], [0], [1], [0, 0, 1, 1], [], []>} : vector<8x32xf32>, vector<32x128xf32>, vector<8x128xf32> -> vector<8x128xf32>
    %273 = arith.addf %253, %272 : vector<8x128xf32>
    %274 = vector.extract_strided_slice %119 {offsets = [240, 0], sizes = [8, 32], strides = [1, 1]} : vector<488x32xf32> to vector<8x32xf32>
    %c30 = arith.constant 30 : index
    %c0_121 = arith.constant 0 : index
    %c0_122 = arith.constant 0 : index
    %275 = vector.load %arg8[%c30, %c0_121, %c0_122] : memref<61x32x128xf32, #tpu.memory_space<vmem>>, vector<1x32x128xf32>
    %276 = vector.shape_cast %275 : vector<1x32x128xf32> to vector<32x128xf32>
    %cst_123 = arith.constant dense<0.000000e+00> : vector<8x128xf32>
    %277 = tpu.matmul %274, %276, %cst_123 {dimension_numbers = #tpu.dot_dimension_numbers<[1], [0], [0], [1], [0, 0, 1, 1], [], []>} : vector<8x32xf32>, vector<32x128xf32>, vector<8x128xf32> -> vector<8x128xf32>
    %278 = arith.addf %258, %277 : vector<8x128xf32>
    %279 = vector.extract_strided_slice %119 {offsets = [248, 0], sizes = [8, 32], strides = [1, 1]} : vector<488x32xf32> to vector<8x32xf32>
    %c31 = arith.constant 31 : index
    %c0_124 = arith.constant 0 : index
    %c0_125 = arith.constant 0 : index
    %280 = vector.load %arg8[%c31, %c0_124, %c0_125] : memref<61x32x128xf32, #tpu.memory_space<vmem>>, vector<1x32x128xf32>
    %281 = vector.shape_cast %280 : vector<1x32x128xf32> to vector<32x128xf32>
    %cst_126 = arith.constant dense<0.000000e+00> : vector<8x128xf32>
    %282 = tpu.matmul %279, %281, %cst_126 {dimension_numbers = #tpu.dot_dimension_numbers<[1], [0], [0], [1], [0, 0, 1, 1], [], []>} : vector<8x32xf32>, vector<32x128xf32>, vector<8x128xf32> -> vector<8x128xf32>
    %283 = arith.addf %263, %282 : vector<8x128xf32>
    %284 = vector.extract_strided_slice %119 {offsets = [256, 0], sizes = [8, 32], strides = [1, 1]} : vector<488x32xf32> to vector<8x32xf32>
    %c32 = arith.constant 32 : index
    %c0_127 = arith.constant 0 : index
    %c0_128 = arith.constant 0 : index
    %285 = vector.load %arg8[%c32, %c0_127, %c0_128] : memref<61x32x128xf32, #tpu.memory_space<vmem>>, vector<1x32x128xf32>
    %286 = vector.shape_cast %285 : vector<1x32x128xf32> to vector<32x128xf32>
    %cst_129 = arith.constant dense<0.000000e+00> : vector<8x128xf32>
    %287 = tpu.matmul %284, %286, %cst_129 {dimension_numbers = #tpu.dot_dimension_numbers<[1], [0], [0], [1], [0, 0, 1, 1], [], []>} : vector<8x32xf32>, vector<32x128xf32>, vector<8x128xf32> -> vector<8x128xf32>
    %288 = arith.addf %268, %287 : vector<8x128xf32>
    %289 = vector.extract_strided_slice %119 {offsets = [264, 0], sizes = [8, 32], strides = [1, 1]} : vector<488x32xf32> to vector<8x32xf32>
    %c33 = arith.constant 33 : index
    %c0_130 = arith.constant 0 : index
    %c0_131 = arith.constant 0 : index
    %290 = vector.load %arg8[%c33, %c0_130, %c0_131] : memref<61x32x128xf32, #tpu.memory_space<vmem>>, vector<1x32x128xf32>
    %291 = vector.shape_cast %290 : vector<1x32x128xf32> to vector<32x128xf32>
    %cst_132 = arith.constant dense<0.000000e+00> : vector<8x128xf32>
    %292 = tpu.matmul %289, %291, %cst_132 {dimension_numbers = #tpu.dot_dimension_numbers<[1], [0], [0], [1], [0, 0, 1, 1], [], []>} : vector<8x32xf32>, vector<32x128xf32>, vector<8x128xf32> -> vector<8x128xf32>
    %293 = arith.addf %273, %292 : vector<8x128xf32>
    %294 = vector.extract_strided_slice %119 {offsets = [272, 0], sizes = [8, 32], strides = [1, 1]} : vector<488x32xf32> to vector<8x32xf32>
    %c34 = arith.constant 34 : index
    %c0_133 = arith.constant 0 : index
    %c0_134 = arith.constant 0 : index
    %295 = vector.load %arg8[%c34, %c0_133, %c0_134] : memref<61x32x128xf32, #tpu.memory_space<vmem>>, vector<1x32x128xf32>
    %296 = vector.shape_cast %295 : vector<1x32x128xf32> to vector<32x128xf32>
    %cst_135 = arith.constant dense<0.000000e+00> : vector<8x128xf32>
    %297 = tpu.matmul %294, %296, %cst_135 {dimension_numbers = #tpu.dot_dimension_numbers<[1], [0], [0], [1], [0, 0, 1, 1], [], []>} : vector<8x32xf32>, vector<32x128xf32>, vector<8x128xf32> -> vector<8x128xf32>
    %298 = arith.addf %278, %297 : vector<8x128xf32>
    %299 = vector.extract_strided_slice %119 {offsets = [280, 0], sizes = [8, 32], strides = [1, 1]} : vector<488x32xf32> to vector<8x32xf32>
    %c35 = arith.constant 35 : index
    %c0_136 = arith.constant 0 : index
    %c0_137 = arith.constant 0 : index
    %300 = vector.load %arg8[%c35, %c0_136, %c0_137] : memref<61x32x128xf32, #tpu.memory_space<vmem>>, vector<1x32x128xf32>
    %301 = vector.shape_cast %300 : vector<1x32x128xf32> to vector<32x128xf32>
    %cst_138 = arith.constant dense<0.000000e+00> : vector<8x128xf32>
    %302 = tpu.matmul %299, %301, %cst_138 {dimension_numbers = #tpu.dot_dimension_numbers<[1], [0], [0], [1], [0, 0, 1, 1], [], []>} : vector<8x32xf32>, vector<32x128xf32>, vector<8x128xf32> -> vector<8x128xf32>
    %303 = arith.addf %283, %302 : vector<8x128xf32>
    %304 = vector.extract_strided_slice %119 {offsets = [288, 0], sizes = [8, 32], strides = [1, 1]} : vector<488x32xf32> to vector<8x32xf32>
    %c36 = arith.constant 36 : index
    %c0_139 = arith.constant 0 : index
    %c0_140 = arith.constant 0 : index
    %305 = vector.load %arg8[%c36, %c0_139, %c0_140] : memref<61x32x128xf32, #tpu.memory_space<vmem>>, vector<1x32x128xf32>
    %306 = vector.shape_cast %305 : vector<1x32x128xf32> to vector<32x128xf32>
    %cst_141 = arith.constant dense<0.000000e+00> : vector<8x128xf32>
    %307 = tpu.matmul %304, %306, %cst_141 {dimension_numbers = #tpu.dot_dimension_numbers<[1], [0], [0], [1], [0, 0, 1, 1], [], []>} : vector<8x32xf32>, vector<32x128xf32>, vector<8x128xf32> -> vector<8x128xf32>
    %308 = arith.addf %288, %307 : vector<8x128xf32>
    %309 = vector.extract_strided_slice %119 {offsets = [296, 0], sizes = [8, 32], strides = [1, 1]} : vector<488x32xf32> to vector<8x32xf32>
    %c37 = arith.constant 37 : index
    %c0_142 = arith.constant 0 : index
    %c0_143 = arith.constant 0 : index
    %310 = vector.load %arg8[%c37, %c0_142, %c0_143] : memref<61x32x128xf32, #tpu.memory_space<vmem>>, vector<1x32x128xf32>
    %311 = vector.shape_cast %310 : vector<1x32x128xf32> to vector<32x128xf32>
    %cst_144 = arith.constant dense<0.000000e+00> : vector<8x128xf32>
    %312 = tpu.matmul %309, %311, %cst_144 {dimension_numbers = #tpu.dot_dimension_numbers<[1], [0], [0], [1], [0, 0, 1, 1], [], []>} : vector<8x32xf32>, vector<32x128xf32>, vector<8x128xf32> -> vector<8x128xf32>
    %313 = arith.addf %293, %312 : vector<8x128xf32>
    %314 = vector.extract_strided_slice %119 {offsets = [304, 0], sizes = [8, 32], strides = [1, 1]} : vector<488x32xf32> to vector<8x32xf32>
    %c38 = arith.constant 38 : index
    %c0_145 = arith.constant 0 : index
    %c0_146 = arith.constant 0 : index
    %315 = vector.load %arg8[%c38, %c0_145, %c0_146] : memref<61x32x128xf32, #tpu.memory_space<vmem>>, vector<1x32x128xf32>
    %316 = vector.shape_cast %315 : vector<1x32x128xf32> to vector<32x128xf32>
    %cst_147 = arith.constant dense<0.000000e+00> : vector<8x128xf32>
    %317 = tpu.matmul %314, %316, %cst_147 {dimension_numbers = #tpu.dot_dimension_numbers<[1], [0], [0], [1], [0, 0, 1, 1], [], []>} : vector<8x32xf32>, vector<32x128xf32>, vector<8x128xf32> -> vector<8x128xf32>
    %318 = arith.addf %298, %317 : vector<8x128xf32>
    %319 = vector.extract_strided_slice %119 {offsets = [312, 0], sizes = [8, 32], strides = [1, 1]} : vector<488x32xf32> to vector<8x32xf32>
    %c39 = arith.constant 39 : index
    %c0_148 = arith.constant 0 : index
    %c0_149 = arith.constant 0 : index
    %320 = vector.load %arg8[%c39, %c0_148, %c0_149] : memref<61x32x128xf32, #tpu.memory_space<vmem>>, vector<1x32x128xf32>
    %321 = vector.shape_cast %320 : vector<1x32x128xf32> to vector<32x128xf32>
    %cst_150 = arith.constant dense<0.000000e+00> : vector<8x128xf32>
    %322 = tpu.matmul %319, %321, %cst_150 {dimension_numbers = #tpu.dot_dimension_numbers<[1], [0], [0], [1], [0, 0, 1, 1], [], []>} : vector<8x32xf32>, vector<32x128xf32>, vector<8x128xf32> -> vector<8x128xf32>
    %323 = arith.addf %303, %322 : vector<8x128xf32>
    %324 = vector.extract_strided_slice %119 {offsets = [320, 0], sizes = [8, 32], strides = [1, 1]} : vector<488x32xf32> to vector<8x32xf32>
    %c40 = arith.constant 40 : index
    %c0_151 = arith.constant 0 : index
    %c0_152 = arith.constant 0 : index
    %325 = vector.load %arg8[%c40, %c0_151, %c0_152] : memref<61x32x128xf32, #tpu.memory_space<vmem>>, vector<1x32x128xf32>
    %326 = vector.shape_cast %325 : vector<1x32x128xf32> to vector<32x128xf32>
    %cst_153 = arith.constant dense<0.000000e+00> : vector<8x128xf32>
    %327 = tpu.matmul %324, %326, %cst_153 {dimension_numbers = #tpu.dot_dimension_numbers<[1], [0], [0], [1], [0, 0, 1, 1], [], []>} : vector<8x32xf32>, vector<32x128xf32>, vector<8x128xf32> -> vector<8x128xf32>
    %328 = arith.addf %308, %327 : vector<8x128xf32>
    %329 = vector.extract_strided_slice %119 {offsets = [328, 0], sizes = [8, 32], strides = [1, 1]} : vector<488x32xf32> to vector<8x32xf32>
    %c41 = arith.constant 41 : index
    %c0_154 = arith.constant 0 : index
    %c0_155 = arith.constant 0 : index
    %330 = vector.load %arg8[%c41, %c0_154, %c0_155] : memref<61x32x128xf32, #tpu.memory_space<vmem>>, vector<1x32x128xf32>
    %331 = vector.shape_cast %330 : vector<1x32x128xf32> to vector<32x128xf32>
    %cst_156 = arith.constant dense<0.000000e+00> : vector<8x128xf32>
    %332 = tpu.matmul %329, %331, %cst_156 {dimension_numbers = #tpu.dot_dimension_numbers<[1], [0], [0], [1], [0, 0, 1, 1], [], []>} : vector<8x32xf32>, vector<32x128xf32>, vector<8x128xf32> -> vector<8x128xf32>
    %333 = arith.addf %313, %332 : vector<8x128xf32>
    %334 = vector.extract_strided_slice %119 {offsets = [336, 0], sizes = [8, 32], strides = [1, 1]} : vector<488x32xf32> to vector<8x32xf32>
    %c42 = arith.constant 42 : index
    %c0_157 = arith.constant 0 : index
    %c0_158 = arith.constant 0 : index
    %335 = vector.load %arg8[%c42, %c0_157, %c0_158] : memref<61x32x128xf32, #tpu.memory_space<vmem>>, vector<1x32x128xf32>
    %336 = vector.shape_cast %335 : vector<1x32x128xf32> to vector<32x128xf32>
    %cst_159 = arith.constant dense<0.000000e+00> : vector<8x128xf32>
    %337 = tpu.matmul %334, %336, %cst_159 {dimension_numbers = #tpu.dot_dimension_numbers<[1], [0], [0], [1], [0, 0, 1, 1], [], []>} : vector<8x32xf32>, vector<32x128xf32>, vector<8x128xf32> -> vector<8x128xf32>
    %338 = arith.addf %318, %337 : vector<8x128xf32>
    %339 = vector.extract_strided_slice %119 {offsets = [344, 0], sizes = [8, 32], strides = [1, 1]} : vector<488x32xf32> to vector<8x32xf32>
    %c43 = arith.constant 43 : index
    %c0_160 = arith.constant 0 : index
    %c0_161 = arith.constant 0 : index
    %340 = vector.load %arg8[%c43, %c0_160, %c0_161] : memref<61x32x128xf32, #tpu.memory_space<vmem>>, vector<1x32x128xf32>
    %341 = vector.shape_cast %340 : vector<1x32x128xf32> to vector<32x128xf32>
    %cst_162 = arith.constant dense<0.000000e+00> : vector<8x128xf32>
    %342 = tpu.matmul %339, %341, %cst_162 {dimension_numbers = #tpu.dot_dimension_numbers<[1], [0], [0], [1], [0, 0, 1, 1], [], []>} : vector<8x32xf32>, vector<32x128xf32>, vector<8x128xf32> -> vector<8x128xf32>
    %343 = arith.addf %323, %342 : vector<8x128xf32>
    %344 = vector.extract_strided_slice %119 {offsets = [352, 0], sizes = [8, 32], strides = [1, 1]} : vector<488x32xf32> to vector<8x32xf32>
    %c44 = arith.constant 44 : index
    %c0_163 = arith.constant 0 : index
    %c0_164 = arith.constant 0 : index
    %345 = vector.load %arg8[%c44, %c0_163, %c0_164] : memref<61x32x128xf32, #tpu.memory_space<vmem>>, vector<1x32x128xf32>
    %346 = vector.shape_cast %345 : vector<1x32x128xf32> to vector<32x128xf32>
    %cst_165 = arith.constant dense<0.000000e+00> : vector<8x128xf32>
    %347 = tpu.matmul %344, %346, %cst_165 {dimension_numbers = #tpu.dot_dimension_numbers<[1], [0], [0], [1], [0, 0, 1, 1], [], []>} : vector<8x32xf32>, vector<32x128xf32>, vector<8x128xf32> -> vector<8x128xf32>
    %348 = arith.addf %328, %347 : vector<8x128xf32>
    %349 = vector.extract_strided_slice %119 {offsets = [360, 0], sizes = [8, 32], strides = [1, 1]} : vector<488x32xf32> to vector<8x32xf32>
    %c45 = arith.constant 45 : index
    %c0_166 = arith.constant 0 : index
    %c0_167 = arith.constant 0 : index
    %350 = vector.load %arg8[%c45, %c0_166, %c0_167] : memref<61x32x128xf32, #tpu.memory_space<vmem>>, vector<1x32x128xf32>
    %351 = vector.shape_cast %350 : vector<1x32x128xf32> to vector<32x128xf32>
    %cst_168 = arith.constant dense<0.000000e+00> : vector<8x128xf32>
    %352 = tpu.matmul %349, %351, %cst_168 {dimension_numbers = #tpu.dot_dimension_numbers<[1], [0], [0], [1], [0, 0, 1, 1], [], []>} : vector<8x32xf32>, vector<32x128xf32>, vector<8x128xf32> -> vector<8x128xf32>
    %353 = arith.addf %333, %352 : vector<8x128xf32>
    %354 = vector.extract_strided_slice %119 {offsets = [368, 0], sizes = [8, 32], strides = [1, 1]} : vector<488x32xf32> to vector<8x32xf32>
    %c46 = arith.constant 46 : index
    %c0_169 = arith.constant 0 : index
    %c0_170 = arith.constant 0 : index
    %355 = vector.load %arg8[%c46, %c0_169, %c0_170] : memref<61x32x128xf32, #tpu.memory_space<vmem>>, vector<1x32x128xf32>
    %356 = vector.shape_cast %355 : vector<1x32x128xf32> to vector<32x128xf32>
    %cst_171 = arith.constant dense<0.000000e+00> : vector<8x128xf32>
    %357 = tpu.matmul %354, %356, %cst_171 {dimension_numbers = #tpu.dot_dimension_numbers<[1], [0], [0], [1], [0, 0, 1, 1], [], []>} : vector<8x32xf32>, vector<32x128xf32>, vector<8x128xf32> -> vector<8x128xf32>
    %358 = arith.addf %338, %357 : vector<8x128xf32>
    %359 = vector.extract_strided_slice %119 {offsets = [376, 0], sizes = [8, 32], strides = [1, 1]} : vector<488x32xf32> to vector<8x32xf32>
    %c47 = arith.constant 47 : index
    %c0_172 = arith.constant 0 : index
    %c0_173 = arith.constant 0 : index
    %360 = vector.load %arg8[%c47, %c0_172, %c0_173] : memref<61x32x128xf32, #tpu.memory_space<vmem>>, vector<1x32x128xf32>
    %361 = vector.shape_cast %360 : vector<1x32x128xf32> to vector<32x128xf32>
    %cst_174 = arith.constant dense<0.000000e+00> : vector<8x128xf32>
    %362 = tpu.matmul %359, %361, %cst_174 {dimension_numbers = #tpu.dot_dimension_numbers<[1], [0], [0], [1], [0, 0, 1, 1], [], []>} : vector<8x32xf32>, vector<32x128xf32>, vector<8x128xf32> -> vector<8x128xf32>
    %363 = arith.addf %343, %362 : vector<8x128xf32>
    %364 = vector.extract_strided_slice %119 {offsets = [384, 0], sizes = [8, 32], strides = [1, 1]} : vector<488x32xf32> to vector<8x32xf32>
    %c48 = arith.constant 48 : index
    %c0_175 = arith.constant 0 : index
    %c0_176 = arith.constant 0 : index
    %365 = vector.load %arg8[%c48, %c0_175, %c0_176] : memref<61x32x128xf32, #tpu.memory_space<vmem>>, vector<1x32x128xf32>
    %366 = vector.shape_cast %365 : vector<1x32x128xf32> to vector<32x128xf32>
    %cst_177 = arith.constant dense<0.000000e+00> : vector<8x128xf32>
    %367 = tpu.matmul %364, %366, %cst_177 {dimension_numbers = #tpu.dot_dimension_numbers<[1], [0], [0], [1], [0, 0, 1, 1], [], []>} : vector<8x32xf32>, vector<32x128xf32>, vector<8x128xf32> -> vector<8x128xf32>
    %368 = arith.addf %348, %367 : vector<8x128xf32>
    %369 = vector.extract_strided_slice %119 {offsets = [392, 0], sizes = [8, 32], strides = [1, 1]} : vector<488x32xf32> to vector<8x32xf32>
    %c49 = arith.constant 49 : index
    %c0_178 = arith.constant 0 : index
    %c0_179 = arith.constant 0 : index
    %370 = vector.load %arg8[%c49, %c0_178, %c0_179] : memref<61x32x128xf32, #tpu.memory_space<vmem>>, vector<1x32x128xf32>
    %371 = vector.shape_cast %370 : vector<1x32x128xf32> to vector<32x128xf32>
    %cst_180 = arith.constant dense<0.000000e+00> : vector<8x128xf32>
    %372 = tpu.matmul %369, %371, %cst_180 {dimension_numbers = #tpu.dot_dimension_numbers<[1], [0], [0], [1], [0, 0, 1, 1], [], []>} : vector<8x32xf32>, vector<32x128xf32>, vector<8x128xf32> -> vector<8x128xf32>
    %373 = arith.addf %353, %372 : vector<8x128xf32>
    %374 = vector.extract_strided_slice %119 {offsets = [400, 0], sizes = [8, 32], strides = [1, 1]} : vector<488x32xf32> to vector<8x32xf32>
    %c50 = arith.constant 50 : index
    %c0_181 = arith.constant 0 : index
    %c0_182 = arith.constant 0 : index
    %375 = vector.load %arg8[%c50, %c0_181, %c0_182] : memref<61x32x128xf32, #tpu.memory_space<vmem>>, vector<1x32x128xf32>
    %376 = vector.shape_cast %375 : vector<1x32x128xf32> to vector<32x128xf32>
    %cst_183 = arith.constant dense<0.000000e+00> : vector<8x128xf32>
    %377 = tpu.matmul %374, %376, %cst_183 {dimension_numbers = #tpu.dot_dimension_numbers<[1], [0], [0], [1], [0, 0, 1, 1], [], []>} : vector<8x32xf32>, vector<32x128xf32>, vector<8x128xf32> -> vector<8x128xf32>
    %378 = arith.addf %358, %377 : vector<8x128xf32>
    %379 = vector.extract_strided_slice %119 {offsets = [408, 0], sizes = [8, 32], strides = [1, 1]} : vector<488x32xf32> to vector<8x32xf32>
    %c51 = arith.constant 51 : index
    %c0_184 = arith.constant 0 : index
    %c0_185 = arith.constant 0 : index
    %380 = vector.load %arg8[%c51, %c0_184, %c0_185] : memref<61x32x128xf32, #tpu.memory_space<vmem>>, vector<1x32x128xf32>
    %381 = vector.shape_cast %380 : vector<1x32x128xf32> to vector<32x128xf32>
    %cst_186 = arith.constant dense<0.000000e+00> : vector<8x128xf32>
    %382 = tpu.matmul %379, %381, %cst_186 {dimension_numbers = #tpu.dot_dimension_numbers<[1], [0], [0], [1], [0, 0, 1, 1], [], []>} : vector<8x32xf32>, vector<32x128xf32>, vector<8x128xf32> -> vector<8x128xf32>
    %383 = arith.addf %363, %382 : vector<8x128xf32>
    %384 = vector.extract_strided_slice %119 {offsets = [416, 0], sizes = [8, 32], strides = [1, 1]} : vector<488x32xf32> to vector<8x32xf32>
    %c52 = arith.constant 52 : index
    %c0_187 = arith.constant 0 : index
    %c0_188 = arith.constant 0 : index
    %385 = vector.load %arg8[%c52, %c0_187, %c0_188] : memref<61x32x128xf32, #tpu.memory_space<vmem>>, vector<1x32x128xf32>
    %386 = vector.shape_cast %385 : vector<1x32x128xf32> to vector<32x128xf32>
    %cst_189 = arith.constant dense<0.000000e+00> : vector<8x128xf32>
    %387 = tpu.matmul %384, %386, %cst_189 {dimension_numbers = #tpu.dot_dimension_numbers<[1], [0], [0], [1], [0, 0, 1, 1], [], []>} : vector<8x32xf32>, vector<32x128xf32>, vector<8x128xf32> -> vector<8x128xf32>
    %388 = arith.addf %368, %387 : vector<8x128xf32>
    %389 = vector.extract_strided_slice %119 {offsets = [424, 0], sizes = [8, 32], strides = [1, 1]} : vector<488x32xf32> to vector<8x32xf32>
    %c53 = arith.constant 53 : index
    %c0_190 = arith.constant 0 : index
    %c0_191 = arith.constant 0 : index
    %390 = vector.load %arg8[%c53, %c0_190, %c0_191] : memref<61x32x128xf32, #tpu.memory_space<vmem>>, vector<1x32x128xf32>
    %391 = vector.shape_cast %390 : vector<1x32x128xf32> to vector<32x128xf32>
    %cst_192 = arith.constant dense<0.000000e+00> : vector<8x128xf32>
    %392 = tpu.matmul %389, %391, %cst_192 {dimension_numbers = #tpu.dot_dimension_numbers<[1], [0], [0], [1], [0, 0, 1, 1], [], []>} : vector<8x32xf32>, vector<32x128xf32>, vector<8x128xf32> -> vector<8x128xf32>
    %393 = arith.addf %373, %392 : vector<8x128xf32>
    %394 = vector.extract_strided_slice %119 {offsets = [432, 0], sizes = [8, 32], strides = [1, 1]} : vector<488x32xf32> to vector<8x32xf32>
    %c54 = arith.constant 54 : index
    %c0_193 = arith.constant 0 : index
    %c0_194 = arith.constant 0 : index
    %395 = vector.load %arg8[%c54, %c0_193, %c0_194] : memref<61x32x128xf32, #tpu.memory_space<vmem>>, vector<1x32x128xf32>
    %396 = vector.shape_cast %395 : vector<1x32x128xf32> to vector<32x128xf32>
    %cst_195 = arith.constant dense<0.000000e+00> : vector<8x128xf32>
    %397 = tpu.matmul %394, %396, %cst_195 {dimension_numbers = #tpu.dot_dimension_numbers<[1], [0], [0], [1], [0, 0, 1, 1], [], []>} : vector<8x32xf32>, vector<32x128xf32>, vector<8x128xf32> -> vector<8x128xf32>
    %398 = arith.addf %378, %397 : vector<8x128xf32>
    %399 = vector.extract_strided_slice %119 {offsets = [440, 0], sizes = [8, 32], strides = [1, 1]} : vector<488x32xf32> to vector<8x32xf32>
    %c55 = arith.constant 55 : index
    %c0_196 = arith.constant 0 : index
    %c0_197 = arith.constant 0 : index
    %400 = vector.load %arg8[%c55, %c0_196, %c0_197] : memref<61x32x128xf32, #tpu.memory_space<vmem>>, vector<1x32x128xf32>
    %401 = vector.shape_cast %400 : vector<1x32x128xf32> to vector<32x128xf32>
    %cst_198 = arith.constant dense<0.000000e+00> : vector<8x128xf32>
    %402 = tpu.matmul %399, %401, %cst_198 {dimension_numbers = #tpu.dot_dimension_numbers<[1], [0], [0], [1], [0, 0, 1, 1], [], []>} : vector<8x32xf32>, vector<32x128xf32>, vector<8x128xf32> -> vector<8x128xf32>
    %403 = arith.addf %383, %402 : vector<8x128xf32>
    %404 = vector.extract_strided_slice %119 {offsets = [448, 0], sizes = [8, 32], strides = [1, 1]} : vector<488x32xf32> to vector<8x32xf32>
    %c56 = arith.constant 56 : index
    %c0_199 = arith.constant 0 : index
    %c0_200 = arith.constant 0 : index
    %405 = vector.load %arg8[%c56, %c0_199, %c0_200] : memref<61x32x128xf32, #tpu.memory_space<vmem>>, vector<1x32x128xf32>
    %406 = vector.shape_cast %405 : vector<1x32x128xf32> to vector<32x128xf32>
    %cst_201 = arith.constant dense<0.000000e+00> : vector<8x128xf32>
    %407 = tpu.matmul %404, %406, %cst_201 {dimension_numbers = #tpu.dot_dimension_numbers<[1], [0], [0], [1], [0, 0, 1, 1], [], []>} : vector<8x32xf32>, vector<32x128xf32>, vector<8x128xf32> -> vector<8x128xf32>
    %408 = arith.addf %388, %407 : vector<8x128xf32>
    %409 = vector.extract_strided_slice %119 {offsets = [456, 0], sizes = [8, 32], strides = [1, 1]} : vector<488x32xf32> to vector<8x32xf32>
    %c57 = arith.constant 57 : index
    %c0_202 = arith.constant 0 : index
    %c0_203 = arith.constant 0 : index
    %410 = vector.load %arg8[%c57, %c0_202, %c0_203] : memref<61x32x128xf32, #tpu.memory_space<vmem>>, vector<1x32x128xf32>
    %411 = vector.shape_cast %410 : vector<1x32x128xf32> to vector<32x128xf32>
    %cst_204 = arith.constant dense<0.000000e+00> : vector<8x128xf32>
    %412 = tpu.matmul %409, %411, %cst_204 {dimension_numbers = #tpu.dot_dimension_numbers<[1], [0], [0], [1], [0, 0, 1, 1], [], []>} : vector<8x32xf32>, vector<32x128xf32>, vector<8x128xf32> -> vector<8x128xf32>
    %413 = arith.addf %393, %412 : vector<8x128xf32>
    %414 = vector.extract_strided_slice %119 {offsets = [464, 0], sizes = [8, 32], strides = [1, 1]} : vector<488x32xf32> to vector<8x32xf32>
    %c58 = arith.constant 58 : index
    %c0_205 = arith.constant 0 : index
    %c0_206 = arith.constant 0 : index
    %415 = vector.load %arg8[%c58, %c0_205, %c0_206] : memref<61x32x128xf32, #tpu.memory_space<vmem>>, vector<1x32x128xf32>
    %416 = vector.shape_cast %415 : vector<1x32x128xf32> to vector<32x128xf32>
    %cst_207 = arith.constant dense<0.000000e+00> : vector<8x128xf32>
    %417 = tpu.matmul %414, %416, %cst_207 {dimension_numbers = #tpu.dot_dimension_numbers<[1], [0], [0], [1], [0, 0, 1, 1], [], []>} : vector<8x32xf32>, vector<32x128xf32>, vector<8x128xf32> -> vector<8x128xf32>
    %418 = arith.addf %398, %417 : vector<8x128xf32>
    %419 = vector.extract_strided_slice %119 {offsets = [472, 0], sizes = [8, 32], strides = [1, 1]} : vector<488x32xf32> to vector<8x32xf32>
    %c59 = arith.constant 59 : index
    %c0_208 = arith.constant 0 : index
    %c0_209 = arith.constant 0 : index
    %420 = vector.load %arg8[%c59, %c0_208, %c0_209] : memref<61x32x128xf32, #tpu.memory_space<vmem>>, vector<1x32x128xf32>
    %421 = vector.shape_cast %420 : vector<1x32x128xf32> to vector<32x128xf32>
    %cst_210 = arith.constant dense<0.000000e+00> : vector<8x128xf32>
    %422 = tpu.matmul %419, %421, %cst_210 {dimension_numbers = #tpu.dot_dimension_numbers<[1], [0], [0], [1], [0, 0, 1, 1], [], []>} : vector<8x32xf32>, vector<32x128xf32>, vector<8x128xf32> -> vector<8x128xf32>
    %423 = arith.addf %403, %422 : vector<8x128xf32>
    %424 = vector.extract_strided_slice %119 {offsets = [480, 0], sizes = [8, 32], strides = [1, 1]} : vector<488x32xf32> to vector<8x32xf32>
    %c60 = arith.constant 60 : index
    %c0_211 = arith.constant 0 : index
    %c0_212 = arith.constant 0 : index
    %425 = vector.load %arg8[%c60, %c0_211, %c0_212] : memref<61x32x128xf32, #tpu.memory_space<vmem>>, vector<1x32x128xf32>
    %426 = vector.shape_cast %425 : vector<1x32x128xf32> to vector<32x128xf32>
    %cst_213 = arith.constant dense<0.000000e+00> : vector<8x128xf32>
    %427 = tpu.matmul %424, %426, %cst_213 {dimension_numbers = #tpu.dot_dimension_numbers<[1], [0], [0], [1], [0, 0, 1, 1], [], []>} : vector<8x32xf32>, vector<32x128xf32>, vector<8x128xf32> -> vector<8x128xf32>
    %428 = arith.addf %408, %427 : vector<8x128xf32>
    %429 = arith.addf %428, %413 : vector<8x128xf32>
    %430 = arith.addf %418, %423 : vector<8x128xf32>
    %431 = arith.addf %429, %430 : vector<8x128xf32>
    %c0_214 = arith.constant 0 : index
    %c0_215 = arith.constant 0 : index
    %432 = vector.load %arg9[%c0_214, %c0_215] : memref<1x128xf32, #tpu.memory_space<vmem>>, vector<1x128xf32>
    %433 = vector.broadcast %432 : vector<1x128xf32> to vector<8x128xf32>
    %434 = arith.addf %431, %433 : vector<8x128xf32>
    %cst_216 = arith.constant 0.000000e+00 : f32
    %435 = vector.broadcast %cst_216 : f32 to vector<8x128xf32>
    %436 = arith.maximumf %434, %435 : vector<8x128xf32>
    %c0_217 = arith.constant 0 : index
    %c0_218 = arith.constant 0 : index
    %437 = vector.load %arg10[%c0_217, %c0_218] : memref<1x128xf32, #tpu.memory_space<vmem>>, vector<1x128xf32>
    %cst_219 = arith.constant dense<0.000000e+00> : vector<1x8xf32>
    %438 = tpu.matmul %437, %436, %cst_219 {dimension_numbers = #tpu.dot_dimension_numbers<[1], [1], [0], [0], [0, 0, 1, 0], [], []>} : vector<1x128xf32>, vector<8x128xf32>, vector<1x8xf32> -> vector<1x8xf32>
    %c0_220 = arith.constant 0 : index
    %c0_221 = arith.constant 0 : index
    %439 = vector.load %arg11[%c0_220, %c0_221] : memref<1x1xf32, #tpu.memory_space<vmem>>, vector<1x1xf32>
    %440 = vector.broadcast %439 : vector<1x1xf32> to vector<1x8xf32>
    %441 = arith.addf %438, %440 : vector<1x8xf32>
    %c0_222 = arith.constant 0 : index
    %c0_223 = arith.constant 0 : index
    %c0_224 = arith.constant 0 : index
    %442 = vector.load %arg12[%c0_222, %c0_223, %c0_224] : memref<1x1x8xf32, #tpu.memory_space<vmem>>, vector<1x1x8xf32>
    %443 = vector.shape_cast %442 : vector<1x1x8xf32> to vector<1x8xf32>
    %444 = vector.shape_cast %441 : vector<1x8xf32> to vector<1x1x8xf32>
    tpu.vector_store %arg12[%c0_222, %c0_223, %c0_224], %444 {strides = array<i32>} : memref<1x1x8xf32, #tpu.memory_space<vmem>>, vector<1x1x8xf32>,
    return
  }
  func.func @transform_0(%arg0: i32) -> (i32, i32, i32) {
    %c0_i32 = arith.constant 0 : i32
    %c0_i32_0 = arith.constant 0 : i32
    %c0_i32_1 = arith.constant 0 : i32
    return %arg0, %c0_i32, %c0_i32_0 : i32, i32, i32
  }
  func.func @transform_1(%arg0: i32) -> (i32, i32) {
    %c0_i32 = arith.constant 0 : i32
    %c0_i32_0 = arith.constant 0 : i32
    %c0_i32_1 = arith.constant 0 : i32
    return %c0_i32, %c0_i32_0 : i32, i32
  }
  func.func @transform_2(%arg0: i32) -> (i32, i32) {
    %c0_i32 = arith.constant 0 : i32
    %c0_i32_0 = arith.constant 0 : i32
    %c0_i32_1 = arith.constant 0 : i32
    return %c0_i32, %c0_i32_0 : i32, i32
  }
  func.func @transform_3(%arg0: i32) -> (i32, i32) {
    %c0_i32 = arith.constant 0 : i32
    %c0_i32_0 = arith.constant 0 : i32
    %c0_i32_1 = arith.constant 0 : i32
    return %c0_i32, %c0_i32_0 : i32, i32
  }
  func.func @transform_4(%arg0: i32) -> (i32, i32) {
    %c0_i32 = arith.constant 0 : i32
    %c0_i32_0 = arith.constant 0 : i32
    %c0_i32_1 = arith.constant 0 : i32
    return %c0_i32, %c0_i32_0 : i32, i32
  }
  func.func @transform_5(%arg0: i32) -> (i32, i32) {
    %c0_i32 = arith.constant 0 : i32
    %c0_i32_0 = arith.constant 0 : i32
    %c0_i32_1 = arith.constant 0 : i32
    return %c0_i32, %c0_i32_0 : i32, i32
  }
  func.func @transform_6(%arg0: i32) -> (i32, i32) {
    %c0_i32 = arith.constant 0 : i32
    %c0_i32_0 = arith.constant 0 : i32
    %c0_i32_1 = arith.constant 0 : i32
    return %c0_i32, %c0_i32_0 : i32, i32
  }
  func.func @transform_7(%arg0: i32) -> (i32, i32, i32) {
    %c0_i32 = arith.constant 0 : i32
    %c0_i32_0 = arith.constant 0 : i32
    %c0_i32_1 = arith.constant 0 : i32
    %c0_i32_2 = arith.constant 0 : i32
    return %c0_i32, %c0_i32_0, %c0_i32_1 : i32, i32, i32
  }
  func.func @transform_8(%arg0: i32) -> (i32, i32) {
    %c0_i32 = arith.constant 0 : i32
    %c0_i32_0 = arith.constant 0 : i32
    %c0_i32_1 = arith.constant 0 : i32
    return %c0_i32, %c0_i32_0 : i32, i32
  }
  func.func @transform_9(%arg0: i32) -> (i32, i32) {
    %c0_i32 = arith.constant 0 : i32
    %c0_i32_0 = arith.constant 0 : i32
    %c0_i32_1 = arith.constant 0 : i32
    return %c0_i32, %c0_i32_0 : i32, i32
  }
  func.func @transform_10(%arg0: i32) -> (i32, i32) {
    %c0_i32 = arith.constant 0 : i32
    %c0_i32_0 = arith.constant 0 : i32
    %c0_i32_1 = arith.constant 0 : i32
    return %c0_i32, %c0_i32_0 : i32, i32
  }
  func.func @transform_11(%arg0: i32) -> (i32, i32, i32) {
    %c0_i32 = arith.constant 0 : i32
    %c0_i32_0 = arith.constant 0 : i32
    %c0_i32_1 = arith.constant 0 : i32
    return %arg0, %c0_i32, %c0_i32_0 : i32, i32, i32
  }
}

</mosaic_0001>

<bundles_post_ra>
// kernel: cnn_forward.1
= control target key start
LH: loop header
LB: loop body
LE: loop exit
PB: predicated region body
PF: predicated region fallthrough
CT: control target
= control target key end

     0   :  { %v13423_v0 = vmov 1   ;;  %v20656_v1 = vmov 0   ;;  %v20661_v63 = vmov 2   ;;  %vm13430_vm0 = vmmov 0   ;;  %s13432_s12 = smov 96   ;;  %s13433_s21 = smov 64   ;;  %s20644_s0 = inlined_call_operand.vmem [shape: f32[1,488,6], index: 0, kind: input, shape index: {}]   ;;  %s20645_s4 = inlined_call_operand.vmem [shape: f32[128,96], index: 4, kind: input, shape index: {}]   ;;  %s20646_s1 = inlined_call_operand.vmem [shape: f32[3,128], index: 1, kind: input, shape index: {}]   ;;  %s20647_s2 = inlined_call_operand.vmem [shape: f32[1,128], index: 2, kind: input, shape index: {}]   ;;  %s20648_s3 = inlined_call_operand.vmem [shape: f32[1,128], index: 3, kind: input, shape index: {}]   ;;  %s20649_s7 = inlined_call_operand.vmem [shape: f32[61,32,128], index: 7, kind: input, shape index: {}]   ;;  %s20650_s5 = inlined_call_operand.vmem [shape: f32[1,32], index: 5, kind: input, shape index: {}]   ;;  %s20651_s6 = inlined_call_operand.vmem [shape: f32[1,32], index: 6, kind: input, shape index: {}]   ;;  %s20652_s10 = inlined_call_operand.<no memory space> [shape: f32[1,1], index: 10, kind: input, shape index: {}]   ;;  %s20653_s8 = inlined_call_operand.vmem [shape: f32[1,128], index: 8, kind: input, shape index: {}]   ;;  %s20654_s9 = inlined_call_operand.vmem [shape: f32[1,128], index: 9, kind: input, shape index: {}]   ;;  %s20655_s11 = inlined_call_operand.vmem [shape: f32[1,1,8], index: 11, kind: output, shape index: {}]  }
   0x1   :  { %13238 = vset.pattern.permute.xlu0 %v13423_v0  ;;  %13236 = vset.pattern.permute.xlu1 %v20656_v1  ;;  %v13499_v2 = vld [vmem:[%s20644_s0 + $0x10] sm:$0xff]  ;;  %v13504_v3 = vld [vmem:[%s20644_s0 + $0x8] sm:$0xff]  ;;  %v13511_v4 = vld [vmem:[%s20644_s0 + $0x18] sm:$0xff]  ;;  %vm6049_vm1 = vcmask 261120   ;;  %vm10929_vm2 = vcmask 57344  }
   0x2   :  { %118 = vperm.xlu1 %13236, %v13499_v2   ;;  %481 = vperm.xlu0 %13238, %v13504_v3   ;;  %v13516_v5 = vld [vmem:[%s20644_s0 + $0x20] sm:$0xff]  ;;  %v13523_v6 = vld [vmem:[%s20644_s0 + $0x28] sm:$0xff]  ;;  %v13528_v7 = vld [vmem:[%s20644_s0 + $0x30] sm:$0xff] }
   0x3   :  { %v13535_v8 = vld [vmem:[%s20644_s0 + $0x38] sm:$0xff]  ;;  %v13540_v9 = vld [vmem:[%s20644_s0 + $0x40] sm:$0xff]  ;;  %v13547_v10 = vld [vmem:[%s20644_s0 + $0x48] sm:$0xff] }
   0x4   :  { %v13552_v11 = vld [vmem:[%s20644_s0 + $0x50] sm:$0xff]  ;;  %v13559_v12 = vld [vmem:[%s20644_s0 + $0x58] sm:$0xff]  ;;  %v13564_v13 = vld [vmem:[%s20644_s0 + $0x60] sm:$0xff] }
   0x5   :  { %v13571_v14 = vld [vmem:[%s20644_s0 + $0x68] sm:$0xff]  ;;  %v13576_v15 = vld [vmem:[%s20644_s0 + $0x70] sm:$0xff]  ;;  %v13583_v16 = vld [vmem:[%s20644_s0 + $0x78] sm:$0xff] }
   0x6   :  { %123 = vperm.xlu1 %13236, %v13511_v4   ;;  %493 = vperm.xlu0 %13238, %v13516_v5   ;;  %v13588_v17 = vld [vmem:[%s20644_s0 + $0x80] sm:$0xff]  ;;  %v13595_v18 = vld [vmem:[%s20644_s0 + $0x88] sm:$0xff]  ;;  %v13600_v19 = vld [vmem:[%s20644_s0 + $0x90] sm:$0xff] }
   0x7   :  { %v13607_v20 = vld [vmem:[%s20644_s0 + $0x98] sm:$0xff]  ;;  %v13612_v21 = vld [vmem:[%s20644_s0 + $0xa0] sm:$0xff]  ;;  %v13619_v22 = vld [vmem:[%s20644_s0 + $0xa8] sm:$0xff] }
   0x8   :  { %v13624_v23 = vld [vmem:[%s20644_s0 + $0xb0] sm:$0xff]  ;;  %v13631_v24 = vld [vmem:[%s20644_s0 + $0xb8] sm:$0xff]  ;;  %v13636_v25 = vld [vmem:[%s20644_s0 + $0xc0] sm:$0xff] }
   0x9   :  { %v13643_v26 = vld [vmem:[%s20644_s0 + $0xc8] sm:$0xff]  ;;  %v13648_v27 = vld [vmem:[%s20644_s0 + $0xd0] sm:$0xff]  ;;  %v13655_v28 = vld [vmem:[%s20644_s0 + $0xd8] sm:$0xff] }
   0xa   :  { %133 = vperm.xlu1 %13236, %v13523_v6   ;;  %501 = vperm.xlu0 %13238, %v13528_v7   ;;  %v13660_v29 = vld [vmem:[%s20644_s0 + $0xe0] sm:$0xff]  ;;  %v13667_v30 = vld [vmem:[%s20644_s0 + $0xe8] sm:$0xff]  ;;  %v13672_v31 = vld [vmem:[%s20644_s0 + $0xf0] sm:$0xff] }
   0xb   :  { %v13679_v32 = vld [vmem:[%s20644_s0 + $0xf8] sm:$0xff]  ;;  %v13684_v33 = vld [vmem:[%s20644_s0 + $0x100] sm:$0xff]  ;;  %v13691_v34 = vld [vmem:[%s20644_s0 + $0x108] sm:$0xff] }
   0xc   :  { %v13696_v35 = vld [vmem:[%s20644_s0 + $0x110] sm:$0xff]  ;;  %v13703_v36 = vld [vmem:[%s20644_s0 + $0x118] sm:$0xff]  ;;  %v13708_v37 = vld [vmem:[%s20644_s0 + $0x120] sm:$0xff] }
   0xd   :  { %v13715_v38 = vld [vmem:[%s20644_s0 + $0x128] sm:$0xff]  ;;  %v13720_v39 = vld [vmem:[%s20644_s0 + $0x130] sm:$0xff]  ;;  %v13727_v40 = vld [vmem:[%s20644_s0 + $0x138] sm:$0xff] }
   0xe   :  { %143 = vperm.xlu1 %13236, %v13535_v8   ;;  %509 = vperm.xlu0 %13238, %v13540_v9   ;;  %v13732_v41 = vld [vmem:[%s20644_s0 + $0x140] sm:$0xff]  ;;  %v13739_v42 = vld [vmem:[%s20644_s0 + $0x148] sm:$0xff]  ;;  %v13744_v43 = vld [vmem:[%s20644_s0 + $0x150] sm:$0xff] }
   0xf   :  { %v13751_v44 = vld [vmem:[%s20644_s0 + $0x158] sm:$0xff]  ;;  %v13756_v45 = vld [vmem:[%s20644_s0 + $0x160] sm:$0xff]  ;;  %v13763_v46 = vld [vmem:[%s20644_s0 + $0x168] sm:$0xff] }
  0x10   :  { %v13768_v47 = vld [vmem:[%s20644_s0 + $0x170] sm:$0xff]  ;;  %v13775_v48 = vld [vmem:[%s20644_s0 + $0x178] sm:$0xff]  ;;  %v13780_v49 = vld [vmem:[%s20644_s0 + $0x180] sm:$0xff] }
  0x11   :  { %v13787_v50 = vld [vmem:[%s20644_s0 + $0x188] sm:$0xff]  ;;  %v13792_v51 = vld [vmem:[%s20644_s0 + $0x190] sm:$0xff]  ;;  %v13799_v52 = vld [vmem:[%s20644_s0 + $0x198] sm:$0xff] }
  0x12   :  { %153 = vperm.xlu1 %13236, %v13547_v10   ;;  %517 = vperm.xlu0 %13238, %v13552_v11   ;;  %v13804_v53 = vld [vmem:[%s20644_s0 + $0x1a0] sm:$0xff]  ;;  %v13811_v54 = vld [vmem:[%s20644_s0 + $0x1a8] sm:$0xff]  ;;  %v13816_v55 = vld [vmem:[%s20644_s0 + $0x1b0] sm:$0xff] }
  0x13   :  { %v13823_v56 = vld [vmem:[%s20644_s0 + $0x1b8] sm:$0xff]  ;;  %v13828_v57 = vld [vmem:[%s20644_s0 + $0x1c0] sm:$0xff]  ;;  %v13835_v58 = vld [vmem:[%s20644_s0 + $0x1c8] sm:$0xff] }
  0x14   :  { %20950 = vst [vmem:[#allocation3_spill] sm:$0xff] %v13835_v58  ;;  %v13840_v59 = vld [vmem:[%s20644_s0 + $0x1d0] sm:$0xff]  ;;  %v13847_v60 = vld [vmem:[%s20644_s0 + $0x1d8] sm:$0xff]  ;;  %v13852_v61 = vld [vmem:[%s20644_s0 + $0x1e0] sm:$0xff] }
  0x15   :  { %20951 = vst [vmem:[#allocation4_spill] sm:$0xff] %v13847_v60  ;;  %v13859_v62 = vld [vmem:[%s20644_s0] sm:$0xff] }
  0x16   :  { %163 = vperm.xlu1 %13236, %v13559_v12   ;;  %525 = vperm.xlu0 %13238, %v13564_v13   ;;  %20952 = vst [vmem:[#allocation5_spill] sm:$0xff] %v13859_v62 }
  0x1a   :  { %173 = vperm.xlu1 %13236, %v13571_v14   ;;  %533 = vperm.xlu0 %13238, %v13576_v15  }
  0x1e   :  { %183 = vperm.xlu1 %13236, %v13583_v16   ;;  %541 = vperm.xlu0 %13238, %v13588_v17  }
  0x22   :  { %193 = vperm.xlu1 %13236, %v13595_v18   ;;  %549 = vperm.xlu0 %13238, %v13600_v19  }
  0x26   :  { %203 = vperm.xlu1 %13236, %v13607_v20   ;;  %557 = vperm.xlu0 %13238, %v13612_v21  }
  0x2a   :  { %213 = vperm.xlu1 %13236, %v13619_v22   ;;  %565 = vperm.xlu0 %13238, %v13624_v23  }
  0x2e   :  { %223 = vperm.xlu1 %13236, %v13631_v24   ;;  %573 = vperm.xlu0 %13238, %v13636_v25  }
  0x32   :  { %233 = vperm.xlu1 %13236, %v13643_v26   ;;  %581 = vperm.xlu0 %13238, %v13648_v27  }
  0x36   :  { %243 = vperm.xlu1 %13236, %v13655_v28   ;;  %589 = vperm.xlu0 %13238, %v13660_v29  }
  0x3a   :  { %253 = vperm.xlu1 %13236, %v13667_v30   ;;  %597 = vperm.xlu0 %13238, %v13672_v31  }
  0x3e   :  { %263 = vperm.xlu1 %13236, %v13679_v32   ;;  %605 = vperm.xlu0 %13238, %v13684_v33  }
  0x42   :  { %273 = vperm.xlu1 %13236, %v13691_v34   ;;  %613 = vperm.xlu0 %13238, %v13696_v35  }
  0x46   :  { %283 = vperm.xlu1 %13236, %v13703_v36   ;;  %621 = vperm.xlu0 %13238, %v13708_v37  }
  0x4a   :  { %293 = vperm.xlu1 %13236, %v13715_v38   ;;  %629 = vperm.xlu0 %13238, %v13720_v39  }
  0x4e   :  { %303 = vperm.xlu1 %13236, %v13727_v40   ;;  %637 = vperm.xlu0 %13238, %v13732_v41  }
  0x52   :  { %313 = vperm.xlu1 %13236, %v13739_v42   ;;  %645 = vperm.xlu0 %13238, %v13744_v43  }
  0x56   :  { %323 = vperm.xlu1 %13236, %v13751_v44   ;;  %653 = vperm.xlu0 %13238, %v13756_v45  }
  0x5a   :  { %333 = vperm.xlu1 %13236, %v13763_v46   ;;  %661 = vperm.xlu0 %13238, %v13768_v47  }
  0x5e   :  { %343 = vperm.xlu1 %13236, %v13775_v48   ;;  %669 = vperm.xlu0 %13238, %v13780_v49  }
  0x62   :  { %353 = vperm.xlu1 %13236, %v13787_v50   ;;  %677 = vperm.xlu0 %13238, %v13792_v51  }
  0x66   :  { %363 = vperm.xlu1 %13236, %v13799_v52   ;;  %685 = vperm.xlu0 %13238, %v13804_v53  }
  0x6a   :  { %373 = vperm.xlu1 %13236, %v13811_v54   ;;  %693 = vperm.xlu0 %13238, %v13816_v55  }
  0x6e   :  { %383 = vperm.xlu1 %13236, %v13823_v56   ;;  %701 = vperm.xlu0 %13238, %v13828_v57  }
  0x72   :  { %393 = vperm.xlu1 %13236, %v13835_v58   ;;  %709 = vperm.xlu0 %13238, %v13840_v59  }
  0x76   :  { %403 = vperm.xlu1 %13236, %v13847_v60   ;;  %717 = vperm.xlu0 %13238, %v13852_v61  }
  0x7a   :  { %13237 = vset.pattern.permute.xlu1 %v13423_v0  ;;  %13240 = vset.pattern.permute.xlu0 %v20661_v63 }
  0x7b   :  { %851 = vperm.xlu0 %13240, %v13504_v3   ;;  %477 = vperm.xlu1 %13237, %v13859_v62  }
  0x7f   :  { %863 = vperm.xlu0 %13240, %v13516_v5   ;;  %485 = vperm.xlu1 %13237, %v13499_v2  }
  0x81   :  { %v13867_v1 = vpop.permute.xlu1 %118  ;;  %v13869_v60 = vpop.permute.xlu0 %481 }
  0x82   :  { %20953 = vst [vmem:[#allocation6_spill] sm:$0xff] %v13867_v1  ;;  %20954 = vst [vmem:[#allocation7_spill] sm:$0xff] %v13869_v60 }
  0x83   :  { %871 = vperm.xlu0 %13240, %v13528_v7   ;;  %489 = vperm.xlu1 %13237, %v13511_v4  }
  0x85   :  { %v13873_v0 = vpop.permute.xlu1 %123  ;;  %v13875_v58 = vpop.permute.xlu0 %493 }
  0x86   :  { %20955 = vst [vmem:[#allocation8_spill] sm:$0xff] %v13873_v0  ;;  %20956 = vst [vmem:[#allocation9_spill] sm:$0xff] %v13875_v58 }
  0x87   :  { %879 = vperm.xlu0 %13240, %v13540_v9   ;;  %497 = vperm.xlu1 %13237, %v13523_v6  }
  0x89   :  { %v13879_v63 = vpop.permute.xlu1 %133  ;;  %v13881_v62 = vpop.permute.xlu0 %501 }
  0x8a   :  { %20957 = vst [vmem:[#allocation10_spill] sm:$0xff] %v13879_v63  ;;  %20958 = vst [vmem:[#allocation11_spill] sm:$0xff] %v13881_v62 }
  0x8b   :  { %887 = vperm.xlu0 %13240, %v13552_v11   ;;  %505 = vperm.xlu1 %13237, %v13535_v8  }
  0x8d   :  { %v13885_v60 = vpop.permute.xlu1 %143  ;;  %v13887_v1 = vpop.permute.xlu0 %509 }
  0x8e   :  { %20959 = vst [vmem:[#allocation12_spill] sm:$0xff] %v13885_v60  ;;  %20960 = vst [vmem:[#allocation13_spill] sm:$0xff] %v13887_v1 }
  0x8f   :  { %895 = vperm.xlu0 %13240, %v13564_v13   ;;  %513 = vperm.xlu1 %13237, %v13547_v10  }
  0x91   :  { %v13891_v58 = vpop.permute.xlu1 %153  ;;  %v13893_v0 = vpop.permute.xlu0 %517 }
  0x92   :  { %20961 = vst [vmem:[#allocation14_spill] sm:$0xff] %v13891_v58  ;;  %20962 = vst [vmem:[#allocation15_spill] sm:$0xff] %v13893_v0 }
  0x93   :  { %903 = vperm.xlu0 %13240, %v13576_v15   ;;  %521 = vperm.xlu1 %13237, %v13559_v12  }
  0x95   :  { %v13897_v62 = vpop.permute.xlu1 %163  ;;  %v13899_v63 = vpop.permute.xlu0 %525 }
  0x96   :  { %20963 = vst [vmem:[#allocation16_spill] sm:$0xff] %v13897_v62  ;;  %20964 = vst [vmem:[#allocation17_spill] sm:$0xff] %v13899_v63 }
  0x97   :  { %911 = vperm.xlu0 %13240, %v13588_v17   ;;  %529 = vperm.xlu1 %13237, %v13571_v14  }
  0x99   :  { %v13903_v1 = vpop.permute.xlu1 %173  ;;  %v13905_v60 = vpop.permute.xlu0 %533 }
  0x9a   :  { %20965 = vst [vmem:[#allocation18_spill] sm:$0xff] %v13903_v1  ;;  %20966 = vst [vmem:[#allocation19_spill] sm:$0xff] %v13905_v60 }
  0x9b   :  { %919 = vperm.xlu0 %13240, %v13600_v19   ;;  %537 = vperm.xlu1 %13237, %v13583_v16  }
  0x9d   :  { %v13909_v0 = vpop.permute.xlu1 %183  ;;  %v13911_v58 = vpop.permute.xlu0 %541 }
  0x9e   :  { %20967 = vst [vmem:[#allocation20_spill] sm:$0xff] %v13909_v0  ;;  %20968 = vst [vmem:[#allocation21_spill] sm:$0xff] %v13911_v58 }
  0x9f   :  { %927 = vperm.xlu0 %13240, %v13612_v21   ;;  %545 = vperm.xlu1 %13237, %v13595_v18  }
  0xa1   :  { %v13915_v63 = vpop.permute.xlu1 %193  ;;  %v13917_v62 = vpop.permute.xlu0 %549 }
  0xa2   :  { %20969 = vst [vmem:[#allocation22_spill] sm:$0xff] %v13915_v63  ;;  %20970 = vst [vmem:[#allocation23_spill] sm:$0xff] %v13917_v62 }
  0xa3   :  { %935 = vperm.xlu0 %13240, %v13624_v23   ;;  %553 = vperm.xlu1 %13237, %v13607_v20  }
  0xa5   :  { %v13921_v60 = vpop.permute.xlu1 %203  ;;  %v13923_v1 = vpop.permute.xlu0 %557 }
  0xa6   :  { %20971 = vst [vmem:[#allocation24_spill] sm:$0xff] %v13921_v60  ;;  %20972 = vst [vmem:[#allocation25_spill] sm:$0xff] %v13923_v1 }
  0xa7   :  { %943 = vperm.xlu0 %13240, %v13636_v25   ;;  %561 = vperm.xlu1 %13237, %v13619_v22  }
  0xa9   :  { %v13927_v58 = vpop.permute.xlu1 %213  ;;  %v13929_v0 = vpop.permute.xlu0 %565 }
  0xaa   :  { %20973 = vst [vmem:[#allocation26_spill] sm:$0xff] %v13927_v58  ;;  %20974 = vst [vmem:[#allocation27_spill] sm:$0xff] %v13929_v0 }
  0xab   :  { %951 = vperm.xlu0 %13240, %v13648_v27   ;;  %569 = vperm.xlu1 %13237, %v13631_v24  }
  0xad   :  { %v13933_v62 = vpop.permute.xlu1 %223  ;;  %v13935_v63 = vpop.permute.xlu0 %573 }
  0xae   :  { %20975 = vst [vmem:[#allocation28_spill] sm:$0xff] %v13933_v62  ;;  %20976 = vst [vmem:[#allocation29_spill] sm:$0xff] %v13935_v63 }
  0xaf   :  { %959 = vperm.xlu0 %13240, %v13660_v29   ;;  %577 = vperm.xlu1 %13237, %v13643_v26  }
  0xb1   :  { %v13939_v1 = vpop.permute.xlu1 %233  ;;  %v13941_v60 = vpop.permute.xlu0 %581 }
  0xb2   :  { %20977 = vst [vmem:[#allocation30_spill] sm:$0xff] %v13939_v1  ;;  %20978 = vst [vmem:[#allocation31_spill] sm:$0xff] %v13941_v60 }
  0xb3   :  { %967 = vperm.xlu0 %13240, %v13672_v31   ;;  %585 = vperm.xlu1 %13237, %v13655_v28  }
  0xb5   :  { %v13945_v0 = vpop.permute.xlu1 %243  ;;  %v13947_v58 = vpop.permute.xlu0 %589 }
  0xb6   :  { %20979 = vst [vmem:[#allocation32_spill] sm:$0xff] %v13945_v0  ;;  %20980 = vst [vmem:[#allocation33_spill] sm:$0xff] %v13947_v58 }
  0xb7   :  { %975 = vperm.xlu0 %13240, %v13684_v33   ;;  %593 = vperm.xlu1 %13237, %v13667_v30  }
  0xb9   :  { %v13951_v63 = vpop.permute.xlu1 %253  ;;  %v13953_v62 = vpop.permute.xlu0 %597 }
  0xba   :  { %20981 = vst [vmem:[#allocation34_spill] sm:$0xff] %v13951_v63  ;;  %20982 = vst [vmem:[#allocation35_spill] sm:$0xff] %v13953_v62 }
  0xbb   :  { %983 = vperm.xlu0 %13240, %v13696_v35   ;;  %601 = vperm.xlu1 %13237, %v13679_v32  }
  0xbd   :  { %v13957_v60 = vpop.permute.xlu1 %263  ;;  %v13959_v1 = vpop.permute.xlu0 %605 }
  0xbe   :  { %20983 = vst [vmem:[#allocation36_spill] sm:$0xff] %v13957_v60  ;;  %20984 = vst [vmem:[#allocation37_spill] sm:$0xff] %v13959_v1 }
  0xbf   :  { %991 = vperm.xlu0 %13240, %v13708_v37   ;;  %609 = vperm.xlu1 %13237, %v13691_v34  }
  0xc1   :  { %v13963_v58 = vpop.permute.xlu1 %273  ;;  %v13965_v0 = vpop.permute.xlu0 %613 }
  0xc2   :  { %20985 = vst [vmem:[#allocation38_spill] sm:$0xff] %v13963_v58  ;;  %20986 = vst [vmem:[#allocation39_spill] sm:$0xff] %v13965_v0 }
  0xc3   :  { %999 = vperm.xlu0 %13240, %v13720_v39   ;;  %617 = vperm.xlu1 %13237, %v13703_v36  }
  0xc5   :  { %v13969_v62 = vpop.permute.xlu1 %283  ;;  %v13971_v63 = vpop.permute.xlu0 %621 }
  0xc6   :  { %20987 = vst [vmem:[#allocation40_spill] sm:$0xff] %v13969_v62  ;;  %20988 = vst [vmem:[#allocation41_spill] sm:$0xff] %v13971_v63 }
  0xc7   :  { %1007 = vperm.xlu0 %13240, %v13732_v41   ;;  %625 = vperm.xlu1 %13237, %v13715_v38  }
  0xc9   :  { %v13975_v1 = vpop.permute.xlu1 %293  ;;  %v13977_v60 = vpop.permute.xlu0 %629 }
  0xca   :  { %20989 = vst [vmem:[#allocation42_spill] sm:$0xff] %v13975_v1  ;;  %20990 = vst [vmem:[#allocation43_spill] sm:$0xff] %v13977_v60 }
  0xcb   :  { %1015 = vperm.xlu0 %13240, %v13744_v43   ;;  %633 = vperm.xlu1 %13237, %v13727_v40  }
  0xcd   :  { %v13981_v0 = vpop.permute.xlu1 %303  ;;  %v13983_v58 = vpop.permute.xlu0 %637 }
  0xce   :  { %20991 = vst [vmem:[#allocation44_spill] sm:$0xff] %v13983_v58 }
  0xcf   :  { %1023 = vperm.xlu0 %13240, %v13756_v45   ;;  %641 = vperm.xlu1 %13237, %v13739_v42  }
  0xd1   :  { %v13987_v63 = vpop.permute.xlu1 %313  ;;  %v13989_v62 = vpop.permute.xlu0 %645 }
  0xd2   :  { %20992 = vst [vmem:[#allocation45_spill] sm:$0xff] %v13987_v63  ;;  %20993 = vst [vmem:[#allocation46_spill] sm:$0xff] %v13989_v62 }
  0xd3   :  { %1031 = vperm.xlu0 %13240, %v13768_v47   ;;  %649 = vperm.xlu1 %13237, %v13751_v44  }
  0xd5   :  { %v13993_v60 = vpop.permute.xlu1 %323  ;;  %v13995_v1 = vpop.permute.xlu0 %653 }
  0xd6   :  { %20994 = vst [vmem:[#allocation47_spill] sm:$0xff] %v13993_v60  ;;  %20995 = vst [vmem:[#allocation48_spill] sm:$0xff] %v13995_v1 }
  0xd7   :  { %1039 = vperm.xlu0 %13240, %v13780_v49   ;;  %657 = vperm.xlu1 %13237, %v13763_v46  }
  0xd9   :  { %v13999_v58 = vpop.permute.xlu1 %333  ;;  %v14001_v45 = vpop.permute.xlu0 %661 }
  0xda   :  { %20996 = vst [vmem:[#allocation49_spill] sm:$0xff] %v13999_v58  ;;  %20997 = vst [vmem:[#allocation50_spill] sm:$0xff] %v14001_v45  ;;  %v20693_v58 = vmov 3  }
  0xdb   :  { %1047 = vperm.xlu0 %13240, %v13792_v51   ;;  %665 = vperm.xlu1 %13237, %v13775_v48  }
  0xdd   :  { %v14005_v62 = vpop.permute.xlu1 %343  ;;  %v14007_v63 = vpop.permute.xlu0 %669 }
  0xde   :  { %20998 = vst [vmem:[#allocation51_spill] sm:$0xff] %v14005_v62  ;;  %20999 = vst [vmem:[#allocation52_spill] sm:$0xff] %v14007_v63 }
  0xdf   :  { %1055 = vperm.xlu0 %13240, %v13804_v53   ;;  %673 = vperm.xlu1 %13237, %v13787_v50  }
  0xe1   :  { %v14011_v1 = vpop.permute.xlu1 %353  ;;  %v14013_v60 = vpop.permute.xlu0 %677 }
  0xe2   :  { %21000 = vst [vmem:[#allocation53_spill] sm:$0xff] %v14011_v1  ;;  %21001 = vst [vmem:[#allocation54_spill] sm:$0xff] %v14013_v60 }
  0xe3   :  { %1063 = vperm.xlu0 %13240, %v13816_v55   ;;  %681 = vperm.xlu1 %13237, %v13799_v52  }
  0xe5   :  { %v14017_v45 = vpop.permute.xlu1 %363  ;;  %v14019_v51 = vpop.permute.xlu0 %685 }
  0xe6   :  { %21002 = vst [vmem:[#allocation55_spill] sm:$0xff] %v14017_v45  ;;  %21003 = vst [vmem:[#allocation56_spill] sm:$0xff] %v14019_v51  ;;  %v21008_v45 = vld [vmem:[#allocation3_spill] sm:$0xff] }
  0xe7   :  { %1071 = vperm.xlu0 %13240, %v13828_v57   ;;  %689 = vperm.xlu1 %13237, %v13811_v54  }
  0xe9   :  { %v14023_v63 = vpop.permute.xlu1 %373  ;;  %v14025_v62 = vpop.permute.xlu0 %693 }
  0xea   :  { %21004 = vst [vmem:[#allocation57_spill] sm:$0xff] %v14023_v63  ;;  %21005 = vst [vmem:[#allocation58_spill] sm:$0xff] %v14025_v62  ;;  %v21011_v62 = vld [vmem:[#allocation4_spill] sm:$0xff] }
  0xeb   :  { %1079 = vperm.xlu0 %13240, %v13840_v59   ;;  %697 = vperm.xlu1 %13237, %v13823_v56  }
  0xed   :  { %v14029_v60 = vpop.permute.xlu1 %383  ;;  %v14031_v55 = vpop.permute.xlu0 %701 }
  0xee   :  { %21006 = vst [vmem:[#allocation59_spill] sm:$0xff] %v14029_v60  ;;  %21007 = vst [vmem:[#allocation60_spill] sm:$0xff] %v14031_v55  ;;  %v21014_v55 = vmov 2  }
  0xef   :  { %1087 = vperm.xlu0 %13240, %v13852_v61   ;;  %705 = vperm.xlu1 %13237, %v21008_v45   ;;  %v21015_v61 = vld [vmem:[#allocation5_spill] sm:$0xff] }
  0xf1   :  { %v14035_v51 = vpop.permute.xlu1 %393  ;;  %v14037_v1 = vpop.permute.xlu0 %709 }
  0xf2   :  { %21009 = vst [vmem:[#allocation3_spill] sm:$0xff] %v14035_v51  ;;  %21010 = vst [vmem:[#allocation61_spill] sm:$0xff] %v14037_v1 }
  0xf3   :  { %13242 = vset.pattern.permute.xlu0 %v20693_v58  ;;  %713 = vperm.xlu1 %13237, %v21011_v62  }
  0xf4   :  { %1599 = vperm.xlu0 %13242, %v13504_v3  }
  0xf5   :  { %v14042_v63 = vpop.permute.xlu1 %403  ;;  %v14044_v60 = vpop.permute.xlu0 %717 }
  0xf6   :  { %21012 = vst [vmem:[#allocation4_spill] sm:$0xff] %v14042_v63  ;;  %21013 = vst [vmem:[#allocation62_spill] sm:$0xff] %v14044_v60 }
  0xf7   :  { %13239 = vset.pattern.permute.xlu1 %v21014_v55 }
  0xf8   :  { %1611 = vperm.xlu0 %13242, %v13516_v5   ;;  %847 = vperm.xlu1 %13239, %v21015_v61  }
  0xfa   :  { %v14049_v51 = vpop.permute.xlu0 %851  ;;  %v14051_v1 = vpop.permute.xlu1 %477 }
  0xfb   :  { %21016 = vst [vmem:[#allocation5_spill] sm:$0xff] %v14051_v1 }
  0xfc   :  { %1619 = vperm.xlu0 %13242, %v13528_v7   ;;  %855 = vperm.xlu1 %13239, %v13499_v2  }
  0xfe   :  { %v14055_v58 = vpop.permute.xlu0 %863  ;;  %v14057_v3 = vpop.permute.xlu1 %485 }
  0xff   :  { %21017 = vst [vmem:[#allocation63_spill] sm:$0xff] %v14057_v3 }
 0x100   :  { %1627 = vperm.xlu0 %13242, %v13540_v9   ;;  %859 = vperm.xlu1 %13239, %v13511_v4  }
 0x102   :  { %v14061_v55 = vpop.permute.xlu0 %871  ;;  %v14063_v5 = vpop.permute.xlu1 %489 }
 0x103   :  { %21018 = vst [vmem:[#allocation64_spill] sm:$0xff] %v14063_v5 }
 0x104   :  { %1635 = vperm.xlu0 %13242, %v13552_v11   ;;  %867 = vperm.xlu1 %13239, %v13523_v6  }
 0x106   :  { %v14067_v60 = vpop.permute.xlu0 %879  ;;  %v14069_v63 = vpop.permute.xlu1 %497 }
 0x107   :  { %21019 = vst [vmem:[#allocation65_spill] sm:$0xff] %v14067_v60  ;;  %21020 = vst [vmem:[#allocation66_spill] sm:$0xff] %v14069_v63 }
 0x108   :  { %1643 = vperm.xlu0 %13242, %v13564_v13   ;;  %875 = vperm.xlu1 %13239, %v13535_v8  }
 0x10a   :  { %v14073_v1 = vpop.permute.xlu0 %887  ;;  %v14075_v3 = vpop.permute.xlu1 %505 }
 0x10b   :  { %21021 = vst [vmem:[#allocation67_spill] sm:$0xff] %v14073_v1  ;;  %21022 = vst [vmem:[#allocation68_spill] sm:$0xff] %v14075_v3 }
 0x10c   :  { %1651 = vperm.xlu0 %13242, %v13576_v15   ;;  %883 = vperm.xlu1 %13239, %v13547_v10  }
 0x10e   :  { %v14079_v5 = vpop.permute.xlu0 %895  ;;  %v14081_v11 = vpop.permute.xlu1 %513 }
 0x10f   :  { %21023 = vst [vmem:[#allocation69_spill] sm:$0xff] %v14081_v11 }
 0x110   :  { %1659 = vperm.xlu0 %13242, %v13588_v17   ;;  %891 = vperm.xlu1 %13239, %v13559_v12  }
 0x112   :  { %v14085_v63 = vpop.permute.xlu0 %903  ;;  %v14087_v60 = vpop.permute.xlu1 %521 }
 0x113   :  { %21024 = vst [vmem:[#allocation70_spill] sm:$0xff] %v14085_v63  ;;  %21025 = vst [vmem:[#allocation71_spill] sm:$0xff] %v14087_v60 }
 0x114   :  { %1667 = vperm.xlu0 %13242, %v13600_v19   ;;  %899 = vperm.xlu1 %13239, %v13571_v14  }
 0x116   :  { %v14091_v3 = vpop.permute.xlu0 %911  ;;  %v14093_v1 = vpop.permute.xlu1 %529 }
 0x117   :  { %21026 = vst [vmem:[#allocation72_spill] sm:$0xff] %v14091_v3  ;;  %21027 = vst [vmem:[#allocation73_spill] sm:$0xff] %v14093_v1 }
 0x118   :  { %1675 = vperm.xlu0 %13242, %v13612_v21   ;;  %907 = vperm.xlu1 %13239, %v13583_v16  }
 0x11a   :  { %v14097_v11 = vpop.permute.xlu0 %919  ;;  %v14099_v17 = vpop.permute.xlu1 %537 }
 0x11b   :  { %21028 = vst [vmem:[#allocation74_spill] sm:$0xff] %v14099_v17 }
 0x11c   :  { %1683 = vperm.xlu0 %13242, %v13624_v23   ;;  %915 = vperm.xlu1 %13239, %v13595_v18  }
 0x11e   :  { %v14103_v60 = vpop.permute.xlu0 %927  ;;  %v14105_v63 = vpop.permute.xlu1 %545 }
 0x11f   :  { %21029 = vst [vmem:[#allocation75_spill] sm:$0xff] %v14103_v60  ;;  %21030 = vst [vmem:[#allocation76_spill] sm:$0xff] %v14105_v63 }
 0x120   :  { %1691 = vperm.xlu0 %13242, %v13636_v25   ;;  %923 = vperm.xlu1 %13239, %v13607_v20  }
 0x122   :  { %v14109_v1 = vpop.permute.xlu0 %935  ;;  %v14111_v3 = vpop.permute.xlu1 %553 }
 0x123   :  { %21031 = vst [vmem:[#allocation77_spill] sm:$0xff] %v14109_v1  ;;  %21032 = vst [vmem:[#allocation78_spill] sm:$0xff] %v14111_v3 }
 0x124   :  { %1699 = vperm.xlu0 %13242, %v13648_v27   ;;  %931 = vperm.xlu1 %13239, %v13619_v22  }
 0x126   :  { %v14115_v17 = vpop.permute.xlu0 %943  ;;  %v14117_v23 = vpop.permute.xlu1 %561 }
 0x127   :  { %21033 = vst [vmem:[#allocation79_spill] sm:$0xff] %v14117_v23 }
 0x128   :  { %1707 = vperm.xlu0 %13242, %v13660_v29   ;;  %939 = vperm.xlu1 %13239, %v13631_v24  }
 0x12a   :  { %v14121_v63 = vpop.permute.xlu0 %951  ;;  %v14123_v60 = vpop.permute.xlu1 %569 }
 0x12b   :  { %21034 = vst [vmem:[#allocation80_spill] sm:$0xff] %v14121_v63  ;;  %21035 = vst [vmem:[#allocation81_spill] sm:$0xff] %v14123_v60 }
 0x12c   :  { %1715 = vperm.xlu0 %13242, %v13672_v31   ;;  %947 = vperm.xlu1 %13239, %v13643_v26  }
 0x12e   :  { %v14127_v3 = vpop.permute.xlu0 %959  ;;  %v14129_v1 = vpop.permute.xlu1 %577 }
 0x12f   :  { %21036 = vst [vmem:[#allocation82_spill] sm:$0xff] %v14129_v1 }
 0x130   :  { %1723 = vperm.xlu0 %13242, %v13684_v33   ;;  %955 = vperm.xlu1 %13239, %v13655_v28  }
 0x132   :  { %v14133_v23 = vpop.permute.xlu0 %967  ;;  %v14135_v29 = vpop.permute.xlu1 %585 }
 0x133   :  { %21037 = vst [vmem:[#allocation83_spill] sm:$0xff] %v14135_v29 }
 0x134   :  { %1731 = vperm.xlu0 %13242, %v13696_v35   ;;  %963 = vperm.xlu1 %13239, %v13667_v30  }
 0x136   :  { %v14139_v60 = vpop.permute.xlu0 %975  ;;  %v14141_v63 = vpop.permute.xlu1 %593 }
 0x137   :  { %21038 = vst [vmem:[#allocation84_spill] sm:$0xff] %v14139_v60  ;;  %21039 = vst [vmem:[#allocation85_spill] sm:$0xff] %v14141_v63 }
 0x138   :  { %1739 = vperm.xlu0 %13242, %v13708_v37   ;;  %971 = vperm.xlu1 %13239, %v13679_v32  }
 0x13a   :  { %v14145_v1 = vpop.permute.xlu0 %983  ;;  %v14147_v33 = vpop.permute.xlu1 %601 }
 0x13b   :  { %21040 = vst [vmem:[#allocation86_spill] sm:$0xff] %v14147_v33 }
 0x13c   :  { %1747 = vperm.xlu0 %13242, %v13720_v39   ;;  %979 = vperm.xlu1 %13239, %v13691_v34  }
 0x13e   :  { %v14151_v29 = vpop.permute.xlu0 %991  ;;  %v14153_v35 = vpop.permute.xlu1 %609 }
 0x13f   :  { %21041 = vst [vmem:[#allocation87_spill] sm:$0xff] %v14153_v35 }
 0x140   :  { %1755 = vperm.xlu0 %13242, %v13732_v41   ;;  %987 = vperm.xlu1 %13239, %v13703_v36  }
 0x142   :  { %v14157_v63 = vpop.permute.xlu0 %999  ;;  %v14159_v60 = vpop.permute.xlu1 %617 }
 0x143   :  { %21042 = vst [vmem:[#allocation88_spill] sm:$0xff] %v14157_v63  ;;  %21043 = vst [vmem:[#allocation89_spill] sm:$0xff] %v14159_v60 }
 0x144   :  { %1763 = vperm.xlu0 %13242, %v13744_v43   ;;  %995 = vperm.xlu1 %13239, %v13715_v38  }
 0x146   :  { %v14163_v33 = vpop.permute.xlu0 %1007  ;;  %v14165_v39 = vpop.permute.xlu1 %625 }
 0x147   :  { %21044 = vst [vmem:[#allocation90_spill] sm:$0xff] %v14165_v39 }
 0x148   :  { %1779 = vperm.xlu0 %13242, %v13768_v47   ;;  %1003 = vperm.xlu1 %13239, %v13727_v40  }
 0x14a   :  { %v14169_v35 = vpop.permute.xlu0 %1015  ;;  %v14171_v41 = vpop.permute.xlu1 %633 }
 0x14b   :  { %21045 = vst [vmem:[#allocation91_spill] sm:$0xff] %v14169_v35  ;;  %21046 = vst [vmem:[#allocation92_spill] sm:$0xff] %v14171_v41 }
 0x14c   :  { %1783 = vperm.xlu0 %13242, %v13775_v48   ;;  %1011 = vperm.xlu1 %13239, %v13739_v42  }
 0x14e   :  { %v14175_v60 = vpop.permute.xlu0 %1023  ;;  %v14177_v63 = vpop.permute.xlu1 %641 }
 0x14f   :  { %21047 = vst [vmem:[#allocation93_spill] sm:$0xff] %v14175_v60  ;;  %21048 = vst [vmem:[#allocation94_spill] sm:$0xff] %v14177_v63 }
 0x150   :  { %1799 = vperm.xlu0 %13242, %v13799_v52   ;;  %1019 = vperm.xlu1 %13239, %v13751_v44  }
 0x152   :  { %v14181_v39 = vpop.permute.xlu0 %1031  ;;  %v14183_v47 = vpop.permute.xlu1 %649 }
 0x153   :  { %21049 = vst [vmem:[#allocation95_spill] sm:$0xff] %v14181_v39  ;;  %21050 = vst [vmem:[#allocation96_spill] sm:$0xff] %v14183_v47 }
 0x154   :  { %1803 = vperm.xlu0 %13242, %v13804_v53   ;;  %1027 = vperm.xlu1 %13239, %v13763_v46   ;;  %v20733_v46 = vmov 5  }
 0x156   :  { %v14187_v41 = vpop.permute.xlu0 %1039  ;;  %v14189_v35 = vpop.permute.xlu1 %657 }
 0x157   :  { %21051 = vst [vmem:[#allocation97_spill] sm:$0xff] %v14187_v41  ;;  %21052 = vst [vmem:[#allocation98_spill] sm:$0xff] %v14189_v35 }
 0x158   :  { %1819 = vperm.xlu0 %13242, %v13828_v57   ;;  %1035 = vperm.xlu1 %13239, %v13775_v48  }
 0x15a   :  { %v14193_v60 = vpop.permute.xlu0 %1047  ;;  %v14195_v63 = vpop.permute.xlu1 %665 }
 0x15b   :  { %21053 = vst [vmem:[#allocation99_spill] sm:$0xff] %v14193_v60  ;;  %21054 = vst [vmem:[#allocation100_spill] sm:$0xff] %v14195_v63 }
 0x15c   :  { %1823 = vperm.xlu0 %13242, %v21008_v45   ;;  %1043 = vperm.xlu1 %13239, %v13787_v50  }
 0x15e   :  { %v14199_v39 = vpop.permute.xlu0 %1055  ;;  %v14201_v47 = vpop.permute.xlu1 %673 }
 0x15f   :  { %21055 = vst [vmem:[#allocation101_spill] sm:$0xff] %v14199_v39  ;;  %21056 = vst [vmem:[#allocation102_spill] sm:$0xff] %v14201_v47 }
 0x160   :  { %13298 = vset.pattern.permute.xlu0 %v20733_v46  ;;  %1051 = vperm.xlu1 %13239, %v13799_v52  }
 0x161   :  { %3120 = vperm.xlu0 %13298, %v21015_v61  }
 0x162   :  { %v14206_v57 = vpop.permute.xlu0 %1063  ;;  %v14208_v60 = vpop.permute.xlu1 %681 }
 0x163   :  { %21057 = vst [vmem:[#allocation103_spill] sm:$0xff] %v14206_v57  ;;  %21058 = vst [vmem:[#allocation104_spill] sm:$0xff] %v14208_v60 }
 0x164   :  { %1059 = vperm.xlu1 %13239, %v13811_v54  }
 0x165   :  { %3132 = vperm.xlu0 %13298, %v13511_v4  }
 0x166   :  { %v14212_v50 = vpop.permute.xlu0 %1071  ;;  %v14214_v39 = vpop.permute.xlu1 %689 }
 0x167   :  { %21059 = vst [vmem:[#allocation105_spill] sm:$0xff] %v14212_v50  ;;  %21060 = vst [vmem:[#allocation106_spill] sm:$0xff] %v14214_v39 }
 0x168   :  { %1067 = vperm.xlu1 %13239, %v13823_v56  }
 0x169   :  { %3144 = vperm.xlu0 %13298, %v13528_v7   ;;  %v21066_v7 = vmov 3  }
 0x16a   :  { %v14218_v46 = vpop.permute.xlu0 %1079  ;;  %v14220_v52 = vpop.permute.xlu1 %697 }
 0x16b   :  { %21061 = vst [vmem:[#allocation107_spill] sm:$0xff] %v14218_v46  ;;  %21062 = vst [vmem:[#allocation108_spill] sm:$0xff] %v14220_v52 }
 0x16c   :  { %1075 = vperm.xlu1 %13239, %v21008_v45  }
 0x16d   :  { %3156 = vperm.xlu0 %13298, %v13547_v10  }
 0x16e   :  { %v14224_v57 = vpop.permute.xlu0 %1087  ;;  %v14226_v60 = vpop.permute.xlu1 %705 }
 0x16f   :  { %21063 = vst [vmem:[#allocation109_spill] sm:$0xff] %v14224_v57  ;;  %21064 = vst [vmem:[#allocation110_spill] sm:$0xff] %v14226_v60 }
 0x170   :  { %1083 = vperm.xlu1 %13239, %v21011_v62  }
 0x171   :  { %3168 = vperm.xlu0 %13298, %v13564_v13  }
 0x172   :  { %v14230_v50 = vpop.permute.xlu1 %713 }
 0x173   :  { %21065 = vst [vmem:[#allocation111_spill] sm:$0xff] %v14230_v50  ;;  %v14232_v56 = vpop.permute.xlu0 %1599 }
 0x174   :  { %13241 = vset.pattern.permute.xlu1 %v21066_v7 }
 0x175   :  { %3180 = vperm.xlu0 %13298, %v13583_v16   ;;  %1595 = vperm.xlu1 %13241, %v21015_v61  }
 0x177   :  { %v14237_v46 = vpop.permute.xlu0 %1611  ;;  %v14239_v52 = vpop.permute.xlu1 %847 }
 0x178   :  { %21067 = vst [vmem:[#allocation112_spill] sm:$0xff] %v14237_v46  ;;  %21068 = vst [vmem:[#allocation113_spill] sm:$0xff] %v14239_v52 }
 0x179   :  { %3192 = vperm.xlu0 %13298, %v13600_v19   ;;  %1603 = vperm.xlu1 %13241, %v13499_v2  }
 0x17b   :  { %v14243_v62 = vpop.permute.xlu0 %1619  ;;  %v14245_v13 = vpop.permute.xlu1 %855 }
 0x17c   :  { %21069 = vst [vmem:[#allocation114_spill] sm:$0xff] %v14243_v62  ;;  %21070 = vst [vmem:[#allocation115_spill] sm:$0xff] %v14245_v13  ;;  %v21184_v62 = vld [vmem:[#allocation42_spill] sm:$0xff] }
 0x17d   :  { %3204 = vperm.xlu0 %13298, %v13619_v22   ;;  %1607 = vperm.xlu1 %13241, %v13511_v4  }
 0x17f   :  { %v14249_v57 = vpop.permute.xlu0 %1627  ;;  %v14251_v50 = vpop.permute.xlu1 %859 }
 0x180   :  { %21071 = vst [vmem:[#allocation116_spill] sm:$0xff] %v14249_v57  ;;  %21072 = vst [vmem:[#allocation117_spill] sm:$0xff] %v14251_v50  ;;  %v21181_v57 = vld [vmem:[#allocation41_spill] sm:$0xff] }
 0x181   :  { %3216 = vperm.xlu0 %13298, %v13636_v25   ;;  %1615 = vperm.xlu1 %13241, %v13523_v6  }
 0x183   :  { %v14255_v60 = vpop.permute.xlu0 %1635  ;;  %v14257_v19 = vpop.permute.xlu1 %867 }
 0x184   :  { %21073 = vst [vmem:[#allocation118_spill] sm:$0xff] %v14255_v60  ;;  %21074 = vst [vmem:[#allocation119_spill] sm:$0xff] %v14257_v19  ;;  %v21176_v60 = vld [vmem:[#allocation38_spill] sm:$0xff] }
 0x185   :  { %3228 = vperm.xlu0 %13298, %v13655_v28   ;;  %1623 = vperm.xlu1 %13241, %v13535_v8  }
 0x187   :  { %v14261_v39 = vpop.permute.xlu0 %1643  ;;  %v14263_v47 = vpop.permute.xlu1 %875 }
 0x188   :  { %21075 = vst [vmem:[#allocation120_spill] sm:$0xff] %v14261_v39  ;;  %21076 = vst [vmem:[#allocation121_spill] sm:$0xff] %v14263_v47  ;;  %v21174_v39 = vld [vmem:[#allocation37_spill] sm:$0xff] }
 0x189   :  { %3240 = vperm.xlu0 %13298, %v13672_v31   ;;  %1631 = vperm.xlu1 %13241, %v13547_v10  }
 0x18b   :  { %v14267_v4 = vpop.permute.xlu0 %1651  ;;  %v14269_v25 = vpop.permute.xlu1 %883 }
 0x18c   :  { %21077 = vst [vmem:[#allocation122_spill] sm:$0xff] %v14267_v4  ;;  %21078 = vst [vmem:[#allocation123_spill] sm:$0xff] %v14269_v25 }
 0x18d   :  { %3252 = vperm.xlu0 %13298, %v13691_v34   ;;  %1639 = vperm.xlu1 %13241, %v13559_v12  }
 0x18f   :  { %v14273_v41 = vpop.permute.xlu0 %1659  ;;  %v14275_v63 = vpop.permute.xlu1 %891 }
 0x190   :  { %21079 = vst [vmem:[#allocation124_spill] sm:$0xff] %v14273_v41  ;;  %21080 = vst [vmem:[#allocation125_spill] sm:$0xff] %v14275_v63 }
 0x191   :  { %3264 = vperm.xlu0 %13298, %v13708_v37   ;;  %1647 = vperm.xlu1 %13241, %v13571_v14  }
 0x193   :  { %v14279_v8 = vpop.permute.xlu0 %1667  ;;  %v14281_v31 = vpop.permute.xlu1 %899 }
 0x194   :  { %21081 = vst [vmem:[#allocation126_spill] sm:$0xff] %v14279_v8  ;;  %21082 = vst [vmem:[#allocation127_spill] sm:$0xff] %v14281_v31 }
 0x195   :  { %3276 = vperm.xlu0 %13298, %v13727_v40   ;;  %1655 = vperm.xlu1 %13241, %v13583_v16  }
 0x197   :  { %v14285_v10 = vpop.permute.xlu0 %1675  ;;  %v14287_v35 = vpop.permute.xlu1 %907 }
 0x198   :  { %21083 = vst [vmem:[#allocation128_spill] sm:$0xff] %v14285_v10  ;;  %21084 = vst [vmem:[#allocation129_spill] sm:$0xff] %v14287_v35 }
 0x199   :  { %3288 = vperm.xlu0 %13298, %v13744_v43   ;;  %1663 = vperm.xlu1 %13241, %v13595_v18  }
 0x19b   :  { %v14291_v7 = vpop.permute.xlu0 %1683  ;;  %v14293_v37 = vpop.permute.xlu1 %915 }
 0x19c   :  { %21085 = vst [vmem:[#allocation130_spill] sm:$0xff] %v14291_v7  ;;  %21086 = vst [vmem:[#allocation131_spill] sm:$0xff] %v14293_v37  ;;  %v21158_v37 = vld [vmem:[#allocation28_spill] sm:$0xff] }
 0x19d   :  { %3292 = vperm.xlu0 %13298, %v13751_v44   ;;  %1671 = vperm.xlu1 %13241, %v13607_v20  }
 0x19f   :  { %v14297_v14 = vpop.permute.xlu0 %1691  ;;  %v14299_v8 = vpop.permute.xlu1 %923 }
 0x1a0   :  { %21087 = vst [vmem:[#allocation132_spill] sm:$0xff] %v14297_v14  ;;  %21088 = vst [vmem:[#allocation133_spill] sm:$0xff] %v14299_v8  ;;  %v21156_v8 = vld [vmem:[#allocation27_spill] sm:$0xff] }
 0x1a1   :  { %3308 = vperm.xlu0 %13298, %v13775_v48   ;;  %1679 = vperm.xlu1 %13241, %v13619_v22  }
 0x1a3   :  { %v14303_v16 = vpop.permute.xlu0 %1699  ;;  %v14305_v43 = vpop.permute.xlu1 %931 }
 0x1a4   :  { %21089 = vst [vmem:[#allocation134_spill] sm:$0xff] %v14303_v16  ;;  %21090 = vst [vmem:[#allocation135_spill] sm:$0xff] %v14305_v43 }
 0x1a5   :  { %3312 = vperm.xlu0 %13298, %v13780_v49   ;;  %1687 = vperm.xlu1 %13241, %v13631_v24  }
 0x1a7   :  { %v14309_v7 = vpop.permute.xlu0 %1707  ;;  %v14311_v44 = vpop.permute.xlu1 %939 }
 0x1a8   :  { %21091 = vst [vmem:[#allocation136_spill] sm:$0xff] %v14309_v7  ;;  %21092 = vst [vmem:[#allocation137_spill] sm:$0xff] %v14311_v44 }
 0x1a9   :  { %3328 = vperm.xlu0 %13298, %v13804_v53   ;;  %1695 = vperm.xlu1 %13241, %v13643_v26  }
 0x1ab   :  { %v14315_v20 = vpop.permute.xlu0 %1715  ;;  %v14317_v48 = vpop.permute.xlu1 %947 }
 0x1ac   :  { %21093 = vst [vmem:[#allocation138_spill] sm:$0xff] %v14315_v20  ;;  %21094 = vst [vmem:[#allocation139_spill] sm:$0xff] %v14317_v48 }
 0x1ad   :  { %3332 = vperm.xlu0 %13298, %v13811_v54   ;;  %1703 = vperm.xlu1 %13241, %v13655_v28   ;;  %v20753_v28 = vmov 4  }
 0x1af   :  { %v14321_v22 = vpop.permute.xlu0 %1723  ;;  %v14323_v49 = vpop.permute.xlu1 %955 }
 0x1b0   :  { %21095 = vst [vmem:[#allocation140_spill] sm:$0xff] %v14321_v22  ;;  %21096 = vst [vmem:[#allocation141_spill] sm:$0xff] %v14323_v49  ;;  %v21141_v49 = vld [vmem:[#allocation18_spill] sm:$0xff] }
 0x1b1   :  { %3348 = vperm.xlu0 %13298, %v21008_v45   ;;  %1711 = vperm.xlu1 %13241, %v13667_v30  }
 0x1b3   :  { %v14327_v7 = vpop.permute.xlu0 %1731  ;;  %v14329_v53 = vpop.permute.xlu1 %963 }
 0x1b4   :  { %21097 = vst [vmem:[#allocation142_spill] sm:$0xff] %v14327_v7  ;;  %21098 = vst [vmem:[#allocation143_spill] sm:$0xff] %v14329_v53  ;;  %v21138_v53 = vld [vmem:[#allocation16_spill] sm:$0xff] }
 0x1b5   :  { %3352 = vperm.xlu0 %13298, %v13840_v59   ;;  %1719 = vperm.xlu1 %13241, %v13679_v32   ;;  %v3729_v59 = vld [vmem:[%s20645_s4] sm:$0xff]  ;;  %v3730_v32 = vld [vmem:[%s20645_s4 + $0x8] sm:$0xff] }
 0x1b7   :  { %v14333_v26 = vpop.permute.xlu0 %1739  ;;  %v14335_v54 = vpop.permute.xlu1 %971 }
 0x1b8   :  { %21099 = vst [vmem:[#allocation144_spill] sm:$0xff] %v14333_v26  ;;  %21100 = vst [vmem:[#allocation145_spill] sm:$0xff] %v14335_v54  ;;  %v12812_v54 = vpack.c.bf16 %v3730_v32, %v3729_v59  ;;  %v3733_v32 = vld [vmem:[%s20645_s4 + $0x20] sm:$0xff] }
 0x1b9   :  { %13302 = vset.pattern.permute.xlu0 %v20753_v28  ;;  %1727 = vperm.xlu1 %13241, %v13691_v34   ;;  %v20758_v34 = vmov 0.0|0.0  }
 0x1ba   :  { %2396 = vperm.xlu0 %13302, %v13499_v2   ;;  %12835 = vmatprep.subr.bf16.mxu1 %v20758_v34 }
 0x1bb   :  { %v14340_v45 = vpop.permute.xlu0 %1747  ;;  %v14342_v7 = vpop.permute.xlu1 %979  ;;  %12837 = vmatpush3.bf16.msra.mxu1 %v12812_v54  ;;  %12811 = vmatprep.subr.bf16.mxu0 %v20758_v34 }
 0x1bc   :  { %21101 = vst [vmem:[#allocation146_spill] sm:$0xff] %v14340_v45  ;;  %21102 = vst [vmem:[#allocation147_spill] sm:$0xff] %v14342_v7  ;;  %v3731_v7 = vld [vmem:[%s20645_s4 + $0x10] sm:$0xff]  ;;  %v3732_v45 = vld [vmem:[%s20645_s4 + $0x18] sm:$0xff]  ;;  %12838 = vmatprep.subr.bf16.mxu1 %v20758_v34  ;;  %12813 = vmatpush3.bf16.msra.mxu0 %v12812_v54 }
 0x1bd   :  { %1735 = vperm.xlu1 %13241, %v13703_v36   ;;  %12814 = vmatprep.subr.bf16.mxu0 %v20758_v34  ;;  %v3735_v54 = vld [vmem:[%s20645_s4 + $0x30] sm:$0xff] }
 0x1be   :  { %2408 = vperm.xlu0 %13302, %v13523_v6   ;;  %v12815_v6 = vpack.c.bf16 %v3732_v45, %v3731_v7  ;;  %v3736_v45 = vld [vmem:[%s20645_s4 + $0x38] sm:$0xff] }
 0x1bf   :  { %v14353_v2 = vpop.permute.xlu0 %1755  ;;  %v14355_v28 = vpop.permute.xlu1 %987 }
 0x1c0   :  { %21103 = vst [vmem:[#allocation148_spill] sm:$0xff] %v14353_v2  ;;  %21104 = vst [vmem:[#allocation149_spill] sm:$0xff] %v14355_v28  ;;  %12840 = vmatpush3.bf16.msra.mxu1 %v12815_v6  ;;  %v3734_v28 = vld [vmem:[%s20645_s4 + $0x28] sm:$0xff]  ;;  %12816 = vmatpush3.bf16.msra.mxu0 %v12815_v6  ;;  %v3737_v6 = vld [vmem:[%s20645_s4 + $0x40] sm:$0xff] }
 0x1c1   :  { %1743 = vperm.xlu1 %13241, %v13715_v38   ;;  %12841 = vmatprep.subr.bf16.mxu1 %v20758_v34 }
 0x1c2   :  { %2420 = vperm.xlu0 %13302, %v13540_v9   ;;  %v12818_v9 = vpack.c.bf16 %v3734_v28, %v3733_v32  ;;  %12817 = vmatprep.subr.bf16.mxu0 %v20758_v34  ;;  %v3738_v32 = vld [vmem:[%s20645_s4 + $0x48] sm:$0xff] }
 0x1c3   :  { %v14368_v36 = vpop.permute.xlu0 %1763  ;;  %v14370_v59 = vpop.permute.xlu1 %995 }
 0x1c4   :  { %21105 = vst [vmem:[#allocation150_spill] sm:$0xff] %v14368_v36  ;;  %21106 = vst [vmem:[#allocation151_spill] sm:$0xff] %v14370_v59  ;;  %12843 = vmatpush3.bf16.msra.mxu1 %v12818_v9  ;;  %12819 = vmatpush3.bf16.msra.mxu0 %v12818_v9  ;;  %v21125_v59 = vld [vmem:[#allocation9_spill] sm:$0xff] }
 0x1c5   :  { %1751 = vperm.xlu1 %13241, %v13727_v40   ;;  %12844 = vmatprep.subr.bf16.mxu1 %v20758_v34 }
 0x1c6   :  { %2432 = vperm.xlu0 %13302, %v13559_v12   ;;  %v12821_v12 = vpack.c.bf16 %v3736_v45, %v3735_v54  ;;  %12820 = vmatprep.subr.bf16.mxu0 %v20758_v34  ;;  %v3739_v45 = vld [vmem:[%s20645_s4 + $0x50] sm:$0xff] }
 0x1c7   :  { %v14382_v38 = vpop.permute.xlu0 %1779  ;;  %v14384_v7 = vpop.permute.xlu1 %1003 }
 0x1c8   :  { %21107 = vst [vmem:[#allocation152_spill] sm:$0xff] %v14382_v38  ;;  %21108 = vst [vmem:[#allocation153_spill] sm:$0xff] %v14384_v7  ;;  %12846 = vmatpush3.bf16.msra.mxu1 %v12821_v12  ;;  %12822 = vmatpush3.bf16.msra.mxu0 %v12821_v12 }
 0x1c9   :  { %1759 = vperm.xlu1 %13241, %v13739_v42   ;;  %12847 = vmatprep.subr.bf16.mxu1 %v20758_v34  ;;  %v21111_v42 = vmov 4   ;;  %v3740_v34 = vld [vmem:[%s20645_s4 + $0x58] sm:$0xff] }
 0x1ca   :  { %2444 = vperm.xlu0 %13302, %v13576_v15   ;;  %v12824_v15 = vpack.c.bf16 %v3738_v32, %v3737_v6  ;;  %v3741_v32 = vld [vmem:[%s20645_s4 + $0x60] sm:$0xff] }
 0x1cb   :  { %v14396_v40 = vpop.permute.xlu0 %1783  ;;  %v14398_v28 = vpop.permute.xlu1 %1011 }
 0x1cc   :  { %21109 = vst [vmem:[#allocation154_spill] sm:$0xff] %v14396_v40  ;;  %21110 = vst [vmem:[#allocation155_spill] sm:$0xff] %v14398_v28  ;;  %12849 = vmatpush3.bf16.msra.mxu1 %v12824_v15  ;;  %v21114_v40 = vmov 0.0|0.0  }
 0x1cd   :  { %13243 = vset.pattern.permute.xlu1 %v21111_v42  ;;  %12823 = vmatprep.subr.bf16.mxu0 %v21114_v40 }
 0x1ce   :  { %2456 = vperm.xlu0 %13302, %v13595_v18   ;;  %2388 = vperm.xlu1 %13243, %v21015_v61   ;;  %v12827_v18 = vpack.c.bf16 %v3740_v34, %v3739_v45  ;;  %v14426_v61 = vld [vmem:[%s20644_s0 + $0x8] sm:$0xff]  ;;  %v14449_v45 = vld [vmem:[%s20646_s1 + $0x1] ss:$0 sm:$0xff] }
 0x1cf   :  { %v14410_v9 = vpop.permute.xlu0 %1799  ;;  %v14412_v54 = vpop.permute.xlu1 %1019  ;;  %12850 = vmatprep.subr.bf16.mxu1 %v21114_v40  ;;  %12825 = vmatpush3.bf16.msra.mxu0 %v12824_v15  ;;  %21115 = vst [vmem:[#allocation158_spill] sm:$0xff] %v14426_v61  ;;  %v14444_v15 = vld [vmem:[%s20646_s1] ss:$0 sm:$0xff]  ;;  %v14689_v47 = vmul.f32 %v14449_v45, %v21174_v39 }
 0x1d0   :  { %21112 = vst [vmem:[#allocation156_spill] sm:$0xff] %v14410_v9  ;;  %21113 = vst [vmem:[#allocation157_spill] sm:$0xff] %v14412_v54  ;;  %12852 = vmatpush3.bf16.msra.mxu1 %v12827_v18  ;;  %12826 = vmatprep.subr.bf16.mxu0 %v21114_v40  ;;  %v21124_v54 = vld [vmem:[#allocation8_spill] sm:$0xff]  ;;  %v14488_v36 = vmul.f32 %v14444_v15, %v21125_v59  ;;  %v14697_v19 = vmul.f32 %v14444_v15, %v21176_v60 }
 0x1d1   :  { %12853 = vmatprep.subr.bf16.mxu1 %v21114_v40  ;;  %v14479_v28 = vmul.f32 %v14444_v15, %v21124_v54  ;;  %21175 = vst [vmem:[#allocation28_spill] sm:$0xff] %v14689_v47  ;;  %v14716_v60 = vmul.f32 %v14449_v45, %v21181_v57 }
 0x1d2   :  { %2468 = vperm.xlu0 %13302, %v13612_v21   ;;  %2392 = vperm.xlu1 %13243, %v14426_v61   ;;  %v3742_v21 = vld [vmem:[%s20645_s4 + $0x68] sm:$0xff] }
 0x1d3   :  { %v14429_v12 = vpop.permute.xlu0 %1803  ;;  %v14431_v6 = vpop.permute.xlu1 %1027  ;;  %v12830_v34 = vpack.c.bf16 %v3742_v21, %v3741_v32  ;;  %12828 = vmatpush3.bf16.msra.mxu0 %v12827_v18  ;;  %v3743_v18 = vld [vmem:[%s20645_s4 + $0x70] sm:$0xff]  ;;  %v3744_v21 = vld [vmem:[%s20645_s4 + $0x78] sm:$0xff] }
 0x1d4   :  { %21116 = vst [vmem:[#allocation159_spill] sm:$0xff] %v14429_v12  ;;  %21117 = vst [vmem:[#allocation160_spill] sm:$0xff] %v14431_v6  ;;  %v21118_v12 = vmov 5   ;;  %v21121_v6 = vld [vmem:[#allocation6_spill] sm:$0xff]  ;;  %v12833_v7 = vpack.c.bf16 %v3744_v21, %v3743_v18  ;;  %12829 = vmatprep.subr.bf16.mxu0 %v21114_v40 }
 0x1d5   :  { %12855 = vmatpush3.bf16.msra.mxu1 %v12830_v34 }
 0x1d6   :  { %2480 = vperm.xlu0 %13302, %v13631_v24   ;;  %13244 = vset.pattern.permute.xlu1 %v21118_v12  ;;  %v14466_v24 = vmul.f32 %v14444_v15, %v21121_v6  ;;  %v14484_v6 = vmul.f32 %v14449_v45, %v21125_v59  ;;  %v13309_v59 = vld [vmem:[%s20644_s0 + $0x10] sm:$0xff] }
 0x1d7   :  { %v14453_v9 = vpop.permute.xlu0 %1819  ;;  %3124 = vperm.xlu1 %13244, %v14426_v61   ;;  %v14456_v32 = vpop.permute.xlu1 %1035  ;;  %12856 = vmatprep.subr.bf16.mxu1 %v21114_v40  ;;  %v21179_v61 = vld [vmem:[#allocation40_spill] sm:$0xff] }
 0x1d8   :  { %21119 = vst [vmem:[#allocation161_spill] sm:$0xff] %v14453_v9  ;;  %21120 = vst [vmem:[#allocation162_spill] sm:$0xff] %v14456_v32  ;;  %v21122_v9 = vld [vmem:[#allocation7_spill] sm:$0xff]  ;;  %12831 = vmatpush3.bf16.msra.mxu0 %v12830_v34 }
 0x1d9   :  { %v14471_v38 = vmul.f32 %v14449_v45, %v21122_v9  ;;  %v14475_v32 = vmul.f32 %v14444_v15, %v21122_v9  ;;  %21126 = vst [vmem:[#allocation7_spill] sm:$0xff] %v14484_v6  ;;  %v21128_v9 = vld [vmem:[#allocation11_spill] sm:$0xff]  ;;  %12858 = vmatpush3.bf16.msra.mxu1 %v12833_v7  ;;  %v21133_v6 = vld [vmem:[#allocation13_spill] sm:$0xff]  ;;  %12832 = vmatprep.subr.bf16.mxu0 %v21114_v40 }
 0x1da   :  { %2492 = vperm.xlu0 %13302, %v13648_v27   ;;  %v14497_v54 = vmul.f32 %v14449_v45, %v21128_v9  ;;  %v14501_v18 = vmul.f32 %v14444_v15, %v21128_v9  ;;  %v21132_v27 = vld [vmem:[#allocation12_spill] sm:$0xff]  ;;  %v14520_v9 = vmul.f32 %v14444_v15, %v21133_v6  ;;  %12865 = vmatprep.subr.bf16.mxu1 %v21114_v40 }
 0x1db   :  { %21123 = vst [vmem:[#allocation6_spill] sm:$0xff] %v14471_v38  ;;  %v21127_v38 = vld [vmem:[#allocation10_spill] sm:$0xff]  ;;  %v14503_v21 = vpop.permute.xlu0 %1823  ;;  %3128 = vperm.xlu1 %13244, %v13309_v59   ;;  %v14512_v34 = vmul.f32 %v14444_v15, %v21132_v27  ;;  %v20780_v59 = vmov 0.0  }
 0x1dc   :  { %v14492_v2 = vmul.f32 %v14444_v15, %v21127_v38  ;;  %21129 = vst [vmem:[#allocation8_spill] sm:$0xff] %v14497_v54  ;;  %21130 = vst [vmem:[#allocation9_spill] sm:$0xff] %v14503_v21  ;;  %v14508_v38 = vpop.permute.xlu1 %1043  ;;  %v14516_v54 = vmul.f32 %v14449_v45, %v21133_v6  ;;  %v21135_v21 = vld [vmem:[#allocation14_spill] sm:$0xff]  ;;  %11952 = vmatprep.mubr.msk.f32.mxu1 %vm13430_vm0, %v20780_v59  ;;  %v14538_v6 = vmul.f32 %v14444_v15, %v21138_v53  ;;  %v21142_v53 = vld [vmem:[#allocation19_spill] sm:$0xff] }
 0x1dd   :  { %21131 = vst [vmem:[#allocation10_spill] sm:$0xff] %v14508_v38  ;;  %v14524_v26 = vmul.f32 %v14444_v15, %v21135_v21  ;;  %v21136_v38 = vld [vmem:[#allocation15_spill] sm:$0xff]  ;;  %11737 = vmatprep.mubr.msk.f32.mxu0 %vm13430_vm0, %v20780_v59  ;;  %v21139_v21 = vld [vmem:[#allocation17_spill] sm:$0xff]  ;;  %12834 = vmatpush3.bf16.msra.mxu0 %v12833_v7  ;;  %v14558_v20 = vmul.f32 %v14449_v45, %v21142_v53  ;;  %v21148_v7 = vld [vmem:[#allocation22_spill] sm:$0xff] }
 0x1de   :  { %21134 = vst [vmem:[#allocation11_spill] sm:$0xff] %v14516_v54  ;;  %v14530_v27 = vmul.f32 %v14449_v45, %v21136_v38  ;;  %v14534_v54 = vmul.f32 %v14444_v15, %v21136_v38  ;;  %v14545_v22 = vmul.f32 %v14449_v45, %v21139_v21  ;;  %v14553_v38 = vmul.f32 %v14444_v15, %v21141_v49 }
 0x1df   :  { %2504 = vperm.xlu0 %13302, %v13667_v30   ;;  %21143 = vst [vmem:[#allocation14_spill] sm:$0xff] %v14558_v20  ;;  %v14562_v59 = vmul.f32 %v14444_v15, %v21142_v53  ;;  %13245 = vset.pattern.permute.xlu1 %v21111_v42  ;;  %v14581_v53 = vmul.f32 %v14444_v15, %v21148_v7  ;;  %v21149_v20 = vld [vmem:[#allocation23_spill] sm:$0xff]  ;;  %v21153_v7 = vld [vmem:[#allocation25_spill] sm:$0xff] }
 0x1e0   :  { %21137 = vst [vmem:[#allocation12_spill] sm:$0xff] %v14530_v27  ;;  %21140 = vst [vmem:[#allocation13_spill] sm:$0xff] %v14545_v22  ;;  %v14549_v27 = vmul.f32 %v14444_v15, %v21139_v21  ;;  %v21144_v22 = vld [vmem:[#allocation20_spill] sm:$0xff]  ;;  %v21145_v21 = vld [vmem:[#allocation21_spill] sm:$0xff]  ;;  %v14573_v30 = vpop.permute.xlu1 %1051  ;;  %v14589_v16 = vmul.f32 %v14444_v15, %v21149_v20  ;;  %v14602_v14 = vmul.f32 %v14449_v45, %v21153_v7  ;;  %12859 = vmatprep.subr.bf16.mxu0 %v21114_v40 }
 0x1e1   :  { %v14566_v48 = vmul.f32 %v14444_v15, %v21144_v22  ;;  %v14570_v44 = vmul.f32 %v14449_v45, %v21145_v21  ;;  %21147 = vst [vmem:[#allocation16_spill] sm:$0xff] %v14573_v30  ;;  %v14577_v49 = vmul.f32 %v14444_v15, %v21145_v21  ;;  %v14585_v22 = vmul.f32 %v14449_v45, %v21149_v20  ;;  %v13310_v30 = vld [vmem:[%s20644_s0 + $0x18] sm:$0xff]  ;;  %v21152_v21 = vld [vmem:[#allocation24_spill] sm:$0xff] }
 0x1e2   :  { %2400 = vperm.xlu1 %13245, %v13310_v30   ;;  %v14598_v43 = vmul.f32 %v14444_v15, %v21152_v21  ;;  %21154 = vst [vmem:[#allocation19_spill] sm:$0xff] %v14602_v14  ;;  %v21155_v20 = vld [vmem:[#allocation26_spill] sm:$0xff]  ;;  %v14615_v30 = vmul.f32 %v14449_v45, %v21156_v8  ;;  %v14619_v21 = vmul.f32 %v14444_v15, %v21156_v8  ;;  %v21165_v40 = vld [vmem:[#allocation32_spill] sm:$0xff] }
 0x1e3   :  { %21146 = vst [vmem:[#allocation15_spill] sm:$0xff] %v14570_v44  ;;  %21150 = vst [vmem:[#allocation17_spill] sm:$0xff] %v14585_v22  ;;  %v14591_v44 = vpop.permute.xlu0 %3120  ;;  %v14606_v22 = vmul.f32 %v14444_v15, %v21153_v7  ;;  %v14623_v14 = vmul.f32 %v14444_v15, %v21158_v37  ;;  %v13311_v7 = vld [vmem:[%s20644_s0 + $0x100] sm:$0xff] }
 0x1e4   :  { %21151 = vst [vmem:[#allocation18_spill] sm:$0xff] %v14591_v44  ;;  %v14610_v44 = vmul.f32 %v14444_v15, %v21155_v20  ;;  %21157 = vst [vmem:[#allocation20_spill] sm:$0xff] %v14615_v30  ;;  %2516 = vperm.xlu0 %13302, %v13311_v7   ;;  %v21159_v20 = vld [vmem:[#allocation29_spill] sm:$0xff]  ;;  %v21161_v8 = vld [vmem:[#allocation30_spill] sm:$0xff]  ;;  %v14645_v41 = vpop.permute.xlu1 %1059 }
 0x1e5   :  { %v14631_v10 = vmul.f32 %v14449_v45, %v21159_v20  ;;  %v14635_v30 = vmul.f32 %v14444_v15, %v21159_v20  ;;  %v14639_v35 = vmul.f32 %v14444_v15, %v21161_v8  ;;  %v21162_v37 = vld [vmem:[#allocation31_spill] sm:$0xff]  ;;  %21164 = vst [vmem:[#allocation23_spill] sm:$0xff] %v14645_v41  ;;  %v21166_v20 = vld [vmem:[#allocation33_spill] sm:$0xff] }
 0x1e6   :  { %v14643_v31 = vmul.f32 %v14449_v45, %v21162_v37  ;;  %v14649_v7 = vmul.f32 %v14444_v15, %v21162_v37  ;;  %v14657_v63 = vmul.f32 %v14449_v45, %v21166_v20  ;;  %v14661_v8 = vmul.f32 %v14444_v15, %v21166_v20  ;;  %v14668_v41 = vld [vmem:[%s20644_s0 + $0x20] sm:$0xff]  ;;  %21182 = vst [vmem:[#allocation31_spill] sm:$0xff] %v14716_v60 }
 0x1e7   :  { %21160 = vst [vmem:[#allocation21_spill] sm:$0xff] %v14631_v10  ;;  %v14653_v10 = vmul.f32 %v14444_v15, %v21165_v40  ;;  %v14663_v4 = vpop.permute.xlu0 %3132  ;;  %21169 = vst [vmem:[#allocation26_spill] sm:$0xff] %v14668_v41  ;;  %2404 = vperm.xlu1 %13245, %v14668_v41   ;;  %v21170_v37 = vld [vmem:[#allocation34_spill] sm:$0xff]  ;;  %v14738_v60 = vmul.f32 %v14444_v15, %v13981_v0 }
 0x1e8   :  { %21163 = vst [vmem:[#allocation22_spill] sm:$0xff] %v14643_v31  ;;  %21167 = vst [vmem:[#allocation24_spill] sm:$0xff] %v14657_v63  ;;  %v14673_v40 = vmul.f32 %v14444_v15, %v21170_v37  ;;  %v21171_v31 = vld [vmem:[#allocation35_spill] sm:$0xff]  ;;  %v14693_v37 = vmul.f32 %v14444_v15, %v21174_v39  ;;  %v14712_v39 = vmul.f32 %v14444_v15, %v21179_v61  ;;  %v14722_v50 = vpop.permute.xlu1 %1067 }
 0x1e9   :  { %21168 = vst [vmem:[#allocation25_spill] sm:$0xff] %v14663_v4  ;;  %v14677_v63 = vmul.f32 %v14449_v45, %v21171_v31  ;;  %v14681_v20 = vmul.f32 %v14444_v15, %v21171_v31  ;;  %v21173_v4 = vld [vmem:[#allocation36_spill] sm:$0xff]  ;;  %21183 = vst [vmem:[#allocation32_spill] sm:$0xff] %v14722_v50 }
 0x1ea   :  { %v14685_v25 = vmul.f32 %v14444_v15, %v21173_v4  ;;  %v13313_v4 = vld [vmem:[%s20644_s0 + $0x118] sm:$0xff]  ;;  %21180 = vst [vmem:[#allocation30_spill] sm:$0xff] %v14712_v39  ;;  %21189 = vst [vmem:[#allocation36_spill] sm:$0xff] %v14738_v60  ;;  %v21191_v50 = vld [vmem:[#allocation44_spill] sm:$0xff] }
 0x1eb   :  { %21172 = vst [vmem:[#allocation27_spill] sm:$0xff] %v14677_v63  ;;  %v21177_v63 = vld [vmem:[#allocation39_spill] sm:$0xff]  ;;  %2528 = vperm.xlu0 %13302, %v13313_v4   ;;  %v14726_v4 = vmul.f32 %v14444_v15, %v21184_v62  ;;  %13246 = vset.pattern.permute.xlu1 %v21118_v12  ;;  %v14745_v62 = vmul.f32 %v14449_v45, %v21191_v50  ;;  %v21208_v39 = vld [vmem:[#allocation50_spill] sm:$0xff] }
 0x1ec   :  { %v14701_v31 = vmul.f32 %v14449_v45, %v21177_v63  ;;  %v14708_v47 = vmul.f32 %v14444_v15, %v21177_v63  ;;  %v21186_v63 = vld [vmem:[#allocation43_spill] sm:$0xff]  ;;  %v14749_v13 = vmul.f32 %v14444_v15, %v21191_v50  ;;  %3136 = vperm.xlu1 %13246, %v14668_v41   ;;  %v21204_v41 = vld [vmem:[#allocation49_spill] sm:$0xff]  ;;  %v14794_v46 = vpop.permute.xlu1 %1075 }
 0x1ed   :  { %21185 = vst [vmem:[#allocation33_spill] sm:$0xff] %v14726_v4  ;;  %v14730_v52 = vmul.f32 %v14449_v45, %v21186_v63  ;;  %v14734_v61 = vmul.f32 %v14444_v15, %v21186_v63  ;;  %21192 = vst [vmem:[#allocation38_spill] sm:$0xff] %v14745_v62  ;;  %v21196_v4 = vld [vmem:[#allocation46_spill] sm:$0xff]  ;;  %v21199_v50 = vld [vmem:[#allocation47_spill] sm:$0xff] }
 0x1ee   :  { %21178 = vst [vmem:[#allocation29_spill] sm:$0xff] %v14701_v31  ;;  %v14720_v31 = vmul.f32 %v14444_v15, %v21181_v57  ;;  %v14740_v57 = vpop.permute.xlu0 %3144  ;;  %21193 = vst [vmem:[#allocation39_spill] sm:$0xff] %v14749_v13  ;;  %v14757_v0 = vmul.f32 %v14449_v45, %v21196_v4  ;;  %v14767_v62 = vmul.f32 %v14444_v15, %v21196_v4  ;;  %v13314_v13 = vld [vmem:[%s20644_s0 + $0x130] sm:$0xff] }
 0x1ef   :  { %21187 = vst [vmem:[#allocation34_spill] sm:$0xff] %v14730_v52  ;;  %21188 = vst [vmem:[#allocation35_spill] sm:$0xff] %v14734_v61  ;;  %v21194_v52 = vld [vmem:[#allocation45_spill] sm:$0xff]  ;;  %v14771_v60 = vmul.f32 %v14444_v15, %v21199_v50  ;;  %2540 = vperm.xlu0 %13302, %v13314_v13   ;;  %v14788_v50 = vmul.f32 %v14444_v15, %v21204_v41  ;;  %v14798_v61 = vmul.f32 %v14449_v45, %v21208_v39 }
 0x1f0   :  { %21190 = vst [vmem:[#allocation37_spill] sm:$0xff] %v14740_v57  ;;  %v14753_v63 = vmul.f32 %v14444_v15, %v21194_v52  ;;  %21197 = vst [vmem:[#allocation41_spill] sm:$0xff] %v14757_v0  ;;  %v14762_v57 = vld [vmem:[%s20646_s1 + $0x2] ss:$0 sm:$0xff]  ;;  %v21201_v52 = vld [vmem:[#allocation48_spill] sm:$0xff]  ;;  %v1473_v0 = vmul.f32 %v14449_v45, %v14049_v51  ;;  %v14802_v13 = vmul.f32 %v14444_v15, %v21208_v39 }
 0x1f1   :  { %21198 = vst [vmem:[#allocation42_spill] sm:$0xff] %v14767_v62  ;;  %21200 = vst [vmem:[#allocation43_spill] sm:$0xff] %v14771_v60  ;;  %v14784_v4 = vmul.f32 %v14444_v15, %v21201_v52  ;;  %v1476_v60 = vmul.f32 %v14449_v45, %v14055_v58  ;;  %v14806_v41 = vmul.f32 %v14762_v57, %v14049_v51 }
 0x1f2   :  { %21195 = vst [vmem:[#allocation40_spill] sm:$0xff] %v14753_v63  ;;  %v14775_v63 = vmul.f32 %v14449_v45, %v21201_v52  ;;  %21205 = vst [vmem:[#allocation46_spill] sm:$0xff] %v14788_v50  ;;  %v14810_v52 = vmul.f32 %v14444_v15, %v14049_v51  ;;  %v14812_v50 = vpop.permute.xlu0 %3156  ;;  %v1478_v39 = vmul.f32 %v14449_v45, %v14061_v55  ;;  %v13315_v51 = vld [vmem:[%s20644_s0 + $0x28] sm:$0xff] }
 0x1f3   :  { %21203 = vst [vmem:[#allocation45_spill] sm:$0xff] %v14784_v4  ;;  %21207 = vst [vmem:[#allocation47_spill] sm:$0xff] %v14794_v46  ;;  %v21214_v4 = vld [vmem:[#allocation5_spill] sm:$0xff]  ;;  %3140 = vperm.xlu1 %13246, %v13315_v51  }
 0x1f4   :  { %21202 = vst [vmem:[#allocation44_spill] sm:$0xff] %v14775_v63  ;;  %v21206_v63 = vld [vmem:[#allocation63_spill] sm:$0xff]  ;;  %21209 = vst [vmem:[#allocation48_spill] sm:$0xff] %v14798_v61  ;;  %v14816_v46 = vmul.f32 %v14449_v45, %v21214_v4  ;;  %v14820_v61 = vmul.f32 %v14444_v15, %v21214_v4  ;;  %v14838_v4 = vmul.f32 %v14444_v15, %v14055_v58  ;;  %v21222_v51 = vld [vmem:[#allocation65_spill] sm:$0xff] }
 0x1f5   :  { %v726_v62 = vmul.f32 %v14449_v45, %v21206_v63  ;;  %21210 = vst [vmem:[#allocation49_spill] sm:$0xff] %v14802_v13  ;;  %21211 = vst [vmem:[#allocation63_spill] sm:$0xff] %v14806_v41  ;;  %v21217_v13 = vld [vmem:[#allocation64_spill] sm:$0xff] }
 0x1f6   :  { %21212 = vst [vmem:[#allocation50_spill] sm:$0xff] %v14810_v52  ;;  %21213 = vst [vmem:[#allocation163_spill] sm:$0xff] %v14812_v50  ;;  %v727_v41 = vmul.f32 %v14449_v45, %v21217_v13  ;;  %v14830_v50 = vadd.f32 %v1473_v0, %v14475_v32  ;;  %v13316_v52 = vld [vmem:[%s20644_s0 + $0x148] sm:$0xff]  ;;  %v14848_v32 = vadd.f32 %v1476_v60, %v14488_v36 }
 0x1f7   :  { %21215 = vst [vmem:[#allocation5_spill] sm:$0xff] %v14816_v46  ;;  %21216 = vst [vmem:[#allocation164_spill] sm:$0xff] %v14820_v61  ;;  %v14834_v46 = vmul.f32 %v14762_v57, %v14055_v58  ;;  %v14842_v61 = vmul.f32 %v14444_v15, %v21206_v63  ;;  %2552 = vperm.xlu0 %13302, %v13316_v52   ;;  %v14851_v0 = vadd.f32 %v726_v62, %v14466_v24  ;;  %v21223_v58 = vld [vmem:[#allocation66_spill] sm:$0xff]  ;;  %v21228_v24 = vld [vmem:[#allocation67_spill] sm:$0xff]  ;;  %v14873_v62 = vpop.permute.xlu0 %3168 }
 0x1f8   :  { %21218 = vst [vmem:[#allocation64_spill] sm:$0xff] %v14830_v50  ;;  %21220 = vst [vmem:[#allocation166_spill] sm:$0xff] %v14838_v4  ;;  %v729_v4 = vmul.f32 %v14449_v45, %v21223_v58  ;;  %v14857_v50 = vpop.permute.xlu1 %1083  ;;  %v14861_v63 = vmul.f32 %v14762_v57, %v14061_v55  ;;  %v14865_v52 = vmul.f32 %v14444_v15, %v14061_v55  ;;  %v21231_v55 = vld [vmem:[#allocation68_spill] sm:$0xff]  ;;  %13247 = vset.pattern.permute.xlu1 %v21111_v42 }
 0x1f9   :  { %21219 = vst [vmem:[#allocation165_spill] sm:$0xff] %v14834_v46  ;;  %21221 = vst [vmem:[#allocation167_spill] sm:$0xff] %v14842_v61  ;;  %v1480_v46 = vmul.f32 %v14449_v45, %v21222_v51  ;;  %v14869_v36 = vmul.f32 %v14444_v15, %v21217_v13  ;;  %v1482_v60 = vmul.f32 %v14449_v45, %v21228_v24 }
 0x1fa   :  { %21224 = vst [vmem:[#allocation65_spill] sm:$0xff] %v14857_v50  ;;  %21225 = vst [vmem:[#allocation66_spill] sm:$0xff] %v14861_v63  ;;  %v14876_v61 = vadd.f32 %v1478_v39, %v14501_v18  ;;  %v14879_v50 = vadd.f32 %v727_v41, %v14479_v28  ;;  %v14883_v63 = vmul.f32 %v14762_v57, %v21222_v51  ;;  %v13317_v41 = vld [vmem:[%s20644_s0 + $0x160] sm:$0xff]  ;;  %v14904_v39 = vld [vmem:[%s20644_s0 + $0x30] sm:$0xff] }
 0x1fb   :  { %21226 = vst [vmem:[#allocation168_spill] sm:$0xff] %v14865_v52  ;;  %21227 = vst [vmem:[#allocation169_spill] sm:$0xff] %v14869_v36  ;;  %v731_v52 = vmul.f32 %v14449_v45, %v21231_v55  ;;  %v14890_v13 = vmul.f32 %v14444_v15, %v21222_v51  ;;  %v14894_v18 = vmul.f32 %v14444_v15, %v21223_v58  ;;  %2564 = vperm.xlu0 %13302, %v13317_v41  }
 0x1fc   :  { %21229 = vst [vmem:[#allocation67_spill] sm:$0xff] %v14873_v62  ;;  %21230 = vst [vmem:[#allocation170_spill] sm:$0xff] %v14883_v63  ;;  %v1484_v28 = vmul.f32 %v14449_v45, %v14079_v5  ;;  %2412 = vperm.xlu1 %13247, %v14904_v39   ;;  %v14908_v51 = vadd.f32 %v1480_v46, %v14520_v9  ;;  %v14911_v58 = vadd.f32 %v729_v4, %v14492_v2  ;;  %v21235_v62 = vld [vmem:[#allocation69_spill] sm:$0xff]  ;;  %v21237_v2 = vld [vmem:[#allocation70_spill] sm:$0xff]  ;;  %v14932_v4 = vpop.permute.xlu0 %3180 }
 0x1fd   :  { %21232 = vst [vmem:[#allocation68_spill] sm:$0xff] %v14894_v18  ;;  %21233 = vst [vmem:[#allocation171_spill] sm:$0xff] %v14904_v39  ;;  %v14915_v63 = vmul.f32 %v14762_v57, %v21228_v24  ;;  %v733_v41 = vmul.f32 %v14449_v45, %v21235_v62  ;;  %v14920_v18 = vadd.f32 %v1482_v60, %v14534_v54  ;;  %v21242_v60 = vld [vmem:[#allocation71_spill] sm:$0xff] }
 0x1fe   :  { %v14924_v36 = vmul.f32 %v14444_v15, %v21228_v24  ;;  %v14928_v46 = vmul.f32 %v14444_v15, %v21231_v55  ;;  %v1486_v9 = vmul.f32 %v14449_v45, %v21237_v2  ;;  %21238 = vst [vmem:[#allocation70_spill] sm:$0xff] %v14932_v4  ;;  %v14937_v39 = vadd.f32 %v731_v52, %v14512_v34  ;;  %v21244_v34 = vld [vmem:[#allocation72_spill] sm:$0xff] }
 0x1ff   :  { %21234 = vst [vmem:[#allocation172_spill] sm:$0xff] %v14915_v63  ;;  %v14934_v63 = vpop.permute.xlu1 %1595  ;;  %v14941_v54 = vmul.f32 %v14762_v57, %v14079_v5  ;;  %v14945_v24 = vmul.f32 %v14444_v15, %v14079_v5  ;;  %v735_v55 = vmul.f32 %v14449_v45, %v21242_v60  ;;  %v14954_v4 = vmul.f32 %v14444_v15, %v21235_v62  ;;  %v13320_v5 = vld [vmem:[%s20644_s0 + $0x38] sm:$0xff] }
 0x200   :  { %21236 = vst [vmem:[#allocation69_spill] sm:$0xff] %v14928_v46  ;;  %21239 = vst [vmem:[#allocation173_spill] sm:$0xff] %v14934_v63  ;;  %v14950_v46 = vadd.f32 %v1484_v28, %v14549_v27  ;;  %v1488_v52 = vmul.f32 %v14449_v45, %v21244_v34  ;;  %2416 = vperm.xlu1 %13247, %v13320_v5   ;;  %v14965_v27 = vadd.f32 %v733_v41, %v14524_v26  ;;  %v21248_v63 = vld [vmem:[#allocation73_spill] sm:$0xff]  ;;  %v21250_v41 = vld [vmem:[#allocation74_spill] sm:$0xff] }
 0x201   :  { %21240 = vst [vmem:[#allocation174_spill] sm:$0xff] %v14941_v54  ;;  %21241 = vst [vmem:[#allocation175_spill] sm:$0xff] %v14945_v24  ;;  %v13319_v54 = vld [vmem:[%s20644_s0 + $0x168] sm:$0xff]  ;;  %v14969_v62 = vmul.f32 %v14762_v57, %v21237_v2  ;;  %v14973_v28 = vmul.f32 %v14444_v15, %v21237_v2  ;;  %v14982_v24 = vmul.f32 %v14444_v15, %v21242_v60 }
 0x202   :  { %21243 = vst [vmem:[#allocation71_spill] sm:$0xff] %v14954_v4  ;;  %2568 = vperm.xlu0 %13302, %v13319_v54   ;;  %21245 = vst [vmem:[#allocation72_spill] sm:$0xff] %v14965_v27  ;;  %v737_v4 = vmul.f32 %v14449_v45, %v21248_v63  ;;  %v14978_v54 = vadd.f32 %v1486_v9, %v14562_v59  ;;  %v1490_v26 = vmul.f32 %v14449_v45, %v14097_v11  ;;  %v14988_v27 = vpop.permute.xlu0 %3192 }
 0x203   :  { %21246 = vst [vmem:[#allocation176_spill] sm:$0xff] %v14969_v62  ;;  %21247 = vst [vmem:[#allocation177_spill] sm:$0xff] %v14973_v28  ;;  %v739_v62 = vmul.f32 %v14449_v45, %v21250_v41  ;;  %v14990_v2 = vpop.permute.xlu1 %1603  ;;  %v14993_v28 = vadd.f32 %v735_v55, %v14538_v6  ;;  %v14997_v59 = vmul.f32 %v14762_v57, %v21244_v34  ;;  %v21257_v6 = vld [vmem:[#allocation76_spill] sm:$0xff] }
 0x204   :  { %21249 = vst [vmem:[#allocation73_spill] sm:$0xff] %v14982_v24  ;;  %21251 = vst [vmem:[#allocation74_spill] sm:$0xff] %v14988_v27  ;;  %v15001_v9 = vmul.f32 %v14444_v15, %v21244_v34  ;;  %v15005_v60 = vmul.f32 %v14444_v15, %v21248_v63  ;;  %v15008_v24 = vadd.f32 %v1488_v52, %v14577_v49  ;;  %v21256_v27 = vld [vmem:[#allocation75_spill] sm:$0xff]  ;;  %13248 = vset.pattern.permute.xlu1 %v21118_v12 }
 0x205   :  { %21252 = vst [vmem:[#allocation178_spill] sm:$0xff] %v14990_v2  ;;  %21253 = vst [vmem:[#allocation179_spill] sm:$0xff] %v14997_v59  ;;  %v1492_v2 = vmul.f32 %v14449_v45, %v21256_v27  ;;  %v741_v55 = vmul.f32 %v14449_v45, %v21257_v6  ;;  %v13321_v59 = vld [vmem:[%s20644_s0 + $0x188] sm:$0xff]  ;;  %v15019_v34 = vadd.f32 %v737_v4, %v14553_v38  ;;  %3148 = vperm.xlu1 %13248, %v13320_v5   ;;  %v21261_v38 = vld [vmem:[#allocation77_spill] sm:$0xff] }
 0x206   :  { %21254 = vst [vmem:[#allocation180_spill] sm:$0xff] %v15001_v9  ;;  %21255 = vst [vmem:[#allocation181_spill] sm:$0xff] %v15005_v60  ;;  %2584 = vperm.xlu0 %13302, %v13321_v59   ;;  %v15023_v49 = vmul.f32 %v14762_v57, %v14097_v11  ;;  %v15027_v63 = vmul.f32 %v14444_v15, %v14097_v11  ;;  %v15031_v52 = vmul.f32 %v14444_v15, %v21250_v41  ;;  %v21262_v9 = vld [vmem:[#allocation78_spill] sm:$0xff] }
 0x207   :  { %21258 = vst [vmem:[#allocation75_spill] sm:$0xff] %v15019_v34  ;;  %v15034_v59 = vadd.f32 %v1490_v26, %v14589_v16  ;;  %v15037_v60 = vadd.f32 %v739_v62, %v14566_v48  ;;  %v1494_v4 = vmul.f32 %v14449_v45, %v21261_v38  ;;  %v15043_v34 = vpop.permute.xlu0 %3204  ;;  %v15045_v11 = vpop.permute.xlu1 %1607  ;;  %v15049_v41 = vmul.f32 %v14762_v57, %v21256_v27 }
 0x208   :  { %21259 = vst [vmem:[#allocation76_spill] sm:$0xff] %v15023_v49  ;;  %21260 = vst [vmem:[#allocation182_spill] sm:$0xff] %v15031_v52  ;;  %v743_v49 = vmul.f32 %v14449_v45, %v21262_v9  ;;  %v15053_v16 = vmul.f32 %v14444_v15, %v21256_v27  ;;  %v15057_v48 = vmul.f32 %v14444_v15, %v21257_v6  ;;  %v13322_v6 = vld [vmem:[%s20644_s0 + $0x190] sm:$0xff] }
 0x209   :  { %21263 = vst [vmem:[#allocation77_spill] sm:$0xff] %v15043_v34  ;;  %21264 = vst [vmem:[#allocation78_spill] sm:$0xff] %v15045_v11  ;;  %v1496_v5 = vmul.f32 %v14449_v45, %v14115_v17  ;;  %v15062_v62 = vadd.f32 %v1492_v2, %v14606_v22  ;;  %v15065_v26 = vadd.f32 %v741_v55, %v14581_v53  ;;  %v21269_v34 = vld [vmem:[#allocation79_spill] sm:$0xff]  ;;  %v21272_v22 = vld [vmem:[#allocation80_spill] sm:$0xff] }
 0x20a   :  { %21265 = vst [vmem:[#allocation183_spill] sm:$0xff] %v15049_v41  ;;  %21266 = vst [vmem:[#allocation184_spill] sm:$0xff] %v15053_v16  ;;  %v15069_v41 = vmul.f32 %v14762_v57, %v21261_v38  ;;  %v745_v27 = vmul.f32 %v14449_v45, %v21269_v34  ;;  %2588 = vperm.xlu0 %13302, %v13322_v6   ;;  %v15078_v11 = vmul.f32 %v14444_v15, %v21261_v38  ;;  %v21273_v55 = vld [vmem:[#allocation81_spill] sm:$0xff] }
 0x20b   :  { %21267 = vst [vmem:[#allocation185_spill] sm:$0xff] %v15057_v48  ;;  %v15082_v53 = vmul.f32 %v14444_v15, %v21262_v9  ;;  %v1498_v2 = vmul.f32 %v14449_v45, %v21272_v22  ;;  %v15091_v48 = vld [vmem:[%s20644_s0 + $0x40] sm:$0xff]  ;;  %v15095_v38 = vadd.f32 %v1494_v4, %v14619_v21  ;;  %v15098_v6 = vadd.f32 %v743_v49, %v14598_v43  ;;  %v15110_v52 = vpop.permute.xlu1 %1615 }
 0x20c   :  { %21268 = vst [vmem:[#allocation186_spill] sm:$0xff] %v15069_v41  ;;  %21270 = vst [vmem:[#allocation79_spill] sm:$0xff] %v15078_v11  ;;  %v747_v41 = vmul.f32 %v14449_v45, %v21273_v55  ;;  %3152 = vperm.xlu1 %13248, %v15091_v48   ;;  %v15102_v9 = vmul.f32 %v14762_v57, %v14115_v17  ;;  %v15108_v11 = vpop.permute.xlu0 %3216  ;;  %v15113_v16 = vadd.f32 %v1496_v5, %v14635_v30  ;;  %v21277_v49 = vld [vmem:[#allocation82_spill] sm:$0xff]  ;;  %v13324_v5 = vld [vmem:[%s20644_s0 + $0x1b0] sm:$0xff] }
 0x20d   :  { %21271 = vst [vmem:[#allocation187_spill] sm:$0xff] %v15082_v53  ;;  %v15106_v53 = vmul.f32 %v14444_v15, %v14115_v17  ;;  %21275 = vst [vmem:[#allocation81_spill] sm:$0xff] %v15108_v11  ;;  %v15117_v21 = vmul.f32 %v14444_v15, %v21269_v34  ;;  %v1500_v43 = vmul.f32 %v14449_v45, %v14127_v3 }
 0x20e   :  { %21274 = vst [vmem:[#allocation80_spill] sm:$0xff] %v15102_v9  ;;  %21276 = vst [vmem:[#allocation188_spill] sm:$0xff] %v15110_v52  ;;  %v749_v4 = vmul.f32 %v14449_v45, %v21277_v49  ;;  %v15124_v17 = vadd.f32 %v745_v27, %v14610_v44  ;;  %v15128_v9 = vmul.f32 %v14762_v57, %v21272_v22  ;;  %2604 = vperm.xlu0 %13302, %v13324_v5   ;;  %v13325_v52 = vld [vmem:[%s20644_s0 + $0x48] sm:$0xff] }
 0x20f   :  { %v15132_v30 = vmul.f32 %v14444_v15, %v21272_v22  ;;  %v15136_v34 = vmul.f32 %v14444_v15, %v21273_v55  ;;  %v15142_v44 = vadd.f32 %v1498_v2, %v14649_v7  ;;  %v15145_v27 = vadd.f32 %v747_v41, %v14623_v14  ;;  %v21280_v22 = vld [vmem:[#allocation83_spill] sm:$0xff]  ;;  %v21284_v7 = vld [vmem:[#allocation84_spill] sm:$0xff] }
 0x210   :  { %21278 = vst [vmem:[#allocation82_spill] sm:$0xff] %v15128_v9  ;;  %v1502_v9 = vmul.f32 %v14449_v45, %v14133_v23  ;;  %v751_v11 = vmul.f32 %v14449_v45, %v21280_v22  ;;  %13249 = vset.pattern.permute.xlu1 %v21111_v42  ;;  %v15154_v55 = vmul.f32 %v14762_v57, %v14127_v3  ;;  %v15166_v2 = vpop.permute.xlu0 %3228 }
 0x211   :  { %21279 = vst [vmem:[#allocation189_spill] sm:$0xff] %v15136_v34  ;;  %v15158_v5 = vmul.f32 %v14444_v15, %v14127_v3  ;;  %v15162_v14 = vmul.f32 %v14444_v15, %v21277_v49  ;;  %v1504_v41 = vmul.f32 %v14449_v45, %v21284_v7  ;;  %21285 = vst [vmem:[#allocation84_spill] sm:$0xff] %v15166_v2  ;;  %2424 = vperm.xlu1 %13249, %v13325_v52   ;;  %v15171_v34 = vpop.permute.xlu1 %1623 }
 0x212   :  { %21281 = vst [vmem:[#allocation83_spill] sm:$0xff] %v15154_v55  ;;  %21286 = vst [vmem:[#allocation192_spill] sm:$0xff] %v15171_v34  ;;  %v15174_v55 = vadd.f32 %v1500_v43, %v14661_v8  ;;  %v15177_v3 = vadd.f32 %v749_v4, %v14639_v35  ;;  %v15181_v49 = vmul.f32 %v14762_v57, %v14133_v23  ;;  %v21290_v35 = vld [vmem:[#allocation86_spill] sm:$0xff] }
 0x213   :  { %21282 = vst [vmem:[#allocation190_spill] sm:$0xff] %v15158_v5  ;;  %21283 = vst [vmem:[#allocation191_spill] sm:$0xff] %v15162_v14  ;;  %v21288_v14 = vld [vmem:[#allocation85_spill] sm:$0xff]  ;;  %v15187_v5 = vmul.f32 %v14444_v15, %v14133_v23  ;;  %v15191_v52 = vmul.f32 %v14444_v15, %v21280_v22  ;;  %v1506_v8 = vmul.f32 %v14449_v45, %v14145_v1 }
 0x214   :  { %21287 = vst [vmem:[#allocation193_spill] sm:$0xff] %v15181_v49  ;;  %v753_v2 = vmul.f32 %v14449_v45, %v21288_v14  ;;  %v755_v43 = vmul.f32 %v14449_v45, %v21290_v35  ;;  %v13326_v4 = vld [vmem:[%s20644_s0 + $0x1b8] sm:$0xff]  ;;  %v15201_v49 = vadd.f32 %v1502_v9, %v14681_v20  ;;  %v15204_v23 = vadd.f32 %v751_v11, %v14653_v10  ;;  %v21295_v10 = vld [vmem:[#allocation87_spill] sm:$0xff]  ;;  %v15225_v9 = vpop.permute.xlu0 %3240 }
 0x215   :  { %21289 = vst [vmem:[#allocation85_spill] sm:$0xff] %v15191_v52  ;;  %2608 = vperm.xlu0 %13302, %v13326_v4   ;;  %v15208_v22 = vmul.f32 %v14762_v57, %v21284_v7  ;;  %v15212_v34 = vmul.f32 %v14444_v15, %v21284_v7  ;;  %v15215_v52 = vadd.f32 %v1504_v41, %v14693_v37  ;;  %21296 = vst [vmem:[#allocation87_spill] sm:$0xff] %v15225_v9  ;;  %v15230_v7 = vld [vmem:[%s20644_s0 + $0x50] sm:$0xff]  ;;  %v15233_v37 = vpop.permute.xlu1 %1631 }
 0x216   :  { %v15219_v4 = vmul.f32 %v14444_v15, %v21288_v14  ;;  %v1508_v20 = vmul.f32 %v14449_v45, %v14151_v29  ;;  %v757_v11 = vmul.f32 %v14449_v45, %v21295_v10  ;;  %2428 = vperm.xlu1 %13249, %v15230_v7   ;;  %21297 = vst [vmem:[#allocation197_spill] sm:$0xff] %v15233_v37 }
 0x217   :  { %21291 = vst [vmem:[#allocation86_spill] sm:$0xff] %v15208_v22  ;;  %21292 = vst [vmem:[#allocation194_spill] sm:$0xff] %v15212_v34  ;;  %v15236_v14 = vadd.f32 %v753_v2, %v14673_v40  ;;  %v15240_v41 = vmul.f32 %v14762_v57, %v14145_v1  ;;  %v15244_v22 = vmul.f32 %v14444_v15, %v14145_v1  ;;  %v21304_v40 = vld [vmem:[#allocation88_spill] sm:$0xff]  ;;  %v21305_v34 = vld [vmem:[#allocation89_spill] sm:$0xff] }
 0x218   :  { %21293 = vst [vmem:[#allocation195_spill] sm:$0xff] %v15215_v52  ;;  %21294 = vst [vmem:[#allocation196_spill] sm:$0xff] %v15219_v4  ;;  %v15248_v9 = vmul.f32 %v14444_v15, %v21290_v35  ;;  %v15251_v4 = vadd.f32 %v1506_v8, %v14708_v47  ;;  %v15254_v37 = vadd.f32 %v755_v43, %v14685_v25  ;;  %v13328_v1 = vld [vmem:[%s20644_s0 + $0x1d8] sm:$0xff] }
 0x219   :  { %21298 = vst [vmem:[#allocation198_spill] sm:$0xff] %v15236_v14  ;;  %21299 = vst [vmem:[#allocation199_spill] sm:$0xff] %v15240_v41  ;;  %v1510_v2 = vmul.f32 %v14449_v45, %v21304_v40  ;;  %v759_v41 = vmul.f32 %v14449_v45, %v21305_v34  ;;  %2624 = vperm.xlu0 %13302, %v13328_v1   ;;  %v15265_v35 = vmul.f32 %v14762_v57, %v14151_v29 }
 0x21a   :  { %21300 = vst [vmem:[#allocation200_spill] sm:$0xff] %v15244_v22  ;;  %21301 = vst [vmem:[#allocation201_spill] sm:$0xff] %v15248_v9  ;;  %v15269_v47 = vmul.f32 %v14444_v15, %v14151_v29  ;;  %v15273_v25 = vmul.f32 %v14444_v15, %v21295_v10  ;;  %v1839_v8 = vmul.f32 %v14762_v57, %v14232_v56  ;;  %v21311_v9 = vld [vmem:[#allocation90_spill] sm:$0xff]  ;;  %13250 = vset.pattern.permute.xlu1 %v21118_v12  ;;  %v15290_v10 = vpop.permute.xlu1 %1639 }
 0x21b   :  { %21302 = vst [vmem:[#allocation202_spill] sm:$0xff] %v15251_v4  ;;  %21303 = vst [vmem:[#allocation203_spill] sm:$0xff] %v15254_v37  ;;  %v15278_v43 = vadd.f32 %v1508_v20, %v14720_v31  ;;  %v15281_v1 = vadd.f32 %v757_v11, %v14697_v19  ;;  %v761_v29 = vmul.f32 %v14449_v45, %v21311_v9  ;;  %v21317_v20 = vld [vmem:[#allocation91_spill] sm:$0xff]  ;;  %3160 = vperm.xlu1 %13250, %v15230_v7   ;;  %v21330_v4 = vld [vmem:[#allocation33_spill] sm:$0xff] }
 0x21c   :  { %21306 = vst [vmem:[#allocation88_spill] sm:$0xff] %v15265_v35  ;;  %21307 = vst [vmem:[#allocation89_spill] sm:$0xff] %v15269_v47  ;;  %v1512_v35 = vmul.f32 %v14449_v45, %v14163_v33  ;;  %v15287_v47 = vpop.permute.xlu0 %3252  ;;  %v15298_v19 = vmul.f32 %v14444_v15, %v21304_v40  ;;  %v15302_v31 = vmul.f32 %v14444_v15, %v21305_v34  ;;  %v13329_v34 = vld [vmem:[%s20644_s0 + $0x1e0] sm:$0xff] }
 0x21d   :  { %21308 = vst [vmem:[#allocation204_spill] sm:$0xff] %v15273_v25  ;;  %21309 = vst [vmem:[#allocation205_spill] sm:$0xff] %v15278_v43  ;;  %v15294_v25 = vmul.f32 %v14762_v57, %v21304_v40  ;;  %v1514_v11 = vmul.f32 %v14449_v45, %v21317_v20  ;;  %v21323_v40 = vld [vmem:[#allocation112_spill] sm:$0xff]  ;;  %2628 = vperm.xlu0 %13302, %v13329_v34   ;;  %v15335_v14 = vadd.f32 %v761_v29, %v21330_v4  ;;  %v21339_v29 = vld [vmem:[#allocation115_spill] sm:$0xff] }
 0x21e   :  { %21310 = vst [vmem:[#allocation206_spill] sm:$0xff] %v15281_v1  ;;  %21312 = vst [vmem:[#allocation90_spill] sm:$0xff] %v15287_v47  ;;  %v21318_v47 = vld [vmem:[#allocation35_spill] sm:$0xff]  ;;  %v15339_v34 = vmul.f32 %v14444_v15, %v21311_v9  ;;  %v15354_v4 = vmul.f32 %v14762_v57, %v21317_v20 }
 0x21f   :  { %21313 = vst [vmem:[#allocation207_spill] sm:$0xff] %v15290_v10  ;;  %21314 = vst [vmem:[#allocation208_spill] sm:$0xff] %v15294_v25  ;;  %v15308_v1 = vadd.f32 %v1510_v2, %v21318_v47  ;;  %v21320_v10 = vld [vmem:[#allocation30_spill] sm:$0xff]  ;;  %v21322_v25 = vld [vmem:[#allocation92_spill] sm:$0xff]  ;;  %v15326_v2 = vmul.f32 %v14444_v15, %v14163_v33 }
 0x220   :  { %21315 = vst [vmem:[#allocation209_spill] sm:$0xff] %v15298_v19  ;;  %21316 = vst [vmem:[#allocation210_spill] sm:$0xff] %v15302_v31  ;;  %v15311_v37 = vadd.f32 %v759_v41, %v21320_v10  ;;  %v763_v43 = vmul.f32 %v14449_v45, %v21322_v25  ;;  %v1842_v19 = vmul.f32 %v14762_v57, %v21323_v40  ;;  %v21326_v41 = vld [vmem:[#allocation94_spill] sm:$0xff]  ;;  %v21327_v10 = vld [vmem:[#allocation64_spill] sm:$0xff] }
 0x221   :  { %21319 = vst [vmem:[#allocation35_spill] sm:$0xff] %v15308_v1  ;;  %v15322_v31 = vmul.f32 %v14762_v57, %v14163_v33  ;;  %21325 = vst [vmem:[#allocation112_spill] sm:$0xff] %v15326_v2  ;;  %v765_v47 = vmul.f32 %v14449_v45, %v21326_v41  ;;  %v21328_v1 = vld [vmem:[#allocation39_spill] sm:$0xff]  ;;  %v15343_v33 = vpop.permute.xlu0 %3264  ;;  %v15345_v2 = vpop.permute.xlu1 %1647  ;;  %v15361_v9 = vmul.f32 %v14444_v15, %v21322_v25 }
 0x222   :  { %21321 = vst [vmem:[#allocation30_spill] sm:$0xff] %v15311_v37  ;;  %v1900_v37 = vadd.f32 %v1839_v8, %v21327_v10  ;;  %v15332_v22 = vadd.f32 %v1512_v35, %v21328_v1  ;;  %21331 = vst [vmem:[#allocation64_spill] sm:$0xff] %v15335_v14  ;;  %v15350_v8 = vld [vmem:[%s20647_s2] ss:$0 sm:$0xff]  ;;  %v1096_v10 = vmul.f32 %v14762_v57, %v21339_v29 }
 0x223   :  { %21324 = vst [vmem:[#allocation92_spill] sm:$0xff] %v15322_v31  ;;  %21332 = vst [vmem:[#allocation39_spill] sm:$0xff] %v15339_v34  ;;  %v2266_v31 = vmul.f32 %v14449_v45, %v14232_v56  ;;  %v21336_v35 = vld [vmem:[#allocation42_spill] sm:$0xff]  ;;  %v1903_v20 = vadd.f32 %v1842_v19, %v14848_v32 }
 0x224   :  { %21329 = vst [vmem:[#allocation94_spill] sm:$0xff] %v15332_v22  ;;  %21333 = vst [vmem:[#allocation33_spill] sm:$0xff] %v15343_v33  ;;  %v15357_v1 = vadd.f32 %v1514_v11, %v21336_v35  ;;  %v13330_v33 = vld [vmem:[%s20644_s0 + $0x58] sm:$0xff]  ;;  %v2269_v11 = vmul.f32 %v14449_v45, %v21323_v40  ;;  %v13331_v32 = vld [vmem:[%s20644_s0] sm:$0xff]  ;;  %v1961_v19 = vmul.f32 %v15350_v8, %v1900_v37 }
 0x225   :  { %21334 = vst [vmem:[#allocation211_spill] sm:$0xff] %v15345_v2  ;;  %21335 = vst [vmem:[#allocation212_spill] sm:$0xff] %v15354_v4  ;;  %3164 = vperm.xlu1 %13250, %v13330_v33   ;;  %v21340_v2 = vld [vmem:[#allocation36_spill] sm:$0xff]  ;;  %v21342_v35 = vld [vmem:[#allocation113_spill] sm:$0xff]  ;;  %v21343_v4 = vmov 0  }
 0x226   :  { %21337 = vst [vmem:[#allocation42_spill] sm:$0xff] %v15357_v1  ;;  %21338 = vst [vmem:[#allocation213_spill] sm:$0xff] %v15361_v9  ;;  %v15369_v34 = vadd.f32 %v763_v43, %v21340_v2  ;;  %v1472_v25 = vmul.f32 %v14449_v45, %v21342_v35  ;;  %13306 = vset.pattern.permute.xlu0 %v21343_v4  ;;  %v21344_v9 = vld [vmem:[#allocation40_spill] sm:$0xff]  ;;  %v15382_v1 = vmul.f32 %v14444_v15, %v21326_v41  ;;  %v21347_v33 = vld [vmem:[#allocation114_spill] sm:$0xff]  ;;  %v15402_v4 = vpop.permute.xlu0 %3276 }
 0x227   :  { %v15378_v14 = vadd.f32 %v765_v47, %v21344_v9  ;;  %v1844_v43 = vmul.f32 %v14762_v57, %v21347_v33  ;;  %108 = vperm.xlu0 %13306, %v13331_v32   ;;  %v15392_v2 = vmul.f32 %v14444_v15, %v14232_v56  ;;  %v15396_v47 = vmul.f32 %v14444_v15, %v21323_v40  ;;  %v15404_v9 = vpop.permute.xlu1 %1655  ;;  %v15412_v56 = vld [vmem:[%s20648_s3] ss:$0 sm:$0xff] }
 0x228   :  { %21341 = vst [vmem:[#allocation115_spill] sm:$0xff] %v15369_v34  ;;  %21346 = vst [vmem:[#allocation113_spill] sm:$0xff] %v15382_v1  ;;  %v15400_v41 = vmul.f32 %v14762_v57, %v21342_v35  ;;  %v21353_v1 = vld [vmem:[#allocation50_spill] sm:$0xff]  ;;  %v2271_v37 = vmul.f32 %v14449_v45, %v21347_v33  ;;  %v1157_v40 = vadd.f32 %v1096_v10, %v14851_v0 }
 0x229   :  { %21345 = vst [vmem:[#allocation36_spill] sm:$0xff] %v15378_v14  ;;  %21348 = vst [vmem:[#allocation40_spill] sm:$0xff] %v15392_v2  ;;  %v15407_v32 = vadd.f32 %v2266_v31, %v21353_v1  ;;  %v21355_v14 = vld [vmem:[#allocation117_spill] sm:$0xff]  ;;  %13251 = vset.pattern.permute.xlu1 %v21111_v42  ;;  %v21356_v31 = vld [vmem:[#allocation164_spill] sm:$0xff]  ;;  %v1964_v34 = vmul.f32 %v15350_v8, %v1903_v20  ;;  %v1905_v22 = vadd.f32 %v1844_v43, %v14876_v61 }
 0x22a   :  { %21349 = vst [vmem:[#allocation114_spill] sm:$0xff] %v15396_v47  ;;  %21350 = vst [vmem:[#allocation214_spill] sm:$0xff] %v15400_v41  ;;  %v1474_v41 = vmul.f32 %v14449_v45, %v21339_v29  ;;  %v15423_v1 = vadd.f32 %v1472_v25, %v21356_v31  ;;  %v15432_v47 = vld [vmem:[%s20644_s0 + $0x60] sm:$0xff]  ;;  %v21361_v25 = vld [vmem:[#allocation116_spill] sm:$0xff]  ;;  %v15446_v2 = vadd.f32 %v15412_v56, %v1961_v19 }
 0x22b   :  { %21351 = vst [vmem:[#allocation215_spill] sm:$0xff] %v15402_v4  ;;  %21352 = vst [vmem:[#allocation216_spill] sm:$0xff] %v15404_v9  ;;  %v1097_v4 = vmul.f32 %v14762_v57, %v21355_v14  ;;  %v15427_v9 = vmul.f32 %v14444_v15, %v21342_v35  ;;  %2436 = vperm.xlu1 %13251, %v15432_v47   ;;  %v21359_v0 = vld [vmem:[#allocation166_spill] sm:$0xff]  ;;  %v1846_v31 = vmul.f32 %v14762_v57, %v21361_v25  ;;  %v21369_v19 = vld [vmem:[#allocation167_spill] sm:$0xff] }
 0x22c   :  { %21354 = vst [vmem:[#allocation50_spill] sm:$0xff] %v15407_v32  ;;  %21357 = vst [vmem:[#allocation117_spill] sm:$0xff] %v15423_v1  ;;  %v15436_v10 = vadd.f32 %v2269_v11, %v21359_v0  ;;  %v2273_v35 = vmul.f32 %v14449_v45, %v21361_v25  ;;  %v21362_v1 = vld [vmem:[#allocation158_spill] sm:$0xff]  ;;  %v15450_v32 = vmul.f32 %v14444_v15, %v21347_v33  ;;  %v21366_v11 = vld [vmem:[#allocation119_spill] sm:$0xff]  ;;  %v15460_v0 = vpop.permute.xlu0 %3288 }
 0x22d   :  { %21358 = vst [vmem:[#allocation164_spill] sm:$0xff] %v15427_v9  ;;  %113 = vperm.xlu0 %13306, %v21362_v1   ;;  %21363 = vst [vmem:[#allocation116_spill] sm:$0xff] %v15446_v2  ;;  %v15454_v20 = vmul.f32 %v14444_v15, %v21339_v29  ;;  %v1475_v61 = vmul.f32 %v14449_v45, %v21355_v14  ;;  %v1099_v43 = vmul.f32 %v14762_v57, %v21366_v11  ;;  %v15462_v1 = vpop.permute.xlu1 %1663  ;;  %v21373_v9 = vld [vmem:[#allocation118_spill] sm:$0xff] }
 0x22e   :  { %21360 = vst [vmem:[#allocation166_spill] sm:$0xff] %v15436_v10  ;;  %21364 = vst [vmem:[#allocation158_spill] sm:$0xff] %v15450_v32  ;;  %v15465_v10 = vadd.f32 %v1474_v41, %v21369_v19  ;;  %v1158_v33 = vadd.f32 %v1097_v4, %v14879_v50  ;;  %v21370_v32 = vld [vmem:[#allocation168_spill] sm:$0xff]  ;;  %v1224_v29 = vmul.f32 %v15350_v8, %v1157_v40  ;;  %v21376_v19 = vld [vmem:[#allocation169_spill] sm:$0xff] }
 0x22f   :  { %21365 = vst [vmem:[#allocation217_spill] sm:$0xff] %v15454_v20  ;;  %21367 = vst [vmem:[#allocation119_spill] sm:$0xff] %v15460_v0  ;;  %v15469_v2 = vadd.f32 %v2271_v37, %v21370_v32  ;;  %v15474_v20 = vmul.f32 %v14444_v15, %v21361_v25  ;;  %v1848_v52 = vmul.f32 %v14762_v57, %v21373_v9  ;;  %v13333_v41 = vld [vmem:[%s20644_s0 + $0x68] sm:$0xff]  ;;  %v21374_v37 = vld [vmem:[#allocation26_spill] sm:$0xff] }
 0x230   :  { %21368 = vst [vmem:[#allocation218_spill] sm:$0xff] %v15462_v1  ;;  %v2275_v0 = vmul.f32 %v14449_v45, %v21373_v9  ;;  %2440 = vperm.xlu1 %13251, %v13333_v41   ;;  %v15484_v50 = vadd.f32 %v15412_v56, %v1964_v34  ;;  %v1907_v4 = vadd.f32 %v1846_v31, %v14908_v51  ;;  %v21377_v51 = vld [vmem:[#allocation121_spill] sm:$0xff] }
 0x231   :  { %21371 = vst [vmem:[#allocation167_spill] sm:$0xff] %v15469_v2  ;;  %21372 = vst [vmem:[#allocation168_spill] sm:$0xff] %v15474_v20  ;;  %v15489_v32 = vmul.f32 %v14444_v15, %v21355_v14  ;;  %128 = vperm.xlu0 %13306, %v21374_v37   ;;  %v15493_v40 = vadd.f32 %v2273_v35, %v14890_v13  ;;  %v1966_v25 = vmul.f32 %v15350_v8, %v1905_v22  ;;  %v15504_v14 = vpop.permute.xlu0 %3292  ;;  %v15506_v2 = vpop.permute.xlu1 %1671 }
 0x232   :  { %v15497_v1 = vadd.f32 %v1475_v61, %v21376_v19  ;;  %v1160_v20 = vadd.f32 %v1099_v43, %v14911_v58  ;;  %v1477_v34 = vmul.f32 %v14449_v45, %v21366_v11  ;;  %v1101_v31 = vmul.f32 %v14762_v57, %v21377_v51  ;;  %21378 = vst [vmem:[#allocation26_spill] sm:$0xff] %v15504_v14  ;;  %v21381_v43 = vld [vmem:[#allocation120_spill] sm:$0xff] }
 0x233   :  { %21375 = vst [vmem:[#allocation118_spill] sm:$0xff] %v15493_v40  ;;  %21379 = vst [vmem:[#allocation169_spill] sm:$0xff] %v15506_v2  ;;  %v15510_v13 = vmul.f32 %v14444_v15, %v21373_v9  ;;  %v15514_v22 = vmul.f32 %v14444_v15, %v21366_v11  ;;  %v15517_v58 = vadd.f32 %v15412_v56, %v1224_v29  ;;  %v21383_v29 = vld [vmem:[#allocation123_spill] sm:$0xff] }
 0x234   :  { %v1225_v35 = vmul.f32 %v15350_v8, %v1158_v33  ;;  %v1909_v61 = vadd.f32 %v1848_v52, %v14920_v18  ;;  %v1850_v37 = vmul.f32 %v14762_v57, %v21381_v43  ;;  %v2277_v19 = vmul.f32 %v14449_v45, %v21381_v43  ;;  %13252 = vset.pattern.permute.xlu1 %v21118_v12  ;;  %v21384_v33 = vld [vmem:[#allocation171_spill] sm:$0xff]  ;;  %v21386_v52 = vld [vmem:[#allocation68_spill] sm:$0xff] }
 0x235   :  { %21380 = vst [vmem:[#allocation121_spill] sm:$0xff] %v15510_v13  ;;  %v15527_v9 = vadd.f32 %v2275_v0, %v14924_v36  ;;  %v1479_v11 = vmul.f32 %v14449_v45, %v21377_v51  ;;  %v1103_v14 = vmul.f32 %v14762_v57, %v21383_v29  ;;  %138 = vperm.xlu0 %13306, %v21384_v33   ;;  %v15541_v40 = vpop.permute.xlu0 %3308  ;;  %v15543_v36 = vpop.permute.xlu1 %1679 }
 0x236   :  { %3172 = vperm.xlu1 %13252, %v13333_v41   ;;  %v15535_v18 = vadd.f32 %v15412_v56, %v1966_v25  ;;  %v15538_v2 = vadd.f32 %v1477_v34, %v21386_v52  ;;  %v1162_v13 = vadd.f32 %v1101_v31, %v14937_v39  ;;  %21388 = vst [vmem:[#allocation68_spill] sm:$0xff] %v15541_v40  ;;  %21389 = vst [vmem:[#allocation219_spill] sm:$0xff] %v15543_v36  ;;  %v21391_v25 = vld [vmem:[#allocation122_spill] sm:$0xff]  ;;  %v21394_v40 = vld [vmem:[#allocation69_spill] sm:$0xff] }
 0x237   :  { %21382 = vst [vmem:[#allocation120_spill] sm:$0xff] %v15527_v9  ;;  %v1227_v0 = vmul.f32 %v15350_v8, %v1160_v20  ;;  %v1968_v9 = vmul.f32 %v15350_v8, %v1907_v4  ;;  %v15549_v33 = vmul.f32 %v14444_v15, %v21381_v43  ;;  %v15553_v41 = vmul.f32 %v14444_v15, %v21377_v51  ;;  %v21392_v43 = vld [vmem:[#allocation175_spill] sm:$0xff]  ;;  %v21395_v36 = vld [vmem:[#allocation72_spill] sm:$0xff] }
 0x238   :  { %21385 = vst [vmem:[#allocation123_spill] sm:$0xff] %v15535_v18  ;;  %21387 = vst [vmem:[#allocation171_spill] sm:$0xff] %v15538_v2  ;;  %v1852_v34 = vmul.f32 %v14762_v57, %v21391_v25  ;;  %v15558_v39 = vadd.f32 %v15412_v56, %v1225_v35  ;;  %v1911_v31 = vadd.f32 %v1850_v37, %v14950_v46  ;;  %v21396_v2 = vld [vmem:[#allocation125_spill] sm:$0xff] }
 0x239   :  { %21390 = vst [vmem:[#allocation220_spill] sm:$0xff] %v15549_v33  ;;  %v2279_v20 = vmul.f32 %v14449_v45, %v21391_v25  ;;  %v1481_v4 = vmul.f32 %v14449_v45, %v21383_v29  ;;  %v15566_v52 = vadd.f32 %v2277_v19, %v21392_v43  ;;  %v15569_v51 = vadd.f32 %v1479_v11, %v21394_v40  ;;  %v13334_v46 = vld [vmem:[%s20644_s0 + $0x70] sm:$0xff]  ;;  %v15578_v37 = vpop.permute.xlu0 %3312  ;;  %v15580_v18 = vpop.permute.xlu1 %1687 }
 0x23a   :  { %v1164_v33 = vadd.f32 %v1103_v14, %v21395_v36  ;;  %v1105_v35 = vmul.f32 %v14762_v57, %v21396_v2  ;;  %148 = vperm.xlu0 %13306, %v15091_v48   ;;  %3176 = vperm.xlu1 %13252, %v13334_v46   ;;  %21397 = vst [vmem:[#allocation175_spill] sm:$0xff] %v15578_v37  ;;  %21398 = vst [vmem:[#allocation69_spill] sm:$0xff] %v15580_v18  ;;  %v21401_v37 = vld [vmem:[#allocation124_spill] sm:$0xff]  ;;  %v21402_v18 = vld [vmem:[#allocation71_spill] sm:$0xff] }
 0x23b   :  { %21393 = vst [vmem:[#allocation122_spill] sm:$0xff] %v15566_v52  ;;  %v15583_v19 = vadd.f32 %v15412_v56, %v1227_v0  ;;  %v1229_v40 = vmul.f32 %v15350_v8, %v1162_v13  ;;  %v15587_v14 = vadd.f32 %v15412_v56, %v1968_v9  ;;  %v1970_v11 = vmul.f32 %v15350_v8, %v1909_v61  ;;  %v21403_v61 = vld [vmem:[#allocation127_spill] sm:$0xff] }
 0x23c   :  { %v1913_v48 = vadd.f32 %v1852_v34, %v14978_v54  ;;  %v15593_v36 = vmul.f32 %v14444_v15, %v21391_v25  ;;  %v15597_v43 = vmul.f32 %v14444_v15, %v21383_v29  ;;  %v1854_v0 = vmul.f32 %v14762_v57, %v21401_v37  ;;  %v21404_v34 = vld [vmem:[#allocation177_spill] sm:$0xff] }
 0x23d   :  { %21399 = vst [vmem:[#allocation72_spill] sm:$0xff] %v15587_v14  ;;  %v15602_v13 = vadd.f32 %v1481_v4, %v21402_v18  ;;  %v2281_v9 = vmul.f32 %v14449_v45, %v21401_v37  ;;  %v1107_v54 = vmul.f32 %v14762_v57, %v21403_v61  ;;  %v15609_v14 = vadd.f32 %v2279_v20, %v21404_v34  ;;  %v13335_v20 = vld [vmem:[%s20644_s0 + $0x78] sm:$0xff] }
 0x23e   :  { %21400 = vst [vmem:[#allocation125_spill] sm:$0xff] %v15593_v36  ;;  %v1166_v25 = vadd.f32 %v1105_v35, %v14993_v28  ;;  %v1483_v29 = vmul.f32 %v14449_v45, %v21396_v2  ;;  %158 = vperm.xlu0 %13306, %v15230_v7   ;;  %13253 = vset.pattern.permute.xlu1 %v21111_v42  ;;  %v15621_v36 = vpop.permute.xlu0 %3328  ;;  %v15626_v28 = vpop.permute.xlu1 %1695 }
 0x23f   :  { %21405 = vst [vmem:[#allocation124_spill] sm:$0xff] %v15609_v14  ;;  %v1231_v18 = vmul.f32 %v15350_v8, %v1164_v33  ;;  %v15619_v4 = vmul.f32 %v14444_v15, %v21401_v37  ;;  %21407 = vst [vmem:[#allocation127_spill] sm:$0xff] %v15621_v36  ;;  %2448 = vperm.xlu1 %13253, %v13335_v20   ;;  %v15629_v35 = vadd.f32 %v15412_v56, %v1229_v40  ;;  %v21411_v36 = vld [vmem:[#allocation126_spill] sm:$0xff]  ;;  %v21414_v14 = vld [vmem:[#allocation180_spill] sm:$0xff] }
 0x240   :  { %21408 = vst [vmem:[#allocation177_spill] sm:$0xff] %v15626_v28  ;;  %v15632_v7 = vadd.f32 %v15412_v56, %v1970_v11  ;;  %v1972_v33 = vmul.f32 %v15350_v8, %v1911_v31  ;;  %v1915_v37 = vadd.f32 %v1854_v0, %v15008_v24  ;;  %v15638_v34 = vmul.f32 %v14444_v15, %v21396_v2  ;;  %v21412_v28 = vld [vmem:[#allocation75_spill] sm:$0xff]  ;;  %v21416_v0 = vld [vmem:[#allocation73_spill] sm:$0xff] }
 0x241   :  { %21406 = vst [vmem:[#allocation71_spill] sm:$0xff] %v15619_v4  ;;  %21409 = vst [vmem:[#allocation221_spill] sm:$0xff] %v15629_v35  ;;  %v1856_v4 = vmul.f32 %v14762_v57, %v21411_v36  ;;  %v2283_v20 = vmul.f32 %v14449_v45, %v21411_v36  ;;  %v1168_v40 = vadd.f32 %v1107_v54, %v21412_v28 }
 0x242   :  { %21410 = vst [vmem:[#allocation222_spill] sm:$0xff] %v15632_v7  ;;  %v1485_v11 = vmul.f32 %v14449_v45, %v21403_v61  ;;  %v21413_v7 = vld [vmem:[#allocation129_spill] sm:$0xff]  ;;  %v15650_v24 = vadd.f32 %v2281_v9, %v21414_v14  ;;  %v15653_v2 = vadd.f32 %v1483_v29, %v21416_v0  ;;  %168 = vperm.xlu0 %13306, %v15432_v47   ;;  %v21420_v9 = vld [vmem:[#allocation128_spill] sm:$0xff]  ;;  %v15671_v0 = vpop.permute.xlu0 %3332  ;;  %v13336_v47 = vld [vmem:[%s20644_s0 + $0x80] sm:$0xff] }
 0x243   :  { %v1109_v31 = vmul.f32 %v14762_v57, %v21413_v7  ;;  %v15657_v52 = vadd.f32 %v15412_v56, %v1231_v18  ;;  %v1233_v35 = vmul.f32 %v15350_v8, %v1166_v25  ;;  %v1974_v54 = vmul.f32 %v15350_v8, %v1913_v48  ;;  %21421 = vst [vmem:[#allocation73_spill] sm:$0xff] %v15671_v0  ;;  %v15676_v25 = vpop.permute.xlu1 %1703  ;;  %v21424_v18 = vld [vmem:[#allocation131_spill] sm:$0xff] }
 0x244   :  { %21415 = vst [vmem:[#allocation126_spill] sm:$0xff] %v15650_v24  ;;  %21417 = vst [vmem:[#allocation75_spill] sm:$0xff] %v15653_v2  ;;  %v15663_v28 = vmul.f32 %v14444_v15, %v21411_v36  ;;  %v15667_v14 = vmul.f32 %v14444_v15, %v21403_v61  ;;  %v1858_v29 = vmul.f32 %v14762_v57, %v21420_v9  ;;  %2452 = vperm.xlu1 %13253, %v13336_v47   ;;  %v21426_v24 = vld [vmem:[#allocation181_spill] sm:$0xff] }
 0x245   :  { %21422 = vst [vmem:[#allocation128_spill] sm:$0xff] %v15676_v25  ;;  %v15679_v48 = vadd.f32 %v15412_v56, %v1972_v33  ;;  %v1917_v36 = vadd.f32 %v1856_v4, %v15034_v59  ;;  %v2285_v61 = vmul.f32 %v14449_v45, %v21420_v9  ;;  %v15687_v0 = vadd.f32 %v2283_v20, %v15027_v63 }
 0x246   :  { %21418 = vst [vmem:[#allocation129_spill] sm:$0xff] %v15663_v28  ;;  %21419 = vst [vmem:[#allocation180_spill] sm:$0xff] %v15667_v14  ;;  %v1111_v28 = vmul.f32 %v14762_v57, %v21424_v18  ;;  %v15690_v14 = vadd.f32 %v1485_v11, %v21426_v24  ;;  %v1170_v2 = vadd.f32 %v1109_v31, %v15037_v60  ;;  %178 = vperm.xlu0 %13306, %v13334_v46   ;;  %v15716_v24 = vpop.permute.xlu0 %3348 }
 0x247   :  { %21423 = vst [vmem:[#allocation223_spill] sm:$0xff] %v15679_v48  ;;  %21425 = vst [vmem:[#allocation131_spill] sm:$0xff] %v15687_v0  ;;  %v1487_v33 = vmul.f32 %v14449_v45, %v21413_v7  ;;  %v1235_v25 = vmul.f32 %v15350_v8, %v1168_v40  ;;  %v15698_v59 = vmul.f32 %v14444_v15, %v21420_v9  ;;  %v21431_v40 = vld [vmem:[#allocation130_spill] sm:$0xff]  ;;  %v21435_v9 = vld [vmem:[#allocation184_spill] sm:$0xff] }
 0x248   :  { %v15701_v4 = vadd.f32 %v15412_v56, %v1233_v35  ;;  %v15704_v63 = vadd.f32 %v15412_v56, %v1974_v54  ;;  %v1976_v20 = vmul.f32 %v15350_v8, %v1915_v37  ;;  %v1919_v60 = vadd.f32 %v1858_v29, %v15062_v62  ;;  %21432 = vst [vmem:[#allocation130_spill] sm:$0xff] %v15716_v24  ;;  %v15719_v35 = vpop.permute.xlu1 %1711  ;;  %v21434_v54 = vld [vmem:[#allocation133_spill] sm:$0xff]  ;;  %v21441_v48 = vld [vmem:[#allocation132_spill] sm:$0xff] }
 0x249   :  { %21427 = vst [vmem:[#allocation181_spill] sm:$0xff] %v15698_v59  ;;  %v15710_v11 = vmul.f32 %v14444_v15, %v21413_v7  ;;  %v1860_v31 = vmul.f32 %v14762_v57, %v21431_v40  ;;  %v2287_v46 = vmul.f32 %v14449_v45, %v21431_v40  ;;  %13254 = vset.pattern.permute.xlu1 %v21118_v12  ;;  %21433 = vst [vmem:[#allocation227_spill] sm:$0xff] %v15719_v35  ;;  %v21437_v59 = vld [vmem:[#allocation182_spill] sm:$0xff] }
 0x24a   :  { %21428 = vst [vmem:[#allocation224_spill] sm:$0xff] %v15701_v4  ;;  %21429 = vst [vmem:[#allocation225_spill] sm:$0xff] %v15704_v63  ;;  %v1172_v37 = vadd.f32 %v1111_v28, %v15065_v26  ;;  %v1489_v62 = vmul.f32 %v14449_v45, %v21424_v18  ;;  %v1113_v7 = vmul.f32 %v14762_v57, %v21434_v54  ;;  %3184 = vperm.xlu1 %13254, %v13336_v47   ;;  %v21570_v4 = vld [vmem:[#allocation188_spill] sm:$0xff] }
 0x24b   :  { %21430 = vst [vmem:[#allocation226_spill] sm:$0xff] %v15710_v11  ;;  %v15727_v29 = vadd.f32 %v2285_v61, %v21435_v9  ;;  %v15730_v63 = vadd.f32 %v1487_v33, %v21437_v59  ;;  %v15733_v24 = vadd.f32 %v15412_v56, %v1235_v25  ;;  %v1237_v35 = vmul.f32 %v15350_v8, %v1170_v2 }
 0x24c   :  { %v1978_v26 = vmul.f32 %v15350_v8, %v1917_v36  ;;  %v15739_v28 = vmul.f32 %v14444_v15, %v21431_v40  ;;  %v1862_v0 = vmul.f32 %v14762_v57, %v21441_v48  ;;  %v2289_v61 = vmul.f32 %v14449_v45, %v21441_v48  ;;  %188 = vperm.xlu0 %13306, %v13336_v47   ;;  %v21444_v36 = vld [vmem:[#allocation135_spill] sm:$0xff]  ;;  %v15755_v40 = vpop.permute.xlu0 %3352  ;;  %v15757_v9 = vpop.permute.xlu1 %1719  ;;  %v21449_v47 = vld [vmem:[#allocation185_spill] sm:$0xff] }
 0x24d   :  { %21436 = vst [vmem:[#allocation133_spill] sm:$0xff] %v15727_v29  ;;  %21438 = vst [vmem:[#allocation184_spill] sm:$0xff] %v15730_v63  ;;  %v15746_v33 = vadd.f32 %v15412_v56, %v1976_v20  ;;  %v1921_v25 = vadd.f32 %v1860_v31, %v15095_v38  ;;  %v15751_v2 = vmul.f32 %v14444_v15, %v21424_v18  ;;  %v13337_v18 = vld [vmem:[%s20644_s0 + $0x88] sm:$0xff] }
 0x24e   :  { %21439 = vst [vmem:[#allocation182_spill] sm:$0xff] %v15733_v24  ;;  %21440 = vst [vmem:[#allocation228_spill] sm:$0xff] %v15739_v28  ;;  %v1115_v59 = vmul.f32 %v14762_v57, %v21444_v36  ;;  %v21447_v28 = vld [vmem:[#allocation79_spill] sm:$0xff]  ;;  %v15763_v24 = vadd.f32 %v1489_v62, %v21449_v47  ;;  %v1174_v20 = vadd.f32 %v1113_v7, %v15098_v6  ;;  %3188 = vperm.xlu1 %13254, %v13337_v18   ;;  %v21455_v47 = vld [vmem:[#allocation134_spill] sm:$0xff] }
 0x24f   :  { %21442 = vst [vmem:[#allocation132_spill] sm:$0xff] %v15746_v33  ;;  %21443 = vst [vmem:[#allocation229_spill] sm:$0xff] %v15751_v2  ;;  %v15760_v29 = vadd.f32 %v2287_v46, %v21447_v28  ;;  %v1491_v38 = vmul.f32 %v14449_v45, %v21434_v54  ;;  %v1239_v31 = vmul.f32 %v15350_v8, %v1172_v37  ;;  %v21545_v2 = vld [vmem:[#allocation50_spill] sm:$0xff] }
 0x250   :  { %21445 = vst [vmem:[#allocation135_spill] sm:$0xff] %v15755_v40  ;;  %21446 = vst [vmem:[#allocation230_spill] sm:$0xff] %v15757_v9  ;;  %v15774_v40 = vmul.f32 %v14444_v15, %v21441_v48  ;;  %v15777_v46 = vadd.f32 %v15412_v56, %v1237_v35  ;;  %v15780_v62 = vadd.f32 %v15412_v56, %v1978_v26  ;;  %v13338_v48 = vld [vmem:[%s20644_s0 + $0x90] sm:$0xff]  ;;  %v15803_v18 = vpop.permute.xlu1 %1727  ;;  %v21459_v9 = vld [vmem:[#allocation187_spill] sm:$0xff] }
 0x251   :  { %21448 = vst [vmem:[#allocation79_spill] sm:$0xff] %v15760_v29  ;;  %21450 = vst [vmem:[#allocation185_spill] sm:$0xff] %v15763_v24  ;;  %v1980_v6 = vmul.f32 %v15350_v8, %v1919_v60  ;;  %v1923_v7 = vadd.f32 %v1862_v0, %v15113_v16  ;;  %v15786_v28 = vmul.f32 %v14444_v15, %v21434_v54  ;;  %198 = vperm.xlu0 %13306, %v13338_v48   ;;  %v21457_v54 = vld [vmem:[#allocation137_spill] sm:$0xff] }
 0x252   :  { %21451 = vst [vmem:[#allocation231_spill] sm:$0xff] %v15774_v40  ;;  %21452 = vst [vmem:[#allocation232_spill] sm:$0xff] %v15777_v46  ;;  %v1864_v37 = vmul.f32 %v14762_v57, %v21455_v47  ;;  %v15794_v35 = vadd.f32 %v2289_v61, %v15106_v53  ;;  %v2291_v60 = vmul.f32 %v14449_v45, %v21455_v47  ;;  %13255 = vset.pattern.permute.xlu1 %v21111_v42 }
 0x253   :  { %21453 = vst [vmem:[#allocation233_spill] sm:$0xff] %v15780_v62  ;;  %21454 = vst [vmem:[#allocation234_spill] sm:$0xff] %v15786_v28  ;;  %v1176_v16 = vadd.f32 %v1115_v59, %v15124_v17  ;;  %v1493_v0 = vmul.f32 %v14449_v45, %v21444_v36  ;;  %v1117_v26 = vmul.f32 %v14762_v57, %v21457_v54  ;;  %v15808_v62 = vpop.permute.xlu0 %2396  ;;  %2460 = vperm.xlu1 %13255, %v13338_v48  }
 0x254   :  { %21456 = vst [vmem:[#allocation134_spill] sm:$0xff] %v15794_v35  ;;  %21458 = vst [vmem:[#allocation137_spill] sm:$0xff] %v15803_v18  ;;  %v15806_v40 = vadd.f32 %v1491_v38, %v21459_v9  ;;  %v15812_v53 = vadd.f32 %v15412_v56, %v1239_v31  ;;  %v1241_v17 = vmul.f32 %v15350_v8, %v1174_v20  ;;  %v21463_v35 = vld [vmem:[#allocation136_spill] sm:$0xff]  ;;  %v15840_v20 = vld [vmem:[%s20646_s1 + $0x1] ss:$0 sm:$0xff]  ;;  %v15853_v48 = vpop.permute.xlu1 %1735 }
 0x255   :  { %v1982_v61 = vmul.f32 %v15350_v8, %v1921_v25  ;;  %v15818_v59 = vmul.f32 %v14444_v15, %v21455_v47  ;;  %v1866_v18 = vmul.f32 %v14762_v57, %v21463_v35  ;;  %v2293_v9 = vmul.f32 %v14449_v45, %v21463_v35  ;;  %v15831_v25 = vld [vmem:[%s20646_s1] ss:$0 sm:$0xff]  ;;  %21468 = vst [vmem:[#allocation238_spill] sm:$0xff] %v15853_v48 }
 0x256   :  { %21460 = vst [vmem:[#allocation187_spill] sm:$0xff] %v15806_v40  ;;  %21461 = vst [vmem:[#allocation235_spill] sm:$0xff] %v15812_v53  ;;  %v15825_v38 = vadd.f32 %v15412_v56, %v1980_v6  ;;  %v1925_v31 = vadd.f32 %v1864_v37, %v15142_v44  ;;  %v15835_v15 = vmul.f32 %v15831_v25, %v21444_v36  ;;  %v21466_v6 = vld [vmem:[#allocation139_spill] sm:$0xff] }
 0x257   :  { %21462 = vst [vmem:[#allocation236_spill] sm:$0xff] %v15818_v59  ;;  %v1495_v45 = vmul.f32 %v15840_v20, %v21457_v54  ;;  %v1119_v44 = vmul.f32 %v14762_v57, %v21466_v6  ;;  %v13341_v47 = vld [vmem:[%s20644_s0 + $0xa0] sm:$0xff]  ;;  %v15850_v37 = vadd.f32 %v1493_v0, %v15117_v21  ;;  %v1178_v36 = vadd.f32 %v1117_v26, %v15145_v27  ;;  %v15863_v33 = vpop.permute.xlu0 %2408 }
 0x258   :  { %21464 = vst [vmem:[#allocation136_spill] sm:$0xff] %v15825_v38  ;;  %21465 = vst [vmem:[#allocation237_spill] sm:$0xff] %v15835_v15  ;;  %208 = vperm.xlu0 %13306, %v13341_v47   ;;  %v15856_v59 = vadd.f32 %v2291_v60, %v15132_v30  ;;  %v1243_v38 = vmul.f32 %v15350_v8, %v1176_v16  ;;  %v15861_v29 = vmul.f32 %v15831_v25, %v21463_v35  ;;  %v21474_v60 = vld [vmem:[#allocation138_spill] sm:$0xff] }
 0x259   :  { %21467 = vst [vmem:[#allocation139_spill] sm:$0xff] %v15850_v37  ;;  %v15866_v53 = vadd.f32 %v15412_v56, %v1241_v17  ;;  %v15869_v21 = vadd.f32 %v15412_v56, %v1982_v61  ;;  %v1984_v27 = vmul.f32 %v15350_v8, %v1923_v7  ;;  %v1927_v0 = vadd.f32 %v1866_v18, %v15174_v55  ;;  %v13342_v16 = vld [vmem:[%s20644_s0 + $0x98] sm:$0xff]  ;;  %v21536_v37 = vld [vmem:[#allocation35_spill] sm:$0xff] }
 0x25a   :  { %21469 = vst [vmem:[#allocation239_spill] sm:$0xff] %v15856_v59  ;;  %21470 = vst [vmem:[#allocation240_spill] sm:$0xff] %v15861_v29  ;;  %v15875_v30 = vmul.f32 %v15831_v25, %v21457_v54  ;;  %v1868_v35 = vmul.f32 %v14762_v57, %v21474_v60  ;;  %2464 = vperm.xlu1 %13255, %v13342_v16   ;;  %v21475_v26 = vld [vmem:[#allocation190_spill] sm:$0xff]  ;;  %v21477_v61 = vld [vmem:[#allocation189_spill] sm:$0xff]  ;;  %v2295_v55 = vmul.f32 %v15840_v20, %v21474_v60 }
 0x25b   :  { %21471 = vst [vmem:[#allocation241_spill] sm:$0xff] %v15866_v53  ;;  %21472 = vst [vmem:[#allocation242_spill] sm:$0xff] %v15869_v21  ;;  %v15883_v17 = vadd.f32 %v2293_v9, %v21475_v26  ;;  %v15886_v48 = vadd.f32 %v1495_v45, %v21477_v61  ;;  %v1180_v7 = vadd.f32 %v1119_v44, %v15177_v3  ;;  %v21479_v54 = vld [vmem:[#allocation141_spill] sm:$0xff]  ;;  %v15901_v45 = vpop.permute.xlu1 %1743  ;;  %v21484_v59 = vld [vmem:[#allocation143_spill] sm:$0xff] }
 0x25c   :  { %21473 = vst [vmem:[#allocation243_spill] sm:$0xff] %v15875_v30  ;;  %v1121_v18 = vmul.f32 %v14762_v57, %v21479_v54  ;;  %v15896_v29 = vld [vmem:[%s20644_s0 + $0xb0] sm:$0xff]  ;;  %v1497_v9 = vmul.f32 %v15840_v20, %v21466_v6  ;;  %21480 = vst [vmem:[#allocation189_spill] sm:$0xff] %v15901_v45  ;;  %v15904_v26 = vadd.f32 %v15412_v56, %v1243_v38  ;;  %v21493_v53 = vld [vmem:[#allocation195_spill] sm:$0xff] }
 0x25d   :  { %21476 = vst [vmem:[#allocation138_spill] sm:$0xff] %v15883_v17  ;;  %21478 = vst [vmem:[#allocation190_spill] sm:$0xff] %v15886_v48  ;;  %218 = vperm.xlu0 %13306, %v15896_v29   ;;  %v1245_v3 = vmul.f32 %v15350_v8, %v1178_v36  ;;  %v1986_v44 = vmul.f32 %v15350_v8, %v1925_v31  ;;  %v15910_v61 = vmul.f32 %v15831_v25, %v21474_v60  ;;  %v21483_v17 = vld [vmem:[#allocation140_spill] sm:$0xff]  ;;  %v15916_v48 = vpop.permute.xlu0 %2420 }
 0x25e   :  { %21481 = vst [vmem:[#allocation141_spill] sm:$0xff] %v15904_v26  ;;  %v1870_v21 = vmul.f32 %v14762_v57, %v21483_v17  ;;  %v1123_v30 = vmul.f32 %v14762_v57, %v21484_v59  ;;  %v15919_v45 = vadd.f32 %v15412_v56, %v1984_v27  ;;  %v1929_v38 = vadd.f32 %v1868_v35, %v15201_v49  ;;  %v15935_v27 = vld [vmem:[%s20644_s0 + $0xc0] sm:$0xff] }
 0x25f   :  { %21482 = vst [vmem:[#allocation244_spill] sm:$0xff] %v15910_v61  ;;  %v15924_v31 = vmul.f32 %v15831_v25, %v21466_v6  ;;  %v2297_v36 = vmul.f32 %v15840_v20, %v21483_v17  ;;  %v1499_v60 = vmul.f32 %v15840_v20, %v21479_v54  ;;  %13256 = vset.pattern.permute.xlu1 %v21118_v12  ;;  %v21488_v35 = vld [vmem:[#allocation191_spill] sm:$0xff] }
 0x260   :  { %21485 = vst [vmem:[#allocation140_spill] sm:$0xff] %v15919_v45  ;;  %v1182_v61 = vadd.f32 %v1121_v18, %v15204_v23  ;;  %3196 = vperm.xlu1 %13256, %v13342_v16   ;;  %v15939_v49 = vadd.f32 %v2295_v55, %v15187_v5  ;;  %v1247_v6 = vmul.f32 %v15350_v8, %v1180_v7  ;;  %v21496_v7 = vld [vmem:[#allocation198_spill] sm:$0xff] }
 0x261   :  { %21486 = vst [vmem:[#allocation143_spill] sm:$0xff] %v15924_v31  ;;  %228 = vperm.xlu0 %13306, %v15935_v27   ;;  %v15943_v45 = vadd.f32 %v1497_v9, %v21488_v35  ;;  %v15945_v31 = vpop.permute.xlu1 %1751  ;;  %v15948_v23 = vadd.f32 %v15412_v56, %v1245_v3  ;;  %v15951_v18 = vadd.f32 %v15412_v56, %v1986_v44  ;;  %v15964_v35 = vpop.permute.xlu0 %2432  ;;  %v21497_v3 = vld [vmem:[#allocation85_spill] sm:$0xff]  ;;  %v21499_v44 = vld [vmem:[#allocation142_spill] sm:$0xff] }
 0x262   :  { %21487 = vst [vmem:[#allocation245_spill] sm:$0xff] %v15939_v49  ;;  %21490 = vst [vmem:[#allocation246_spill] sm:$0xff] %v15945_v31  ;;  %v1988_v26 = vmul.f32 %v15350_v8, %v1927_v0  ;;  %v1931_v16 = vadd.f32 %v1870_v21, %v21493_v53  ;;  %v15957_v5 = vmul.f32 %v15831_v25, %v21483_v17  ;;  %v21500_v21 = vld [vmem:[#allocation194_spill] sm:$0xff] }
 0x263   :  { %21489 = vst [vmem:[#allocation191_spill] sm:$0xff] %v15943_v45  ;;  %21491 = vst [vmem:[#allocation247_spill] sm:$0xff] %v15948_v23  ;;  %v15961_v55 = vmul.f32 %v15831_v25, %v21479_v54  ;;  %v1184_v9 = vadd.f32 %v1123_v30, %v21496_v7  ;;  %v15967_v31 = vadd.f32 %v1499_v60, %v21497_v3  ;;  %v15981_v30 = vld [vmem:[%s20644_s0 + $0xd0] sm:$0xff] }
 0x264   :  { %21492 = vst [vmem:[#allocation248_spill] sm:$0xff] %v15951_v18  ;;  %21494 = vst [vmem:[#allocation195_spill] sm:$0xff] %v15957_v5  ;;  %v1872_v0 = vmul.f32 %v14762_v57, %v21499_v44  ;;  %v2299_v53 = vmul.f32 %v15840_v20, %v21499_v44  ;;  %v15974_v17 = vadd.f32 %v2297_v36, %v21500_v21  ;;  %3200 = vperm.xlu1 %13256, %v13341_v47   ;;  %v21504_v3 = vld [vmem:[#allocation144_spill] sm:$0xff]  ;;  %v21507_v47 = vld [vmem:[#allocation145_spill] sm:$0xff] }
 0x265   :  { %21495 = vst [vmem:[#allocation249_spill] sm:$0xff] %v15961_v55  ;;  %21498 = vst [vmem:[#allocation198_spill] sm:$0xff] %v15967_v31  ;;  %v1501_v54 = vmul.f32 %v15840_v20, %v21484_v59  ;;  %238 = vperm.xlu0 %13306, %v15981_v30   ;;  %v15985_v60 = vadd.f32 %v15412_v56, %v1247_v6  ;;  %v1249_v7 = vmul.f32 %v15350_v8, %v1182_v61  ;;  %v15994_v5 = vpop.permute.xlu1 %1759  ;;  %v16004_v18 = vpop.permute.xlu0 %2444  ;;  %v21513_v31 = vld [vmem:[#allocation196_spill] sm:$0xff] }
 0x266   :  { %21501 = vst [vmem:[#allocation85_spill] sm:$0xff] %v15974_v17  ;;  %v15990_v36 = vmul.f32 %v15831_v25, %v21499_v44  ;;  %v1874_v21 = vmul.f32 %v14762_v57, %v21504_v3  ;;  %21505 = vst [vmem:[#allocation144_spill] sm:$0xff] %v15994_v5  ;;  %v15997_v17 = vadd.f32 %v15412_v56, %v1988_v26  ;;  %v21510_v5 = vld [vmem:[#allocation173_spill] sm:$0xff] }
 0x267   :  { %21502 = vst [vmem:[#allocation142_spill] sm:$0xff] %v15985_v60  ;;  %v1990_v49 = vmul.f32 %v15350_v8, %v1929_v38  ;;  %v1125_v6 = vmul.f32 %v14762_v57, %v21507_v47  ;;  %v1503_v61 = vmul.f32 %v15840_v20, %v21507_v47  ;;  %v1251_v44 = vmul.f32 %v15350_v8, %v1184_v9  ;;  %v21508_v60 = vld [vmem:[#allocation202_spill] sm:$0xff] }
 0x268   :  { %21503 = vst [vmem:[#allocation194_spill] sm:$0xff] %v15990_v36  ;;  %21506 = vst [vmem:[#allocation250_spill] sm:$0xff] %v15997_v17  ;;  %v1992_v36 = vmul.f32 %v15350_v8, %v1931_v16  ;;  %v1933_v23 = vadd.f32 %v1872_v0, %v21508_v60  ;;  %v16011_v26 = vmul.f32 %v15831_v25, %v21484_v59  ;;  %v21511_v17 = vld [vmem:[#allocation200_spill] sm:$0xff]  ;;  %v16026_v16 = vld [vmem:[%s20644_s0 + $0xe0] sm:$0xff]  ;;  %13257 = vset.pattern.permute.xlu1 %v21111_v42 }
 0x269   :  { %v2265_v38 = vmul.f32 %v15840_v20, %v21510_v5  ;;  %v16016_v55 = vadd.f32 %v2299_v53, %v21511_v17  ;;  %v16019_v45 = vadd.f32 %v1501_v54, %v21513_v31  ;;  %v2301_v9 = vmul.f32 %v15840_v20, %v21504_v3  ;;  %248 = vperm.xlu0 %13306, %v16026_v16   ;;  %v21516_v0 = vld [vmem:[#allocation205_spill] sm:$0xff]  ;;  %v13347_v54 = vld [vmem:[%s20644_s0 + $0xa8] sm:$0xff] }
 0x26a   :  { %21509 = vst [vmem:[#allocation145_spill] sm:$0xff] %v16011_v26  ;;  %v16031_v59 = vadd.f32 %v15412_v56, %v1249_v7  ;;  %v16034_v53 = vadd.f32 %v1874_v21, %v21516_v0  ;;  %v16038_v31 = vmul.f32 %v15831_v25, %v21504_v3  ;;  %v16042_v17 = vmul.f32 %v15831_v25, %v21507_v47  ;;  %v21520_v7 = vld [vmem:[#allocation203_spill] sm:$0xff]  ;;  %v21521_v21 = vld [vmem:[#allocation201_spill] sm:$0xff]  ;;  %v2389_v3 = vpop.permute.xlu1 %2388 }
 0x26b   :  { %21512 = vst [vmem:[#allocation202_spill] sm:$0xff] %v16016_v55  ;;  %21514 = vst [vmem:[#allocation173_spill] sm:$0xff] %v16019_v45  ;;  %2472 = vperm.xlu1 %13257, %v13347_v54   ;;  %v16048_v60 = vadd.f32 %v15412_v56, %v1990_v49  ;;  %v1186_v55 = vadd.f32 %v1125_v6, %v21520_v7  ;;  %v16052_v0 = vadd.f32 %v1503_v61, %v21521_v21  ;;  %v21527_v26 = vld [vmem:[#allocation147_spill] sm:$0xff] }
 0x26c   :  { %21515 = vst [vmem:[#allocation200_spill] sm:$0xff] %v16031_v59  ;;  %21517 = vst [vmem:[#allocation196_spill] sm:$0xff] %v16038_v31  ;;  %v16054_v59 = vpop.permute.xlu0 %2456  ;;  %v16057_v31 = vadd.f32 %v15412_v56, %v1251_v44  ;;  %v16060_v47 = vadd.f32 %v15412_v56, %v1992_v36  ;;  %v1127_v49 = vmul.f32 %v14762_v57, %v21527_v26  ;;  %v16076_v36 = vld [vmem:[%s20644_s0 + $0xf0] sm:$0xff] }
 0x26d   :  { %21518 = vst [vmem:[#allocation205_spill] sm:$0xff] %v16042_v17  ;;  %21519 = vst [vmem:[#allocation251_spill] sm:$0xff] %v16048_v60  ;;  %v21526_v17 = vld [vmem:[#allocation146_spill] sm:$0xff]  ;;  %v21528_v60 = vld [vmem:[#allocation164_spill] sm:$0xff]  ;;  %v2631_v61 = vmul.f32 %v14762_v57, %v2389_v3  ;;  %v2936_v44 = vmul.f32 %v15831_v25, %v21510_v5  ;;  %v2997_v21 = vmul.f32 %v15840_v20, %v2389_v3  ;;  %258 = vperm.xlu0 %13306, %v16076_v36  }
 0x26e   :  { %21522 = vst [vmem:[#allocation203_spill] sm:$0xff] %v16052_v0  ;;  %21523 = vst [vmem:[#allocation201_spill] sm:$0xff] %v16054_v59  ;;  %v1876_v54 = vmul.f32 %v14762_v57, %v21526_v17  ;;  %v2326_v6 = vadd.f32 %v2265_v38, %v21528_v60  ;;  %v2303_v7 = vmul.f32 %v15840_v20, %v21526_v17  ;;  %v21531_v38 = vld [vmem:[#allocation178_spill] sm:$0xff] }
 0x26f   :  { %21524 = vst [vmem:[#allocation252_spill] sm:$0xff] %v16057_v31  ;;  %21525 = vst [vmem:[#allocation253_spill] sm:$0xff] %v16060_v47  ;;  %v21529_v47 = vld [vmem:[#allocation89_spill] sm:$0xff]  ;;  %v1505_v57 = vmul.f32 %v15840_v20, %v21527_v26  ;;  %v2267_v60 = vmul.f32 %v15840_v20, %v21531_v38  ;;  %2476 = vperm.xlu1 %13257, %v15896_v29   ;;  %v1994_v3 = vmul.f32 %v15350_v8, %v1933_v23  ;;  %v2393_v23 = vpop.permute.xlu1 %2392 }
 0x270   :  { %v16080_v31 = vadd.f32 %v2301_v9, %v21529_v47  ;;  %v2692_v0 = vadd.f32 %v2631_v61, %v2326_v6  ;;  %v16090_v45 = vmul.f32 %v15831_v25, %v21526_v17  ;;  %v16094_v15 = vmul.f32 %v15831_v25, %v21527_v26  ;;  %v16099_v9 = vld [vmem:[%s20646_s1 + $0x2] ss:$0 sm:$0xff]  ;;  %v21534_v47 = vld [vmem:[#allocation18_spill] sm:$0xff] }
 0x271   :  { %v3363_v6 = vmul.f32 %v16099_v9, %v21534_v47  ;;  %v3058_v61 = vadd.f32 %v2997_v21, %v2936_v44  ;;  %v16106_v28 = vadd.f32 %v1876_v54, %v21536_v37  ;;  %v21537_v17 = vld [vmem:[#allocation206_spill] sm:$0xff]  ;;  %v2633_v26 = vmul.f32 %v16099_v9, %v15808_v62  ;;  %v21538_v37 = vld [vmem:[#allocation209_spill] sm:$0xff]  ;;  %v21542_v47 = vld [vmem:[#allocation148_spill] sm:$0xff] }
 0x272   :  { %21530 = vst [vmem:[#allocation146_spill] sm:$0xff] %v16080_v31  ;;  %21532 = vst [vmem:[#allocation147_spill] sm:$0xff] %v16090_v45  ;;  %v16103_v31 = vpop.permute.xlu0 %2468  ;;  %v1188_v45 = vadd.f32 %v1127_v49, %v21537_v17  ;;  %v2632_v46 = vmul.f32 %v16099_v9, %v2393_v23  ;;  %v2998_v59 = vmul.f32 %v15840_v20, %v2393_v23  ;;  %v16117_v44 = vld [vmem:[%s20644_s0 + $0x100] sm:$0xff]  ;;  %v21540_v49 = vld [vmem:[#allocation204_spill] sm:$0xff] }
 0x273   :  { %21533 = vst [vmem:[#allocation164_spill] sm:$0xff] %v16094_v15  ;;  %21535 = vst [vmem:[#allocation89_spill] sm:$0xff] %v16103_v31  ;;  %v2753_v15 = vmul.f32 %v15350_v8, %v2692_v0  ;;  %v3424_v40 = vadd.f32 %v3363_v6, %v3058_v61  ;;  %268 = vperm.xlu0 %13306, %v16117_v44   ;;  %v16121_v54 = vadd.f32 %v2303_v7, %v21538_v37  ;;  %v21543_v6 = vld [vmem:[#allocation217_spill] sm:$0xff] }
 0x274   :  { %v16124_v21 = vadd.f32 %v1505_v57, %v21540_v49  ;;  %v1878_v0 = vmul.f32 %v16099_v9, %v21542_v47  ;;  %v2328_v61 = vadd.f32 %v2267_v60, %v21543_v6  ;;  %13258 = vset.pattern.permute.xlu1 %v21118_v12  ;;  %v1253_v23 = vmul.f32 %v15350_v8, %v1186_v55  ;;  %v21544_v17 = vld [vmem:[#allocation149_spill] sm:$0xff]  ;;  %v3125_v49 = vpop.permute.xlu1 %3124 }
 0x275   :  { %21539 = vst [vmem:[#allocation178_spill] sm:$0xff] %v16121_v54  ;;  %v1129_v31 = vmul.f32 %v16099_v9, %v21544_v17  ;;  %v2693_v24 = vadd.f32 %v2632_v46, %v21545_v2  ;;  %3208 = vperm.xlu1 %13258, %v15896_v29   ;;  %v2814_v7 = vadd.f32 %v15412_v56, %v2753_v15  ;;  %v21548_v46 = vld [vmem:[#allocation40_spill] sm:$0xff] }
 0x276   :  { %21541 = vst [vmem:[#allocation18_spill] sm:$0xff] %v16124_v21  ;;  %v16134_v11 = vpop.permute.xlu0 %2480  ;;  %v3485_v57 = vmul.f32 %v15350_v8, %v3424_v40  ;;  %v1507_v60 = vmul.f32 %v15840_v20, %v21544_v17  ;;  %v2694_v37 = vadd.f32 %v2633_v26, %v2328_v61  ;;  %v2999_v55 = vmul.f32 %v15840_v20, %v15808_v62  ;;  %v16152_v40 = vld [vmem:[%s20644_s0 + $0x110] sm:$0xff]  ;;  %v21550_v62 = vld [vmem:[#allocation94_spill] sm:$0xff] }
 0x277   :  { %21546 = vst [vmem:[#allocation35_spill] sm:$0xff] %v16134_v11  ;;  %v16144_v6 = vadd.f32 %v15412_v56, %v1994_v3  ;;  %v2754_v2 = vmul.f32 %v15350_v8, %v2693_v24  ;;  %v3059_v54 = vadd.f32 %v2998_v59, %v21548_v46  ;;  %v3364_v29 = vmul.f32 %v16099_v9, %v3125_v49  ;;  %v21552_v61 = vld [vmem:[#allocation30_spill] sm:$0xff] }
 0x278   :  { %21549 = vst [vmem:[#allocation209_spill] sm:$0xff] %v16152_v40  ;;  %278 = vperm.xlu0 %13306, %v16152_v40   ;;  %v3546_v15 = vadd.f32 %v15412_v56, %v3485_v57  ;;  %v16157_v26 = vadd.f32 %v1878_v0, %v21550_v62  ;;  %v16161_v3 = vmul.f32 %v15840_v20, %v21542_v47  ;;  %v13352_v0 = vld [vmem:[%s20644_s0 + $0xb8] sm:$0xff]  ;;  %v2875_v57 = vmax.f32 %v2814_v7, 0.0  ;;  %v3129_v11 = vpop.permute.xlu1 %3128 }
 0x279   :  { %21547 = vst [vmem:[#allocation206_spill] sm:$0xff] %v16144_v6  ;;  %v16165_v24 = vmul.f32 %v15831_v25, %v21544_v17  ;;  %v2938_v59 = vmul.f32 %v15831_v25, %v21531_v38  ;;  %v16170_v49 = vadd.f32 %v1129_v31, %v21552_v61  ;;  %v3425_v46 = vadd.f32 %v3364_v29, %v3059_v54  ;;  %v21554_v47 = vld [vmem:[#allocation210_spill] sm:$0xff] }
 0x27a   :  { %v16172_v6 = vpop.permute.xlu0 %2492  ;;  %3212 = vperm.xlu1 %13258, %v13352_v0   ;;  %v3607_v62 = vmax.f32 %v3546_v15, 0.0  ;;  %v16178_v21 = vadd.f32 %v1507_v60, %v21554_v47  ;;  %v2755_v17 = vmul.f32 %v15350_v8, %v2694_v37  ;;  %v16182_v31 = vadd.f32 %v15412_v56, %v1253_v23  ;;  %v16189_v61 = vld [vmem:[%s20644_s0 + $0x120] sm:$0xff] }
 0x27b   :  { %21551 = vst [vmem:[#allocation204_spill] sm:$0xff] %v16165_v24  ;;  %21553 = vst [vmem:[#allocation217_spill] sm:$0xff] %v16172_v6  ;;  %v3060_v24 = vadd.f32 %v2999_v55, %v2938_v59  ;;  %v3486_v54 = vmul.f32 %v15350_v8, %v3425_v46  ;;  %v3365_v29 = vmul.f32 %v16099_v9, %v3129_v11  ;;  %v21558_v60 = vld [vmem:[#allocation150_spill] sm:$0xff]  ;;  %v21560_v59 = vld [vmem:[#allocation151_spill] sm:$0xff] }
 0x27c   :  { %21555 = vst [vmem:[#allocation149_spill] sm:$0xff] %v16178_v21  ;;  %21556 = vst [vmem:[#allocation50_spill] sm:$0xff] %v16182_v31  ;;  %288 = vperm.xlu0 %13306, %v16189_v61   ;;  %v3668_v47 = vmax.f32 %v2875_v57, %v3607_v62  ;;  %v2815_v7 = vadd.f32 %v15412_v56, %v2754_v2  ;;  %v1880_v37 = vmul.f32 %v16099_v9, %v21558_v60  ;;  %v21559_v55 = vld [vmem:[#allocation78_spill] sm:$0xff] }
 0x27d   :  { %21557 = vst [vmem:[#allocation40_spill] sm:$0xff] %v16189_v61  ;;  %v2268_v23 = vmul.f32 %v15840_v20, %v21559_v55  ;;  %v1255_v15 = vmul.f32 %v15350_v8, %v1188_v45  ;;  %v1996_v11 = vmul.f32 %v15350_v8, %v16034_v53  ;;  %v1131_v46 = vmul.f32 %v16099_v9, %v21560_v59  ;;  %v21567_v61 = vld [vmem:[#allocation64_spill] sm:$0xff] }
 0x27e   :  { %v3426_v0 = vadd.f32 %v3365_v29, %v3060_v24  ;;  %11953 = vmatmul.mubr.f32.vlgmr.msra.gmra.mrb[0].mxu1 %v3668_v47  ;;  %v16202_v21 = vpop.permute.xlu0 %2504  ;;  %13259 = vset.pattern.permute.xlu1 %v21111_v42  ;;  %v3547_v2 = vadd.f32 %v15412_v56, %v3486_v54  ;;  %v1509_v57 = vmul.f32 %v15840_v20, %v21560_v59  ;;  %v21563_v53 = vmov 0.0   ;;  %v16222_v54 = vld [vmem:[%s20644_s0 + $0x130] sm:$0xff] }
 0x27f   :  { %21561 = vst [vmem:[#allocation94_spill] sm:$0xff] %v16202_v21  ;;  %v16210_v45 = vmul.f32 %v15831_v25, %v21560_v59  ;;  %2484 = vperm.xlu1 %13259, %v15935_v27   ;;  %11955 = vmatprep.mubr.msk.f32.mxu1 %vm13430_vm0, %v21563_v53  ;;  %v1998_v29 = vmul.f32 %v15350_v8, %v16106_v28  ;;  %21565 = vst [vmem:[#allocation210_spill] sm:$0xff] %v16222_v54  ;;  %v2401_v59 = vpop.permute.xlu1 %2400  ;;  %v2876_v60 = vmax.f32 %v2815_v7, 0.0  ;;  %v21566_v21 = vld [vmem:[#allocation42_spill] sm:$0xff] }
 0x280   :  { %v3487_v47 = vmul.f32 %v15350_v8, %v3426_v0  ;;  %298 = vperm.xlu0 %13306, %v16222_v54   ;;  %v3608_v27 = vmax.f32 %v3547_v2, 0.0  ;;  %v2939_v62 = vmul.f32 %v15831_v25, %v21559_v55  ;;  %v2329_v31 = vadd.f32 %v2268_v23, %v15489_v32 }
 0x281   :  { %21562 = vst [vmem:[#allocation30_spill] sm:$0xff] %v16210_v45  ;;  %v2816_v45 = vadd.f32 %v15412_v56, %v2755_v17  ;;  %v2634_v28 = vmul.f32 %v16099_v9, %v2401_v59  ;;  %v3000_v0 = vmul.f32 %v15840_v20, %v2401_v59  ;;  %v16232_v6 = vadd.f32 %v1880_v37, %v21566_v21  ;;  %v21569_v17 = vld [vmem:[#allocation25_spill] sm:$0xff]  ;;  %v13355_v21 = vld [vmem:[%s20644_s0 + $0xc8] sm:$0xff] }
 0x282   :  { %v1192_v24 = vadd.f32 %v1131_v46, %v21567_v61  ;;  %v16235_v54 = vpop.permute.xlu0 %2516  ;;  %v3669_v7 = vmax.f32 %v2876_v60, %v3608_v27  ;;  %v3548_v2 = vadd.f32 %v15412_v56, %v3487_v47  ;;  %v3366_v63 = vmul.f32 %v16099_v9, %v21569_v17  ;;  %v21571_v37 = vld [vmem:[#allocation153_spill] sm:$0xff]  ;;  %v16250_v60 = vld [vmem:[%s20644_s0 + $0x140] sm:$0xff] }
 0x283   :  { %21568 = vst [vmem:[#allocation78_spill] sm:$0xff] %v16235_v54  ;;  %v2270_v32 = vmul.f32 %v15840_v20, %v21570_v4  ;;  %v2695_v23 = vadd.f32 %v2634_v28, %v2329_v31  ;;  %v3061_v40 = vadd.f32 %v3000_v0, %v2939_v62  ;;  %2488 = vperm.xlu1 %13259, %v13355_v21   ;;  %v2405_v46 = vpop.permute.xlu1 %2404  ;;  %v2877_v47 = vmax.f32 %v2816_v45, 0.0  ;;  %v21573_v17 = vld [vmem:[#allocation39_spill] sm:$0xff] }
 0x284   :  { %v1133_v61 = vmul.f32 %v16099_v9, %v21571_v37  ;;  %308 = vperm.xlu0 %13306, %v16250_v60   ;;  %11956 = vmatmul.mubr.f32.gmra.mrb[2].mxu1 %v3669_v7  ;;  %v3609_v31 = vmax.f32 %v3548_v2, 0.0  ;;  %v16254_v62 = vadd.f32 %v15412_v56, %v1255_v15  ;;  %v2636_v59 = vmul.f32 %v16099_v9, %v15863_v33 }
 0x285   :  { %v2756_v27 = vmul.f32 %v15350_v8, %v2695_v23  ;;  %v3427_v28 = vadd.f32 %v3366_v63, %v3061_v40  ;;  %v2635_v0 = vmul.f32 %v16099_v9, %v2405_v46  ;;  %11958 = vmatprep.mubr.msk.f32.mxu1 %vm13430_vm0, %v21563_v53  ;;  %v16263_v54 = vadd.f32 %v1509_v57, %v21573_v17  ;;  %v21574_v23 = vld [vmem:[#allocation166_spill] sm:$0xff] }
 0x286   :  { %21572 = vst [vmem:[#allocation151_spill] sm:$0xff] %v16254_v62  ;;  %v3001_v45 = vmul.f32 %v15840_v20, %v2405_v46  ;;  %v16266_v7 = vpop.permute.xlu0 %2528  ;;  %v3670_v15 = vmax.f32 %v2877_v47, %v3609_v31  ;;  %v1257_v2 = vmul.f32 %v15350_v8, %v16170_v49  ;;  %v2331_v62 = vadd.f32 %v2270_v32, %v15514_v22  ;;  %v13357_v47 = vld [vmem:[%s20644_s0 + $0x150] sm:$0xff] }
 0x287   :  { %v2696_v63 = vadd.f32 %v2635_v0, %v21574_v23  ;;  %13260 = vset.pattern.permute.xlu1 %v21118_v12  ;;  %v16274_v40 = vadd.f32 %v15412_v56, %v1996_v11  ;;  %v16277_v57 = vadd.f32 %v15412_v56, %v1998_v29  ;;  %v1511_v46 = vmul.f32 %v15840_v20, %v21571_v37  ;;  %v21577_v11 = vld [vmem:[#allocation115_spill] sm:$0xff]  ;;  %v3137_v23 = vpop.permute.xlu1 %3136 }
 0x288   :  { %318 = vperm.xlu0 %13306, %v13357_v47   ;;  %3220 = vperm.xlu1 %13260, %v13355_v21   ;;  %v2817_v22 = vadd.f32 %v15412_v56, %v2756_v27  ;;  %v3488_v49 = vmul.f32 %v15350_v8, %v3427_v28  ;;  %v1194_v31 = vadd.f32 %v1133_v61, %v21577_v11  ;;  %v21579_v47 = vld [vmem:[#allocation114_spill] sm:$0xff]  ;;  %v21580_v61 = vld [vmem:[#allocation155_spill] sm:$0xff] }
 0x289   :  { %21575 = vst [vmem:[#allocation42_spill] sm:$0xff] %v16274_v40  ;;  %21576 = vst [vmem:[#allocation64_spill] sm:$0xff] %v16277_v57  ;;  %v16290_v29 = vmul.f32 %v15831_v25, %v21571_v37  ;;  %v2697_v0 = vadd.f32 %v2636_v59, %v2331_v62  ;;  %v3002_v17 = vmul.f32 %v15840_v20, %v15863_v33  ;;  %11959 = vmatmul.mubr.f32.gmra.mrb[4].mxu1 %v3670_v15  ;;  %v21581_v15 = vld [vmem:[#allocation213_spill] sm:$0xff]  ;;  %v21582_v40 = vld [vmem:[#allocation112_spill] sm:$0xff] }
 0x28a   :  { %v2757_v21 = vmul.f32 %v15350_v8, %v2696_v63  ;;  %v3062_v27 = vadd.f32 %v3001_v45, %v21579_v47  ;;  %v3367_v28 = vmul.f32 %v16099_v9, %v3137_v23  ;;  %v16297_v57 = vpop.permute.xlu0 %2540  ;;  %11961 = vmatprep.mubr.msk.f32.mxu1 %vm13430_vm0, %v21563_v53  ;;  %v3549_v37 = vadd.f32 %v15412_v56, %v3488_v49  ;;  %v13358_v23 = vld [vmem:[%s20644_s0 + $0x160] sm:$0xff] }
 0x28b   :  { %21578 = vst [vmem:[#allocation25_spill] sm:$0xff] %v16290_v29  ;;  %v1135_v62 = vmul.f32 %v16099_v9, %v21580_v61  ;;  %v2941_v33 = vmul.f32 %v15831_v25, %v21570_v4  ;;  %v16307_v59 = vadd.f32 %v15412_v56, %v1257_v2  ;;  %v1259_v45 = vmul.f32 %v15350_v8, %v1192_v24  ;;  %v3141_v24 = vpop.permute.xlu1 %3140 }
 0x28c   :  { %v16311_v63 = vadd.f32 %v1511_v46, %v21581_v15  ;;  %v3428_v11 = vadd.f32 %v3367_v28, %v3062_v27  ;;  %328 = vperm.xlu0 %13306, %v13358_v23   ;;  %3224 = vperm.xlu1 %13260, %v15981_v30   ;;  %v2878_v49 = vmax.f32 %v2817_v22, 0.0  ;;  %v3610_v47 = vmax.f32 %v3549_v37, 0.0  ;;  %v21584_v37 = vld [vmem:[#allocation36_spill] sm:$0xff] }
 0x28d   :  { %v1513_v32 = vmul.f32 %v15840_v20, %v21580_v61  ;;  %v2758_v2 = vmul.f32 %v15350_v8, %v2697_v0  ;;  %v3063_v29 = vadd.f32 %v3002_v17, %v2941_v33  ;;  %v16322_v46 = vadd.f32 %v16161_v3, %v21582_v40  ;;  %v13359_v33 = vld [vmem:[%s20644_s0 + $0x170] sm:$0xff] }
 0x28e   :  { %v3489_v27 = vmul.f32 %v15350_v8, %v3428_v11  ;;  %v3368_v28 = vmul.f32 %v16099_v9, %v3141_v24  ;;  %v16326_v15 = vpop.permute.xlu0 %2552  ;;  %v3671_v30 = vmax.f32 %v2878_v49, %v3610_v47  ;;  %v2818_v22 = vadd.f32 %v15412_v56, %v2757_v21  ;;  %v21586_v11 = vld [vmem:[#allocation113_spill] sm:$0xff] }
 0x28f   :  { %21583 = vst [vmem:[#allocation188_spill] sm:$0xff] %v16322_v46  ;;  %v16330_v23 = vadd.f32 %v1135_v62, %v21584_v37  ;;  %v16334_v0 = vmul.f32 %v15831_v25, %v21580_v61  ;;  %v16337_v17 = vadd.f32 %v15412_v56, %v1259_v45  ;;  %v1261_v3 = vmul.f32 %v15350_v8, %v1194_v31  ;;  %v21591_v45 = vld [vmem:[#allocation37_spill] sm:$0xff] }
 0x290   :  { %v3429_v40 = vadd.f32 %v3368_v28, %v3063_v29  ;;  %11962 = vmatmul.mubr.f32.gmra.mrb[6].mxu1 %v3671_v30  ;;  %338 = vperm.xlu0 %13306, %v13359_v33   ;;  %v3550_v21 = vadd.f32 %v15412_v56, %v3489_v27  ;;  %v2000_v61 = vmul.f32 %v15350_v8, %v16157_v26  ;;  %v13360_v26 = vld [vmem:[%s20644_s0 + $0xd8] sm:$0xff]  ;;  %v2879_v24 = vmax.f32 %v2818_v22, 0.0  ;;  %v21588_v28 = vld [vmem:[#allocation192_spill] sm:$0xff]  ;;  %v13361_v22 = vld [vmem:[%s20644_s0 + $0x180] sm:$0xff] }
 0x291   :  { %21585 = vst [vmem:[#allocation153_spill] sm:$0xff] %v16334_v0  ;;  %v16348_v49 = vadd.f32 %v1513_v32, %v21586_v11  ;;  %v1840_v31 = vmul.f32 %v16099_v9, %v21531_v38  ;;  %v1841_v29 = vmul.f32 %v16099_v9, %v21559_v55  ;;  %13261 = vset.pattern.permute.xlu1 %v21111_v42  ;;  %v2413_v38 = vpop.permute.xlu1 %2412 }
 0x292   :  { %11964 = vmatprep.mubr.msk.f32.mxu1 %vm13430_vm0, %v21563_v53  ;;  %v3490_v47 = vmul.f32 %v15350_v8, %v3429_v40  ;;  %2496 = vperm.xlu1 %13261, %v13360_v26   ;;  %v16362_v32 = vpop.permute.xlu0 %2564  ;;  %v3611_v27 = vmax.f32 %v3550_v21, 0.0  ;;  %v2819_v55 = vadd.f32 %v15412_v56, %v2758_v2  ;;  %v2272_v30 = vmul.f32 %v15840_v20, %v21588_v28 }
 0x293   :  { %21587 = vst [vmem:[#allocation39_spill] sm:$0xff] %v16362_v32  ;;  %v2637_v37 = vmul.f32 %v16099_v9, %v2413_v38  ;;  %v16369_v33 = vadd.f32 %v15412_v56, %v1261_v3  ;;  %v16373_v40 = vmul.f32 %v15350_v8, %v16232_v6  ;;  %v3003_v11 = vmul.f32 %v15840_v20, %v2413_v38  ;;  %v21592_v38 = vld [vmem:[#allocation167_spill] sm:$0xff] }
 0x294   :  { %348 = vperm.xlu0 %13306, %v13361_v22   ;;  %v3672_v2 = vmax.f32 %v2879_v24, %v3611_v27  ;;  %v3551_v21 = vadd.f32 %v15412_v56, %v3490_v47  ;;  %v16381_v26 = vadd.f32 %v15412_v56, %v2000_v61  ;;  %v3369_v3 = vmul.f32 %v16099_v9, %v21591_v45 }
 0x295   :  { %21589 = vst [vmem:[#allocation166_spill] sm:$0xff] %v16373_v40  ;;  %v1838_v8 = vmul.f32 %v16099_v9, %v21510_v5  ;;  %v1901_v6 = vadd.f32 %v1840_v31, %v15465_v10  ;;  %v2698_v62 = vadd.f32 %v2637_v37, %v21592_v38  ;;  %v1902_v32 = vadd.f32 %v1841_v29, %v15497_v1  ;;  %v21593_v40 = vld [vmem:[#allocation158_spill] sm:$0xff]  ;;  %v2417_v56 = vpop.permute.xlu1 %2416  ;;  %v21595_v29 = vld [vmem:[#allocation163_spill] sm:$0xff] }
 0x296   :  { %21590 = vst [vmem:[#allocation115_spill] sm:$0xff] %v16381_v26  ;;  %v3064_v22 = vadd.f32 %v3003_v11, %v21593_v40  ;;  %2500 = vperm.xlu1 %13261, %v16026_v16   ;;  %v16392_v47 = vpop.permute.xlu0 %2568  ;;  %11965 = vmatmul.mubr.f32.gmra.mrb[8].mxu1 %v3672_v2  ;;  %v2880_v61 = vmax.f32 %v2819_v55, 0.0  ;;  %v3612_v24 = vmax.f32 %v3551_v21, 0.0  ;;  %v2639_v45 = vmul.f32 %v16099_v9, %v15916_v48  ;;  %v16399_v10 = vld [vmem:[%s20647_s2] ss:$0 sm:$0xff]  ;;  %v13363_v40 = vld [vmem:[%s20644_s0 + $0x190] sm:$0xff] }
 0x297   :  { %21594 = vst [vmem:[#allocation114_spill] sm:$0xff] %v16392_v47  ;;  %v2759_v1 = vmul.f32 %v16399_v10, %v2698_v62  ;;  %v2333_v5 = vadd.f32 %v2272_v30, %v15553_v41  ;;  %v2638_v31 = vmul.f32 %v16099_v9, %v2417_v56  ;;  %11967 = vmatprep.mubr.msk.f32.mxu1 %vm13430_vm0, %v21563_v53  ;;  %v21596_v11 = vld [vmem:[#allocation117_spill] sm:$0xff] }
 0x298   :  { %v16408_v27 = vmul.f32 %v16099_v9, %v21595_v29  ;;  %v3430_v55 = vadd.f32 %v3369_v3, %v3064_v22  ;;  %v3004_v37 = vmul.f32 %v15840_v20, %v2417_v56  ;;  %358 = vperm.xlu0 %13306, %v13363_v40   ;;  %v3673_v62 = vmax.f32 %v2880_v61, %v3612_v24  ;;  %v16426_v22 = vld [vmem:[%s20648_s3] ss:$0 sm:$0xff]  ;;  %v21598_v56 = vld [vmem:[#allocation123_spill] sm:$0xff] }
 0x299   :  { %v1899_v41 = vadd.f32 %v1838_v8, %v21596_v11  ;;  %v1843_v30 = vmul.f32 %v16099_v9, %v21570_v4  ;;  %v2699_v2 = vadd.f32 %v2638_v31, %v2333_v5  ;;  %v1962_v21 = vmul.f32 %v16399_v10, %v1901_v6  ;;  %v21599_v6 = vld [vmem:[#allocation118_spill] sm:$0xff]  ;;  %v3149_v31 = vpop.permute.xlu1 %3148  ;;  %v21602_v61 = vld [vmem:[#allocation171_spill] sm:$0xff] }
 0x29a   :  { %v2943_v38 = vmul.f32 %v15831_v25, %v21588_v28  ;;  %13262 = vset.pattern.permute.xlu1 %v21118_v12  ;;  %v16421_v3 = vpop.permute.xlu0 %2584  ;;  %11968 = vmatmul.mubr.f32.gmra.mrb[10].mxu1 %v3673_v62  ;;  %v2820_v8 = vadd.f32 %v16426_v22, %v2759_v1  ;;  %v3491_v4 = vmul.f32 %v16399_v10, %v3430_v55 }
 0x29b   :  { %21597 = vst [vmem:[#allocation155_spill] sm:$0xff] %v16421_v3  ;;  %v2700_v24 = vadd.f32 %v2639_v45, %v21599_v6  ;;  %v3005_v5 = vmul.f32 %v15840_v20, %v15916_v48  ;;  %3232 = vperm.xlu1 %13262, %v16026_v16   ;;  %11970 = vmatprep.mubr.msk.f32.mxu1 %vm13430_vm0, %v21563_v53  ;;  %v13365_v45 = vld [vmem:[%s20644_s0 + $0x1a0] sm:$0xff] }
 0x29c   :  { %v1963_v29 = vmul.f32 %v16399_v10, %v1902_v32  ;;  %v2760_v1 = vmul.f32 %v16399_v10, %v2699_v2  ;;  %v3065_v55 = vadd.f32 %v3004_v37, %v2943_v38  ;;  %v3370_v62 = vmul.f32 %v16099_v9, %v3149_v31  ;;  %368 = vperm.xlu0 %13306, %v13365_v45   ;;  %v21600_v16 = vld [vmem:[#allocation67_spill] sm:$0xff]  ;;  %v21601_v6 = vld [vmem:[#allocation70_spill] sm:$0xff] }
 0x29d   :  { %v3552_v48 = vadd.f32 %v16426_v22, %v3491_v4  ;;  %v16447_v11 = vmul.f32 %v16099_v9, %v21600_v16  ;;  %v16451_v32 = vmul.f32 %v16099_v9, %v21601_v6  ;;  %v1904_v2 = vadd.f32 %v1843_v30, %v21602_v61  ;;  %v21604_v16 = vld [vmem:[#allocation168_spill] sm:$0xff]  ;;  %v3153_v30 = vpop.permute.xlu1 %3152 }
 0x29e   :  { %v1960_v37 = vmul.f32 %v16399_v10, %v1899_v41  ;;  %v1845_v38 = vmul.f32 %v16099_v9, %v21588_v28  ;;  %v3431_v31 = vadd.f32 %v3370_v62, %v3065_v55  ;;  %v16457_v40 = vpop.permute.xlu0 %2588  ;;  %v2881_v45 = vmax.f32 %v2820_v8, 0.0  ;;  %v13366_v6 = vld [vmem:[%s20644_s0 + $0xe8] sm:$0xff]  ;;  %v21605_v62 = vld [vmem:[#allocation74_spill] sm:$0xff] }
 0x29f   :  { %21603 = vst [vmem:[#allocation213_spill] sm:$0xff] %v16457_v40  ;;  %v3613_v4 = vmax.f32 %v3552_v48, 0.0  ;;  %v2761_v3 = vmul.f32 %v16399_v10, %v2700_v24  ;;  %v3066_v47 = vadd.f32 %v3005_v5, %v21604_v16  ;;  %3236 = vperm.xlu1 %13262, %v13366_v6   ;;  %v2023_v41 = vadd.f32 %v16426_v22, %v1962_v21  ;;  %v13367_v24 = vld [vmem:[%s20644_s0 + $0x1b0] sm:$0xff] }
 0x2a0   :  { %v16466_v61 = vadd.f32 %v16426_v22, %v1963_v29  ;;  %v3492_v28 = vmul.f32 %v16399_v10, %v3431_v31  ;;  %v3371_v8 = vmul.f32 %v16099_v9, %v3153_v30  ;;  %378 = vperm.xlu0 %13306, %v13367_v24   ;;  %v2821_v55 = vadd.f32 %v16426_v22, %v2760_v1  ;;  %v21606_v21 = vld [vmem:[#allocation77_spill] sm:$0xff] }
 0x2a1   :  { %v3674_v5 = vmax.f32 %v2881_v45, %v3613_v4  ;;  %v16476_v48 = vmul.f32 %v16099_v9, %v21605_v62  ;;  %v16480_v29 = vmul.f32 %v16099_v9, %v21606_v21  ;;  %v21607_v16 = vld [vmem:[#allocation197_spill] sm:$0xff]  ;;  %v16485_v6 = vadd.f32 %v16426_v22, %v1960_v37 }
 0x2a2   :  { %v2274_v31 = vmul.f32 %v15840_v20, %v21607_v16  ;;  %v1906_v30 = vadd.f32 %v1845_v38, %v15569_v51  ;;  %v3432_v24 = vadd.f32 %v3371_v8, %v3066_v47  ;;  %v16488_v45 = vpop.permute.xlu0 %2604  ;;  %v3553_v1 = vadd.f32 %v16426_v22, %v3492_v28  ;;  %v21609_v62 = vld [vmem:[#allocation81_spill] sm:$0xff]  ;;  %v2425_v38 = vpop.permute.xlu1 %2424 }
 0x2a3   :  { %11971 = vmatmul.mubr.f32.gmra.mrb[12].mxu1 %v3674_v5  ;;  %21608 = vst [vmem:[#allocation112_spill] sm:$0xff] %v16488_v45  ;;  %v1965_v4 = vmul.f32 %v16399_v10, %v1904_v2  ;;  %v16494_v21 = vmul.f32 %v16099_v9, %v21609_v62  ;;  %v1847_v40 = vmul.f32 %v16099_v9, %v21607_v16  ;;  %v2084_v51 = vmax.f32 %v2023_v41, 0.0  ;;  %v13368_v2 = vld [vmem:[%s20644_s0 + $0x1c0] sm:$0xff] }
 0x2a4   :  { %13263 = vset.pattern.permute.xlu1 %v21111_v42  ;;  %11973 = vmatprep.mubr.msk.f32.mxu1 %vm13430_vm0, %v21563_v53  ;;  %v2085_v47 = vmax.f32 %v16466_v61, 0.0  ;;  %v3493_v37 = vmul.f32 %v16399_v10, %v3432_v24  ;;  %v2882_v28 = vmax.f32 %v2821_v55, 0.0  ;;  %v3614_v8 = vmax.f32 %v3553_v1, 0.0  ;;  %v21611_v1 = vld [vmem:[#allocation207_spill] sm:$0xff] }
 0x2a5   :  { %2508 = vperm.xlu1 %13263, %v16076_v36   ;;  %388 = vperm.xlu0 %13306, %v13368_v2   ;;  %v2822_v5 = vadd.f32 %v16426_v22, %v2761_v3  ;;  %v2945_v62 = vmul.f32 %v15831_v25, %v21607_v16  ;;  %v2335_v41 = vadd.f32 %v2274_v31, %v15597_v43  ;;  %v21612_v31 = vld [vmem:[#allocation84_spill] sm:$0xff] }
 0x2a6   :  { %v2640_v61 = vmul.f32 %v16099_v9, %v2425_v38  ;;  %v3006_v24 = vmul.f32 %v15840_v20, %v2425_v38  ;;  %v16513_v36 = vpop.permute.xlu0 %2608  ;;  %v3675_v45 = vmax.f32 %v2882_v28, %v3614_v8  ;;  %v3554_v46 = vadd.f32 %v16426_v22, %v3493_v37  ;;  %v13369_v38 = vld [vmem:[%s20644_s0 + $0xf8] sm:$0xff] }
 0x2a7   :  { %21610 = vst [vmem:[#allocation36_spill] sm:$0xff] %v16513_v36  ;;  %v2026_v2 = vadd.f32 %v16426_v22, %v1965_v4  ;;  %v1967_v55 = vmul.f32 %v16399_v10, %v1906_v30  ;;  %v1908_v3 = vadd.f32 %v1847_v40, %v15602_v13  ;;  %v2276_v16 = vmul.f32 %v15840_v20, %v21611_v1  ;;  %v13370_v30 = vld [vmem:[%s20644_s0 + $0x1d0] sm:$0xff]  ;;  %v2429_v13 = vpop.permute.xlu1 %2428 }
 0x2a8   :  { %v2701_v0 = vadd.f32 %v2640_v61, %v2335_v41  ;;  %v3067_v43 = vadd.f32 %v3006_v24, %v2945_v62  ;;  %v16523_v26 = vmul.f32 %v16099_v9, %v21612_v31  ;;  %v2883_v40 = vmax.f32 %v2822_v5, 0.0  ;;  %11974 = vmatmul.mubr.f32.gmra.mrb[14].mxu1 %v3675_v45 }
 0x2a9   :  { %2512 = vperm.xlu1 %13263, %v13369_v38   ;;  %398 = vperm.xlu0 %13306, %v13370_v30   ;;  %v3615_v4 = vmax.f32 %v3554_v46, 0.0  ;;  %v21613_v37 = vmax.f32 %v15517_v58, 0.0  ;;  %v2642_v8 = vmul.f32 %v16099_v9, %v15964_v35  ;;  %v2641_v61 = vmul.f32 %v16099_v9, %v2429_v13  ;;  %v21616_v30 = vld [vmem:[#allocation120_spill] sm:$0xff] }
 0x2aa   :  { %v2762_v62 = vmul.f32 %v16399_v10, %v2701_v0  ;;  %v3433_v41 = vadd.f32 %v16408_v27, %v3067_v43  ;;  %v3007_v24 = vmul.f32 %v15840_v20, %v2429_v13  ;;  %v16541_v31 = vpop.permute.xlu0 %2624  ;;  %11976 = vmatprep.mubr.msk.f32.mxu1 %vm13430_vm0, %v21563_v53  ;;  %v21615_v46 = vmax.f32 %v15558_v39, 0.0  ;;  %v21617_v13 = vld [vmem:[#allocation87_spill] sm:$0xff] }
 0x2ab   :  { %v16533_v28 = vmax.f32 %v21613_v37, %v2084_v51  ;;  %21614 = vst [vmem:[#allocation113_spill] sm:$0xff] %v16541_v31  ;;  %v3676_v58 = vmax.f32 %v2883_v40, %v3615_v4  ;;  %v2087_v5 = vmax.f32 %v2026_v2, 0.0  ;;  %v2337_v0 = vadd.f32 %v2276_v16, %v15638_v34  ;;  %v13371_v39 = vld [vmem:[%s20644_s0 + $0x1e0] sm:$0xff]  ;;  %v21618_v2 = vld [vmem:[#allocation221_spill] sm:$0xff]  ;;  %v3161_v4 = vpop.permute.xlu1 %3160 }
 0x2ac   :  { %v16547_v51 = vmax.f32 %v21615_v46, %v2085_v47  ;;  %v2702_v27 = vadd.f32 %v2641_v61, %v21616_v30  ;;  %v2028_v45 = vadd.f32 %v16426_v22, %v1967_v55  ;;  %v1969_v43 = vmul.f32 %v16399_v10, %v1908_v3  ;;  %v21619_v30 = vld [vmem:[#allocation121_spill] sm:$0xff] }
 0x2ad   :  { %v16555_v37 = vmul.f32 %v16099_v9, %v21617_v13  ;;  %13264 = vset.pattern.permute.xlu1 %v21118_v12  ;;  %408 = vperm.xlu0 %13306, %v13371_v39   ;;  %v2823_v47 = vadd.f32 %v16426_v22, %v2762_v62  ;;  %v3494_v34 = vmul.f32 %v16399_v10, %v3433_v41  ;;  %v1357_v16 = vmax.f32 %v21618_v2, 0.0 }
 0x2ae   :  { %v1849_v55 = vmul.f32 %v16099_v9, %v21611_v1  ;;  %v2703_v3 = vadd.f32 %v2642_v8, %v2337_v0  ;;  %v3008_v40 = vmul.f32 %v15840_v20, %v15964_v35  ;;  %3244 = vperm.xlu1 %13264, %v13369_v38   ;;  %11977 = vmatmul.mubr.f32.gmra.mrb[16].mxu1 %v3676_v58  ;;  %v1359_v61 = vmax.f32 %v15657_v52, 0.0  ;;  %v16572_v13 = vpop.permute.xlu0 %2628 }
 0x2af   :  { %v2763_v46 = vmul.f32 %v16399_v10, %v2702_v27  ;;  %v3068_v62 = vadd.f32 %v3007_v24, %v21619_v30  ;;  %v3373_v41 = vmul.f32 %v16099_v9, %v3161_v4  ;;  %21620 = vst [vmem:[#allocation192_spill] sm:$0xff] %v16572_v13  ;;  %11979 = vmatprep.mubr.msk.f32.mxu1 %vm13430_vm0, %v21563_v53  ;;  %v21621_v38 = vmax.f32 %v15583_v19, 0.0  ;;  %v21622_v24 = vld [vmem:[#allocation90_spill] sm:$0xff]  ;;  %v21623_v30 = vld [vmem:[#allocation75_spill] sm:$0xff] }
 0x2b0   :  { %v3555_v8 = vadd.f32 %v16426_v22, %v3494_v34  ;;  %v2947_v35 = vmul.f32 %v15831_v25, %v21611_v1  ;;  %v2089_v52 = vmax.f32 %v2028_v45, 0.0  ;;  %v2030_v0 = vadd.f32 %v16426_v22, %v1969_v43  ;;  %v21624_v34 = vld [vmem:[#allocation211_spill] sm:$0xff] }
 0x2b1   :  { %v16581_v58 = vmax.f32 %v21621_v38, %v2087_v5  ;;  %v16586_v27 = vmul.f32 %v16099_v9, %v21622_v24  ;;  %v3434_v39 = vadd.f32 %v3373_v41, %v3068_v62  ;;  %v2884_v2 = vmax.f32 %v2823_v47, 0.0  ;;  %v3165_v5 = vpop.permute.xlu1 %3164  ;;  %v21625_v47 = vld [vmem:[#allocation33_spill] sm:$0xff] }
 0x2b2   :  { %v3616_v4 = vmax.f32 %v3555_v8, 0.0  ;;  %v1910_v13 = vadd.f32 %v1849_v55, %v21623_v30  ;;  %v1851_v31 = vmul.f32 %v16099_v9, %v21624_v34  ;;  %v2764_v1 = vmul.f32 %v16399_v10, %v2703_v3  ;;  %3248 = vperm.xlu1 %13264, %v16117_v44   ;;  %v109_v8 = vpop.permute.xlu0 %108 }
 0x2b3   :  { %v3069_v19 = vadd.f32 %v3008_v40, %v2947_v35  ;;  %v3495_v45 = vmul.f32 %v16399_v10, %v3434_v39  ;;  %v3374_v43 = vmul.f32 %v16099_v9, %v3165_v5  ;;  %v2824_v62 = vadd.f32 %v16426_v22, %v2763_v46 }
 0x2b4   :  { %v3677_v38 = vmax.f32 %v2884_v2, %v3616_v4  ;;  %v16598_v41 = vmul.f32 %v16099_v9, %v21625_v47  ;;  %v2278_v55 = vmul.f32 %v15840_v20, %v21624_v34  ;;  %v16602_v3 = vmax.f32 %v1357_v16, %v2089_v52  ;;  %v21626_v4 = vld [vmem:[#allocation5_spill] sm:$0xff] }
 0x2b5   :  { %v2091_v40 = vmax.f32 %v2030_v0, 0.0  ;;  %v16606_v44 = vmul.f32 %v15831_v25, %v21624_v34  ;;  %v3435_v35 = vadd.f32 %v3374_v43, %v3069_v19  ;;  %v415_v24 = vmul.f32 %v15831_v25, %v109_v8 }
 0x2b6   :  { %11980 = vmatmul.mubr.f32.gmra.mrb[18].mxu1 %v3677_v38  ;;  %v3556_v46 = vadd.f32 %v16426_v22, %v3495_v45  ;;  %v16611_v39 = vadd.f32 %v1851_v31, %v15690_v14  ;;  %13265 = vset.pattern.permute.xlu1 %v21111_v42  ;;  %v2825_v16 = vadd.f32 %v16426_v22, %v2764_v1  ;;  %v2082_v52 = vmax.f32 %v16485_v6, 0.0  ;;  %v13372_v14 = vld [vmem:[%s20644_s0 + $0x108] sm:$0xff]  ;;  %v2437_v31 = vpop.permute.xlu1 %2436  ;;  %v114_v45 = vpop.permute.xlu0 %113  ;;  %v21628_v38 = vld [vmem:[#allocation214_spill] sm:$0xff] }
 0x2b7   :  { %11982 = vmatprep.mubr.msk.f32.mxu1 %vm13430_vm0, %v21563_v53  ;;  %v1971_v0 = vmul.f32 %v16399_v10, %v1910_v13  ;;  %v3496_v2 = vmul.f32 %v16399_v10, %v3435_v35  ;;  %v785_v30 = vadd.f32 %v21626_v4, %v415_v24  ;;  %2520 = vperm.xlu1 %13265, %v13372_v14   ;;  %v2885_v34 = vmax.f32 %v2824_v62, 0.0  ;;  %v21627_v6 = vld [vmem:[#allocation180_spill] sm:$0xff] }
 0x2b8   :  { %v3617_v19 = vmax.f32 %v3556_v46, 0.0  ;;  %v2643_v5 = vmul.f32 %v16099_v9, %v2437_v31  ;;  %v3009_v1 = vmul.f32 %v15840_v20, %v2437_v31  ;;  %v2339_v43 = vadd.f32 %v2278_v55, %v21627_v6  ;;  %v21629_v46 = vld [vmem:[#allocation122_spill] sm:$0xff]  ;;  %v21630_v14 = vld [vmem:[#allocation220_spill] sm:$0xff] }
 0x2b9   :  { %v16627_v13 = vmax.f32 %v1359_v61, %v2091_v40  ;;  %v1155_v47 = vadd.f32 %v21628_v38, %v785_v30  ;;  %v416_v8 = vmul.f32 %v15831_v25, %v114_v45  ;;  %v3557_v24 = vadd.f32 %v16426_v22, %v3496_v2  ;;  %v21631_v55 = vld [vmem:[#allocation6_spill] sm:$0xff]  ;;  %v21632_v30 = vld [vmem:[#allocation209_spill] sm:$0xff]  ;;  %v21633_v38 = vld [vmem:[#allocation63_spill] sm:$0xff] }
 0x2ba   :  { %v3678_v35 = vmax.f32 %v2885_v34, %v3617_v19  ;;  %v2645_v62 = vmul.f32 %v16099_v9, %v16004_v18  ;;  %v2704_v4 = vadd.f32 %v2643_v5, %v21629_v46  ;;  %v3070_v36 = vadd.f32 %v3009_v1, %v21630_v14  ;;  %v2441_v34 = vpop.permute.xlu1 %2440 }
 0x2bb   :  { %v16637_v31 = vadd.f32 %v16426_v22, %v1971_v0  ;;  %v1222_v61 = vmul.f32 %v16399_v10, %v1155_v47  ;;  %v786_v40 = vadd.f32 %v21631_v55, %v416_v8  ;;  %2524 = vperm.xlu1 %13265, %v21632_v30   ;;  %v2886_v19 = vmax.f32 %v2825_v16, 0.0  ;;  %v129_v0 = vpop.permute.xlu0 %128 }
 0x2bc   :  { %11983 = vmatmul.mubr.f32.gmra.mrb[20].mxu1 %v3678_v35  ;;  %v3618_v2 = vmax.f32 %v3557_v24, 0.0  ;;  %v2765_v45 = vmul.f32 %v16399_v10, %v2704_v4  ;;  %v3436_v6 = vadd.f32 %v16447_v11, %v3070_v36  ;;  %v2644_v5 = vmul.f32 %v16099_v9, %v2441_v34  ;;  %v21634_v24 = vld [vmem:[#allocation216_spill] sm:$0xff] }
 0x2bd   :  { %v3010_v1 = vmul.f32 %v15840_v20, %v2441_v34  ;;  %11985 = vmatprep.mubr.msk.f32.mxu1 %vm13430_vm0, %v21563_v53  ;;  %v1156_v47 = vadd.f32 %v21633_v38, %v786_v40  ;;  %v419_v8 = vmul.f32 %v15831_v25, %v129_v0  ;;  %v1289_v16 = vadd.f32 %v16426_v22, %v1222_v61  ;;  %v21635_v34 = vld [vmem:[#allocation7_spill] sm:$0xff]  ;;  %v21636_v61 = vld [vmem:[#allocation124_spill] sm:$0xff]  ;;  %v16671_v0 = vld [vmem:[%s20646_s1] ss:$0 sm:$0xff] }
 0x2be   :  { %v3679_v35 = vmax.f32 %v2886_v19, %v3618_v2  ;;  %v1853_v46 = vmul.f32 %v16099_v9, %v21634_v24  ;;  %v2705_v4 = vadd.f32 %v2644_v5, %v2339_v43  ;;  %v2826_v11 = vadd.f32 %v16426_v22, %v2765_v45  ;;  %v3173_v45 = vpop.permute.xlu1 %3172 }
 0x2bf   :  { %v3497_v36 = vmul.f32 %v16399_v10, %v3436_v6  ;;  %v3011_v14 = vmul.f32 %v15840_v20, %v16004_v18  ;;  %v1223_v55 = vmul.f32 %v16399_v10, %v1156_v47  ;;  %v789_v40 = vadd.f32 %v21635_v34, %v419_v8  ;;  %13266 = vset.pattern.permute.xlu1 %v21118_v12  ;;  %v139_v43 = vpop.permute.xlu0 %138  ;;  %v21637_v18 = vld [vmem:[#allocation224_spill] sm:$0xff]  ;;  %v21638_v47 = vld [vmem:[#allocation165_spill] sm:$0xff] }
 0x2c0   :  { %11986 = vmatmul.mubr.f32.gmra.mrb[22].mxu1 %v3679_v35  ;;  %v1350_v25 = vmax.f32 %v1289_v16, 0.0  ;;  %v2706_v19 = vadd.f32 %v2645_v62, %v21636_v61  ;;  %v2766_v2 = vmul.f32 %v16399_v10, %v2705_v4  ;;  %3256 = vperm.xlu1 %13266, %v21632_v30   ;;  %v1361_v6 = vmax.f32 %v21637_v18, 0.0 }
 0x2c1   :  { %11988 = vmatprep.mubr.msk.f32.mxu1 %vm13430_vm0, %v21563_v53  ;;  %v3558_v20 = vadd.f32 %v16426_v22, %v3497_v36  ;;  %v3071_v5 = vadd.f32 %v3010_v1, %v16606_v44  ;;  %v421_v62 = vmul.f32 %v16671_v0, %v139_v43  ;;  %v3376_v30 = vmul.f32 %v16099_v9, %v3173_v45  ;;  %v16680_v44 = vld [vmem:[%s20646_s1 + $0x1] ss:$0 sm:$0xff]  ;;  %v21639_v45 = vld [vmem:[#allocation125_spill] sm:$0xff] }
 0x2c2   :  { %v2143_v38 = vmax.f32 %v1350_v25, %v2082_v52  ;;  %v1159_v8 = vadd.f32 %v21638_v47, %v789_v40  ;;  %v2887_v35 = vmax.f32 %v2826_v11, 0.0  ;;  %v1290_v4 = vadd.f32 %v16426_v22, %v1223_v55  ;;  %v13375_v55 = vld [vmem:[%s20644_s0 + $0x118] sm:$0xff]  ;;  %v3177_v40 = vpop.permute.xlu1 %3176 }
 0x2c3   :  { %v3619_v16 = vmax.f32 %v3558_v20, 0.0  ;;  %v2280_v1 = vmul.f32 %v16680_v44, %v21634_v24  ;;  %v3437_v36 = vadd.f32 %v3376_v30, %v3071_v5  ;;  %v2093_v34 = vmax.f32 %v16637_v31, 0.0  ;;  %v21640_v20 = vld [vmem:[#allocation8_spill] sm:$0xff] }
 0x2c4   :  { %11738 = vmatmul.mubr.f32.vlgmr.msra.gmra.mrb[0].mxu0 %v2143_v38  ;;  %v1973_v52 = vmul.f32 %v16399_v10, %v16611_v39  ;;  %v2767_v11 = vmul.f32 %v16399_v10, %v2706_v19  ;;  %3260 = vperm.xlu1 %13266, %v13375_v55   ;;  %v1351_v61 = vmax.f32 %v1290_v4, 0.0  ;;  %v2827_v43 = vadd.f32 %v16426_v22, %v2766_v2  ;;  %v21641_v5 = vld [vmem:[#allocation184_spill] sm:$0xff]  ;;  %v149_v55 = vpop.permute.xlu0 %148 }
 0x2c5   :  { %11740 = vmatprep.mubr.msk.f32.mxu0 %vm13430_vm0, %v21563_v53  ;;  %v3680_v25 = vmax.f32 %v2887_v35, %v3619_v16  ;;  %v3072_v31 = vadd.f32 %v3011_v14, %v21639_v45  ;;  %v791_v18 = vadd.f32 %v21640_v20, %v421_v62  ;;  %v3498_v39 = vmul.f32 %v16399_v10, %v3437_v36  ;;  %v21642_v35 = vld [vmem:[#allocation116_spill] sm:$0xff]  ;;  %v21644_v14 = vld [vmem:[#allocation226_spill] sm:$0xff] }
 0x2c6   :  { %v3377_v19 = vmul.f32 %v16099_v9, %v3177_v40  ;;  %v1914_v30 = vadd.f32 %v1853_v46, %v21641_v5  ;;  %v2951_v38 = vmul.f32 %v16671_v0, %v21634_v24  ;;  %v1226_v47 = vmul.f32 %v16399_v10, %v1159_v8  ;;  %v21645_v36 = vld [vmem:[#allocation218_spill] sm:$0xff] }
 0x2c7   :  { %11989 = vmatmul.mubr.f32.gmra.mrb[24].mxu1 %v3680_v25  ;;  %v21643_v16 = vmax.f32 %v21642_v35, 0.0  ;;  %v2341_v45 = vadd.f32 %v2280_v1, %v21644_v14  ;;  %v3559_v62 = vadd.f32 %v16426_v22, %v3498_v39  ;;  %v16709_v46 = vadd.f32 %v16426_v22, %v1973_v52  ;;  %v21646_v1 = vld [vmem:[#allocation66_spill] sm:$0xff]  ;;  %v21647_v39 = vld [vmem:[#allocation40_spill] sm:$0xff]  ;;  %v2449_v52 = vpop.permute.xlu1 %2448 }
 0x2c8   :  { %v3438_v4 = vadd.f32 %v3377_v19, %v3072_v31  ;;  %11991 = vmatprep.mubr.msk.f32.mxu1 %vm13430_vm0, %v21563_v53  ;;  %v1855_v24 = vmul.f32 %v16099_v9, %v21645_v36  ;;  %13267 = vset.pattern.permute.xlu1 %v21111_v42  ;;  %v2888_v8 = vmax.f32 %v2827_v43, 0.0  ;;  %v2828_v40 = vadd.f32 %v16426_v22, %v2767_v11 }
 0x2c9   :  { %v2144_v2 = vmax.f32 %v1351_v61, %v21643_v16  ;;  %v16715_v25 = vmax.f32 %v1361_v6, %v2093_v34  ;;  %v1161_v61 = vadd.f32 %v21646_v1, %v791_v18  ;;  %v423_v31 = vmul.f32 %v16671_v0, %v149_v55  ;;  %2532 = vperm.xlu1 %13267, %v21647_v39   ;;  %v21648_v16 = vld [vmem:[#allocation185_spill] sm:$0xff]  ;;  %v21649_v1 = vld [vmem:[#allocation11_spill] sm:$0xff] }
 0x2ca   :  { %v3499_v20 = vmul.f32 %v16399_v10, %v3438_v4  ;;  %v3620_v19 = vmax.f32 %v3559_v62, 0.0  ;;  %v2282_v43 = vmul.f32 %v16680_v44, %v21645_v36  ;;  %v2646_v11 = vmul.f32 %v16099_v9, %v2449_v52 }
 0x2cb   :  { %11741 = vmatmul.mubr.f32.gmra.mrb[2].mxu0 %v2144_v2  ;;  %v3012_v6 = vmul.f32 %v16680_v44, %v2449_v52  ;;  %v1293_v34 = vadd.f32 %v16426_v22, %v1226_v47  ;;  %v16730_v18 = vmul.f32 %v16671_v0, %v21645_v36  ;;  %v2095_v35 = vmax.f32 %v16709_v46, 0.0  ;;  %v13376_v36 = vld [vmem:[%s20644_s0 + $0x128] sm:$0xff]  ;;  %v2453_v46 = vpop.permute.xlu1 %2452  ;;  %v21651_v52 = vld [vmem:[#allocation201_spill] sm:$0xff] }
 0x2cc   :  { %11743 = vmatprep.mubr.msk.f32.mxu0 %vm13430_vm0, %v21563_v53  ;;  %v3681_v5 = vmax.f32 %v2888_v8, %v3620_v19  ;;  %v3560_v55 = vadd.f32 %v16426_v22, %v3499_v20  ;;  %v16735_v2 = vadd.f32 %v1855_v24, %v21648_v16  ;;  %v2707_v4 = vadd.f32 %v2646_v11, %v2341_v45  ;;  %v159_v20 = vpop.permute.xlu0 %158  ;;  %v21653_v16 = vld [vmem:[#allocation170_spill] sm:$0xff] }
 0x2cd   :  { %v3073_v14 = vadd.f32 %v3012_v6, %v2951_v38  ;;  %v1975_v62 = vmul.f32 %v16399_v10, %v1914_v30  ;;  %v1228_v47 = vmul.f32 %v16399_v10, %v1161_v61  ;;  %v793_v39 = vadd.f32 %v21649_v1, %v423_v31  ;;  %2536 = vperm.xlu1 %13267, %v13376_v36   ;;  %v21650_v61 = vld [vmem:[#allocation229_spill] sm:$0xff]  ;;  %v21652_v6 = vld [vmem:[#allocation126_spill] sm:$0xff] }
 0x2ce   :  { %11992 = vmatmul.mubr.f32.gmra.mrb[26].mxu1 %v3681_v5  ;;  %v2889_v8 = vmax.f32 %v2828_v40, 0.0  ;;  %v3621_v24 = vmax.f32 %v3560_v55, 0.0  ;;  %v2768_v38 = vmul.f32 %v16399_v10, %v2707_v4  ;;  %v2647_v30 = vmul.f32 %v16099_v9, %v2453_v46  ;;  %v21654_v1 = vld [vmem:[#allocation182_spill] sm:$0xff] }
 0x2cf   :  { %11744 = vmatmul.mubr.f32.gmra.mrb[4].mxu0 %v16533_v28  ;;  %v3439_v28 = vadd.f32 %v16451_v32, %v3073_v14  ;;  %v1354_v45 = vmax.f32 %v1293_v34, 0.0  ;;  %v2343_v31 = vadd.f32 %v2282_v43, %v21650_v61  ;;  %v2648_v19 = vmul.f32 %v16099_v9, %v21651_v52  ;;  %11994 = vmatprep.mubr.msk.f32.mxu1 %vm13430_vm0, %v21563_v53 }
 0x2d0   :  { %11746 = vmatprep.mubr.msk.f32.mxu0 %vm13430_vm0, %v21563_v53  ;;  %v3013_v11 = vmul.f32 %v16680_v44, %v2453_v46  ;;  %v3682_v40 = vmax.f32 %v2889_v8, %v3621_v24  ;;  %v2708_v5 = vadd.f32 %v2647_v30, %v21652_v6  ;;  %v2829_v32 = vadd.f32 %v16426_v22, %v2768_v38  ;;  %v21657_v30 = vld [vmem:[#allocation71_spill] sm:$0xff]  ;;  %v21659_v6 = vld [vmem:[#allocation12_spill] sm:$0xff] }
 0x2d1   :  { %v3500_v55 = vmul.f32 %v16399_v10, %v3439_v28  ;;  %v16760_v34 = vadd.f32 %v16426_v22, %v1975_v62  ;;  %v3014_v43 = vmul.f32 %v16680_v44, %v21651_v52  ;;  %v1163_v4 = vadd.f32 %v21653_v16, %v793_v39  ;;  %13268 = vset.pattern.permute.xlu1 %v21118_v12  ;;  %v21656_v39 = vld [vmem:[#allocation72_spill] sm:$0xff] }
 0x2d2   :  { %v425_v14 = vmul.f32 %v16671_v0, %v159_v20  ;;  %11995 = vmatmul.mubr.f32.gmra.mrb[28].mxu1 %v3682_v40  ;;  %v1363_v46 = vmax.f32 %v21654_v1, 0.0  ;;  %3268 = vperm.xlu1 %13268, %v13376_v36   ;;  %v21655_v62 = vmax.f32 %v15484_v50, 0.0  ;;  %v1295_v38 = vadd.f32 %v16426_v22, %v1228_v47  ;;  %v16784_v50 = vld [vmem:[%s20646_s1 + $0x2] ss:$0 sm:$0xff]  ;;  %v169_v40 = vpop.permute.xlu0 %168 }
 0x2d3   :  { %11747 = vmatmul.mubr.f32.gmra.mrb[6].mxu0 %v16547_v51  ;;  %v3185_v51 = vpop.permute.xlu1 %3184  ;;  %v3561_v24 = vadd.f32 %v16426_v22, %v3500_v55  ;;  %v2090_v28 = vmax.f32 %v21656_v39, 0.0  ;;  %v2709_v20 = vadd.f32 %v2648_v19, %v2343_v31  ;;  %v3074_v61 = vadd.f32 %v3013_v11, %v21657_v30  ;;  %11997 = vmatprep.mubr.msk.f32.mxu1 %vm13430_vm0, %v21563_v53 }
 0x2d4   :  { %11749 = vmatprep.mubr.msk.f32.mxu0 %vm13430_vm0, %v21563_v53  ;;  %v2147_v8 = vmax.f32 %v1354_v45, %v21655_v62  ;;  %v3379_v52 = vmul.f32 %v16099_v9, %v3185_v51  ;;  %v16779_v36 = vmax.f32 %v1363_v46, %v2095_v35  ;;  %v21658_v45 = vld [vmem:[#allocation169_spill] sm:$0xff]  ;;  %v2769_v31 = vmul.f32 %v16399_v10, %v2708_v5  ;;  %v21660_v46 = vld [vmem:[#allocation210_spill] sm:$0xff] }
 0x2d5   :  { %v1857_v47 = vmul.f32 %v16784_v50, %v21658_v45  ;;  %v2890_v19 = vmax.f32 %v2829_v32, 0.0  ;;  %v3622_v11 = vmax.f32 %v3561_v24, 0.0  ;;  %v2284_v9 = vmul.f32 %v16680_v44, %v21658_v45 }
 0x2d6   :  { %v1230_v35 = vmul.f32 %v16399_v10, %v1163_v4  ;;  %v795_v55 = vadd.f32 %v21659_v6, %v425_v14  ;;  %v3440_v16 = vadd.f32 %v3379_v52, %v3074_v61  ;;  %v3075_v1 = vadd.f32 %v3014_v43, %v16730_v18  ;;  %3272 = vperm.xlu1 %13268, %v21660_v46   ;;  %v21661_v43 = vld [vmem:[#allocation222_spill] sm:$0xff] }
 0x2d7   :  { %11750 = vmatmul.mubr.f32.gmra.mrb[8].mxu0 %v2147_v8  ;;  %v3189_v51 = vpop.permute.xlu1 %3188  ;;  %v3683_v5 = vmax.f32 %v2890_v19, %v3622_v11  ;;  %v1356_v62 = vmax.f32 %v1295_v38, 0.0  ;;  %v2097_v32 = vmax.f32 %v16760_v34, 0.0  ;;  %v2770_v8 = vmul.f32 %v16399_v10, %v2709_v20  ;;  %v21662_v20 = vld [vmem:[#allocation172_spill] sm:$0xff]  ;;  %v21664_v19 = vld [vmem:[#allocation187_spill] sm:$0xff] }
 0x2d8   :  { %11752 = vmatprep.mubr.msk.f32.mxu0 %vm13430_vm0, %v21563_v53  ;;  %v427_v24 = vmul.f32 %v16671_v0, %v169_v40  ;;  %v3501_v4 = vmul.f32 %v16399_v10, %v3440_v16  ;;  %v3380_v14 = vmul.f32 %v16784_v50, %v3189_v51  ;;  %v16804_v30 = vmul.f32 %v16671_v0, %v21658_v45 }
 0x2d9   :  { %11998 = vmatmul.mubr.f32.gmra.mrb[30].mxu1 %v3683_v5  ;;  %v2830_v18 = vadd.f32 %v16426_v22, %v2769_v31  ;;  %v1977_v34 = vmul.f32 %v16399_v10, %v16735_v2  ;;  %v1165_v61 = vadd.f32 %v21662_v20, %v795_v55  ;;  %v1297_v45 = vadd.f32 %v16426_v22, %v1230_v35  ;;  %v21666_v55 = vld [vmem:[#allocation234_spill] sm:$0xff] }
 0x2da   :  { %v3441_v52 = vadd.f32 %v3380_v14, %v3075_v1  ;;  %12000 = vmatprep.mubr.msk.f32.mxu1 %vm13430_vm0, %v21563_v53  ;;  %v1918_v31 = vadd.f32 %v1857_v47, %v21664_v19  ;;  %13269 = vset.pattern.permute.xlu1 %v21111_v42  ;;  %v21665_v11 = vmax.f32 %v21598_v56, 0.0  ;;  %v3562_v6 = vadd.f32 %v16426_v22, %v3501_v4  ;;  %v21667_v1 = vld [vmem:[#allocation13_spill] sm:$0xff]  ;;  %v179_v56 = vpop.permute.xlu0 %178  ;;  %v21669_v19 = vld [vmem:[#allocation131_spill] sm:$0xff] }
 0x2db   :  { %11753 = vmatmul.mubr.f32.gmra.mrb[10].mxu0 %v16581_v58  ;;  %v21663_v58 = vld [vmem:[#allocation232_spill] sm:$0xff]  ;;  %v2345_v16 = vadd.f32 %v2284_v9, %v21666_v55  ;;  %v797_v46 = vadd.f32 %v21667_v1, %v427_v24  ;;  %v13378_v35 = vld [vmem:[%s20644_s0 + $0x138] sm:$0xff]  ;;  %v2461_v5 = vpop.permute.xlu1 %2460  ;;  %v2831_v47 = vadd.f32 %v16426_v22, %v2770_v8  ;;  %v2891_v4 = vmax.f32 %v2830_v18, 0.0 }
 0x2dc   :  { %11755 = vmatprep.mubr.msk.f32.mxu0 %vm13430_vm0, %v21563_v53  ;;  %v1365_v40 = vmax.f32 %v21663_v58, 0.0  ;;  %v2149_v2 = vmax.f32 %v1356_v62, %v21665_v11  ;;  %v3502_v51 = vmul.f32 %v16399_v10, %v3441_v52  ;;  %2544 = vperm.xlu1 %13269, %v13378_v35   ;;  %v2649_v62 = vmul.f32 %v16784_v50, %v2461_v5  ;;  %v21672_v1 = vld [vmem:[#allocation174_spill] sm:$0xff] }
 0x2dd   :  { %v3015_v9 = vmul.f32 %v16680_v44, %v2461_v5  ;;  %v3623_v24 = vmax.f32 %v3562_v6, 0.0  ;;  %v1232_v20 = vmul.f32 %v16399_v10, %v1165_v61  ;;  %v1358_v52 = vmax.f32 %v1297_v45, 0.0  ;;  %v21671_v6 = vld [vmem:[#allocation89_spill] sm:$0xff] }
 0x2de   :  { %v16830_v14 = vmax.f32 %v1365_v40, %v2097_v32  ;;  %v3563_v58 = vadd.f32 %v16426_v22, %v3502_v51  ;;  %v16839_v8 = vadd.f32 %v16426_v22, %v1977_v34  ;;  %v21668_v32 = vld [vmem:[#allocation219_spill] sm:$0xff]  ;;  %v2710_v11 = vadd.f32 %v2649_v62, %v21669_v19 }
 0x2df   :  { %11756 = vmatmul.mubr.f32.gmra.mrb[12].mxu0 %v2149_v2  ;;  %v1859_v40 = vmul.f32 %v16784_v50, %v21668_v32  ;;  %v21670_v2 = vld [vmem:[#allocation129_spill] sm:$0xff]  ;;  %v3684_v18 = vmax.f32 %v2891_v4, %v3623_v24  ;;  %v2651_v61 = vmul.f32 %v16784_v50, %v21671_v6  ;;  %v1167_v35 = vadd.f32 %v21672_v1, %v797_v46  ;;  %v2465_v51 = vpop.permute.xlu1 %2464 }
 0x2e0   :  { %11758 = vmatprep.mubr.msk.f32.mxu0 %vm13430_vm0, %v21563_v53  ;;  %v3076_v55 = vadd.f32 %v3015_v9, %v21670_v2  ;;  %v429_v45 = vmul.f32 %v16671_v0, %v179_v56  ;;  %2548 = vperm.xlu1 %13269, %v16250_v60   ;;  %v3624_v34 = vmax.f32 %v3563_v58, 0.0  ;;  %v2771_v5 = vmul.f32 %v16399_v10, %v2710_v11 }
 0x2e1   :  { %12001 = vmatmul.mubr.f32.gmra.mrb[32].mxu1 %v3684_v18  ;;  %v2650_v62 = vmul.f32 %v16784_v50, %v2465_v51  ;;  %v2892_v9 = vmax.f32 %v2831_v47, 0.0  ;;  %v3016_v4 = vmul.f32 %v16680_v44, %v2465_v51  ;;  %v2151_v60 = vmax.f32 %v1358_v52, %v2090_v28  ;;  %v21676_v51 = vld [vmem:[#allocation14_spill] sm:$0xff] }
 0x2e2   :  { %v3442_v38 = vadd.f32 %v16476_v48, %v3076_v55  ;;  %12003 = vmatprep.mubr.msk.f32.mxu1 %vm13430_vm0, %v21563_v53  ;;  %v1299_v46 = vadd.f32 %v16426_v22, %v1232_v20  ;;  %v21673_v48 = vld [vmem:[#allocation223_spill] sm:$0xff]  ;;  %v2832_v58 = vadd.f32 %v16426_v22, %v2771_v5  ;;  %v2286_v19 = vmul.f32 %v16680_v44, %v21668_v32  ;;  %v21675_v55 = vld [vmem:[#allocation225_spill] sm:$0xff] }
 0x2e3   :  { %11759 = vmatmul.mubr.f32.gmra.mrb[14].mxu0 %v16602_v3  ;;  %v2094_v56 = vmax.f32 %v21673_v48, 0.0  ;;  %v2711_v3 = vadd.f32 %v2650_v62, %v2345_v16  ;;  %v3685_v24 = vmax.f32 %v2892_v9, %v3624_v34  ;;  %v16869_v11 = vmul.f32 %v16671_v0, %v21668_v32  ;;  %v21674_v16 = vld [vmem:[#allocation133_spill] sm:$0xff]  ;;  %v3197_v2 = vpop.permute.xlu1 %3196 }
 0x2e4   :  { %11761 = vmatprep.mubr.msk.f32.mxu0 %vm13430_vm0, %v21563_v53  ;;  %v3503_v47 = vmul.f32 %v16399_v10, %v3442_v38  ;;  %v3017_v39 = vmul.f32 %v16680_v44, %v21671_v6  ;;  %13270 = vset.pattern.permute.xlu1 %v21118_v12  ;;  %v1979_v28 = vmul.f32 %v16399_v10, %v1918_v31  ;;  %v13379_v38 = vld [vmem:[%s20644_s0 + $0x140] sm:$0xff]  ;;  %v2096_v18 = vmax.f32 %v21675_v55, 0.0  ;;  %v189_v6 = vpop.permute.xlu0 %188 }
 0x2e5   :  { %v2712_v20 = vadd.f32 %v2651_v61, %v21674_v16  ;;  %v1234_v52 = vmul.f32 %v16399_v10, %v1167_v35  ;;  %3280 = vperm.xlu1 %13270, %v13379_v38   ;;  %v2772_v1 = vmul.f32 %v16399_v10, %v2711_v3  ;;  %v3077_v31 = vadd.f32 %v3016_v4, %v16804_v30  ;;  %v13384_v55 = vld [vmem:[%s20644_s0 + $0x160] sm:$0xff] }
 0x2e6   :  { %v3564_v32 = vadd.f32 %v16426_v22, %v3503_v47  ;;  %12004 = vmatmul.mubr.f32.gmra.mrb[34].mxu1 %v3685_v24  ;;  %v3382_v61 = vmul.f32 %v16784_v50, %v3197_v2  ;;  %v2099_v35 = vmax.f32 %v16839_v8, 0.0  ;;  %v799_v34 = vadd.f32 %v21676_v51, %v429_v45  ;;  %v21678_v47 = vld [vmem:[#allocation181_spill] sm:$0xff]  ;;  %v13380_v8 = vld [vmem:[%s20644_s0 + $0x148] sm:$0xff] }
 0x2e7   :  { %11762 = vmatmul.mubr.f32.gmra.mrb[16].mxu0 %v2151_v60  ;;  %12006 = vmatprep.mubr.msk.f32.mxu1 %vm13430_vm0, %v21563_v53  ;;  %v2893_v5 = vmax.f32 %v2832_v58, 0.0  ;;  %v1360_v9 = vmax.f32 %v1299_v46, 0.0  ;;  %v21677_v60 = vld [vmem:[#allocation139_spill] sm:$0xff]  ;;  %v3078_v30 = vadd.f32 %v3017_v39, %v21678_v47  ;;  %v21679_v24 = vld [vmem:[#allocation237_spill] sm:$0xff]  ;;  %v2773_v38 = vmul.f32 %v16399_v10, %v2712_v20  ;;  %v3201_v45 = vpop.permute.xlu1 %3200  ;;  %v21681_v20 = vld [vmem:[#allocation176_spill] sm:$0xff] }
 0x2e8   :  { %11764 = vmatprep.mubr.msk.f32.mxu0 %vm13430_vm0, %v21563_v53  ;;  %v3625_v62 = vmax.f32 %v3564_v32, 0.0  ;;  %v1920_v3 = vadd.f32 %v1859_v40, %v21677_v60  ;;  %v3443_v4 = vadd.f32 %v3382_v61, %v3077_v31  ;;  %v2347_v16 = vadd.f32 %v2286_v19, %v21679_v24  ;;  %v21680_v58 = vld [vmem:[#allocation235_spill] sm:$0xff]  ;;  %v13381_v24 = vld [vmem:[%s20644_s0 + $0x150] sm:$0xff] }
 0x2e9   :  { %v431_v2 = vmul.f32 %v16671_v0, %v189_v6  ;;  %3284 = vperm.xlu1 %13270, %v13380_v8   ;;  %v1367_v40 = vmax.f32 %v21680_v58, 0.0  ;;  %v3383_v32 = vmul.f32 %v16784_v50, %v3201_v45  ;;  %v2833_v19 = vadd.f32 %v16426_v22, %v2772_v1  ;;  %v21684_v1 = vld [vmem:[#allocation15_spill] sm:$0xff] }
 0x2ea   :  { %v3686_v46 = vmax.f32 %v2893_v5, %v3625_v62  ;;  %v3504_v39 = vmul.f32 %v16399_v10, %v3443_v4  ;;  %v1169_v6 = vadd.f32 %v21681_v20, %v799_v34  ;;  %v21682_v31 = vmax.f32 %v21661_v43, 0.0  ;;  %v21683_v62 = vld [vmem:[#allocation69_spill] sm:$0xff]  ;;  %v21686_v20 = vld [vmem:[#allocation190_spill] sm:$0xff] }
 0x2eb   :  { %11765 = vmatmul.mubr.f32.gmra.mrb[18].mxu0 %v16627_v13  ;;  %v1301_v13 = vadd.f32 %v16426_v22, %v1234_v52  ;;  %v16910_v51 = vmax.f32 %v1367_v40, %v2099_v35  ;;  %v2040_v5 = vadd.f32 %v16426_v22, %v1979_v28  ;;  %v1861_v60 = vmul.f32 %v16784_v50, %v21683_v62  ;;  %v21685_v34 = vld [vmem:[#allocation241_spill] sm:$0xff]  ;;  %v2473_v8 = vpop.permute.xlu1 %2472  ;;  %v199_v40 = vpop.permute.xlu0 %198 }
 0x2ec   :  { %11767 = vmatprep.mubr.msk.f32.mxu0 %vm13430_vm0, %v21563_v53  ;;  %12007 = vmatmul.mubr.f32.gmra.mrb[36].mxu1 %v3686_v46  ;;  %v2153_v61 = vmax.f32 %v1360_v9, %v21682_v31  ;;  %v2288_v47 = vmul.f32 %v16680_v44, %v21683_v62  ;;  %v3444_v4 = vadd.f32 %v3383_v32, %v3078_v30  ;;  %v1369_v9 = vmax.f32 %v21685_v34, 0.0  ;;  %v21688_v34 = vld [vmem:[#allocation179_spill] sm:$0xff] }
 0x2ed   :  { %12009 = vmatprep.mubr.msk.f32.mxu1 %vm13430_vm0, %v21563_v53  ;;  %v3565_v52 = vadd.f32 %v16426_v22, %v3504_v39  ;;  %v16922_v43 = vmul.f32 %v16671_v0, %v21683_v62  ;;  %v801_v35 = vadd.f32 %v21684_v1, %v431_v2  ;;  %13271 = vset.pattern.permute.xlu1 %v21111_v42  ;;  %v2894_v45 = vmax.f32 %v2833_v19, 0.0  ;;  %v21687_v1 = vld [vmem:[#allocation243_spill] sm:$0xff] }
 0x2ee   :  { %v2834_v28 = vadd.f32 %v16426_v22, %v2773_v38  ;;  %v3505_v30 = vmul.f32 %v16399_v10, %v3444_v4  ;;  %2556 = vperm.xlu1 %13271, %v13381_v24   ;;  %v1362_v46 = vmax.f32 %v1301_v13, 0.0  ;;  %v1236_v58 = vmul.f32 %v16399_v10, %v1169_v6 }
 0x2ef   :  { %11768 = vmatmul.mubr.f32.gmra.mrb[20].mxu0 %v2153_v61  ;;  %v3626_v2 = vmax.f32 %v3565_v52, 0.0  ;;  %v2652_v38 = vmul.f32 %v16784_v50, %v2473_v8  ;;  %v3018_v39 = vmul.f32 %v16680_v44, %v2473_v8  ;;  %v2101_v32 = vmax.f32 %v2040_v5, 0.0 }
 0x2f0   :  { %11770 = vmatprep.mubr.msk.f32.mxu0 %vm13430_vm0, %v21563_v53  ;;  %v16938_v31 = vadd.f32 %v1861_v60, %v21686_v20  ;;  %v3566_v62 = vadd.f32 %v16426_v22, %v3505_v30  ;;  %v1981_v4 = vmul.f32 %v16399_v10, %v1920_v3  ;;  %v2349_v19 = vadd.f32 %v2288_v47, %v21687_v1  ;;  %v2477_v60 = vpop.permute.xlu1 %2476  ;;  %v21693_v20 = vld [vmem:[#allocation177_spill] sm:$0xff] }
 0x2f1   :  { %v3687_v61 = vmax.f32 %v2894_v45, %v3626_v2  ;;  %v2713_v52 = vadd.f32 %v2652_v38, %v2347_v16  ;;  %v3079_v13 = vadd.f32 %v3018_v39, %v16869_v11  ;;  %v2895_v6 = vmax.f32 %v2834_v28, 0.0  ;;  %v21690_v28 = vld [vmem:[#allocation35_spill] sm:$0xff]  ;;  %v21694_v1 = vld [vmem:[#allocation141_spill] sm:$0xff] }
 0x2f2   :  { %v1171_v24 = vadd.f32 %v21688_v34, %v801_v35  ;;  %v433_v5 = vmul.f32 %v16671_v0, %v199_v40  ;;  %v21689_v8 = vmov 3   ;;  %v2155_v30 = vmax.f32 %v1362_v46, %v2094_v56  ;;  %v21691_v56 = vld [vmem:[#allocation132_spill] sm:$0xff]  ;;  %v21692_v46 = vld [vmem:[#allocation79_spill] sm:$0xff]  ;;  %v21695_v34 = vld [vmem:[#allocation17_spill] sm:$0xff] }
 0x2f3   :  { %11771 = vmatmul.mubr.f32.gmra.mrb[22].mxu0 %v16715_v25  ;;  %13272 = vset.pattern.permute.xlu1 %v21689_v8  ;;  %v3627_v3 = vmax.f32 %v3566_v62, 0.0  ;;  %v2774_v47 = vmul.f32 %v16399_v10, %v2713_v52  ;;  %v3445_v16 = vadd.f32 %v16480_v29, %v3079_v13  ;;  %v13382_v25 = vld [vmem:[%s20644_s0 + $0x158] sm:$0xff]  ;;  %v2653_v11 = vmul.f32 %v16784_v50, %v2477_v60 }
 0x2f4   :  { %12010 = vmatmul.mubr.f32.gmra.mrb[38].mxu1 %v3687_v61  ;;  %1767 = vperm.xlu1 %13272, %v13382_v25   ;;  %v1303_v35 = vadd.f32 %v16426_v22, %v1236_v58  ;;  %v2654_v45 = vmul.f32 %v16784_v50, %v21690_v28  ;;  %v3019_v48 = vmul.f32 %v16680_v44, %v2477_v60  ;;  %v2098_v2 = vmax.f32 %v21691_v56, 0.0 }
 0x2f5   :  { %11773 = vmatprep.mubr.msk.f32.mxu0 %vm13430_vm0, %v21563_v53  ;;  %12012 = vmatprep.mubr.msk.f32.mxu1 %vm13430_vm0, %v21563_v53  ;;  %v3688_v29 = vmax.f32 %v2895_v6, %v3627_v3  ;;  %v2714_v40 = vadd.f32 %v2653_v11, %v21692_v46  ;;  %v2835_v38 = vadd.f32 %v16426_v22, %v2774_v47  ;;  %v1371_v52 = vmax.f32 %v21694_v1, 0.0  ;;  %v16995_v11 = vld [vmem:[%s20647_s2] ss:$0 sm:$0xff]  ;;  %v21697_v46 = vld [vmem:[#allocation76_spill] sm:$0xff] }
 0x2f6   :  { %v3506_v58 = vmul.f32 %v16399_v10, %v3445_v16  ;;  %v16968_v39 = vmax.f32 %v1369_v9, %v2101_v32  ;;  %v1863_v61 = vmul.f32 %v16784_v50, %v21693_v20  ;;  %v1238_v62 = vmul.f32 %v16399_v10, %v1171_v24  ;;  %v209_v9 = vpop.permute.xlu0 %208  ;;  %v3209_v32 = vpop.permute.xlu1 %3208 }
 0x2f7   :  { %11774 = vmatmul.mubr.f32.gmra.mrb[24].mxu0 %v2155_v30  ;;  %v2042_v13 = vadd.f32 %v16426_v22, %v1981_v4  ;;  %v2290_v6 = vmul.f32 %v16680_v44, %v21693_v20  ;;  %v803_v60 = vadd.f32 %v21695_v34, %v433_v5  ;;  %v1364_v30 = vmax.f32 %v1303_v35, 0.0  ;;  %v21696_v4 = vld [vmem:[#allocation228_spill] sm:$0xff] }
 0x2f8   :  { %12013 = vmatmul.mubr.f32.gmra.mrb[40].mxu1 %v3688_v29  ;;  %11776 = vmatprep.mubr.msk.f32.mxu0 %vm13430_vm0, %v21563_v53  ;;  %v3567_v10 = vadd.f32 %v16426_v22, %v3506_v58  ;;  %v2715_v24 = vadd.f32 %v2654_v45, %v2349_v19  ;;  %v3020_v3 = vmul.f32 %v16680_v44, %v21690_v28  ;;  %v2896_v19 = vmax.f32 %v2835_v38, 0.0 }
 0x2f9   :  { %13273 = vset.pattern.permute.xlu1 %v21111_v42  ;;  %12015 = vmatprep.mubr.msk.f32.mxu1 %vm13430_vm0, %v21563_v53  ;;  %v3080_v47 = vadd.f32 %v3019_v48, %v21696_v4  ;;  %v3385_v16 = vmul.f32 %v16784_v50, %v3209_v32  ;;  %v16990_v5 = vmul.f32 %v16671_v0, %v21693_v20  ;;  %v2103_v29 = vmax.f32 %v2042_v13, 0.0 }
 0x2fa   :  { %2560 = vperm.xlu1 %13273, %v13382_v25   ;;  %v2775_v35 = vmul.f32 %v16995_v11, %v2714_v40  ;;  %v3628_v28 = vmax.f32 %v3567_v10, 0.0  ;;  %v435_v45 = vmul.f32 %v16671_v0, %v209_v9  ;;  %v1305_v48 = vadd.f32 %v16426_v22, %v1238_v62  ;;  %v3213_v20 = vpop.permute.xlu1 %3212  ;;  %v21698_v62 = vld [vmem:[#allocation191_spill] sm:$0xff] }
 0x2fb   :  { %11777 = vmatmul.mubr.f32.gmra.mrb[26].mxu0 %v16779_v36  ;;  %v3446_v25 = vadd.f32 %v3385_v16, %v3080_v47  ;;  %v1173_v58 = vadd.f32 %v21697_v46, %v803_v60  ;;  %v2157_v1 = vmax.f32 %v1364_v30, %v2096_v18  ;;  %v1983_v36 = vmul.f32 %v16995_v11, %v16938_v31  ;;  %v219_v60 = vpop.permute.xlu0 %218  ;;  %v17020_v18 = vld [vmem:[%s20648_s3] ss:$0 sm:$0xff]  ;;  %v21699_v31 = vld [vmem:[#allocation143_spill] sm:$0xff]  ;;  %v21700_v30 = vld [vmem:[#allocation233_spill] sm:$0xff] }
 0x2fc   :  { %11779 = vmatprep.mubr.msk.f32.mxu0 %vm13430_vm0, %v21563_v53  ;;  %v3689_v40 = vmax.f32 %v2896_v19, %v3628_v28  ;;  %v2776_v38 = vmul.f32 %v16995_v11, %v2715_v24  ;;  %v3081_v34 = vadd.f32 %v3020_v3, %v16922_v43  ;;  %v3386_v22 = vmul.f32 %v16784_v50, %v3213_v20  ;;  %v21701_v24 = vld [vmem:[#allocation19_spill] sm:$0xff]  ;;  %v21702_v16 = vld [vmem:[#allocation128_spill] sm:$0xff] }
 0x2fd   :  { %v3507_v9 = vmul.f32 %v16995_v11, %v3446_v25  ;;  %v1924_v13 = vadd.f32 %v1863_v61, %v21698_v62  ;;  %v2836_v43 = vadd.f32 %v17020_v18, %v2775_v35  ;;  %v2351_v32 = vadd.f32 %v2290_v6, %v21699_v31 }
 0x2fe   :  { %13274 = vset.pattern.permute.xlu1 %v21689_v8  ;;  %v2100_v10 = vmax.f32 %v21700_v30, 0.0  ;;  %v805_v61 = vadd.f32 %v21701_v24, %v435_v45  ;;  %v3447_v3 = vadd.f32 %v3386_v22, %v3081_v34  ;;  %12016 = vmatmul.mubr.f32.gmra.mrb[42].mxu1 %v3689_v40  ;;  %v1366_v4 = vmax.f32 %v1305_v48, 0.0  ;;  %v2485_v48 = vpop.permute.xlu1 %2484  ;;  %v21703_v40 = vld [vmem:[#allocation183_spill] sm:$0xff]  ;;  %v21705_v22 = vld [vmem:[#allocation134_spill] sm:$0xff] }
 0x2ff   :  { %11780 = vmatmul.mubr.f32.gmra.mrb[28].mxu0 %v2157_v1  ;;  %1771 = vperm.xlu1 %13274, %v13384_v55   ;;  %v17028_v47 = vmax.f32 %v1371_v52, %v2103_v29  ;;  %v1865_v19 = vmul.f32 %v16784_v50, %v21702_v16  ;;  %v1240_v28 = vmul.f32 %v16995_v11, %v1173_v58  ;;  %v2897_v20 = vmax.f32 %v2836_v43, 0.0 }
 0x300   :  { %11782 = vmatprep.mubr.msk.f32.mxu0 %vm13430_vm0, %v21563_v53  ;;  %12018 = vmatprep.mubr.msk.f32.mxu1 %vm13430_vm0, %v21563_v53  ;;  %v3568_v6 = vadd.f32 %v17020_v18, %v3507_v9  ;;  %v17037_v35 = vadd.f32 %v17020_v18, %v1983_v36  ;;  %v2292_v45 = vmul.f32 %v16680_v44, %v21702_v16 }
 0x301   :  { %v437_v25 = vmul.f32 %v16671_v0, %v219_v60  ;;  %v3508_v52 = vmul.f32 %v16995_v11, %v3447_v3  ;;  %v2837_v29 = vadd.f32 %v17020_v18, %v2776_v38  ;;  %v2655_v46 = vmul.f32 %v16784_v50, %v2485_v48  ;;  %v21706_v60 = vld [vmem:[#allocation231_spill] sm:$0xff]  ;;  %v21707_v3 = vld [vmem:[#allocation217_spill] sm:$0xff] }
 0x302   :  { %v3021_v58 = vmul.f32 %v16680_v44, %v2485_v48  ;;  %v3629_v1 = vmax.f32 %v3568_v6, 0.0  ;;  %v1175_v36 = vadd.f32 %v21703_v40, %v805_v61  ;;  %v2159_v34 = vmax.f32 %v1366_v4, %v2098_v2  ;;  %v21708_v61 = vld [vmem:[#allocation20_spill] sm:$0xff]  ;;  %v2489_v48 = vpop.permute.xlu1 %2488 }
 0x303   :  { %11783 = vmatmul.mubr.f32.gmra.mrb[30].mxu0 %v16830_v14  ;;  %13275 = vset.pattern.permute.xlu1 %v21118_v12  ;;  %v3569_v38 = vadd.f32 %v17020_v18, %v3508_v52  ;;  %v21704_v14 = vld [vmem:[#allocation136_spill] sm:$0xff]  ;;  %v2716_v62 = vadd.f32 %v2655_v46, %v21705_v22  ;;  %v1307_v43 = vadd.f32 %v17020_v18, %v1240_v28  ;;  %v2898_v46 = vmax.f32 %v2837_v29, 0.0 }
 0x304   :  { %3296 = vperm.xlu1 %13275, %v13384_v55   ;;  %11785 = vmatprep.mubr.msk.f32.mxu0 %vm13430_vm0, %v21563_v53  ;;  %v2102_v9 = vmax.f32 %v21704_v14, 0.0  ;;  %v3082_v31 = vadd.f32 %v3021_v58, %v21706_v60  ;;  %v3690_v24 = vmax.f32 %v2897_v20, %v3629_v1  ;;  %v2657_v55 = vmul.f32 %v16784_v50, %v21707_v3  ;;  %v21709_v58 = vld [vmem:[#allocation198_spill] sm:$0xff]  ;;  %v229_v1 = vpop.permute.xlu0 %228 }
 0x305   :  { %v807_v6 = vadd.f32 %v21708_v61, %v437_v25  ;;  %v3630_v40 = vmax.f32 %v3569_v38, 0.0  ;;  %v1985_v56 = vmul.f32 %v16995_v11, %v1924_v13  ;;  %v2777_v2 = vmul.f32 %v16995_v11, %v2716_v62 }
 0x306   :  { %v3448_v4 = vadd.f32 %v16494_v21, %v3082_v31  ;;  %12019 = vmatmul.mubr.f32.gmra.mrb[44].mxu1 %v3690_v24  ;;  %v2656_v52 = vmul.f32 %v16784_v50, %v2489_v48  ;;  %v1926_v28 = vadd.f32 %v1865_v19, %v21709_v58  ;;  %v17068_v20 = vmul.f32 %v16671_v0, %v21702_v16  ;;  %v13386_v19 = vld [vmem:[%s20644_s0 + $0x168] sm:$0xff]  ;;  %v21712_v31 = vld [vmem:[#allocation186_spill] sm:$0xff] }
 0x307   :  { %11786 = vmatmul.mubr.f32.gmra.mrb[32].mxu0 %v2159_v34  ;;  %v3022_v25 = vmul.f32 %v16680_v44, %v2489_v48  ;;  %v2105_v21 = vmax.f32 %v17037_v35, 0.0  ;;  %v1242_v13 = vmul.f32 %v16995_v11, %v1175_v36  ;;  %12021 = vmatprep.mubr.msk.f32.mxu1 %vm13430_vm0, %v21563_v53  ;;  %v3691_v16 = vmax.f32 %v2898_v46, %v3630_v40  ;;  %v21710_v35 = vld [vmem:[#allocation249_spill] sm:$0xff]  ;;  %v21711_v36 = vld [vmem:[#allocation239_spill] sm:$0xff]  ;;  %v3221_v61 = vpop.permute.xlu1 %3220 }
 0x308   :  { %13276 = vset.pattern.permute.xlu1 %v21689_v8  ;;  %11788 = vmatprep.mubr.msk.f32.mxu0 %vm13430_vm0, %v21563_v53  ;;  %v2717_v34 = vadd.f32 %v2656_v52, %v2351_v32  ;;  %v1368_v29 = vmax.f32 %v1307_v43, 0.0  ;;  %v3023_v38 = vmul.f32 %v16680_v44, %v21707_v3  ;;  %v3509_v22 = vmul.f32 %v16995_v11, %v3448_v4  ;;  %v21713_v48 = vld [vmem:[#allocation247_spill] sm:$0xff] }
 0x309   :  { %1775 = vperm.xlu1 %13276, %v13386_v19   ;;  %v17085_v62 = vadd.f32 %v2292_v45, %v21710_v35  ;;  %v2046_v32 = vadd.f32 %v17020_v18, %v1985_v56  ;;  %v2718_v60 = vadd.f32 %v2657_v55, %v21711_v36  ;;  %v1177_v24 = vadd.f32 %v21712_v31, %v807_v6  ;;  %v21714_v55 = vld [vmem:[#allocation142_spill] sm:$0xff]  ;;  %v21715_v52 = vld [vmem:[#allocation227_spill] sm:$0xff] }
 0x30a   :  { %12022 = vmatmul.mubr.f32.gmra.mrb[46].mxu1 %v3691_v16  ;;  %v2838_v43 = vadd.f32 %v17020_v18, %v2777_v2  ;;  %v1373_v40 = vmax.f32 %v21713_v48, 0.0  ;;  %v439_v3 = vmul.f32 %v16671_v0, %v229_v1  ;;  %v3083_v4 = vadd.f32 %v3022_v25, %v16990_v5 }
 0x30b   :  { %11789 = vmatmul.mubr.f32.gmra.mrb[34].mxu0 %v16910_v51  ;;  %v3388_v45 = vmul.f32 %v16784_v50, %v3221_v61  ;;  %12024 = vmatprep.mubr.msk.f32.mxu1 %vm13430_vm0, %v21563_v53  ;;  %v1375_v51 = vmax.f32 %v21714_v55, 0.0  ;;  %v2778_v6 = vmul.f32 %v16995_v11, %v2717_v34  ;;  %v2161_v56 = vmax.f32 %v1368_v29, %v2100_v10  ;;  %v21716_v34 = vld [vmem:[#allocation236_spill] sm:$0xff]  ;;  %v3225_v35 = vpop.permute.xlu1 %3224  ;;  %v239_v61 = vpop.permute.xlu0 %238  ;;  %v21719_v55 = vld [vmem:[#allocation145_spill] sm:$0xff] }
 0x30c   :  { %11791 = vmatprep.mubr.msk.f32.mxu0 %vm13430_vm0, %v21563_v53  ;;  %v3570_v2 = vadd.f32 %v17020_v18, %v3509_v22  ;;  %v1309_v5 = vadd.f32 %v17020_v18, %v1242_v13  ;;  %v1867_v46 = vmul.f32 %v16784_v50, %v21715_v52  ;;  %v2294_v58 = vmul.f32 %v16680_v44, %v21715_v52 }
 0x30d   :  { %13277 = vset.pattern.permute.xlu1 %v21118_v12  ;;  %v3449_v25 = vadd.f32 %v3388_v45, %v3083_v4  ;;  %v17111_v1 = vmax.f32 %v1373_v40, %v2105_v21  ;;  %v3084_v16 = vadd.f32 %v3023_v38, %v21716_v34  ;;  %v2899_v30 = vmax.f32 %v2838_v43, 0.0  ;;  %v21717_v21 = vld [vmem:[#allocation21_spill] sm:$0xff] }
 0x30e   :  { %3300 = vperm.xlu1 %13277, %v13386_v19   ;;  %v3631_v10 = vmax.f32 %v3570_v2, 0.0  ;;  %v2107_v29 = vmax.f32 %v2046_v32, 0.0  ;;  %v2779_v22 = vmul.f32 %v16995_v11, %v2718_v60  ;;  %v1244_v13 = vmul.f32 %v16995_v11, %v1177_v24  ;;  %v21718_v4 = vld [vmem:[#allocation173_spill] sm:$0xff] }
 0x30f   :  { %11792 = vmatmul.mubr.f32.gmra.mrb[36].mxu0 %v2161_v56  ;;  %v3510_v36 = vmul.f32 %v16995_v11, %v3449_v25  ;;  %v3389_v31 = vmul.f32 %v16784_v50, %v3225_v35  ;;  %v809_v19 = vadd.f32 %v21717_v21, %v439_v3  ;;  %v1370_v48 = vmax.f32 %v1309_v5, 0.0  ;;  %v21720_v56 = vld [vmem:[#allocation242_spill] sm:$0xff]  ;;  %v13387_v25 = vld [vmem:[%s20644_s0 + $0x170] sm:$0xff] }
 0x310   :  { %11794 = vmatprep.mubr.msk.f32.mxu0 %vm13430_vm0, %v21563_v53  ;;  %v3692_v38 = vmax.f32 %v2899_v30, %v3631_v10  ;;  %v2839_v43 = vadd.f32 %v17020_v18, %v2778_v6  ;;  %v17124_v32 = vmul.f32 %v16671_v0, %v21715_v52  ;;  %v1987_v40 = vmul.f32 %v16995_v11, %v1926_v28  ;;  %v21722_v30 = vld [vmem:[#allocation230_spill] sm:$0xff] }
 0x311   :  { %v3450_v60 = vadd.f32 %v3389_v31, %v3084_v16  ;;  %v3571_v24 = vadd.f32 %v17020_v18, %v3510_v36  ;;  %v1928_v45 = vadd.f32 %v1867_v46, %v21718_v4  ;;  %v2355_v3 = vadd.f32 %v2294_v58, %v21719_v55  ;;  %v2497_v34 = vpop.permute.xlu1 %2496  ;;  %v21723_v21 = vld [vmem:[#allocation22_spill] sm:$0xff] }
 0x312   :  { %13278 = vset.pattern.permute.xlu1 %v21111_v42  ;;  %12025 = vmatmul.mubr.f32.gmra.mrb[48].mxu1 %v3692_v38  ;;  %v2104_v6 = vmax.f32 %v21720_v56, 0.0  ;;  %v17133_v2 = vmax.f32 %v1375_v51, %v2107_v29  ;;  %v441_v5 = vmul.f32 %v16671_v0, %v239_v61  ;;  %v2840_v46 = vadd.f32 %v17020_v18, %v2779_v22  ;;  %v21724_v56 = vld [vmem:[#allocation203_spill] sm:$0xff] }
 0x313   :  { %11795 = vmatmul.mubr.f32.gmra.mrb[38].mxu0 %v16968_v39  ;;  %v3511_v52 = vmul.f32 %v16995_v11, %v3450_v60  ;;  %2572 = vperm.xlu1 %13278, %v13387_v25   ;;  %v3632_v28 = vmax.f32 %v3571_v24, 0.0  ;;  %v21721_v39 = vld [vmem:[#allocation80_spill] sm:$0xff]  ;;  %v2163_v51 = vmax.f32 %v1370_v48, %v2102_v9  ;;  %v2900_v16 = vmax.f32 %v2839_v43, 0.0  ;;  %v249_v60 = vpop.permute.xlu0 %248 }
 0x314   :  { %11797 = vmatprep.mubr.msk.f32.mxu0 %vm13430_vm0, %v21563_v53  ;;  %v1179_v58 = vadd.f32 %v21721_v39, %v809_v19  ;;  %12027 = vmatprep.mubr.msk.f32.mxu1 %vm13430_vm0, %v21563_v53  ;;  %v1311_v35 = vadd.f32 %v17020_v18, %v1244_v13  ;;  %v1869_v10 = vmul.f32 %v16784_v50, %v21722_v30 }
 0x315   :  { %v2658_v29 = vmul.f32 %v16784_v50, %v2497_v34  ;;  %v3024_v36 = vmul.f32 %v16680_v44, %v2497_v34  ;;  %v2048_v22 = vadd.f32 %v17020_v18, %v1987_v40  ;;  %v2296_v31 = vmul.f32 %v16680_v44, %v21722_v30  ;;  %v2501_v24 = vpop.permute.xlu1 %2500 }
 0x316   :  { %v17158_v14 = vmul.f32 %v16671_v0, %v21722_v30  ;;  %v3693_v9 = vmax.f32 %v2900_v16, %v3632_v28  ;;  %v3572_v13 = vadd.f32 %v17020_v18, %v3511_v52  ;;  %v811_v19 = vadd.f32 %v21723_v21, %v441_v5  ;;  %v21725_v5 = vld [vmem:[#allocation94_spill] sm:$0xff] }
 0x317   :  { %11798 = vmatmul.mubr.f32.gmra.mrb[40].mxu0 %v2163_v51  ;;  %v2719_v61 = vadd.f32 %v2658_v29, %v17085_v62  ;;  %v3085_v38 = vadd.f32 %v3024_v36, %v17068_v20  ;;  %13279 = vset.pattern.permute.xlu1 %v21118_v12  ;;  %v1989_v48 = vmul.f32 %v16995_v11, %v1928_v45  ;;  %v2901_v40 = vmax.f32 %v2840_v46, 0.0  ;;  %v21728_v29 = vld [vmem:[#allocation140_spill] sm:$0xff] }
 0x318   :  { %v1246_v43 = vmul.f32 %v16995_v11, %v1179_v58  ;;  %3304 = vperm.xlu1 %13279, %v13387_v25   ;;  %12028 = vmatmul.mubr.f32.gmra.mrb[50].mxu1 %v3693_v9  ;;  %v3633_v4 = vmax.f32 %v3572_v13, 0.0  ;;  %v1372_v55 = vmax.f32 %v1311_v35, 0.0  ;;  %v17168_v52 = vadd.f32 %v1869_v10, %v21724_v56  ;;  %v21726_v58 = vld [vmem:[#allocation82_spill] sm:$0xff] }
 0x319   :  { %v2660_v62 = vmul.f32 %v16784_v50, %v21725_v5  ;;  %v2780_v20 = vmul.f32 %v16995_v11, %v2719_v61  ;;  %v3451_v28 = vadd.f32 %v16523_v26, %v3085_v38  ;;  %11800 = vmatprep.mubr.msk.f32.mxu0 %vm13430_vm0, %v21563_v53  ;;  %v2659_v45 = vmul.f32 %v16784_v50, %v2501_v24  ;;  %v21727_v35 = vld [vmem:[#allocation138_spill] sm:$0xff]  ;;  %v259_v61 = vpop.permute.xlu0 %258 }
 0x31a   :  { %v3025_v25 = vmul.f32 %v16680_v44, %v2501_v24  ;;  %12030 = vmatprep.mubr.msk.f32.mxu1 %vm13430_vm0, %v21563_v53  ;;  %v3694_v46 = vmax.f32 %v2901_v40, %v3633_v4  ;;  %v2109_v39 = vmax.f32 %v2048_v22, 0.0  ;;  %v1181_v34 = vadd.f32 %v21726_v58, %v811_v19  ;;  %v13388_v9 = vld [vmem:[%s20644_s0 + $0x178] sm:$0xff]  ;;  %v3233_v13 = vpop.permute.xlu1 %3232 }
 0x31b   :  { %11801 = vmatmul.mubr.f32.gmra.mrb[42].mxu0 %v17028_v47  ;;  %v443_v51 = vmul.f32 %v16671_v0, %v249_v60  ;;  %v2841_v26 = vadd.f32 %v17020_v18, %v2780_v20  ;;  %v3512_v16 = vmul.f32 %v16995_v11, %v3451_v28  ;;  %v2720_v30 = vadd.f32 %v2659_v45, %v21727_v35  ;;  %v21731_v60 = vld [vmem:[#allocation205_spill] sm:$0xff] }
 0x31c   :  { %11803 = vmatprep.mubr.msk.f32.mxu0 %vm13430_vm0, %v21563_v53  ;;  %13280 = vset.pattern.permute.xlu1 %v21111_v42  ;;  %v2165_v47 = vmax.f32 %v1372_v55, %v2104_v6  ;;  %v1313_v10 = vadd.f32 %v17020_v18, %v1246_v43  ;;  %v2106_v36 = vmax.f32 %v21728_v29, 0.0  ;;  %v2721_v22 = vadd.f32 %v2660_v62, %v2355_v3  ;;  %v21729_v6 = vld [vmem:[#allocation200_spill] sm:$0xff] }
 0x31d   :  { %12031 = vmatmul.mubr.f32.gmra.mrb[52].mxu1 %v3694_v46  ;;  %v3026_v0 = vmul.f32 %v16680_v44, %v21725_v5  ;;  %2576 = vperm.xlu1 %13280, %v13388_v9   ;;  %v3573_v21 = vadd.f32 %v17020_v18, %v3512_v16  ;;  %v1377_v19 = vmax.f32 %v21729_v6, 0.0  ;;  %v2781_v38 = vmul.f32 %v16995_v11, %v2720_v30  ;;  %v21730_v3 = vld [vmem:[#allocation240_spill] sm:$0xff]  ;;  %v17220_v46 = vld [vmem:[%s20646_s1] ss:$0 sm:$0xff]  ;;  %v21734_v30 = vld [vmem:[#allocation137_spill] sm:$0xff] }
 0x31e   :  { %12033 = vmatprep.mubr.msk.f32.mxu1 %vm13430_vm0, %v21563_v53  ;;  %v3086_v43 = vadd.f32 %v3025_v25, %v21730_v3  ;;  %v3391_v44 = vmul.f32 %v16784_v50, %v3233_v13  ;;  %v17204_v24 = vadd.f32 %v2296_v31, %v21731_v60  ;;  %v1248_v40 = vmul.f32 %v16995_v11, %v1181_v34  ;;  %v21732_v5 = vld [vmem:[#allocation24_spill] sm:$0xff]  ;;  %v21736_v9 = vld [vmem:[#allocation83_spill] sm:$0xff] }
 0x31f   :  { %11804 = vmatmul.mubr.f32.gmra.mrb[44].mxu0 %v2165_v47  ;;  %v2902_v4 = vmax.f32 %v2841_v26, 0.0  ;;  %v3634_v55 = vmax.f32 %v3573_v21, 0.0  ;;  %v17209_v56 = vmax.f32 %v1377_v19, %v2109_v39  ;;  %v813_v62 = vadd.f32 %v21732_v5, %v443_v51  ;;  %v3237_v39 = vpop.permute.xlu1 %3236  ;;  %v21733_v16 = vld [vmem:[#allocation248_spill] sm:$0xff]  ;;  %v21738_v5 = vld [vmem:[#allocation18_spill] sm:$0xff] }
 0x320   :  { %11806 = vmatprep.mubr.msk.f32.mxu0 %vm13430_vm0, %v21563_v53  ;;  %v3452_v20 = vadd.f32 %v3391_v44, %v3086_v43  ;;  %v1374_v28 = vmax.f32 %v1313_v10, 0.0  ;;  %v17213_v45 = vadd.f32 %v17020_v18, %v1989_v48  ;;  %v2782_v25 = vmul.f32 %v16995_v11, %v2721_v22  ;;  %v13390_v48 = vld [vmem:[%s20644_s0 + $0x180] sm:$0xff]  ;;  %v21735_v22 = vld [vmem:[#allocation252_spill] sm:$0xff] }
 0x321   :  { %v3087_v31 = vadd.f32 %v3026_v0, %v17124_v32  ;;  %v445_v58 = vmul.f32 %v17220_v46, %v259_v61  ;;  %13281 = vset.pattern.permute.xlu1 %v21689_v8  ;;  %v3695_v34 = vmax.f32 %v2902_v4, %v3634_v55  ;;  %v3392_v32 = vmul.f32 %v16784_v50, %v3237_v39  ;;  %v17237_v10 = vld [vmem:[%s20646_s1 + $0x1] ss:$0 sm:$0xff]  ;;  %v21739_v39 = vld [vmem:[#allocation164_spill] sm:$0xff] }
 0x322   :  { %v3513_v51 = vmul.f32 %v16995_v11, %v3452_v20  ;;  %1787 = vperm.xlu1 %13281, %v13390_v48   ;;  %v2842_v26 = vadd.f32 %v17020_v18, %v2781_v38  ;;  %v2108_v35 = vmax.f32 %v21733_v16, 0.0  ;;  %v1871_v47 = vmul.f32 %v16784_v50, %v21734_v30  ;;  %v21737_v44 = vld [vmem:[#allocation27_spill] sm:$0xff]  ;;  %v269_v20 = vpop.permute.xlu0 %268  ;;  %v21742_v16 = vld [vmem:[#allocation244_spill] sm:$0xff] }
 0x323   :  { %11807 = vmatmul.mubr.f32.gmra.mrb[46].mxu0 %v17111_v1  ;;  %v2298_v29 = vmul.f32 %v17237_v10, %v21734_v30  ;;  %12034 = vmatmul.mubr.f32.gmra.mrb[54].mxu1 %v3695_v34  ;;  %v1315_v1 = vadd.f32 %v17020_v18, %v1248_v40  ;;  %v1379_v0 = vmax.f32 %v21735_v22, 0.0  ;;  %v1183_v13 = vadd.f32 %v21736_v9, %v813_v62 }
 0x324   :  { %11809 = vmatprep.mubr.msk.f32.mxu0 %vm13430_vm0, %v21563_v53  ;;  %v3453_v21 = vadd.f32 %v3392_v32, %v3087_v31  ;;  %v2167_v6 = vmax.f32 %v1374_v28, %v2106_v36  ;;  %12036 = vmatprep.mubr.msk.f32.mxu1 %vm13430_vm0, %v21563_v53  ;;  %v3574_v19 = vadd.f32 %v17020_v18, %v3513_v51  ;;  %v2111_v3 = vmax.f32 %v17213_v45, 0.0  ;;  %v2509_v40 = vpop.permute.xlu1 %2508  ;;  %v21740_v51 = vld [vmem:[#allocation78_spill] sm:$0xff] }
 0x325   :  { %v17251_v61 = vmul.f32 %v17220_v46, %v21734_v30  ;;  %v2843_v38 = vadd.f32 %v17020_v18, %v2782_v25  ;;  %v1991_v43 = vmul.f32 %v16995_v11, %v17168_v52  ;;  %v815_v60 = vadd.f32 %v21737_v44, %v445_v58 }
 0x326   :  { %v3514_v36 = vmul.f32 %v16995_v11, %v3453_v21  ;;  %13282 = vset.pattern.permute.xlu1 %v21111_v42  ;;  %v2903_v4 = vmax.f32 %v2842_v26, 0.0  ;;  %v3635_v55 = vmax.f32 %v3574_v19, 0.0  ;;  %v17261_v62 = vadd.f32 %v1871_v47, %v21738_v5 }
 0x327   :  { %11810 = vmatmul.mubr.f32.gmra.mrb[48].mxu0 %v2167_v6  ;;  %2580 = vperm.xlu1 %13282, %v13390_v48   ;;  %v2661_v28 = vmul.f32 %v16784_v50, %v2509_v40  ;;  %v3027_v45 = vmul.f32 %v17237_v10, %v2509_v40  ;;  %v1376_v52 = vmax.f32 %v1315_v1, 0.0  ;;  %v1250_v25 = vmul.f32 %v16995_v11, %v1183_v13  ;;  %v21741_v48 = vld [vmem:[#allocation245_spill] sm:$0xff] }
 0x328   :  { %11812 = vmatprep.mubr.msk.f32.mxu0 %vm13430_vm0, %v21563_v53  ;;  %v3696_v31 = vmax.f32 %v2903_v4, %v3635_v55  ;;  %v3575_v58 = vadd.f32 %v17020_v18, %v3514_v36  ;;  %v17270_v34 = vadd.f32 %v2298_v29, %v21739_v39  ;;  %v2663_v32 = vmul.f32 %v16784_v50, %v21740_v51  ;;  %v21743_v1 = vld [vmem:[#allocation193_spill] sm:$0xff]  ;;  %v2513_v13 = vpop.permute.xlu1 %2512  ;;  %v21744_v55 = vld [vmem:[#allocation238_spill] sm:$0xff] }
 0x329   :  { %v2722_v26 = vadd.f32 %v2661_v28, %v21741_v48  ;;  %v3088_v30 = vadd.f32 %v3027_v45, %v21742_v16  ;;  %v17277_v47 = vadd.f32 %v17020_v18, %v1991_v43  ;;  %v1185_v22 = vadd.f32 %v21743_v1, %v815_v60  ;;  %v13392_v60 = vld [vmem:[%s20644_s0 + $0x188] sm:$0xff] }
 0x32a   :  { %v447_v9 = vmul.f32 %v17220_v46, %v269_v20  ;;  %12037 = vmatmul.mubr.f32.gmra.mrb[56].mxu1 %v3696_v31  ;;  %v2904_v29 = vmax.f32 %v2843_v38, 0.0  ;;  %v3636_v21 = vmax.f32 %v3575_v58, 0.0  ;;  %v2662_v44 = vmul.f32 %v16784_v50, %v2513_v13  ;;  %v21745_v20 = vld [vmem:[#allocation85_spill] sm:$0xff]  ;;  %v21747_v31 = vld [vmem:[#allocation28_spill] sm:$0xff] }
 0x32b   :  { %11813 = vmatmul.mubr.f32.gmra.mrb[50].mxu0 %v17133_v2  ;;  %v2783_v6 = vmul.f32 %v16995_v11, %v2722_v26  ;;  %v3454_v19 = vadd.f32 %v16555_v37, %v3088_v30  ;;  %13283 = vset.pattern.permute.xlu1 %v21689_v8  ;;  %v2169_v43 = vmax.f32 %v1376_v52, %v2108_v35 }
 0x32c   :  { %v3028_v36 = vmul.f32 %v17237_v10, %v2513_v13  ;;  %1791 = vperm.xlu1 %13283, %v13392_v60   ;;  %11815 = vmatprep.mubr.msk.f32.mxu0 %vm13430_vm0, %v21563_v53  ;;  %v3697_v2 = vmax.f32 %v2904_v29, %v3636_v21  ;;  %v1317_v38 = vadd.f32 %v17020_v18, %v1250_v25  ;;  %v21749_v21 = vld [vmem:[#allocation195_spill] sm:$0xff] }
 0x32d   :  { %v2723_v37 = vadd.f32 %v2662_v44, %v17204_v24  ;;  %12039 = vmatprep.mubr.msk.f32.mxu1 %vm13430_vm0, %v21563_v53  ;;  %v2844_v35 = vadd.f32 %v17020_v18, %v2783_v6  ;;  %v3515_v40 = vmul.f32 %v16995_v11, %v3454_v19  ;;  %v17298_v4 = vmax.f32 %v1379_v0, %v2111_v3  ;;  %v21746_v24 = vld [vmem:[#allocation250_spill] sm:$0xff]  ;;  %v3245_v39 = vpop.permute.xlu1 %3244 }
 0x32e   :  { %v1873_v5 = vmul.f32 %v16784_v50, %v21744_v55  ;;  %v2724_v28 = vadd.f32 %v2663_v32, %v21745_v20  ;;  %v3029_v45 = vmul.f32 %v17237_v10, %v21740_v51  ;;  %12040 = vmatmul.mubr.f32.gmra.mrb[58].mxu1 %v3697_v2  ;;  %v2110_v52 = vmax.f32 %v21746_v24, 0.0  ;;  %v21748_v3 = vld [vmem:[#allocation50_spill] sm:$0xff]  ;;  %v279_v51 = vpop.permute.xlu0 %278  ;;  %v21752_v20 = vld [vmem:[#allocation204_spill] sm:$0xff] }
 0x32f   :  { %11816 = vmatmul.mubr.f32.gmra.mrb[52].mxu0 %v2169_v43  ;;  %v1252_v25 = vmul.f32 %v16995_v11, %v1185_v22  ;;  %v817_v58 = vadd.f32 %v21747_v31, %v447_v9  ;;  %12042 = vmatprep.mubr.msk.f32.mxu1 %vm13430_vm0, %v21563_v53  ;;  %v3576_v0 = vadd.f32 %v17020_v18, %v3515_v40  ;;  %v1381_v32 = vmax.f32 %v21748_v3, 0.0  ;;  %v21750_v19 = vld [vmem:[#allocation86_spill] sm:$0xff]  ;;  %v21751_v40 = vld [vmem:[#allocation149_spill] sm:$0xff] }
 0x330   :  { %11818 = vmatprep.mubr.msk.f32.mxu0 %vm13430_vm0, %v21563_v53  ;;  %v2784_v48 = vmul.f32 %v16995_v11, %v2723_v37  ;;  %v3089_v26 = vadd.f32 %v3028_v36, %v17158_v14  ;;  %13284 = vset.pattern.permute.xlu1 %v21118_v12  ;;  %v3394_v16 = vmul.f32 %v16784_v50, %v3245_v39  ;;  %v1378_v30 = vmax.f32 %v1317_v38, 0.0  ;;  %v17337_v37 = vld [vmem:[%s20646_s1 + $0x2] ss:$0 sm:$0xff] }
 0x331   :  { %v2300_v1 = vmul.f32 %v17237_v10, %v21744_v55  ;;  %v17322_v22 = vmul.f32 %v17220_v46, %v21744_v55  ;;  %3316 = vperm.xlu1 %13284, %v13392_v60   ;;  %v2905_v9 = vmax.f32 %v2844_v35, 0.0  ;;  %v3637_v13 = vmax.f32 %v3576_v0, 0.0  ;;  %v3249_v36 = vpop.permute.xlu1 %3248 }
 0x332   :  { %v2785_v29 = vmul.f32 %v16995_v11, %v2724_v28  ;;  %v3090_v6 = vadd.f32 %v3029_v45, %v21749_v21  ;;  %v3455_v14 = vadd.f32 %v3394_v16, %v3089_v26  ;;  %v2113_v50 = vmax.f32 %v17277_v47, 0.0  ;;  %v289_v0 = vpop.permute.xlu0 %288 }
 0x333   :  { %11819 = vmatmul.mubr.f32.gmra.mrb[54].mxu0 %v17209_v56  ;;  %v1187_v44 = vadd.f32 %v21750_v19, %v817_v58  ;;  %v449_v43 = vmul.f32 %v17220_v46, %v279_v51  ;;  %v3698_v60 = vmax.f32 %v2905_v9, %v3637_v13  ;;  %v1319_v2 = vadd.f32 %v17020_v18, %v1252_v25  ;;  %v13394_v25 = vld [vmem:[%s20644_s0 + $0x190] sm:$0xff] }
 0x334   :  { %11821 = vmatprep.mubr.msk.f32.mxu0 %vm13430_vm0, %v21563_v53  ;;  %v3516_v38 = vmul.f32 %v16995_v11, %v3455_v14  ;;  %v3395_v56 = vmul.f32 %v17337_v37, %v3249_v36  ;;  %v2171_v47 = vmax.f32 %v1378_v30, %v2110_v52  ;;  %v2845_v35 = vadd.f32 %v17020_v18, %v2784_v48  ;;  %v21753_v58 = vld [vmem:[#allocation29_spill] sm:$0xff] }
 0x335   :  { %v1934_v55 = vadd.f32 %v1873_v5, %v21751_v40  ;;  %v17343_v28 = vadd.f32 %v2300_v1, %v21752_v20  ;;  %13285 = vset.pattern.permute.xlu1 %v21689_v8  ;;  %12043 = vmatmul.mubr.f32.gmra.mrb[60].mxu1 %v3698_v60  ;;  %v1993_v45 = vmul.f32 %v16995_v11, %v17261_v62  ;;  %v21754_v62 = vld [vmem:[#allocation251_spill] sm:$0xff]  ;;  %v1380_v30 = vmax.f32 %v1319_v2, 0.0  ;;  %v21755_v1 = vld [vmem:[#allocation189_spill] sm:$0xff]  ;;  %v21757_v2 = vld [vmem:[#allocation206_spill] sm:$0xff] }
 0x336   :  { %v3456_v24 = vadd.f32 %v3395_v56, %v3090_v6  ;;  %1795 = vperm.xlu1 %13285, %v13394_v25   ;;  %v3577_v52 = vadd.f32 %v17020_v18, %v3516_v38  ;;  %v17352_v31 = vmax.f32 %v1381_v32, %v2113_v50  ;;  %v1254_v5 = vmul.f32 %v16995_v11, %v1187_v44  ;;  %v2521_v26 = vpop.permute.xlu1 %2520  ;;  %v21756_v19 = vld [vmem:[#allocation253_spill] sm:$0xff]  ;;  %v21758_v56 = vld [vmem:[#allocation199_spill] sm:$0xff] }
 0x337   :  { %11822 = vmatmul.mubr.f32.gmra.mrb[56].mxu0 %v2171_v47  ;;  %v819_v39 = vadd.f32 %v21753_v58, %v449_v43  ;;  %12045 = vmatprep.mubr.msk.f32.mxu1 %vm13430_vm0, %v21563_v53  ;;  %v2112_v3 = vmax.f32 %v21754_v62, 0.0  ;;  %v2846_v51 = vadd.f32 %v17020_v18, %v2785_v29  ;;  %v2906_v32 = vmax.f32 %v2845_v35, 0.0 }
 0x338   :  { %11824 = vmatprep.mubr.msk.f32.mxu0 %vm13430_vm0, %v21563_v53  ;;  %v3517_v48 = vmul.f32 %v16995_v11, %v3456_v24  ;;  %v3638_v16 = vmax.f32 %v3577_v52, 0.0  ;;  %v17365_v9 = vmul.f32 %v17337_v37, %v21755_v1  ;;  %v2664_v13 = vmul.f32 %v17337_v37, %v2521_v26 }
 0x339   :  { %v3030_v21 = vmul.f32 %v17237_v10, %v2521_v26  ;;  %v17370_v6 = vadd.f32 %v17020_v18, %v1993_v45  ;;  %v451_v14 = vmul.f32 %v17220_v46, %v289_v0  ;;  %v2114_v44 = vmax.f32 %v21756_v19, 0.0  ;;  %v21759_v0 = vld [vmem:[#allocation31_spill] sm:$0xff] }
 0x33a   :  { %13286 = vset.pattern.permute.xlu1 %v21118_v12  ;;  %v3699_v29 = vmax.f32 %v2906_v32, %v3638_v16  ;;  %v3578_v50 = vadd.f32 %v17020_v18, %v3517_v48  ;;  %v2725_v43 = vadd.f32 %v2664_v13, %v17270_v34  ;;  %v1321_v60 = vadd.f32 %v17020_v18, %v1254_v5  ;;  %v299_v5 = vpop.permute.xlu0 %298  ;;  %v13395_v32 = vld [vmem:[%s20644_s0 + $0x198] sm:$0xff] }
 0x33b   :  { %11825 = vmatmul.mubr.f32.gmra.mrb[58].mxu0 %v17298_v4  ;;  %v3091_v36 = vadd.f32 %v3030_v21, %v17251_v61  ;;  %3320 = vperm.xlu1 %13286, %v13394_v25   ;;  %v2116_v38 = vmax.f32 %v21757_v2, 0.0  ;;  %v1189_v47 = vadd.f32 %v21758_v56, %v819_v39  ;;  %v2525_v4 = vpop.permute.xlu1 %2524  ;;  %v2173_v35 = vmax.f32 %v1380_v30, %v2112_v3  ;;  %v21763_v56 = vld [vmem:[#allocation246_spill] sm:$0xff] }
 0x33c   :  { %11827 = vmatprep.mubr.msk.f32.mxu0 %vm13430_vm0, %v21563_v53  ;;  %12046 = vmatmul.mubr.f32.gmra.mrb[62].mxu1 %v3699_v29  ;;  %v2907_v40 = vmax.f32 %v2846_v51, 0.0  ;;  %v3639_v20 = vmax.f32 %v3578_v50, 0.0  ;;  %v2666_v34 = vmul.f32 %v17337_v37, %v16266_v7  ;;  %v2786_v61 = vmul.f32 %v16995_v11, %v2725_v43  ;;  %v21762_v43 = vld [vmem:[#allocation194_spill] sm:$0xff] }
 0x33d   :  { %v3457_v45 = vadd.f32 %v16586_v27, %v3091_v36  ;;  %v2665_v24 = vmul.f32 %v17337_v37, %v2525_v4  ;;  %12048 = vmatprep.mubr.msk.f32.mxu1 %vm13430_vm0, %v21563_v53  ;;  %v2302_v25 = vmul.f32 %v17237_v10, %v21755_v1  ;;  %v17395_v52 = vmul.f32 %v17220_v46, %v21755_v1  ;;  %v21760_v27 = vld [vmem:[#allocation202_spill] sm:$0xff]  ;;  %v21761_v1 = vld [vmem:[#allocation151_spill] sm:$0xff] }
 0x33e   :  { %v3031_v58 = vmul.f32 %v17237_v10, %v2525_v4  ;;  %v3700_v39 = vmax.f32 %v2907_v40, %v3639_v20  ;;  %v821_v62 = vadd.f32 %v21759_v0, %v451_v14  ;;  %v1382_v51 = vmax.f32 %v1321_v60, 0.0 }
 0x33f   :  { %11828 = vmatmul.mubr.f32.gmra.mrb[60].mxu0 %v2173_v35  ;;  %v2726_v3 = vadd.f32 %v2665_v24, %v21760_v27  ;;  %13287 = vset.pattern.permute.xlu1 %v21111_v42  ;;  %v1995_v48 = vmul.f32 %v16995_v11, %v1934_v55  ;;  %v1256_v26 = vmul.f32 %v16995_v11, %v1189_v47  ;;  %v1383_v13 = vmax.f32 %v21761_v1, 0.0  ;;  %v3257_v29 = vpop.permute.xlu1 %3256  ;;  %v21764_v47 = vld [vmem:[#allocation88_spill] sm:$0xff] }
 0x340   :  { %11830 = vmatprep.mubr.msk.f32.mxu0 %vm13430_vm0, %v21563_v53  ;;  %2592 = vperm.xlu1 %13287, %v13395_v32   ;;  %v2847_v16 = vadd.f32 %v17020_v18, %v2786_v61  ;;  %v3518_v30 = vmul.f32 %v16995_v11, %v3457_v45  ;;  %v2727_v21 = vadd.f32 %v2666_v34, %v17343_v28  ;;  %v2115_v50 = vmax.f32 %v17370_v6, 0.0  ;;  %v21767_v1 = vld [vmem:[#allocation208_spill] sm:$0xff] }
 0x341   :  { %12049 = vmatmul.mubr.f32.gmra.mrb[64].mxu1 %v3700_v39  ;;  %v3032_v14 = vmul.f32 %v17237_v10, %v16266_v7  ;;  %v453_v55 = vmul.f32 %v17220_v46, %v299_v5  ;;  %v2787_v19 = vmul.f32 %v16995_v11, %v2726_v3  ;;  %v3092_v36 = vadd.f32 %v3031_v58, %v21762_v43  ;;  %v21765_v5 = vld [vmem:[#allocation34_spill] sm:$0xff] }
 0x342   :  { %12051 = vmatprep.mubr.msk.f32.mxu1 %vm13430_vm0, %v21563_v53  ;;  %v3397_v60 = vmul.f32 %v17337_v37, %v3257_v29  ;;  %v3579_v28 = vadd.f32 %v17020_v18, %v3518_v30  ;;  %v1877_v7 = vmul.f32 %v17337_v37, %v21763_v56  ;;  %v1191_v4 = vadd.f32 %v21764_v47, %v821_v62  ;;  %v13396_v29 = vld [vmem:[%s20644_s0 + $0x1a0] sm:$0xff] }
 0x343   :  { %11831 = vmatmul.mubr.f32.gmra.mrb[62].mxu0 %v17352_v31  ;;  %v2175_v35 = vmax.f32 %v1382_v51, %v2114_v44  ;;  %v2056_v6 = vadd.f32 %v17020_v18, %v1995_v48  ;;  %v2908_v20 = vmax.f32 %v2847_v16, 0.0  ;;  %v1323_v31 = vadd.f32 %v17020_v18, %v1256_v26  ;;  %v3261_v44 = vpop.permute.xlu1 %3260  ;;  %v21766_v51 = vld [vmem:[#allocation30_spill] sm:$0xff] }
 0x344   :  { %11833 = vmatprep.mubr.msk.f32.mxu0 %vm13430_vm0, %v21563_v53  ;;  %v3458_v40 = vadd.f32 %v3397_v60, %v3092_v36  ;;  %13288 = vset.pattern.permute.xlu1 %v21118_v12  ;;  %v3640_v34 = vmax.f32 %v3579_v28, 0.0  ;;  %v1936_v61 = vadd.f32 %v17365_v9, %v16263_v54  ;;  %v2788_v45 = vmul.f32 %v16995_v11, %v2727_v21  ;;  %v309_v9 = vpop.permute.xlu0 %308  ;;  %v21768_v36 = vld [vmem:[#allocation144_spill] sm:$0xff] }
 0x345   :  { %v3093_v24 = vadd.f32 %v3032_v14, %v17322_v22  ;;  %v823_v58 = vadd.f32 %v21765_v5, %v453_v55  ;;  %3324 = vperm.xlu1 %13288, %v13395_v32   ;;  %v3398_v0 = vmul.f32 %v17337_v37, %v3261_v44  ;;  %v2848_v27 = vadd.f32 %v17020_v18, %v2787_v19  ;;  %v21771_v5 = vld [vmem:[#allocation38_spill] sm:$0xff] }
 0x346   :  { %v3519_v39 = vmul.f32 %v16995_v11, %v3458_v40  ;;  %v3701_v62 = vmax.f32 %v2908_v20, %v3640_v34  ;;  %v1938_v3 = vadd.f32 %v1877_v7, %v16311_v63  ;;  %v1258_v54 = vmul.f32 %v16995_v11, %v1191_v4  ;;  %v21769_v20 = vld [vmem:[#allocation146_spill] sm:$0xff] }
 0x347   :  { %11834 = vmatmul.mubr.f32.gmra.mrb[64].mxu0 %v2175_v35  ;;  %v2176_v22 = vmax.f32 %v1383_v13, %v2115_v50  ;;  %v2363_v48 = vadd.f32 %v2302_v25, %v21766_v51  ;;  %v3459_v26 = vadd.f32 %v3398_v0, %v3093_v24  ;;  %v1384_v32 = vmax.f32 %v1323_v31, 0.0  ;;  %v21770_v31 = vld [vmem:[#allocation196_spill] sm:$0xff] }
 0x348   :  { %11836 = vmatprep.mubr.msk.f32.mxu0 %vm13430_vm0, %v21563_v53  ;;  %12052 = vmatmul.mubr.f32.gmra.mrb[66].mxu1 %v3701_v62  ;;  %v3580_v16 = vadd.f32 %v17020_v18, %v3519_v39  ;;  %v2117_v30 = vmax.f32 %v2056_v6, 0.0  ;;  %v1193_v21 = vadd.f32 %v21767_v1, %v823_v58  ;;  %v1385_v63 = vmax.f32 %v16307_v59, 0.0  ;;  %v2533_v50 = vpop.permute.xlu1 %2532  ;;  %v319_v39 = vpop.permute.xlu0 %318 }
 0x349   :  { %13289 = vset.pattern.permute.xlu1 %v21111_v42  ;;  %12054 = vmatprep.mubr.msk.f32.mxu1 %vm13430_vm0, %v21563_v53  ;;  %v2849_v14 = vadd.f32 %v17020_v18, %v2788_v45  ;;  %v1997_v13 = vmul.f32 %v16995_v11, %v1936_v61  ;;  %v455_v25 = vmul.f32 %v17220_v46, %v309_v9  ;;  %v2909_v19 = vmax.f32 %v2848_v27, 0.0  ;;  %v13397_v27 = vld [vmem:[%s20644_s0 + $0x1a8] sm:$0xff] }
 0x34a   :  { %v3520_v55 = vmul.f32 %v16995_v11, %v3459_v26  ;;  %2596 = vperm.xlu1 %13289, %v13396_v29   ;;  %v3641_v43 = vmax.f32 %v3580_v16, 0.0  ;;  %v1879_v59 = vmul.f32 %v17337_v37, %v21768_v36  ;;  %v2667_v60 = vmul.f32 %v17337_v37, %v2533_v50  ;;  %v21772_v26 = vld [vmem:[#allocation42_spill] sm:$0xff] }
 0x34b   :  { %11837 = vmatmul.mubr.f32.gmra.mrb[66].mxu0 %v2176_v22  ;;  %v3033_v28 = vmul.f32 %v17237_v10, %v2533_v50  ;;  %v1325_v7 = vadd.f32 %v17020_v18, %v1258_v54  ;;  %v2177_v47 = vmax.f32 %v1384_v32, %v2116_v38  ;;  %v2178_v35 = vmax.f32 %v1385_v63, %v2117_v30  ;;  %v21773_v63 = vld [vmem:[#allocation178_spill] sm:$0xff] }
 0x34c   :  { %11839 = vmatprep.mubr.msk.f32.mxu0 %vm13430_vm0, %v21563_v53  ;;  %v3702_v4 = vmax.f32 %v2909_v19, %v3641_v43  ;;  %v3581_v6 = vadd.f32 %v17020_v18, %v3520_v55  ;;  %v2669_v40 = vmul.f32 %v17337_v37, %v16297_v57  ;;  %v2728_v34 = vadd.f32 %v2667_v60, %v21769_v20  ;;  %v2537_v2 = vpop.permute.xlu1 %2536 }
 0x34d   :  { %v3094_v61 = vadd.f32 %v3033_v28, %v21770_v31  ;;  %v2058_v45 = vadd.f32 %v17020_v18, %v1997_v13  ;;  %v1260_v24 = vmul.f32 %v16995_v11, %v1193_v21  ;;  %v825_v58 = vadd.f32 %v21771_v5, %v455_v25  ;;  %v21774_v25 = vld [vmem:[#allocation92_spill] sm:$0xff] }
 0x34e   :  { %13290 = vset.pattern.permute.xlu1 %v21689_v8  ;;  %v2910_v38 = vmax.f32 %v2849_v14, 0.0  ;;  %v3642_v44 = vmax.f32 %v3581_v6, 0.0  ;;  %v2789_v0 = vmul.f32 %v16995_v11, %v2728_v34  ;;  %12055 = vmatmul.mubr.f32.gmra.mrb[68].mxu1 %v3702_v4  ;;  %v2668_v54 = vmul.f32 %v17337_v37, %v2537_v2 }
 0x34f   :  { %11840 = vmatmul.mubr.f32.gmra.mrb[68].mxu0 %v2177_v47  ;;  %v3460_v62 = vadd.f32 %v16598_v41, %v3094_v61  ;;  %1807 = vperm.xlu1 %13290, %v13397_v27   ;;  %v1386_v9 = vmax.f32 %v1325_v7, 0.0  ;;  %v3034_v22 = vmul.f32 %v17237_v10, %v2537_v2  ;;  %v2118_v41 = vmax.f32 %v21772_v26, 0.0 }
 0x350   :  { %11842 = vmatprep.mubr.msk.f32.mxu0 %vm13430_vm0, %v21563_v53  ;;  %12057 = vmatprep.mubr.msk.f32.mxu1 %vm13430_vm0, %v21563_v53  ;;  %v3703_v51 = vmax.f32 %v2910_v38, %v3642_v44  ;;  %v1999_v32 = vmul.f32 %v16995_v11, %v1938_v3  ;;  %v2729_v16 = vadd.f32 %v2668_v54, %v2363_v48  ;;  %v2119_v21 = vmax.f32 %v2058_v45, 0.0  ;;  %v21778_v44 = vld [vmem:[#allocation215_spill] sm:$0xff] }
 0x351   :  { %v2850_v30 = vadd.f32 %v17020_v18, %v2789_v0  ;;  %v3521_v1 = vmul.f32 %v16995_v11, %v3460_v62  ;;  %v2730_v14 = vadd.f32 %v2669_v40, %v21773_v63  ;;  %v3035_v13 = vmul.f32 %v17237_v10, %v16297_v57  ;;  %v3269_v3 = vpop.permute.xlu1 %3268  ;;  %v17501_v28 = vpop.f32.mrb[0].mxu1  ;;  %v21776_v40 = vld [vmem:[#allocation147_spill] sm:$0xff]  ;;  %v13399_v62 = vld [vmem:[%s20644_s0 + $0x1b0] sm:$0xff] }
 0x352   :  { %v1195_v55 = vadd.f32 %v21774_v25, %v825_v58  ;;  %v457_v29 = vmul.f32 %v17220_v46, %v319_v39  ;;  %12058 = vmatmul.mubr.f32.gmra.mrb[70].mxu1 %v3703_v51  ;;  %v2179_v48 = vmax.f32 %v1386_v9, %v2118_v41  ;;  %v1327_v19 = vadd.f32 %v17020_v18, %v1260_v24  ;;  %v11954_v4 = vpop.f32.mrb[1].mxu1 }
 0x353   :  { %11843 = vmatmul.mubr.f32.gmra.mrb[70].mxu0 %v2178_v35  ;;  %13291 = vset.pattern.permute.xlu1 %v21111_v42  ;;  %v3582_v50 = vadd.f32 %v17020_v18, %v3521_v1  ;;  %v2790_v43 = vmul.f32 %v16995_v11, %v2729_v16  ;;  %v3095_v60 = vadd.f32 %v3034_v22, %v17395_v52  ;;  %v1387_v7 = vmax.f32 %v16337_v17, 0.0  ;;  %v17516_v17 = vld [vmem:[%s20647_s2] ss:$0 sm:$0xff]  ;;  %v21781_v16 = vld [vmem:[#allocation212_spill] sm:$0xff] }
 0x354   :  { %2600 = vperm.xlu1 %13291, %v13397_v27   ;;  %v3400_v57 = vmul.f32 %v17337_v37, %v3269_v3  ;;  %21775 = vst [vmem:[#allocation37_spill] sm:$0xff] %v17501_v28  ;;  %11845 = vmatprep.mubr.msk.f32.mxu0 %vm13430_vm0, %v21563_v53  ;;  %v1940_v47 = vadd.f32 %v1879_v59, %v16348_v49  ;;  %v2911_v35 = vmax.f32 %v2850_v30, 0.0  ;;  %v21777_v59 = vld [vmem:[#allocation41_spill] sm:$0xff]  ;;  %v21779_v27 = vld [vmem:[#allocation64_spill] sm:$0xff]  ;;  %v1389_v41 = vmax.f32 %v16369_v33, 0.0 }
 0x355   :  { %12060 = vmatprep.mubr.msk.f32.mxu1 %vm13430_vm0, %v21563_v53  ;;  %v3643_v6 = vmax.f32 %v3582_v50, 0.0  ;;  %v1263_v52 = vmul.f32 %v16995_v11, %v16330_v23  ;;  %v3096_v20 = vadd.f32 %v3035_v13, %v21776_v40  ;;  %v2180_v31 = vmax.f32 %v1387_v7, %v2119_v21  ;;  %v3273_v24 = vpop.permute.xlu1 %3272 }
 0x356   :  { %v3461_v34 = vadd.f32 %v3400_v57, %v3095_v60  ;;  %v2060_v61 = vadd.f32 %v17020_v18, %v1999_v32  ;;  %v2791_v49 = vmul.f32 %v17516_v17, %v2730_v14  ;;  %v827_v45 = vadd.f32 %v21777_v59, %v457_v29  ;;  %v17551_v14 = vld [vmem:[%s20648_s3] ss:$0 sm:$0xff] }
 0x357   :  { %11846 = vmatmul.mubr.f32.gmra.mrb[72].mxu0 %v2179_v48  ;;  %v3704_v23 = vmax.f32 %v2911_v35, %v3643_v6  ;;  %v1388_v11 = vmax.f32 %v1327_v19, 0.0  ;;  %v1262_v5 = vmul.f32 %v17516_v17, %v1195_v55  ;;  %v3401_v2 = vmul.f32 %v17337_v37, %v3273_v24  ;;  %v17538_v51 = vpop.f32.mrb[2].mxu1  ;;  %v21782_v48 = vld [vmem:[#allocation25_spill] sm:$0xff] }
 0x358   :  { %11848 = vmatprep.mubr.msk.f32.mxu0 %vm13430_vm0, %v21563_v53  ;;  %v3522_v58 = vmul.f32 %v17516_v17, %v3461_v34  ;;  %13292 = vset.pattern.permute.xlu1 %v21689_v8  ;;  %v2851_v38 = vadd.f32 %v17020_v18, %v2790_v43  ;;  %v3402_v39 = vmul.f32 %v17337_v37, %v21778_v44  ;;  %v2120_v54 = vmax.f32 %v21779_v27, 0.0  ;;  %v11957_v1 = vpop.f32.mrb[3].mxu1  ;;  %v21786_v44 = vld [vmem:[#allocation148_spill] sm:$0xff] }
 0x359   :  { %v2304_v0 = vmul.f32 %v17237_v10, %v21763_v56  ;;  %1811 = vperm.xlu1 %13292, %v13399_v62   ;;  %12061 = vmatmul.mubr.f32.gmra.mrb[72].mxu1 %v3704_v23  ;;  %v17536_v9 = vadd.f32 %v17020_v18, %v1263_v52  ;;  %v3462_v22 = vadd.f32 %v3401_v2, %v3096_v20  ;;  %v2121_v63 = vmax.f32 %v2060_v61, 0.0  ;;  %v21784_v23 = vld [vmem:[#allocation51_spill] sm:$0xff]  ;;  %v21788_v27 = vld [vmem:[#allocation188_spill] sm:$0xff] }
 0x35a   :  { %21780 = vst [vmem:[#allocation167_spill] sm:$0xff] %v17538_v51  ;;  %12063 = vmatprep.mubr.msk.f32.mxu1 %vm13430_vm0, %v21563_v53  ;;  %v3583_v26 = vadd.f32 %v17020_v18, %v3522_v58  ;;  %v2001_v32 = vmul.f32 %v17516_v17, %v1940_v47  ;;  %v1197_v30 = vadd.f32 %v21781_v16, %v827_v45  ;;  %v2912_v25 = vmax.f32 %v2851_v38, 0.0  ;;  %v21785_v2 = vld [vmem:[#allocation115_spill] sm:$0xff] }
 0x35b   :  { %11849 = vmatmul.mubr.f32.gmra.mrb[74].mxu0 %v2180_v31  ;;  %v2181_v21 = vmax.f32 %v1388_v11, %v2120_v54  ;;  %v2852_v13 = vadd.f32 %v17551_v14, %v2791_v49  ;;  %v3523_v18 = vmul.f32 %v17516_v17, %v3462_v22  ;;  %v2545_v33 = vpop.permute.xlu1 %2544  ;;  %v1329_v29 = vadd.f32 %v17551_v14, %v1262_v5  ;;  %v13401_v22 = vld [vmem:[%s20644_s0 + $0x1b8] sm:$0xff] }
 0x35c   :  { %11851 = vmatprep.mubr.msk.f32.mxu0 %vm13430_vm0, %v21563_v53  ;;  %v3644_v55 = vmax.f32 %v3583_v26, 0.0  ;;  %v2975_v3 = vmul.f32 %v17220_v46, %v21763_v56  ;;  %v2365_v50 = vadd.f32 %v2304_v0, %v21782_v48  ;;  %v2670_v19 = vmul.f32 %v17337_v37, %v2545_v33  ;;  %v17565_v35 = vpop.f32.mrb[4].mxu1  ;;  %v21787_v0 = vld [vmem:[#allocation153_spill] sm:$0xff] }
 0x35d   :  { %13293 = vset.pattern.permute.xlu1 %v21118_v12  ;;  %v3036_v43 = vmul.f32 %v17237_v10, %v2545_v33  ;;  %v2306_v60 = vmul.f32 %v17237_v10, %v21768_v36  ;;  %v3584_v7 = vadd.f32 %v17551_v14, %v3523_v18  ;;  %21783 = vst [vmem:[#allocation158_spill] sm:$0xff] %v17565_v35  ;;  %v11960_v40 = vpop.f32.mrb[5].mxu1  ;;  %v2913_v34 = vmax.f32 %v2852_v13, 0.0  ;;  %v21789_v18 = vld [vmem:[#allocation166_spill] sm:$0xff] }
 0x35e   :  { %3336 = vperm.xlu1 %13293, %v13399_v62   ;;  %v3705_v57 = vmax.f32 %v2912_v25, %v3644_v55  ;;  %v2731_v47 = vadd.f32 %v2670_v19, %v2365_v50  ;;  %v2182_v56 = vmax.f32 %v1389_v41, %v2121_v63  ;;  %v2062_v6 = vadd.f32 %v17551_v14, %v2001_v32 }
 0x35f   :  { %11852 = vmatmul.mubr.f32.gmra.mrb[76].mxu0 %v2181_v21  ;;  %v3097_v4 = vadd.f32 %v3036_v43, %v2975_v3  ;;  %v1264_v52 = vmul.f32 %v17516_v17, %v1197_v30  ;;  %v2549_v20 = vpop.permute.xlu1 %2548  ;;  %v3645_v31 = vmax.f32 %v3584_v7, 0.0  ;;  %v1390_v61 = vmax.f32 %v1329_v29, 0.0 }
 0x360   :  { %11854 = vmatprep.mubr.msk.f32.mxu0 %vm13430_vm0, %v21563_v53  ;;  %12064 = vmatmul.mubr.f32.gmra.mrb[74].mxu1 %v3705_v57  ;;  %v2672_v49 = vmul.f32 %v17337_v37, %v16326_v15  ;;  %v2792_v59 = vmul.f32 %v17516_v17, %v2731_v47  ;;  %v2671_v24 = vmul.f32 %v17337_v37, %v2549_v20  ;;  %v2122_v38 = vmax.f32 %v21785_v2, 0.0 }
 0x361   :  { %v3463_v45 = vadd.f32 %v3402_v39, %v3097_v4  ;;  %12066 = vmatprep.mubr.msk.f32.mxu1 %vm13430_vm0, %v21563_v53  ;;  %v17579_v11 = vmul.f32 %v17220_v46, %v21784_v23  ;;  %v3037_v5 = vmul.f32 %v17237_v10, %v2549_v20  ;;  %v3706_v58 = vmax.f32 %v2913_v34, %v3645_v31  ;;  %v21791_v4 = vld [vmem:[#allocation96_spill] sm:$0xff] }
 0x362   :  { %13294 = vset.pattern.permute.xlu1 %v21689_v8  ;;  %v2976_v39 = vmul.f32 %v17220_v46, %v21786_v44  ;;  %v2367_v62 = vadd.f32 %v2306_v60, %v21787_v0  ;;  %v2732_v54 = vadd.f32 %v2671_v24, %v21788_v27  ;;  %v2123_v26 = vmax.f32 %v2062_v6, 0.0  ;;  %v21793_v24 = vld [vmem:[#allocation150_spill] sm:$0xff] }
 0x363   :  { %11855 = vmatmul.mubr.f32.gmra.mrb[78].mxu0 %v2182_v56  ;;  %1815 = vperm.xlu1 %13294, %v13401_v22   ;;  %v2183_v41 = vmax.f32 %v1390_v61, %v2122_v38  ;;  %v2853_v32 = vadd.f32 %v17551_v14, %v2792_v59  ;;  %v3524_v16 = vmul.f32 %v17516_v17, %v3463_v45  ;;  %v1391_v13 = vmax.f32 %v17536_v9, 0.0  ;;  %v17605_v3 = vpop.f32.mrb[6].mxu1 }
 0x364   :  { %11857 = vmatprep.mubr.msk.f32.mxu0 %vm13430_vm0, %v21563_v53  ;;  %12067 = vmatmul.mubr.f32.gmra.mrb[76].mxu1 %v3706_v58  ;;  %v1331_v30 = vadd.f32 %v17551_v14, %v1264_v52  ;;  %v2733_v1 = vadd.f32 %v2672_v49, %v2367_v62  ;;  %v3038_v21 = vmul.f32 %v17237_v10, %v16326_v15  ;;  %v3281_v63 = vpop.permute.xlu1 %3280  ;;  %v21790_v15 = vld [vmem:[#allocation91_spill] sm:$0xff]  ;;  %v11963_v19 = vpop.f32.mrb[7].mxu1  ;;  %v21792_v49 = vld [vmem:[#allocation93_spill] sm:$0xff] }
 0x365   :  { %12069 = vmatprep.mubr.msk.f32.mxu1 %vm13430_vm0, %v21563_v53  ;;  %v2063_v33 = vadd.f32 %v17551_v14, %v21789_v18  ;;  %v2793_v25 = vmul.f32 %v17516_v17, %v2732_v54  ;;  %v3098_v55 = vadd.f32 %v3037_v5, %v2976_v39  ;;  %v3403_v29 = vmul.f32 %v17337_v37, %v3281_v63  ;;  %v21794_v5 = vld [vmem:[#allocation157_spill] sm:$0xff]  ;;  %v21795_v62 = vld [vmem:[#allocation43_spill] sm:$0xff]  ;;  %v329_v63 = vpop.permute.xlu0 %328 }
 0x366   :  { %v3585_v48 = vadd.f32 %v17551_v14, %v3524_v16  ;;  %v2246_v50 = vmul.f32 %v17220_v46, %v21790_v15  ;;  %v2977_v9 = vmul.f32 %v17220_v46, %v21768_v36  ;;  %v2184_v43 = vmax.f32 %v1391_v13, %v2123_v26 }
 0x367   :  { %11858 = vmatmul.mubr.f32.gmra.mrb[80].mxu0 %v2183_v41  ;;  %13295 = vset.pattern.permute.xlu1 %v21118_v12  ;;  %v3464_v60 = vadd.f32 %v3403_v29, %v3098_v55  ;;  %v2914_v57 = vmax.f32 %v2853_v32, 0.0  ;;  %v1392_v47 = vmax.f32 %v1331_v30, 0.0  ;;  %v767_v56 = vmul.f32 %v17237_v10, %v21791_v4 }
 0x368   :  { %11860 = vmatprep.mubr.msk.f32.mxu0 %vm13430_vm0, %v21563_v53  ;;  %3340 = vperm.xlu1 %13295, %v13401_v22   ;;  %v3646_v7 = vmax.f32 %v3585_v48, 0.0  ;;  %v2794_v6 = vmul.f32 %v17516_v17, %v2733_v1  ;;  %v3099_v52 = vadd.f32 %v3038_v21, %v2977_v9  ;;  %v3285_v40 = vpop.permute.xlu1 %3284  ;;  %v2124_v36 = vmax.f32 %v2063_v33, 0.0  ;;  %v13402_v22 = vld [vmem:[%s20644_s0 + $0x1c0] sm:$0xff] }
 0x369   :  { %v3525_v20 = vmul.f32 %v17516_v17, %v3464_v60  ;;  %v3404_v34 = vmul.f32 %v17337_v37, %v3285_v40  ;;  %v2854_v61 = vadd.f32 %v17551_v14, %v2793_v25  ;;  %v17623_v59 = vmul.f32 %v17337_v37, %v21792_v49  ;;  %v17634_v38 = vpop.f32.mrb[8].mxu1  ;;  %v21796_v25 = vld [vmem:[#allocation95_spill] sm:$0xff] }
 0x36a   :  { %v3707_v31 = vmax.f32 %v2914_v57, %v3646_v7  ;;  %v1516_v45 = vmul.f32 %v17237_v10, %v21792_v49  ;;  %v2307_v23 = vmul.f32 %v17237_v10, %v21793_v24  ;;  %v1137_v58 = vmul.f32 %v17337_v37, %v21794_v5  ;;  %v11966_v26 = vpop.f32.mrb[9].mxu1 }
 0x36b   :  { %11861 = vmatmul.mubr.f32.gmra.mrb[82].mxu0 %v2184_v43  ;;  %v3465_v2 = vadd.f32 %v3404_v34, %v3099_v52  ;;  %v2185_v44 = vmax.f32 %v1392_v47, %v2124_v36  ;;  %v3586_v39 = vadd.f32 %v17551_v14, %v3525_v20  ;;  %v17639_v0 = vmul.f32 %v17220_v46, %v21792_v49  ;;  %v21799_v47 = vld [vmem:[#allocation45_spill] sm:$0xff] }
 0x36c   :  { %11863 = vmatprep.mubr.msk.f32.mxu0 %vm13430_vm0, %v21563_v53  ;;  %13296 = vset.pattern.permute.xlu1 %v21111_v42  ;;  %v828_v27 = vadd.f32 %v767_v56, %v21795_v62  ;;  %v2978_v54 = vmul.f32 %v17220_v46, %v21793_v24  ;;  %v2915_v16 = vmax.f32 %v2854_v61, 0.0  ;;  %v2855_v1 = vadd.f32 %v17551_v14, %v2794_v6 }
 0x36d   :  { %12070 = vmatmul.mubr.f32.gmra.mrb[78].mxu1 %v3707_v31  ;;  %2612 = vperm.xlu1 %13296, %v13402_v22   ;;  %v3526_v41 = vmul.f32 %v17516_v17, %v3465_v2  ;;  %v2557_v32 = vpop.permute.xlu1 %2556  ;;  %v3647_v30 = vmax.f32 %v3586_v39, 0.0  ;;  %v1515_v21 = vmul.f32 %v17237_v10, %v21794_v5  ;;  %v2368_v13 = vadd.f32 %v2307_v23, %v2246_v50  ;;  %v17659_v48 = vpop.f32.mrb[10].mxu1  ;;  %v21798_v50 = vld [vmem:[#allocation119_spill] sm:$0xff]  ;;  %v21800_v23 = vld [vmem:[#allocation49_spill] sm:$0xff]  ;;  %v21801_v2 = vld [vmem:[#allocation98_spill] sm:$0xff] }
 0x36e   :  { %12072 = vmatprep.mubr.msk.f32.mxu1 %vm13430_vm0, %v21563_v53  ;;  %v2673_v18 = vmul.f32 %v17337_v37, %v2557_v32  ;;  %v3039_v33 = vmul.f32 %v17237_v10, %v2557_v32  ;;  %v1518_v55 = vmul.f32 %v17237_v10, %v21796_v25  ;;  %v1198_v29 = vadd.f32 %v1137_v58, %v828_v27  ;;  %v11969_v7 = vpop.f32.mrb[11].mxu1 }
 0x36f   :  { %11864 = vmatmul.mubr.f32.gmra.mrb[84].mxu0 %v2185_v44  ;;  %21797 = vst [vmem:[#allocation163_spill] sm:$0xff] %v17659_v48  ;;  %v3708_v15 = vmax.f32 %v2915_v16, %v3647_v30  ;;  %v3587_v9 = vadd.f32 %v17551_v14, %v3526_v41  ;;  %v1454_v19 = vmul.f32 %v17220_v46, %v21791_v4  ;;  %v2916_v52 = vmax.f32 %v2855_v1, 0.0  ;;  %v13403_v16 = vld [vmem:[%s20644_s0 + $0x1c8] sm:$0xff]  ;;  %v339_v7 = vpop.permute.xlu0 %338 }
 0x370   :  { %11866 = vmatprep.mubr.msk.f32.mxu0 %vm13430_vm0, %v21563_v53  ;;  %v3405_v43 = vmul.f32 %v17337_v37, %v21798_v50  ;;  %v2734_v60 = vadd.f32 %v2673_v18, %v2368_v13  ;;  %v3100_v57 = vadd.f32 %v3039_v33, %v2978_v54  ;;  %v17668_v56 = vadd.f32 %v1516_v45, %v21799_v47  ;;  %v21802_v54 = vld [vmem:[#allocation44_spill] sm:$0xff]  ;;  %v21805_v50 = vld [vmem:[#allocation46_spill] sm:$0xff] }
 0x371   :  { %13297 = vset.pattern.permute.xlu1 %v21118_v12  ;;  %v459_v6 = vmul.f32 %v17220_v46, %v329_v63  ;;  %12073 = vmatmul.mubr.f32.gmra.mrb[80].mxu1 %v3708_v15  ;;  %v3648_v40 = vmax.f32 %v3587_v9, 0.0  ;;  %v17673_v4 = vmul.f32 %v17337_v37, %v21796_v25  ;;  %v1576_v36 = vadd.f32 %v1515_v21, %v1454_v19  ;;  %v21803_v30 = vld [vmem:[#allocation100_spill] sm:$0xff] }
 0x372   :  { %3344 = vperm.xlu1 %13297, %v13402_v22   ;;  %v2795_v20 = vmul.f32 %v17516_v17, %v2734_v60  ;;  %v3466_v34 = vadd.f32 %v3405_v43, %v3100_v57  ;;  %12075 = vmatprep.mubr.msk.f32.mxu1 %vm13430_vm0, %v21563_v53  ;;  %v1265_v24 = vmul.f32 %v17516_v17, %v1198_v29 }
 0x373   :  { %v1768_v31 = vpop.permute.xlu1 %1767  ;;  %v3709_v45 = vmax.f32 %v2916_v52, %v3648_v40  ;;  %v17682_v58 = vadd.f32 %v1518_v55, %v21800_v23  ;;  %v769_v44 = vmul.f32 %v17237_v10, %v21801_v2  ;;  %v2247_v27 = vmul.f32 %v17220_v46, %v21794_v5 }
 0x374   :  { %v1881_v61 = vmul.f32 %v17337_v37, %v1768_v31  ;;  %v2308_v49 = vmul.f32 %v17237_v10, %v1768_v31  ;;  %v2856_v39 = vadd.f32 %v17551_v14, %v2795_v20  ;;  %v3527_v62 = vmul.f32 %v17516_v17, %v3466_v34 }
 0x375   :  { %v829_v22 = vadd.f32 %v21802_v54, %v459_v6  ;;  %12076 = vmatmul.mubr.f32.gmra.mrb[82].mxu1 %v3709_v45  ;;  %v17694_v41 = vmul.f32 %v17220_v46, %v21801_v2  ;;  %v2979_v32 = vmul.f32 %v17220_v46, %v1768_v31  ;;  %v771_v1 = vmul.f32 %v17237_v10, %v21803_v30  ;;  %v21806_v6 = vld [vmem:[#allocation26_spill] sm:$0xff]  ;;  %v21807_v31 = vld [vmem:[#allocation152_spill] sm:$0xff] }
 0x376   :  { %v1942_v26 = vadd.f32 %v1881_v61, %v1576_v36  ;;  %13299 = vset.pattern.permute.xlu1 %v21111_v42  ;;  %12078 = vmatprep.mubr.msk.f32.mxu1 %vm13430_vm0, %v21563_v53  ;;  %v3588_v5 = vadd.f32 %v17551_v14, %v3527_v62  ;;  %v17705_v21 = vpop.f32.mrb[12].mxu1  ;;  %v2369_v63 = vadd.f32 %v2308_v49, %v2247_v27  ;;  %v2917_v9 = vmax.f32 %v2856_v39, 0.0 }
 0x377   :  { %2616 = vperm.xlu1 %13299, %v13403_v16   ;;  %21804 = vst [vmem:[#allocation117_spill] sm:$0xff] %v17705_v21  ;;  %v1332_v18 = vadd.f32 %v17551_v14, %v1265_v24  ;;  %v11972_v15 = vpop.f32.mrb[13].mxu1  ;;  %v830_v43 = vadd.f32 %v769_v44, %v21805_v50  ;;  %v1458_v60 = vmul.f32 %v17220_v46, %v21803_v30  ;;  %v21808_v24 = vld [vmem:[#allocation160_spill] sm:$0xff] }
 0x378   :  { %v2003_v33 = vmul.f32 %v17516_v17, %v1942_v26  ;;  %v3649_v19 = vmax.f32 %v3588_v5, 0.0  ;;  %v1199_v57 = vadd.f32 %v17623_v59, %v829_v22  ;;  %v3406_v52 = vmul.f32 %v17337_v37, %v21806_v6  ;;  %v13404_v59 = vld [vmem:[%s20644_s0 + $0x1d0] sm:$0xff] }
 0x379   :  { %v2561_v13 = vpop.permute.xlu1 %2560  ;;  %v17720_v34 = vadd.f32 %v771_v1, %v17579_v11  ;;  %v1884_v61 = vmul.f32 %v17337_v37, %v21807_v31  ;;  %v1393_v49 = vmax.f32 %v1332_v18, 0.0  ;;  %v1139_v23 = vmul.f32 %v17337_v37, %v21808_v24  ;;  %v21810_v1 = vld [vmem:[#allocation39_spill] sm:$0xff] }
 0x37a   :  { %v2674_v55 = vmul.f32 %v17337_v37, %v2561_v13  ;;  %v3040_v29 = vmul.f32 %v17237_v10, %v2561_v13  ;;  %v2064_v47 = vadd.f32 %v17551_v14, %v2003_v33  ;;  %v3710_v20 = vmax.f32 %v2917_v9, %v3649_v19  ;;  %v17756_v33 = vld [vmem:[%s20646_s1 + $0x1] ss:$0 sm:$0xff] }
 0x37b   :  { %13300 = vset.pattern.permute.xlu1 %v21689_v8  ;;  %v461_v2 = vmul.f32 %v17220_v46, %v339_v7  ;;  %v1266_v62 = vmul.f32 %v17516_v17, %v1199_v57  ;;  %v1517_v26 = vmul.f32 %v17237_v10, %v21808_v24  ;;  %v17741_v46 = vld [vmem:[%s20646_s1] ss:$0 sm:$0xff]  ;;  %v17744_v16 = vpop.f32.mrb[14].mxu1  ;;  %v3041_v15 = vmul.f32 %v17756_v33, %v21810_v1 }
 0x37c   :  { %v2735_v40 = vadd.f32 %v2674_v55, %v2369_v63  ;;  %v3101_v36 = vadd.f32 %v3040_v29, %v2979_v32  ;;  %1827 = vperm.xlu1 %13300, %v13404_v59   ;;  %v2125_v45 = vmax.f32 %v2064_v47, 0.0  ;;  %12079 = vmatmul.mubr.f32.gmra.mrb[84].mxu1 %v3710_v20  ;;  %21809 = vst [vmem:[#allocation123_spill] sm:$0xff] %v17744_v16  ;;  %v11975_v18 = vpop.f32.mrb[15].mxu1  ;;  %v21811_v55 = vld [vmem:[#allocation162_spill] sm:$0xff] }
 0x37d   :  { %12081 = vmatprep.mubr.msk.f32.mxu1 %vm13430_vm0, %v21563_v53  ;;  %v2675_v63 = vmul.f32 %v17337_v37, %v21810_v1  ;;  %v1519_v29 = vmul.f32 %v17756_v33, %v21811_v55  ;;  %v1333_v50 = vadd.f32 %v17551_v14, %v1266_v62  ;;  %v1200_v20 = vadd.f32 %v1139_v23, %v830_v43 }
 0x37e   :  { %v2796_v44 = vmul.f32 %v17516_v17, %v2735_v40  ;;  %v3467_v39 = vadd.f32 %v3406_v52, %v3101_v36  ;;  %v1772_v11 = vpop.permute.xlu1 %1771  ;;  %v2186_v22 = vmax.f32 %v1393_v49, %v2125_v45  ;;  %v1945_v36 = vadd.f32 %v1884_v61, %v17682_v58  ;;  %v13407_v58 = vld [vmem:[%s20644_s0 + $0x1d8] sm:$0xff] }
 0x37f   :  { %v1882_v27 = vmul.f32 %v17337_v37, %v1772_v11  ;;  %v2309_v54 = vmul.f32 %v17237_v10, %v1772_v11  ;;  %v2980_v32 = vmul.f32 %v17741_v46, %v1772_v11  ;;  %v1394_v43 = vmax.f32 %v1333_v50, 0.0 }
 0x380   :  { %v2857_v5 = vadd.f32 %v17551_v14, %v2796_v44  ;;  %v3528_v30 = vmul.f32 %v17516_v17, %v3467_v39  ;;  %13301 = vset.pattern.permute.xlu1 %v21111_v42  ;;  %11867 = vmatmul.mubr.f32.gmra.mrb[86].mxu0 %v2186_v22  ;;  %v21812_v42 = vld [vmem:[#allocation48_spill] sm:$0xff]  ;;  %v1580_v39 = vadd.f32 %v1519_v29, %v1458_v60 }
 0x381   :  { %v1943_v13 = vadd.f32 %v1882_v27, %v17668_v56  ;;  %v2370_v10 = vadd.f32 %v2309_v54, %v17639_v0  ;;  %2620 = vperm.xlu1 %13301, %v13404_v59   ;;  %11869 = vmatprep.mubr.msk.f32.mxu0 %vm13430_vm0, %v21563_v53  ;;  %v831_v0 = vadd.f32 %v21812_v42, %v461_v2  ;;  %v17769_v6 = vpop.f32.mrb[16].mxu1  ;;  %v21813_v2 = vld [vmem:[#allocation154_spill] sm:$0xff] }
 0x382   :  { %v3589_v56 = vadd.f32 %v17551_v14, %v3528_v30  ;;  %v3102_v7 = vadd.f32 %v3041_v15, %v2980_v32  ;;  %v2918_v52 = vmax.f32 %v2857_v5, 0.0  ;;  %v11978_v59 = vpop.f32.mrb[17].mxu1  ;;  %v1885_v44 = vmul.f32 %v17337_v37, %v21813_v2 }
 0x383   :  { %v2736_v9 = vadd.f32 %v2675_v63, %v2370_v10  ;;  %v3297_v19 = vpop.permute.xlu1 %3296  ;;  %v2004_v57 = vmul.f32 %v17516_v17, %v1943_v13  ;;  %v2249_v27 = vmul.f32 %v17741_v46, %v21808_v24  ;;  %v1201_v54 = vadd.f32 %v17673_v4, %v831_v0 }
 0x384   :  { %v3407_v47 = vmul.f32 %v17337_v37, %v3297_v19  ;;  %v3650_v40 = vmax.f32 %v3589_v56, 0.0  ;;  %v1578_v23 = vadd.f32 %v1517_v26, %v17694_v41  ;;  %v1141_v60 = vmul.f32 %v17337_v37, %v21811_v55  ;;  %v21814_v26 = vld [vmem:[#allocation114_spill] sm:$0xff] }
 0x385   :  { %v2065_v49 = vadd.f32 %v17551_v14, %v2004_v57  ;;  %v2797_v45 = vmul.f32 %v17516_v17, %v2736_v9  ;;  %13303 = vset.pattern.permute.xlu1 %v21689_v8  ;;  %v1267_v1 = vmul.f32 %v17516_v17, %v1200_v20  ;;  %v1946_v41 = vadd.f32 %v1885_v44, %v1580_v39 }
 0x386   :  { %v3468_v11 = vadd.f32 %v3407_v47, %v3102_v7  ;;  %v3711_v62 = vmax.f32 %v2918_v52, %v3650_v40  ;;  %1831 = vperm.xlu1 %13303, %v13407_v58   ;;  %v2676_v63 = vmul.f32 %v17337_v37, %v21814_v26  ;;  %v1268_v18 = vmul.f32 %v17516_v17, %v1201_v54 }
 0x387   :  { %v2126_v61 = vmax.f32 %v2065_v49, 0.0  ;;  %v2858_v24 = vadd.f32 %v17551_v14, %v2797_v45  ;;  %v1202_v42 = vadd.f32 %v1141_v60, %v17720_v34  ;;  %v3042_v0 = vmul.f32 %v17756_v33, %v21814_v26 }
 0x388   :  { %v3529_v22 = vmul.f32 %v17516_v17, %v3468_v11  ;;  %12082 = vmatmul.mubr.f32.gmra.mrb[86].mxu1 %v3711_v62  ;;  %v1776_v32 = vpop.permute.xlu1 %1775  ;;  %v1334_v47 = vadd.f32 %v17551_v14, %v1267_v1  ;;  %v2006_v40 = vmul.f32 %v17516_v17, %v1945_v36  ;;  %v1335_v45 = vadd.f32 %v17551_v14, %v1268_v18 }
 0x389   :  { %v1883_v4 = vmul.f32 %v17337_v37, %v1776_v32  ;;  %v2310_v5 = vmul.f32 %v17756_v33, %v1776_v32  ;;  %v2187_v30 = vmax.f32 %v1394_v43, %v2126_v61  ;;  %12084 = vmatprep.mubr.msk.f32.mxu1 %vm13430_vm0, %v21563_v53  ;;  %v2981_v13 = vmul.f32 %v17741_v46, %v1776_v32  ;;  %v17799_v56 = vpop.f32.mrb[18].mxu1 }
 0x38a   :  { %v3590_v10 = vadd.f32 %v17551_v14, %v3529_v22  ;;  %13304 = vset.pattern.permute.xlu1 %v21118_v12  ;;  %v11981_v9 = vpop.f32.mrb[19].mxu1  ;;  %v2919_v19 = vmax.f32 %v2858_v24, 0.0  ;;  %v2007_v39 = vmul.f32 %v17516_v17, %v1946_v41  ;;  %v2311_v11 = vmul.f32 %v17756_v33, %v21807_v31  ;;  %v21816_v22 = vld [vmem:[#allocation52_spill] sm:$0xff]  ;;  %v349_v41 = vpop.permute.xlu0 %348 }
 0x38b   :  { %v1944_v29 = vadd.f32 %v1883_v4, %v1578_v23  ;;  %v2371_v15 = vadd.f32 %v2310_v5, %v2249_v27  ;;  %11870 = vmatmul.mubr.f32.gmra.mrb[88].mxu0 %v2187_v30  ;;  %3356 = vperm.xlu1 %13304, %v13407_v58   ;;  %v3103_v20 = vadd.f32 %v3042_v0, %v2981_v13  ;;  %v1395_v27 = vmax.f32 %v1334_v47, 0.0  ;;  %v21818_v9 = vld [vmem:[#allocation54_spill] sm:$0xff] }
 0x38c   :  { %v3651_v50 = vmax.f32 %v3590_v10, 0.0  ;;  %11872 = vmatprep.mubr.msk.f32.mxu0 %vm13430_vm0, %v21563_v53  ;;  %v2067_v58 = vadd.f32 %v17551_v14, %v2006_v40  ;;  %v1269_v43 = vmul.f32 %v17516_v17, %v1202_v42  ;;  %v772_v32 = vmul.f32 %v17756_v33, %v21816_v22  ;;  %v21817_v10 = vld [vmem:[#allocation53_spill] sm:$0xff] }
 0x38d   :  { %v2737_v57 = vadd.f32 %v2676_v63, %v2371_v15  ;;  %v3301_v7 = vpop.permute.xlu1 %3300  ;;  %v2005_v52 = vmul.f32 %v17516_v17, %v1944_v29  ;;  %v1396_v5 = vmax.f32 %v1335_v45, 0.0  ;;  %v2068_v30 = vadd.f32 %v17551_v14, %v2007_v39  ;;  %v21820_v45 = vld [vmem:[#allocation97_spill] sm:$0xff] }
 0x38e   :  { %v3408_v34 = vmul.f32 %v17337_v37, %v3301_v7  ;;  %v3712_v59 = vmax.f32 %v2919_v19, %v3651_v50  ;;  %v13408_v37 = vld [vmem:[%s20644_s0 + $0x1e0] sm:$0xff]  ;;  %v1459_v1 = vmul.f32 %v17741_v46, %v21816_v22  ;;  %v17844_v18 = vmul.f32 %v17741_v46, %v21817_v10 }
 0x38f   :  { %v2066_v49 = vadd.f32 %v17551_v14, %v2005_v52  ;;  %v2798_v44 = vmul.f32 %v17516_v17, %v2737_v57  ;;  %13305 = vset.pattern.permute.xlu1 %v21689_v8  ;;  %v17820_v36 = vpop.f32.mrb[20].mxu1  ;;  %v2250_v8 = vmul.f32 %v17741_v46, %v21796_v25  ;;  %v17838_v25 = vld [vmem:[%s20646_s1 + $0x2] ss:$0 sm:$0xff]  ;;  %v2128_v42 = vmax.f32 %v2067_v58, 0.0  ;;  %v21821_v58 = vld [vmem:[#allocation56_spill] sm:$0xff] }
 0x390   :  { %v3469_v62 = vadd.f32 %v3408_v34, %v3103_v20  ;;  %12085 = vmatmul.mubr.f32.gmra.mrb[88].mxu1 %v3712_v59  ;;  %1835 = vperm.xlu1 %13305, %v13408_v37   ;;  %21815 = vst [vmem:[#allocation118_spill] sm:$0xff] %v17820_v36  ;;  %v11984_v23 = vpop.f32.mrb[21].mxu1  ;;  %v1336_v0 = vadd.f32 %v17551_v14, %v1269_v43  ;;  %v2129_v20 = vmax.f32 %v2068_v30, 0.0  ;;  %v21819_v59 = vld [vmem:[#allocation55_spill] sm:$0xff] }
 0x391   :  { %v2127_v54 = vmax.f32 %v2066_v49, 0.0  ;;  %12087 = vmatprep.mubr.msk.f32.mxu1 %vm13430_vm0, %v21563_v53  ;;  %v2859_v60 = vadd.f32 %v17551_v14, %v2798_v44  ;;  %v2372_v26 = vadd.f32 %v2311_v11, %v2250_v8  ;;  %v17853_v19 = vmul.f32 %v17756_v33, %v21818_v9 }
 0x392   :  { %v3530_v61 = vmul.f32 %v17516_v17, %v3469_v62  ;;  %v2573_v24 = vpop.permute.xlu1 %2572  ;;  %v463_v52 = vmul.f32 %v17741_v46, %v349_v41  ;;  %v2189_v40 = vmax.f32 %v1396_v5, %v2128_v42  ;;  %v1461_v34 = vmul.f32 %v17741_v46, %v21818_v9 }
 0x393   :  { %v2188_v4 = vmax.f32 %v1395_v27, %v2127_v54  ;;  %v2677_v63 = vmul.f32 %v17838_v25, %v2573_v24  ;;  %v3043_v29 = vmul.f32 %v17756_v33, %v2573_v24  ;;  %v17848_v15 = vpop.f32.mrb[22].mxu1  ;;  %v2920_v7 = vmax.f32 %v2859_v60, 0.0 }
 0x394   :  { %v3591_v13 = vadd.f32 %v17551_v14, %v3530_v61  ;;  %13307 = vset.pattern.permute.xlu1 %v21118_v12  ;;  %v11987_v57 = vpop.f32.mrb[23].mxu1  ;;  %v2982_v12 = vmul.f32 %v17741_v46, %v21807_v31  ;;  %v17864_v49 = vmul.f32 %v17741_v46, %v21819_v59  ;;  %v1520_v44 = vmul.f32 %v17756_v33, %v21820_v45 }
 0x395   :  { %11873 = vmatmul.mubr.f32.gmra.mrb[90].mxu0 %v2188_v4  ;;  %v2738_v50 = vadd.f32 %v2677_v63, %v2372_v26  ;;  %3360 = vperm.xlu1 %13307, %v13408_v37   ;;  %v1397_v54 = vmax.f32 %v1336_v0, 0.0  ;;  %v17874_v43 = vmul.f32 %v17756_v33, %v21821_v58  ;;  %v1463_v8 = vmul.f32 %v17741_v46, %v21821_v58  ;;  %v21828_v58 = vld [vmem:[#allocation10_spill] sm:$0xff] }
 0x396   :  { %11875 = vmatprep.mubr.msk.f32.mxu0 %vm13430_vm0, %v21563_v53  ;;  %v3652_v47 = vmax.f32 %v3591_v13, 0.0  ;;  %v3104_v37 = vadd.f32 %v3043_v29, %v2982_v12  ;;  %v2251_v61 = vmul.f32 %v17741_v46, %v21811_v55  ;;  %v833_v60 = vadd.f32 %v772_v32, %v463_v52  ;;  %v21823_v32 = vld [vmem:[#allocation99_spill] sm:$0xff] }
 0x397   :  { %v3305_v39 = vpop.permute.xlu1 %3304  ;;  %v2799_v62 = vmul.f32 %v17516_v17, %v2738_v50  ;;  %v17870_v27 = vpop.f32.mrb[0].mxu0  ;;  %v2190_v24 = vmax.f32 %v1397_v54, %v2129_v20  ;;  %v1142_v4 = vmul.f32 %v17838_v25, %v21820_v45  ;;  %v1581_v5 = vadd.f32 %v1520_v44, %v1459_v1  ;;  %v21826_v20 = vld [vmem:[#allocation102_spill] sm:$0xff] }
 0x398   :  { %v3713_v11 = vmax.f32 %v2920_v7, %v3652_v47  ;;  %v3409_v31 = vmul.f32 %v17838_v25, %v3305_v39  ;;  %v11739_v23 = vpop.f32.mrb[1].mxu0  ;;  %v2252_v55 = vmul.f32 %v17741_v46, %v21820_v45  ;;  %v2312_v30 = vmul.f32 %v17756_v33, %v21813_v2  ;;  %v21825_v47 = vld [vmem:[#allocation101_spill] sm:$0xff]  ;;  %v21827_v45 = vld [vmem:[#allocation68_spill] sm:$0xff] }
 0x399   :  { %11876 = vmatmul.mubr.f32.gmra.mrb[92].mxu0 %v2189_v40  ;;  %5105 = vrot.lane.b32.xlu1 %v17634_v38, %s13432_s12  ;;  %v17896_v26 = vmul.f32 %v17838_v25, %v21823_v32  ;;  %v1522_v63 = vmul.f32 %v17756_v33, %v21823_v32  ;;  %v2860_v29 = vadd.f32 %v17551_v14, %v2799_v62  ;;  %v21829_v23 = vld [vmem:[#allocation16_spill] sm:$0xff] }
 0x39a   :  { %12088 = vmatmul.mubr.f32.gmra.mrb[90].mxu1 %v3713_v11  ;;  %v3470_v22 = vadd.f32 %v3409_v31, %v3104_v37  ;;  %11878 = vmatprep.mubr.msk.f32.mxu0 %vm13430_vm0, %v21563_v53  ;;  %v17892_v41 = vpop.f32.mrb[24].mxu1  ;;  %v2983_v42 = vmul.f32 %v17741_v46, %v21813_v2  ;;  %v2373_v0 = vadd.f32 %v2312_v30, %v2251_v61 }
 0x39b   :  { %12090 = vmatprep.mubr.msk.f32.mxu1 %vm13430_vm0, %v21563_v53  ;;  %21822 = vst [vmem:[#allocation67_spill] sm:$0xff] %v17892_v41  ;;  %v11990_v1 = vpop.f32.mrb[25].mxu1  ;;  %v17912_v7 = vmul.f32 %v17741_v46, %v21823_v32  ;;  %v1524_v12 = vmul.f32 %v17756_v33, %v21825_v47  ;;  %v1203_v52 = vadd.f32 %v1142_v4, %v833_v60  ;;  %v2921_v31 = vmax.f32 %v2860_v29, 0.0 }
 0x39c   :  { %v3531_v13 = vmul.f32 %v17516_v17, %v3470_v22  ;;  %v2577_v10 = vpop.permute.xlu1 %2576  ;;  %v773_v59 = vmul.f32 %v17756_v33, %v21826_v20  ;;  %v3410_v44 = vmul.f32 %v17838_v25, %v21827_v45  ;;  %v17921_v62 = vadd.f32 %v1522_v63, %v1461_v34 }
 0x39d   :  { %11879 = vmatmul.mubr.f32.gmra.mrb[94].mxu0 %v2190_v24  ;;  %v2678_v9 = vmul.f32 %v17838_v25, %v2577_v10  ;;  %v3044_v50 = vmul.f32 %v17756_v33, %v2577_v10  ;;  %v1460_v37 = vmul.f32 %v17741_v46, %v21826_v20  ;;  %v1143_v61 = vmul.f32 %v17838_v25, %v21828_v58 }
 0x39e   :  { %v17906_v57 = vpop.f32.mrb[2].mxu0  ;;  %11881 = vmatprep.mubr.msk.f32.mxu0 %vm13430_vm0, %v21563_v53  ;;  %v3592_v2 = vadd.f32 %v17551_v14, %v3531_v13  ;;  %v1523_v60 = vmul.f32 %v17756_v33, %v21829_v23  ;;  %v1270_v34 = vmul.f32 %v17516_v17, %v1203_v52  ;;  %v17937_v29 = vadd.f32 %v1524_v12, %v1463_v8  ;;  %v21833_v8 = vld [vmem:[#allocation156_spill] sm:$0xff] }
 0x39f   :  { %21824 = vst [vmem:[#allocation70_spill] sm:$0xff] %v17906_v57  ;;  %v11742_v40 = vpop.f32.mrb[3].mxu0  ;;  %v2739_v39 = vadd.f32 %v2678_v9, %v2373_v0  ;;  %v3105_v11 = vadd.f32 %v3044_v50, %v2983_v42  ;;  %v834_v42 = vadd.f32 %v773_v59, %v17844_v18  ;;  %v1521_v20 = vmul.f32 %v17756_v33, %v21828_v58  ;;  %v359_v59 = vpop.permute.xlu0 %358 }
 0x3a0   :  { %v3653_v54 = vmax.f32 %v3592_v2, 0.0  ;;  %v21832_v40 = vld [vmem:[#allocation104_spill] sm:$0xff]  ;;  %v1889_v18 = vmul.f32 %v17838_v25, %v21833_v8 }
 0x3a1   :  { %v2800_v22 = vmul.f32 %v17516_v17, %v2739_v39  ;;  %v3471_v24 = vadd.f32 %v3410_v44, %v3105_v11  ;;  %v1788_v4 = vpop.permute.xlu1 %1787  ;;  %v17935_v10 = vpop.f32.mrb[26].mxu1  ;;  %v17944_v52 = vmul.f32 %v17756_v33, %v21832_v40  ;;  %v1462_v2 = vmul.f32 %v17741_v46, %v21832_v40 }
 0x3a2   :  { %v17930_v30 = vpop.f32.mrb[4].mxu0  ;;  %v1886_v32 = vmul.f32 %v17838_v25, %v1788_v4  ;;  %v2313_v63 = vmul.f32 %v17756_v33, %v1788_v4  ;;  %21831 = vst [vmem:[#allocation168_spill] sm:$0xff] %v17935_v10  ;;  %v3714_v1 = vmax.f32 %v2921_v31, %v3653_v54  ;;  %v11993_v0 = vpop.f32.mrb[27].mxu1  ;;  %v1204_v12 = vadd.f32 %v1143_v61, %v834_v42 }
 0x3a3   :  { %21830 = vst [vmem:[#allocation171_spill] sm:$0xff] %v17930_v30  ;;  %v11745_v13 = vpop.f32.mrb[5].mxu0  ;;  %v2861_v9 = vadd.f32 %v17551_v14, %v2800_v22  ;;  %v3532_v50 = vmul.f32 %v17516_v17, %v3471_v24  ;;  %v2984_v44 = vmul.f32 %v17741_v46, %v1788_v4  ;;  %v1584_v31 = vadd.f32 %v1523_v60, %v1462_v2  ;;  %v21835_v0 = vld [vmem:[#allocation159_spill] sm:$0xff] }
 0x3a4   :  { %v1947_v45 = vadd.f32 %v1886_v32, %v1581_v5  ;;  %12091 = vmatmul.mubr.f32.gmra.mrb[92].mxu1 %v3714_v1  ;;  %v2374_v54 = vadd.f32 %v2313_v63, %v2252_v55  ;;  %v1337_v5 = vadd.f32 %v17551_v14, %v1270_v34  ;;  %v17966_v40 = vmul.f32 %v17838_v25, %v21835_v0 }
 0x3a5   :  { %12093 = vmatprep.mubr.msk.f32.mxu1 %vm13430_vm0, %v21563_v53  ;;  %v3593_v11 = vadd.f32 %v17551_v14, %v3532_v50  ;;  %v17962_v4 = vpop.f32.mrb[28].mxu1  ;;  %v2922_v1 = vmax.f32 %v2861_v9, 0.0  ;;  %v1582_v60 = vadd.f32 %v1521_v20, %v1460_v37  ;;  %v2253_v55 = vmul.f32 %v17741_v46, %v21828_v58  ;;  %v21836_v50 = vld [vmem:[#allocation175_spill] sm:$0xff] }
 0x3a6   :  { %v17953_v39 = vpop.f32.mrb[6].mxu0  ;;  %v2581_v22 = vpop.permute.xlu1 %2580  ;;  %v2008_v32 = vmul.f32 %v17516_v17, %v1947_v45  ;;  %21834 = vst [vmem:[#allocation74_spill] sm:$0xff] %v17962_v4  ;;  %v3411_v2 = vmul.f32 %v17838_v25, %v21836_v50  ;;  %v465_v37 = vmul.f32 %v17741_v46, %v359_v59  ;;  %v1398_v20 = vmax.f32 %v1337_v5, 0.0  ;;  %v10955_v59 = vld [vmem:[%s20649_s7 + $0x88] sm:$0xff]  ;;  %v10956_v4 = vld [vmem:[%s20649_s7 + $0x90] sm:$0xff] }
 0x3a7   :  { %v11748_v24 = vpop.f32.mrb[7].mxu0  ;;  %v2679_v61 = vmul.f32 %v17838_v25, %v2581_v22  ;;  %v3045_v13 = vmul.f32 %v17756_v33, %v2581_v22  ;;  %v3654_v42 = vmax.f32 %v3593_v11, 0.0  ;;  %v11996_v63 = vpop.f32.mrb[29].mxu1  ;;  %v17977_v11 = vmul.f32 %v17838_v25, %v21829_v23 }
 0x3a8   :  { %v2069_v34 = vadd.f32 %v17551_v14, %v2008_v32  ;;  %v17982_v63 = vadd.f32 %v1889_v18, %v1584_v31  ;;  %v369_v18 = vpop.permute.xlu0 %368 }
 0x3a9   :  { %v2740_v45 = vadd.f32 %v2679_v61, %v2374_v54  ;;  %v3106_v22 = vadd.f32 %v3045_v13, %v2984_v44  ;;  %v3715_v9 = vmax.f32 %v2922_v1, %v3654_v42  ;;  %v1271_v13 = vmul.f32 %v17516_v17, %v1204_v12  ;;  %v10954_v1 = vld [vmem:[%s20649_s7 + $0x80] sm:$0xff] }
 0x3aa   :  { %v17973_v24 = vpop.f32.mrb[8].mxu0  ;;  %v2130_v32 = vmax.f32 %v2069_v34, 0.0  ;;  %v21837_v42 = vld [vmem:[#allocation155_spill] sm:$0xff] }
 0x3ab   :  { %4556 = vrot.lane.b32.xlu0 %v17973_v24, %s13432_s12  ;;  %v11751_v58 = vpop.f32.mrb[9].mxu0  ;;  %v2801_v54 = vmul.f32 %v17516_v17, %v2740_v45  ;;  %v3472_v44 = vadd.f32 %v3411_v2, %v3106_v22  ;;  %12094 = vmatmul.mubr.f32.gmra.mrb[94].mxu1 %v3715_v9  ;;  %v1792_v61 = vpop.permute.xlu1 %1791  ;;  %v2680_v5 = vmul.f32 %v17838_v25, %v21837_v42 }
 0x3ac   :  { %v1887_v31 = vmul.f32 %v17838_v25, %v1792_v61  ;;  %v2314_v34 = vmul.f32 %v17756_v33, %v1792_v61  ;;  %v2191_v50 = vmax.f32 %v1398_v20, %v2130_v32  ;;  %12096 = vmatprep.mubr.msk.f32.mxu1 %vm13430_vm0, %v21563_v53  ;;  %v2985_v12 = vmul.f32 %v17741_v46, %v1792_v61  ;;  %v18001_v45 = vpop.f32.mrb[30].mxu1  ;;  %v10957_v20 = vld [vmem:[%s20649_s7 + $0x98] sm:$0xff] }
 0x3ad   :  { %v2862_v22 = vadd.f32 %v17551_v14, %v2801_v54  ;;  %v3533_v9 = vmul.f32 %v17516_v17, %v3472_v44  ;;  %v12860_v58 = vpack.c.bf16 %v10955_v59, %v10954_v1  ;;  %v835_v32 = vadd.f32 %v17853_v19, %v465_v37  ;;  %v11999_v54 = vpop.f32.mrb[31].mxu1 }
 0x3ae   :  { %v17999_v2 = vpop.f32.mrb[10].mxu0  ;;  %v1948_v61 = vadd.f32 %v1887_v31, %v1582_v60  ;;  %v2375_v10 = vadd.f32 %v2314_v34, %v2253_v55  ;;  %11882 = vmatmul.mubr.f32.gmra.mrb[96].mxu0 %v2191_v50  ;;  %v3046_v44 = vmul.f32 %v17756_v33, %v21837_v42  ;;  %v1338_v19 = vadd.f32 %v17551_v14, %v1271_v13 }
 0x3af   :  { %21838 = vst [vmem:[#allocation77_spill] sm:$0xff] %v17999_v2  ;;  %v11754_v41 = vpop.f32.mrb[11].mxu0  ;;  %4861 = vrot.lane.b32.xlu0 %v17634_v38, %s13433_s21  ;;  %5350 = vrot.lane.b32.xlu1 %v17999_v2, %s13433_s21  ;;  %v3594_v1 = vadd.f32 %v17551_v14, %v3533_v9  ;;  %v12863_v59 = vpack.c.bf16 %v10957_v20, %v10956_v4  ;;  %v2923_v50 = vmax.f32 %v2862_v22, 0.0  ;;  %v21840_v54 = vmov 0.0|0.0  }
 0x3b0   :  { %11884 = vmatprep.mubr.msk.f32.mxu0 %vm13430_vm0, %v21563_v53  ;;  %v467_v41 = vmul.f32 %v17741_v46, %v369_v18  ;;  %v2741_v60 = vadd.f32 %v2680_v5, %v2375_v10  ;;  %v3317_v55 = vpop.permute.xlu1 %3316  ;;  %v2009_v37 = vmul.f32 %v17516_v17, %v1948_v61  ;;  %12861 = vmatpush3.bf16.msra.mxu0 %v12860_v58  ;;  %v1399_v20 = vmax.f32 %v1338_v19, 0.0 }
 0x3b1   :  { %v3107_v31 = vadd.f32 %v3046_v44, %v2985_v12  ;;  %v3412_v42 = vmul.f32 %v17838_v25, %v3317_v55  ;;  %v3655_v9 = vmax.f32 %v3594_v1, 0.0  ;;  %12862 = vmatprep.subr.bf16.mxu0 %v21840_v54  ;;  %v836_v13 = vadd.f32 %v17944_v52, %v17864_v49 }
 0x3b2   :  { %v18025_v34 = vpop.f32.mrb[12].mxu0  ;;  %v1205_v18 = vadd.f32 %v17896_v26, %v835_v32  ;;  %v2070_v4 = vadd.f32 %v17551_v14, %v2009_v37  ;;  %v2802_v5 = vmul.f32 %v17516_v17, %v2741_v60  ;;  %v1146_v12 = vmul.f32 %v17838_v25, %v21825_v47  ;;  %v18048_v17 = vld [vmem:[%s20647_s2] ss:$0 sm:$0xff] }
 0x3b3   :  { %21839 = vst [vmem:[#allocation197_spill] sm:$0xff] %v18025_v34  ;;  %v11757_v10 = vpop.f32.mrb[13].mxu0  ;;  %4558 = vrot.lane.b32.xlu0 %v17999_v2, %s13432_s12  ;;  %v18039_v22 = vadd.f32 %v17966_v40, %v17937_v29  ;;  %v3473_v58 = vadd.f32 %v3412_v42, %v3107_v31  ;;  %5097 = vrot.lane.b32.xlu1 %v17501_v28, %s13432_s12  ;;  %v21843_v42 = vld [vmem:[#allocation213_spill] sm:$0xff] }
 0x3b4   :  { %v3716_v49 = vmax.f32 %v2923_v50, %v3655_v9  ;;  %v1206_v26 = vadd.f32 %v17977_v11, %v836_v13  ;;  %v837_v52 = vadd.f32 %v17874_v43, %v467_v41  ;;  %v2131_v32 = vmax.f32 %v2070_v4, 0.0  ;;  %12864 = vmatpush3.bf16.msra.mxu0 %v12863_v59  ;;  %v18060_v41 = vpop.f32.mrb[32].mxu1 }
 0x3b5   :  { %v3534_v29 = vmul.f32 %v18048_v17, %v3473_v58  ;;  %v1796_v40 = vpop.permute.xlu1 %1795  ;;  %v2863_v44 = vadd.f32 %v17551_v14, %v2802_v5  ;;  %v2011_v11 = vmul.f32 %v18048_v17, %v17982_v63  ;;  %12871 = vmatprep.subr.bf16.mxu0 %v21840_v54  ;;  %v1272_v43 = vmul.f32 %v18048_v17, %v1205_v18  ;;  %v12002_v59 = vpop.f32.mrb[33].mxu1 }
 0x3b6   :  { %12097 = vmatmul.mubr.f32.gmra.mrb[96].mxu1 %v3716_v49  ;;  %v18051_v61 = vpop.f32.mrb[14].mxu0  ;;  %v1888_v1 = vmul.f32 %v17838_v25, %v1796_v40  ;;  %v2315_v19 = vmul.f32 %v17756_v33, %v1796_v40  ;;  %21842 = vst [vmem:[#allocation207_spill] sm:$0xff] %v18060_v41  ;;  %v2192_v55 = vmax.f32 %v1399_v20, %v2131_v32  ;;  %v6026_v32 = vld [vmem:[%s20649_s7 + $0x8] sm:$0xff] }
 0x3b7   :  { %21841 = vst [vmem:[#allocation81_spill] sm:$0xff] %v18051_v61  ;;  %v11760_v60 = vpop.f32.mrb[15].mxu0  ;;  %5107 = vrot.lane.b32.xlu0 %v17659_v48, %s13432_s12  ;;  %v2255_v37 = vmul.f32 %v17741_v46, %v21829_v23  ;;  %v2986_v63 = vmul.f32 %v17741_v46, %v1796_v40  ;;  %4548 = vrot.lane.b32.xlu1 %v17870_v27, %s13432_s12  ;;  %v2924_v4 = vmax.f32 %v2863_v44, 0.0 }
 0x3b8   :  { %12099 = vmatprep.mubr.msk.f32.mxu1 %vm13430_vm0, %v21563_v53  ;;  %v3595_v31 = vadd.f32 %v17551_v14, %v3534_v29  ;;  %v2681_v50 = vmul.f32 %v17838_v25, %v21843_v42  ;;  %v1207_v9 = vadd.f32 %v1146_v12, %v837_v52  ;;  %v1949_v13 = vadd.f32 %v1888_v1, %v17921_v62 }
 0x3b9   :  { %v2376_v18 = vadd.f32 %v2315_v19, %v17912_v7  ;;  %11885 = vmatmul.mubr.f32.gmra.mrb[98].mxu0 %v2192_v55  ;;  %v3047_v23 = vmul.f32 %v17756_v33, %v21843_v42  ;;  %v1273_v14 = vmul.f32 %v18048_v17, %v1206_v26  ;;  %v18083_v49 = vpop.f32.mrb[34].mxu1  ;;  %v18090_v7 = vld [vmem:[%s20648_s3] ss:$0 sm:$0xff]  ;;  %v2316_v59 = vmul.f32 %v17756_v33, %v21833_v8  ;;  %v6027_v42 = vld [vmem:[%s20649_s7 + $0x10] sm:$0xff] }
 0x3ba   :  { %v18078_v10 = vpop.f32.mrb[16].mxu0  ;;  %v3656_v5 = vmax.f32 %v3595_v31, 0.0  ;;  %11887 = vmatprep.mubr.msk.f32.mxu0 %vm13430_vm0, %v21563_v53  ;;  %21844 = vst [vmem:[#allocation84_spill] sm:$0xff] %v18083_v49  ;;  %v3321_v12 = vpop.permute.xlu1 %3320  ;;  %v1339_v62 = vadd.f32 %v18090_v7, %v1272_v43  ;;  %v2010_v52 = vmul.f32 %v18048_v17, %v1949_v13  ;;  %v2072_v20 = vadd.f32 %v18090_v7, %v2011_v11  ;;  %v6025_v26 = vld [vmem:[%s20649_s7] sm:$0xff] }
 0x3bb   :  { %v2742_v58 = vadd.f32 %v2681_v50, %v2376_v18  ;;  %4853 = vrot.lane.b32.xlu0 %v17501_v28, %s13433_s21  ;;  %v3108_v29 = vadd.f32 %v3047_v23, %v2986_v63  ;;  %v3413_v40 = vmul.f32 %v17838_v25, %v3321_v12  ;;  %v11763_v44 = vpop.f32.mrb[17].mxu0  ;;  %v12005_v1 = vpop.f32.mrb[35].mxu1  ;;  %4863 = vrot.lane.b32.xlu1 %v17659_v48, %s13433_s21  ;;  %v6028_v50 = vld [vmem:[%s20649_s7 + $0x18] sm:$0xff] }
 0x3bc   :  { %v3717_v43 = vmax.f32 %v2924_v4, %v3656_v5  ;;  %v12866_v19 = vpack.c.bf16 %v6026_v32, %v6025_v26  ;;  %v1274_v11 = vmul.f32 %v18048_v17, %v1207_v9  ;;  %v2071_v60 = vadd.f32 %v18090_v7, %v2010_v52  ;;  %v21846_v44 = vld [vmem:[#allocation57_spill] sm:$0xff] }
 0x3bd   :  { %v2803_v55 = vmul.f32 %v18048_v17, %v2742_v58  ;;  %v3474_v31 = vadd.f32 %v3413_v40, %v3108_v29  ;;  %v1400_v13 = vmax.f32 %v1339_v62, 0.0  ;;  %v1340_v23 = vadd.f32 %v18090_v7, %v1273_v14 }
 0x3be   :  { %12100 = vmatmul.mubr.f32.gmra.mrb[98].mxu1 %v3717_v43  ;;  %v18109_v63 = vpop.f32.mrb[18].mxu0  ;;  %v2132_v18 = vmax.f32 %v2071_v60, 0.0  ;;  %v2012_v4 = vmul.f32 %v18048_v17, %v18039_v22  ;;  %v2377_v58 = vadd.f32 %v2316_v59, %v2255_v37  ;;  %v2133_v26 = vmax.f32 %v2072_v20, 0.0  ;;  %v21847_v37 = vld [vmem:[#allocation58_spill] sm:$0xff] }
 0x3bf   :  { %v11766_v9 = vpop.f32.mrb[19].mxu0  ;;  %5342 = vrot.lane.b32.xlu0 %v17906_v57, %s13433_s21  ;;  %12102 = vmatprep.mubr.msk.f32.mxu1 %vm13430_vm0, %v21563_v53  ;;  %v3535_v5 = vmul.f32 %v18048_v17, %v3474_v31  ;;  %v2593_v12 = vpop.permute.xlu1 %2592  ;;  %v2864_v62 = vadd.f32 %v18090_v7, %v2803_v55  ;;  %v1341_v40 = vadd.f32 %v18090_v7, %v1274_v11  ;;  %v1401_v31 = vmax.f32 %v1340_v23, 0.0 }
 0x3c0   :  { %5352 = vrot.lane.b32.xlu1 %v18025_v34, %s13433_s21  ;;  %v18127_v52 = vpop.f32.mrb[36].mxu1  ;;  %12867 = vmatpush3.bf16.msra.mxu1 %v12866_v19  ;;  %v2682_v14 = vmul.f32 %v17838_v25, %v2593_v12  ;;  %v2193_v32 = vmax.f32 %v1400_v13, %v2132_v18  ;;  %v12869_v22 = vpack.c.bf16 %v6028_v50, %v6027_v42  ;;  %v21848_v50 = vld [vmem:[#allocation59_spill] sm:$0xff] }
 0x3c1   :  { %21845 = vst [vmem:[#allocation120_spill] sm:$0xff] %v18127_v52  ;;  %v12008_v29 = vpop.f32.mrb[37].mxu1  ;;  %12868 = vmatprep.subr.bf16.mxu1 %v21840_v54  ;;  %v468_v1 = vmul.f32 %v17741_v46, %v21846_v44  ;;  %v18137_v43 = vmul.f32 %v17756_v33, %v21847_v37  ;;  %v3048_v20 = vmul.f32 %v17756_v33, %v2593_v12  ;;  %v2925_v18 = vmax.f32 %v2864_v62, 0.0 }
 0x3c2   :  { %v18140_v60 = vpop.f32.mrb[20].mxu0  ;;  %v3596_v19 = vadd.f32 %v18090_v7, %v3535_v5  ;;  %v18145_v55 = vmul.f32 %v17741_v46, %v21847_v37  ;;  %v2743_v11 = vadd.f32 %v2682_v14, %v2377_v58  ;;  %11888 = vmatmul.mubr.f32.gmra.mrb[100].mxu0 %v2193_v32  ;;  %v2073_v42 = vadd.f32 %v18090_v7, %v2012_v4  ;;  %v21849_v58 = vld [vmem:[#allocation60_spill] sm:$0xff]  ;;  %v21850_v4 = vld [vmem:[#allocation106_spill] sm:$0xff] }
 0x3c3   :  { %v11769_v59 = vpop.f32.mrb[21].mxu0  ;;  %4550 = vrot.lane.b32.xlu0 %v17906_v57, %s13432_s12  ;;  %v18152_v9 = vmul.f32 %v17741_v46, %v21848_v50  ;;  %v2987_v13 = vmul.f32 %v17741_v46, %v21833_v8  ;;  %11890 = vmatprep.mubr.msk.f32.mxu0 %vm13430_vm0, %v21563_v53  ;;  %v18162_v23 = vmul.f32 %v17756_v33, %v21849_v58  ;;  %v1402_v29 = vmax.f32 %v1341_v40, 0.0  ;;  %v21851_v50 = vld [vmem:[#allocation3_spill] sm:$0xff] }
 0x3c4   :  { %4560 = vrot.lane.b32.xlu1 %v18025_v34, %s13432_s12  ;;  %v3657_v5 = vmax.f32 %v3596_v19, 0.0  ;;  %v777_v12 = vmul.f32 %v17756_v33, %v21850_v4  ;;  %v3325_v14 = vpop.permute.xlu1 %3324  ;;  %v2194_v32 = vmax.f32 %v1401_v31, %v2133_v26  ;;  %12870 = vmatpush3.bf16.msra.mxu1 %v12869_v22  ;;  %v2804_v8 = vmul.f32 %v18048_v17, %v2743_v11  ;;  %v21853_v31 = vld [vmem:[#allocation23_spill] sm:$0xff] }
 0x3c5   :  { %v3109_v44 = vadd.f32 %v3048_v20, %v2987_v13  ;;  %v3414_v37 = vmul.f32 %v17838_v25, %v3325_v14  ;;  %12877 = vmatprep.subr.bf16.mxu1 %v21840_v54  ;;  %v18173_v19 = vmul.f32 %v17741_v46, %v21849_v58  ;;  %v18177_v34 = vmul.f32 %v17741_v46, %v21851_v50  ;;  %v21854_v58 = vld [vmem:[#allocation103_spill] sm:$0xff]  ;;  %v379_v50 = vpop.permute.xlu0 %378 }
 0x3c6   :  { %v18168_v59 = vpop.f32.mrb[22].mxu0  ;;  %v3718_v62 = vmax.f32 %v2925_v18, %v3657_v5  ;;  %v2317_v26 = vmul.f32 %v17756_v33, %v21835_v0  ;;  %11891 = vmatmul.mubr.f32.gmra.mrb[102].mxu0 %v2194_v32  ;;  %v2134_v20 = vmax.f32 %v2073_v42, 0.0  ;;  %v2256_v11 = vmul.f32 %v17741_v46, %v21825_v47 }
 0x3c7   :  { %v11772_v40 = vpop.f32.mrb[23].mxu0  ;;  %5099 = vrot.lane.b32.xlu0 %v17538_v51, %s13432_s12  ;;  %v18183_v22 = vpop.f32.mrb[38].mxu1  ;;  %v1147_v13 = vmul.f32 %v17838_v25, %v21853_v31  ;;  %v3475_v18 = vadd.f32 %v3414_v37, %v3109_v44  ;;  %v18193_v14 = vmul.f32 %v17838_v25, %v21854_v58  ;;  %v838_v32 = vadd.f32 %v777_v12, %v468_v1 }
 0x3c8   :  { %21852 = vst [vmem:[#allocation87_spill] sm:$0xff] %v18183_v22  ;;  %5109 = vrot.lane.b32.xlu1 %v17705_v21, %s13432_s12  ;;  %12103 = vmatmul.mubr.f32.gmra.mrb[100].mxu1 %v3718_v62  ;;  %v12011_v5 = vpop.f32.mrb[39].mxu1  ;;  %v2195_v42 = vmax.f32 %v1402_v29, %v2134_v20  ;;  %v2988_v47 = vmul.f32 %v17741_v46, %v21835_v0 }
 0x3c9   :  { %11893 = vmatprep.mubr.msk.f32.mxu0 %vm13430_vm0, %v21563_v53  ;;  %12105 = vmatprep.mubr.msk.f32.mxu1 %vm13430_vm0, %v21563_v53  ;;  %v1525_v44 = vmul.f32 %v17756_v33, %v21853_v31  ;;  %v3536_v37 = vmul.f32 %v18048_v17, %v3475_v18  ;;  %v2597_v62 = vpop.permute.xlu1 %2596  ;;  %v2865_v1 = vadd.f32 %v18090_v7, %v2804_v8 }
 0x3ca   :  { %v18204_v40 = vpop.f32.mrb[24].mxu0  ;;  %v2378_v12 = vadd.f32 %v2317_v26, %v2256_v11  ;;  %v2683_v5 = vmul.f32 %v17838_v25, %v2597_v62  ;;  %v3049_v29 = vmul.f32 %v17756_v33, %v2597_v62  ;;  %11894 = vmatmul.mubr.f32.gmra.mrb[104].mxu0 %v2195_v42  ;;  %v1526_v18 = vmul.f32 %v17756_v33, %v21854_v58  ;;  %v21856_v42 = vld [vmem:[#allocation127_spill] sm:$0xff] }
 0x3cb   :  { %v11775_v20 = vpop.f32.mrb[25].mxu0  ;;  %4855 = vrot.lane.b32.xlu0 %v17538_v51, %s13433_s21  ;;  %v18211_v0 = vpop.f32.mrb[40].mxu1  ;;  %v1208_v22 = vadd.f32 %v1147_v13, %v838_v32  ;;  %v3597_v26 = vadd.f32 %v18090_v7, %v3536_v37  ;;  %11896 = vmatprep.mubr.msk.f32.mxu0 %vm13430_vm0, %v21563_v53  ;;  %v1464_v11 = vmul.f32 %v17741_v46, %v21850_v4  ;;  %v2926_v37 = vmax.f32 %v2865_v1, 0.0 }
 0x3cc   :  { %21855 = vst [vmem:[#allocation221_spill] sm:$0xff] %v18211_v0  ;;  %4865 = vrot.lane.b32.xlu1 %v17705_v21, %s13433_s21  ;;  %v12014_v8 = vpop.f32.mrb[41].mxu1  ;;  %v3415_v62 = vmul.f32 %v17838_v25, %v21856_v42  ;;  %v2744_v20 = vadd.f32 %v2683_v5, %v2378_v12  ;;  %v3110_v51 = vadd.f32 %v3049_v29, %v2988_v47  ;;  %v21857_v0 = vld [vmem:[#allocation105_spill] sm:$0xff] }
 0x3cd   :  { %v18226_v13 = vmul.f32 %v17741_v46, %v21854_v58  ;;  %v469_v32 = vmul.f32 %v17741_v46, %v379_v50  ;;  %v3658_v21 = vmax.f32 %v3597_v26, 0.0  ;;  %v1528_v57 = vmul.f32 %v17756_v33, %v21857_v0  ;;  %v21858_v26 = vld [vmem:[#allocation108_spill] sm:$0xff] }
 0x3ce   :  { %v18229_v8 = vpop.f32.mrb[26].mxu0  ;;  %v1586_v48 = vadd.f32 %v1525_v44, %v1464_v11  ;;  %v2805_v4 = vmul.f32 %v18048_v17, %v2744_v20  ;;  %v3476_v28 = vadd.f32 %v3415_v62, %v3110_v51  ;;  %v1808_v42 = vpop.permute.xlu1 %1807  ;;  %v1275_v1 = vmul.f32 %v18048_v17, %v1208_v22 }
 0x3cf   :  { %v11778_v12 = vpop.f32.mrb[27].mxu0  ;;  %5344 = vrot.lane.b32.xlu0 %v17930_v30, %s13433_s21  ;;  %v1891_v58 = vmul.f32 %v17838_v25, %v1808_v42  ;;  %v2318_v50 = vmul.f32 %v17756_v33, %v1808_v42  ;;  %v3719_v47 = vmax.f32 %v2926_v37, %v3658_v21  ;;  %v18242_v44 = vadd.f32 %v1526_v18, %v18145_v55 }
 0x3d0   :  { %5354 = vrot.lane.b32.xlu1 %v18051_v61, %s13433_s21  ;;  %v18246_v51 = vmul.f32 %v17838_v25, %v21857_v0  ;;  %v2866_v5 = vadd.f32 %v18090_v7, %v2805_v4  ;;  %v3537_v29 = vmul.f32 %v18048_v17, %v3476_v28  ;;  %v779_v11 = vmul.f32 %v17756_v33, %v21858_v26 }
 0x3d1   :  { %v2257_v62 = vmul.f32 %v17741_v46, %v21853_v31  ;;  %v839_v21 = vadd.f32 %v18137_v43, %v469_v32  ;;  %v1952_v22 = vadd.f32 %v1891_v58, %v1586_v48  ;;  %12106 = vmatmul.mubr.f32.gmra.mrb[102].mxu1 %v3719_v47  ;;  %v1589_v18 = vadd.f32 %v1528_v57, %v18173_v19  ;;  %v18261_v28 = vpop.f32.mrb[42].mxu1  ;;  %v21860_v43 = vld [vmem:[#allocation161_spill] sm:$0xff] }
 0x3d2   :  { %v18255_v55 = vpop.f32.mrb[28].mxu0  ;;  %v2989_v20 = vmul.f32 %v17741_v46, %v1808_v42  ;;  %21859 = vst [vmem:[#allocation121_spill] sm:$0xff] %v18261_v28  ;;  %12108 = vmatprep.mubr.msk.f32.mxu1 %vm13430_vm0, %v21563_v53  ;;  %v3598_v31 = vadd.f32 %v18090_v7, %v3537_v29  ;;  %v1894_v48 = vmul.f32 %v17838_v25, %v21860_v43  ;;  %v12017_v32 = vpop.f32.mrb[43].mxu1  ;;  %v2927_v47 = vmax.f32 %v2866_v5, 0.0 }
 0x3d3   :  { %v11781_v37 = vpop.f32.mrb[29].mxu0  ;;  %4552 = vrot.lane.b32.xlu0 %v17930_v30, %s13432_s12  ;;  %v2379_v57 = vadd.f32 %v2318_v50, %v2257_v62  ;;  %v2601_v19 = vpop.permute.xlu1 %2600  ;;  %v1342_v4 = vadd.f32 %v18090_v7, %v1275_v1  ;;  %v2013_v42 = vmul.f32 %v18048_v17, %v1952_v22  ;;  %v18275_v29 = vadd.f32 %v779_v11, %v18152_v9  ;;  %v21861_v22 = vld [vmem:[#allocation73_spill] sm:$0xff]  ;;  %v21862_v11 = vld [vmem:[#allocation110_spill] sm:$0xff] }
 0x3d4   :  { %4562 = vrot.lane.b32.xlu1 %v18051_v61, %s13432_s12  ;;  %v2684_v12 = vmul.f32 %v17838_v25, %v2601_v19  ;;  %v3050_v58 = vmul.f32 %v17756_v33, %v2601_v19  ;;  %v3659_v37 = vmax.f32 %v3598_v31, 0.0  ;;  %v18279_v28 = vmul.f32 %v17741_v46, %v21858_v26  ;;  %v389_v62 = vpop.permute.xlu0 %388 }
 0x3d5   :  { %v1209_v50 = vadd.f32 %v18193_v14, %v839_v21  ;;  %v2074_v1 = vadd.f32 %v18090_v7, %v2013_v42  ;;  %v3416_v61 = vmul.f32 %v17838_v25, %v21861_v22  ;;  %v18291_v26 = vmul.f32 %v17756_v33, %v21862_v11 }
 0x3d6   :  { %v18282_v32 = vpop.f32.mrb[30].mxu0  ;;  %v2745_v19 = vadd.f32 %v2684_v12, %v2379_v57  ;;  %v3111_v5 = vadd.f32 %v3050_v58, %v2989_v20  ;;  %v3720_v9 = vmax.f32 %v2927_v47, %v3659_v37  ;;  %v1468_v14 = vmul.f32 %v17741_v46, %v21862_v11 }
 0x3d7   :  { %v11784_v31 = vpop.f32.mrb[31].mxu0  ;;  %5101 = vrot.lane.b32.xlu0 %v17565_v35, %s13432_s12  ;;  %v1403_v21 = vmax.f32 %v1342_v4, 0.0  ;;  %v2135_v42 = vmax.f32 %v2074_v1, 0.0  ;;  %v18297_v22 = vadd.f32 %v1894_v48, %v1589_v18  ;;  %v471_v20 = vmul.f32 %v17741_v46, %v389_v62  ;;  %v21864_v46 = vld [vmem:[#allocation32_spill] sm:$0xff] }
 0x3d8   :  { %5111 = vrot.lane.b32.xlu1 %v17744_v16, %s13432_s12  ;;  %v2806_v57 = vmul.f32 %v18048_v17, %v2745_v19  ;;  %v3477_v12 = vadd.f32 %v3416_v61, %v3111_v5  ;;  %12109 = vmatmul.mubr.f32.gmra.mrb[104].mxu1 %v3720_v9  ;;  %v1812_v58 = vpop.permute.xlu1 %1811  ;;  %v1276_v47 = vmul.f32 %v18048_v17, %v1209_v50  ;;  %v18315_v61 = vld [vmem:[%s20646_s1] ss:$0 sm:$0xff]  ;;  %v21865_v19 = vld [vmem:[#allocation112_spill] sm:$0xff] }
 0x3d9   :  { %v1892_v37 = vmul.f32 %v17838_v25, %v1812_v58  ;;  %v2319_v31 = vmul.f32 %v17756_v33, %v1812_v58  ;;  %v18306_v30 = vpop.f32.mrb[44].mxu1  ;;  %v2196_v4 = vmax.f32 %v1403_v21, %v2135_v42  ;;  %12111 = vmatprep.mubr.msk.f32.mxu1 %vm13430_vm0, %v21563_v53  ;;  %v1149_v18 = vmul.f32 %v17838_v25, %v21864_v46  ;;  %v18331_v42 = vld [vmem:[%s20646_s1 + $0x1] ss:$0 sm:$0xff] }
 0x3da   :  { %v18304_v11 = vpop.f32.mrb[32].mxu0  ;;  %21863 = vst [vmem:[#allocation90_spill] sm:$0xff] %v18306_v30  ;;  %v2990_v48 = vmul.f32 %v18315_v61, %v1812_v58  ;;  %v12020_v33 = vpop.f32.mrb[45].mxu1  ;;  %v2867_v62 = vadd.f32 %v18090_v7, %v2806_v57  ;;  %v3538_v1 = vmul.f32 %v18048_v17, %v3477_v12  ;;  %v2685_v5 = vmul.f32 %v17838_v25, %v21865_v19  ;;  %v21866_v12 = vld [vmem:[#allocation47_spill] sm:$0xff] }
 0x3db   :  { %v11787_v50 = vpop.f32.mrb[33].mxu0  ;;  %4857 = vrot.lane.b32.xlu0 %v17565_v35, %s13433_s21  ;;  %v1953_v9 = vadd.f32 %v1892_v37, %v18242_v44  ;;  %v2380_v21 = vadd.f32 %v2319_v31, %v18226_v13  ;;  %11897 = vmatmul.mubr.f32.gmra.mrb[106].mxu0 %v2196_v4  ;;  %v1527_v57 = vmul.f32 %v18331_v42, %v21864_v46 }
 0x3dc   :  { %4867 = vrot.lane.b32.xlu1 %v17744_v16, %s13433_s21  ;;  %v1529_v58 = vmul.f32 %v18331_v42, %v21866_v12  ;;  %v3051_v44 = vmul.f32 %v18331_v42, %v21865_v19  ;;  %v3599_v13 = vadd.f32 %v18090_v7, %v3538_v1  ;;  %11899 = vmatprep.mubr.msk.f32.mxu0 %vm13430_vm0, %v21563_v53  ;;  %v2928_v1 = vmax.f32 %v2867_v62, 0.0 }
 0x3dd   :  { %v841_v37 = vadd.f32 %v18162_v23, %v471_v20  ;;  %v2746_v31 = vadd.f32 %v2685_v5, %v2380_v21  ;;  %v3337_v4 = vpop.permute.xlu1 %3336  ;;  %v1343_v33 = vadd.f32 %v18090_v7, %v1276_v47  ;;  %v2014_v16 = vmul.f32 %v18048_v17, %v1953_v9  ;;  %v18348_v52 = vpop.f32.mrb[46].mxu1  ;;  %v21869_v23 = vld [vmem:[#allocation9_spill] sm:$0xff] }
 0x3de   :  { %v18343_v50 = vpop.f32.mrb[34].mxu0  ;;  %v3112_v35 = vadd.f32 %v3051_v44, %v2990_v48  ;;  %v3417_v30 = vmul.f32 %v17838_v25, %v3337_v4  ;;  %21868 = vst [vmem:[#allocation211_spill] sm:$0xff] %v18348_v52  ;;  %v3660_v49 = vmax.f32 %v3599_v13, 0.0  ;;  %v1895_v20 = vmul.f32 %v17838_v25, %v21869_v23  ;;  %v12023_v21 = vpop.f32.mrb[47].mxu1 }
 0x3df   :  { %21867 = vst [vmem:[#allocation75_spill] sm:$0xff] %v18343_v50  ;;  %v11790_v19 = vpop.f32.mrb[35].mxu0  ;;  %5346 = vrot.lane.b32.xlu0 %v17953_v39, %s13433_s21  ;;  %v1210_v5 = vadd.f32 %v1149_v18, %v18275_v29  ;;  %v2075_v47 = vadd.f32 %v18090_v7, %v2014_v16  ;;  %v2807_v48 = vmul.f32 %v18048_v17, %v2746_v31  ;;  %v1404_v29 = vmax.f32 %v1343_v33, 0.0 }
 0x3e0   :  { %5356 = vrot.lane.b32.xlu1 %v18078_v10, %s13433_s21  ;;  %v2259_v9 = vmul.f32 %v18315_v61, %v21864_v46  ;;  %v1590_v44 = vadd.f32 %v1529_v58, %v1468_v14  ;;  %v3478_v4 = vadd.f32 %v3417_v30, %v3112_v35  ;;  %v3721_v62 = vmax.f32 %v2928_v1, %v3660_v49  ;;  %v21870_v58 = vld [vmem:[#allocation36_spill] sm:$0xff] }
 0x3e1   :  { %v1588_v13 = vadd.f32 %v1527_v57, %v18279_v28  ;;  %v1211_v19 = vadd.f32 %v18246_v51, %v841_v37  ;;  %v2136_v18 = vmax.f32 %v2075_v47, 0.0  ;;  %v1151_v21 = vmul.f32 %v17838_v25, %v21866_v12 }
 0x3e2   :  { %v18363_v52 = vpop.f32.mrb[36].mxu0  ;;  %v3539_v16 = vmul.f32 %v18048_v17, %v3478_v4  ;;  %12112 = vmatmul.mubr.f32.gmra.mrb[106].mxu1 %v3721_v62  ;;  %v1816_v31 = vpop.permute.xlu1 %1815  ;;  %v2868_v35 = vadd.f32 %v18090_v7, %v2807_v48  ;;  %v1277_v28 = vmul.f32 %v18048_v17, %v1210_v5  ;;  %v842_v14 = vadd.f32 %v18291_v26, %v18177_v34 }
 0x3e3   :  { %v11793_v2 = vpop.f32.mrb[37].mxu0  ;;  %4554 = vrot.lane.b32.xlu0 %v17953_v39, %s13432_s12  ;;  %v1893_v30 = vmul.f32 %v17838_v25, %v1816_v31  ;;  %v2320_v49 = vmul.f32 %v18331_v42, %v1816_v31  ;;  %v2197_v51 = vmax.f32 %v1404_v29, %v2136_v18  ;;  %v1956_v46 = vadd.f32 %v1895_v20, %v1590_v44 }
 0x3e4   :  { %4564 = vrot.lane.b32.xlu1 %v18078_v10, %s13432_s12  ;;  %v2991_v2 = vmul.f32 %v18315_v61, %v1816_v31  ;;  %12114 = vmatprep.mubr.msk.f32.mxu1 %vm13430_vm0, %v21563_v53  ;;  %v3600_v57 = vadd.f32 %v18090_v7, %v3539_v16  ;;  %v2686_v37 = vmul.f32 %v17838_v25, %v21870_v58  ;;  %v2929_v44 = vmax.f32 %v2868_v35, 0.0 }
 0x3e5   :  { %v1278_v33 = vmul.f32 %v18048_v17, %v1211_v19  ;;  %v1954_v1 = vadd.f32 %v1893_v30, %v1588_v13  ;;  %v2381_v47 = vadd.f32 %v2320_v49, %v2259_v9  ;;  %11900 = vmatmul.mubr.f32.gmra.mrb[108].mxu0 %v2197_v51  ;;  %v18385_v5 = vpop.f32.mrb[48].mxu1  ;;  %v3052_v34 = vmul.f32 %v18331_v42, %v21870_v58 }
 0x3e6   :  { %v18387_v48 = vpop.f32.mrb[38].mxu0  ;;  %v12026_v26 = vpop.f32.mrb[49].mxu1  ;;  %v3661_v4 = vmax.f32 %v3600_v57, 0.0  ;;  %11902 = vmatprep.mubr.msk.f32.mxu0 %vm13430_vm0, %v21563_v53  ;;  %v2016_v9 = vmul.f32 %v18048_v17, %v18297_v22  ;;  %v1212_v62 = vadd.f32 %v1151_v21, %v842_v14  ;;  %v1344_v29 = vadd.f32 %v18090_v7, %v1277_v28 }
 0x3e7   :  { %21871 = vst [vmem:[#allocation33_spill] sm:$0xff] %v18387_v48  ;;  %v11796_v20 = vpop.f32.mrb[39].mxu0  ;;  %5103 = vrot.lane.b32.xlu0 %v17605_v3, %s13432_s12  ;;  %v2747_v13 = vadd.f32 %v2686_v37, %v2381_v47  ;;  %v3341_v19 = vpop.permute.xlu1 %3340  ;;  %v2015_v18 = vmul.f32 %v18048_v17, %v1954_v1  ;;  %v2321_v16 = vmul.f32 %v18331_v42, %v21860_v43 }
 0x3e8   :  { %5113 = vrot.lane.b32.xlu1 %v17769_v6, %s13432_s12  ;;  %v3113_v31 = vadd.f32 %v3052_v34, %v2991_v2  ;;  %v3418_v35 = vmul.f32 %v17838_v25, %v3341_v19  ;;  %v3722_v30 = vmax.f32 %v2929_v44, %v3661_v4  ;;  %v1345_v21 = vadd.f32 %v18090_v7, %v1278_v33  ;;  %v399_v20 = vpop.permute.xlu0 %398  ;;  %v18427_v44 = vld [vmem:[%s20646_s1 + $0x2] ss:$0 sm:$0xff] }
 0x3e9   :  { %v2076_v22 = vadd.f32 %v18090_v7, %v2015_v18  ;;  %v2808_v51 = vmul.f32 %v18048_v17, %v2747_v13  ;;  %v2017_v14 = vmul.f32 %v18048_v17, %v1956_v46  ;;  %v2260_v28 = vmul.f32 %v18315_v61, %v21857_v0 }
 0x3ea   :  { %v18404_v49 = vpop.f32.mrb[40].mxu0  ;;  %v3479_v57 = vadd.f32 %v3418_v35, %v3113_v31  ;;  %12115 = vmatmul.mubr.f32.gmra.mrb[108].mxu1 %v3722_v30  ;;  %v1405_v2 = vmax.f32 %v1344_v29, 0.0  ;;  %v2077_v33 = vadd.f32 %v18090_v7, %v2016_v9  ;;  %v1279_v0 = vmul.f32 %v18048_v17, %v1212_v62 }
 0x3eb   :  { %v11799_v58 = vpop.f32.mrb[41].mxu0  ;;  %4859 = vrot.lane.b32.xlu0 %v17605_v3, %s13433_s21  ;;  %v18416_v25 = vpop.f32.mrb[50].mxu1  ;;  %v2137_v37 = vmax.f32 %v2076_v22, 0.0  ;;  %12117 = vmatprep.mubr.msk.f32.mxu1 %vm13430_vm0, %v21563_v53  ;;  %v2382_v1 = vadd.f32 %v2321_v16, %v2260_v28  ;;  %v2869_v26 = vadd.f32 %v18090_v7, %v2808_v51  ;;  %v1406_v19 = vmax.f32 %v1345_v21, 0.0 }
 0x3ec   :  { %4869 = vrot.lane.b32.xlu1 %v17769_v6, %s13433_s21  ;;  %v3540_v46 = vmul.f32 %v18048_v17, %v3479_v57  ;;  %v2613_v47 = vpop.permute.xlu1 %2612  ;;  %v12029_v34 = vpop.f32.mrb[51].mxu1  ;;  %v2078_v62 = vadd.f32 %v18090_v7, %v2017_v14  ;;  %v2138_v30 = vmax.f32 %v2077_v33, 0.0  ;;  %v1346_v22 = vadd.f32 %v18090_v7, %v1279_v0  ;;  %v21874_v58 = vld [vmem:[#allocation61_spill] sm:$0xff] }
 0x3ed   :  { %v2687_v4 = vmul.f32 %v18427_v44, %v2613_v47  ;;  %v2198_v13 = vmax.f32 %v1405_v2, %v2137_v37  ;;  %v3053_v29 = vmul.f32 %v18331_v42, %v2613_v47  ;;  %v2992_v21 = vmul.f32 %v18315_v61, %v21860_v43 }
 0x3ee   :  { %v18430_v9 = vpop.f32.mrb[42].mxu0  ;;  %v3601_v16 = vadd.f32 %v18090_v7, %v3540_v46  ;;  %v473_v51 = vmul.f32 %v18315_v61, %v399_v20  ;;  %v2930_v28 = vmax.f32 %v2869_v26, 0.0  ;;  %v782_v2 = vmul.f32 %v18331_v42, %v21874_v58 }
 0x3ef   :  { %21872 = vst [vmem:[#allocation5_spill] sm:$0xff] %v18430_v9  ;;  %v11802_v18 = vpop.f32.mrb[43].mxu0  ;;  %5348 = vrot.lane.b32.xlu0 %v17973_v24, %s13433_s21  ;;  %v2748_v31 = vadd.f32 %v2687_v4, %v2382_v1  ;;  %11903 = vmatmul.mubr.f32.gmra.mrb[110].mxu0 %v2198_v13  ;;  %v2199_v33 = vmax.f32 %v1406_v19, %v2138_v30  ;;  %v2139_v1 = vmax.f32 %v2078_v62, 0.0  ;;  %v1407_v4 = vmax.f32 %v1346_v22, 0.0  ;;  %v21875_v62 = vld [vmem:[#allocation107_spill] sm:$0xff] }
 0x3f0   :  { %5358 = vrot.lane.b32.xlu1 %v18109_v63, %s13433_s21  ;;  %v18439_v35 = vpop.f32.mrb[52].mxu1  ;;  %11905 = vmatprep.mubr.msk.f32.mxu0 %vm13430_vm0, %v21563_v53  ;;  %v3662_v57 = vmax.f32 %v3601_v16, 0.0  ;;  %v3114_v47 = vadd.f32 %v3053_v29, %v2992_v21  ;;  %v2261_v26 = vmul.f32 %v18315_v61, %v21866_v12  ;;  %v843_v13 = vadd.f32 %v782_v2, %v473_v51 }
 0x3f1   :  { %21873 = vst [vmem:[#allocation180_spill] sm:$0xff] %v18439_v35  ;;  %v12032_v14 = vpop.f32.mrb[53].mxu1  ;;  %v3345_v37 = vpop.permute.xlu1 %3344  ;;  %v2809_v0 = vmul.f32 %v18048_v17, %v2748_v31  ;;  %v1152_v29 = vmul.f32 %v18427_v44, %v21875_v62  ;;  %v2322_v18 = vmul.f32 %v18331_v42, %v21869_v23  ;;  %v2200_v12 = vmax.f32 %v1407_v4, %v2139_v1 }
 0x3f2   :  { %v18449_v46 = vpop.f32.mrb[44].mxu0  ;;  %v3419_v43 = vmul.f32 %v18427_v44, %v3345_v37  ;;  %v3723_v20 = vmax.f32 %v2930_v28, %v3662_v57  ;;  %v1530_v31 = vmul.f32 %v18331_v42, %v21875_v62  ;;  %v2993_v30 = vmul.f32 %v18315_v61, %v21869_v23 }
 0x3f3   :  { %v11805_v34 = vpop.f32.mrb[45].mxu0  ;;  %4566 = vrot.lane.b32.xlu0 %v18109_v63, %s13432_s12  ;;  %11906 = vmatmul.mubr.f32.gmra.mrb[112].mxu0 %v2199_v33  ;;  %v2870_v14 = vadd.f32 %v18090_v7, %v2809_v0  ;;  %v2383_v28 = vadd.f32 %v2322_v18, %v2261_v26  ;;  %v1213_v23 = vadd.f32 %v1152_v29, %v843_v13  ;;  %v21878_v18 = vld [vmem:[#allocation111_spill] sm:$0xff] }
 0x3f4   :  { %4568 = vrot.lane.b32.xlu1 %v18140_v60, %s13432_s12  ;;  %v3480_v19 = vadd.f32 %v3419_v43, %v3114_v47  ;;  %12118 = vmatmul.mubr.f32.gmra.mrb[110].mxu1 %v3723_v20  ;;  %v1469_v0 = vmul.f32 %v18315_v61, %v21874_v58  ;;  %v21877_v47 = vld [vmem:[#allocation130_spill] sm:$0xff] }
 0x3f5   :  { %11908 = vmatprep.mubr.msk.f32.mxu0 %vm13430_vm0, %v21563_v53  ;;  %12120 = vmatprep.mubr.msk.f32.mxu1 %vm13430_vm0, %v21563_v53  ;;  %v3420_v43 = vmul.f32 %v18427_v44, %v21877_v47  ;;  %v2931_v13 = vmax.f32 %v2870_v14, 0.0  ;;  %v21879_v14 = vld [vmem:[#allocation4_spill] sm:$0xff]  ;;  %v2262_v47 = vmul.f32 %v18315_v61, %v21875_v62 }
 0x3f6   :  { %v18465_v16 = vpop.f32.mrb[46].mxu0  ;;  %v3541_v22 = vmul.f32 %v18048_v17, %v3480_v19  ;;  %v2617_v21 = vpop.permute.xlu1 %2616  ;;  %v1591_v29 = vadd.f32 %v1530_v31, %v1469_v0  ;;  %v474_v31 = vmul.f32 %v18315_v61, %v21879_v14 }
 0x3f7   :  { %v11808_v51 = vpop.f32.mrb[47].mxu0  ;;  %5115 = vrot.lane.b32.xlu0 %v17799_v56, %s13432_s12  ;;  %v2688_v57 = vmul.f32 %v18427_v44, %v2617_v21  ;;  %v3054_v2 = vmul.f32 %v18331_v42, %v2617_v21  ;;  %v18479_v37 = vpop.f32.mrb[54].mxu1  ;;  %11909 = vmatmul.mubr.f32.gmra.mrb[114].mxu0 %v2200_v12  ;;  %v783_v12 = vmul.f32 %v18331_v42, %v21878_v18 }
 0x3f8   :  { %21876 = vst [vmem:[#allocation214_spill] sm:$0xff] %v18479_v37  ;;  %5117 = vrot.lane.b32.xlu1 %v17820_v36, %s13432_s12  ;;  %v12035_v33 = vpop.f32.mrb[55].mxu1  ;;  %v3602_v1 = vadd.f32 %v18090_v7, %v3541_v22  ;;  %11911 = vmatprep.mubr.msk.f32.mxu0 %vm13430_vm0, %v21563_v53 }
 0x3f9   :  { %v2749_v34 = vadd.f32 %v2688_v57, %v2383_v28  ;;  %v3115_v20 = vadd.f32 %v3054_v2, %v2993_v30  ;;  %v1280_v30 = vmul.f32 %v18048_v17, %v1213_v23  ;;  %v21881_v23 = vld [vmem:[#allocation65_spill] sm:$0xff] }
 0x3fa   :  { %v18490_v26 = vpop.f32.mrb[48].mxu0  ;;  %v3663_v19 = vmax.f32 %v3602_v1, 0.0 }
 0x3fb   :  { %v11811_v4 = vpop.f32.mrb[49].mxu0  ;;  %4871 = vrot.lane.b32.xlu0 %v17799_v56, %s13433_s21  ;;  %v2810_v22 = vmul.f32 %v18048_v17, %v2749_v34  ;;  %v3481_v58 = vadd.f32 %v3420_v43, %v3115_v20  ;;  %v1828_v21 = vpop.permute.xlu1 %1827  ;;  %v1153_v43 = vmul.f32 %v18427_v44, %v21881_v23 }
 0x3fc   :  { %4873 = vrot.lane.b32.xlu1 %v17820_v36, %s13433_s21  ;;  %v1896_v51 = vmul.f32 %v18427_v44, %v1828_v21  ;;  %v2323_v28 = vmul.f32 %v18331_v42, %v1828_v21  ;;  %v3724_v57 = vmax.f32 %v2931_v13, %v3663_v19  ;;  %v844_v13 = vadd.f32 %v783_v12, %v474_v31 }
 0x3fd   :  { %v18506_v33 = vpop.f32.mrb[56].mxu1  ;;  %v2871_v1 = vadd.f32 %v18090_v7, %v2810_v22  ;;  %v3542_v0 = vmul.f32 %v18048_v17, %v3481_v58  ;;  %v2994_v19 = vmul.f32 %v18315_v61, %v1828_v21  ;;  %v409_v22 = vpop.permute.xlu0 %408 }
 0x3fe   :  { %v18504_v2 = vpop.f32.mrb[50].mxu0  ;;  %21880 = vst [vmem:[#allocation122_spill] sm:$0xff] %v18506_v33  ;;  %v1957_v34 = vadd.f32 %v1896_v51, %v1591_v29  ;;  %12121 = vmatmul.mubr.f32.gmra.mrb[112].mxu1 %v3724_v57  ;;  %v12038_v4 = vpop.f32.mrb[57].mxu1  ;;  %v1531_v29 = vmul.f32 %v18331_v42, %v21881_v23  ;;  %v2384_v58 = vadd.f32 %v2323_v28, %v2262_v47 }
 0x3ff   :  { %v11814_v20 = vpop.f32.mrb[51].mxu0  ;;  %5360 = vrot.lane.b32.xlu0 %v18140_v60, %s13433_s21  ;;  %12123 = vmatprep.mubr.msk.f32.mxu1 %vm13430_vm0, %v21563_v53  ;;  %v3603_v62 = vadd.f32 %v18090_v7, %v3542_v0  ;;  %v1347_v57 = vadd.f32 %v18090_v7, %v1280_v30  ;;  %v2932_v4 = vmax.f32 %v2871_v1, 0.0  ;;  %v1470_v33 = vmul.f32 %v18315_v61, %v21878_v18 }
 0x400   :  { %5362 = vrot.lane.b32.xlu1 %v18168_v59, %s13433_s21  ;;  %v2621_v51 = vpop.permute.xlu1 %2620  ;;  %v2018_v12 = vmul.f32 %v18048_v17, %v1957_v34  ;;  %v1214_v37 = vadd.f32 %v1153_v43, %v844_v13  ;;  %v21883_v34 = vld [vmem:[#allocation135_spill] sm:$0xff]  ;;  %v475_v43 = vmul.f32 %v18315_v61, %v409_v22 }
 0x401   :  { %v2689_v21 = vmul.f32 %v18427_v44, %v2621_v51  ;;  %v3055_v14 = vmul.f32 %v18331_v42, %v2621_v51  ;;  %v18530_v20 = vpop.f32.mrb[58].mxu1  ;;  %v3664_v0 = vmax.f32 %v3603_v62, 0.0  ;;  %v3421_v51 = vmul.f32 %v18427_v44, %v21883_v34  ;;  %v21884_v62 = vld [vmem:[#allocation62_spill] sm:$0xff] }
 0x402   :  { %v18528_v31 = vpop.f32.mrb[52].mxu0  ;;  %21882 = vst [vmem:[#allocation220_spill] sm:$0xff] %v18530_v20  ;;  %v12041_v30 = vpop.f32.mrb[59].mxu1  ;;  %v2079_v47 = vadd.f32 %v18090_v7, %v2018_v12  ;;  %v784_v18 = vmul.f32 %v18331_v42, %v21884_v62  ;;  %v1408_v13 = vmax.f32 %v1347_v57, 0.0  ;;  %v1592_v20 = vadd.f32 %v1531_v29, %v1470_v33  ;;  %v21886_v57 = vld [vmem:[#allocation113_spill] sm:$0xff] }
 0x403   :  { %v11817_v28 = vpop.f32.mrb[53].mxu0  ;;  %4570 = vrot.lane.b32.xlu0 %v18168_v59, %s13432_s12  ;;  %v2750_v36 = vadd.f32 %v2689_v21, %v2384_v58  ;;  %v3116_v35 = vadd.f32 %v3055_v14, %v2994_v19  ;;  %v3725_v1 = vmax.f32 %v2932_v4, %v3664_v0  ;;  %v2263_v12 = vmul.f32 %v18315_v61, %v21881_v23 }
 0x404   :  { %4572 = vrot.lane.b32.xlu1 %v18204_v40, %s13432_s12  ;;  %v2140_v28 = vmax.f32 %v2079_v47, 0.0  ;;  %v1281_v33 = vmul.f32 %v18048_v17, %v1214_v37  ;;  %v2690_v0 = vmul.f32 %v18427_v44, %v21886_v57  ;;  %v845_v47 = vadd.f32 %v784_v18, %v475_v43 }
 0x405   :  { %v2811_v30 = vmul.f32 %v18048_v17, %v2750_v36  ;;  %v3482_v34 = vadd.f32 %v3421_v51, %v3116_v35  ;;  %12124 = vmatmul.mubr.f32.gmra.mrb[114].mxu1 %v3725_v1  ;;  %v1832_v19 = vpop.permute.xlu1 %1831  ;;  %v21885_v36 = vld [vmem:[#allocation67_spill] sm:$0xff] }
 0x406   :  { %v18547_v58 = vpop.f32.mrb[54].mxu0  ;;  %v1897_v21 = vmul.f32 %v18427_v44, %v1832_v19  ;;  %v2324_v14 = vmul.f32 %v18331_v42, %v1832_v19  ;;  %v2201_v22 = vmax.f32 %v1408_v13, %v2140_v28  ;;  %v2995_v23 = vmul.f32 %v18315_v61, %v1832_v19  ;;  %12126 = vmatprep.mubr.msk.f32.mxu1 %vm13430_vm0, %v21563_v53  ;;  %v21888_v13 = vld [vmem:[#allocation109_spill] sm:$0xff] }
 0x407   :  { %v11820_v4 = vpop.f32.mrb[55].mxu0  ;;  %5119 = vrot.lane.b32.xlu0 %v17848_v15, %s13432_s12  ;;  %v2872_v35 = vadd.f32 %v18090_v7, %v2811_v30  ;;  %v3543_v29 = vmul.f32 %v18048_v17, %v3482_v34  ;;  %v1154_v28 = vmul.f32 %v18427_v44, %v21888_v13  ;;  %v3056_v19 = vmul.f32 %v18331_v42, %v21886_v57 }
 0x408   :  { %5121 = vrot.lane.b32.xlu1 %v21885_v36, %s13432_s12  ;;  %v1958_v51 = vadd.f32 %v1897_v21, %v1592_v20  ;;  %v2385_v1 = vadd.f32 %v2324_v14, %v2263_v12  ;;  %11912 = vmatmul.mubr.f32.gmra.mrb[116].mxu0 %v2201_v22  ;;  %v18563_v37 = vpop.f32.mrb[60].mxu1  ;;  %v1532_v20 = vmul.f32 %v18331_v42, %v21888_v13 }
 0x409   :  { %21887 = vst [vmem:[#allocation6_spill] sm:$0xff] %v18563_v37  ;;  %v12044_v30 = vpop.f32.mrb[61].mxu1  ;;  %v3604_v34 = vadd.f32 %v18090_v7, %v3543_v29  ;;  %11914 = vmatprep.mubr.msk.f32.mxu0 %vm13430_vm0, %v21563_v53  ;;  %v1348_v21 = vadd.f32 %v18090_v7, %v1281_v33  ;;  %v3117_v22 = vadd.f32 %v3056_v19, %v2995_v23  ;;  %v2933_v29 = vmax.f32 %v2872_v35, 0.0 }
 0x40a   :  { %v18569_v4 = vpop.f32.mrb[56].mxu0  ;;  %v2751_v18 = vadd.f32 %v2690_v0, %v2385_v1  ;;  %v3357_v43 = vpop.permute.xlu1 %3356  ;;  %v2019_v14 = vmul.f32 %v18048_v17, %v1958_v51  ;;  %v1215_v37 = vadd.f32 %v1154_v28, %v845_v47  ;;  %v2264_v23 = vmul.f32 %v18315_v61, %v21888_v13 }
 0x40b   :  { %21889 = vst [vmem:[#allocation209_spill] sm:$0xff] %v18569_v4  ;;  %v11823_v12 = vpop.f32.mrb[57].mxu0  ;;  %4875 = vrot.lane.b32.xlu0 %v17848_v15, %s13433_s21  ;;  %v3422_v57 = vmul.f32 %v18427_v44, %v3357_v43  ;;  %v3665_v30 = vmax.f32 %v3604_v34, 0.0  ;;  %v1409_v35 = vmax.f32 %v1348_v21, 0.0 }
 0x40c   :  { %4877 = vrot.lane.b32.xlu1 %v21885_v36, %s13433_s21  ;;  %v2080_v0 = vadd.f32 %v18090_v7, %v2019_v14  ;;  %v2812_v1 = vmul.f32 %v18048_v17, %v2751_v18  ;;  %v1471_v12 = vmul.f32 %v18315_v61, %v21884_v62  ;;  %v13415_v17 = vld [vmem:[%s20647_s2] ss:$0 sm:$0xff] }
 0x40d   :  { %v3483_v4 = vadd.f32 %v3422_v57, %v3117_v22  ;;  %v3726_v51 = vmax.f32 %v2933_v29, %v3665_v30  ;;  %v1282_v43 = vmul.f32 %v13415_v17, %v1215_v37  ;;  %v21890_v30 = vld [vmem:[#allocation192_spill] sm:$0xff] }
 0x40e   :  { %v18587_v33 = vpop.f32.mrb[58].mxu0  ;;  %v2141_v47 = vmax.f32 %v2080_v0, 0.0  ;;  %v1593_v28 = vadd.f32 %v1532_v20, %v1471_v12  ;;  %v2873_v13 = vadd.f32 %v18090_v7, %v2812_v1  ;;  %v2691_v0 = vmul.f32 %v18427_v44, %v21890_v30 }
 0x40f   :  { %v11826_v19 = vpop.f32.mrb[59].mxu0  ;;  %5364 = vrot.lane.b32.xlu0 %v18204_v40, %s13433_s21  ;;  %v3544_v34 = vmul.f32 %v13415_v17, %v3483_v4  ;;  %12127 = vmatmul.mubr.f32.gmra.mrb[116].mxu1 %v3726_v51  ;;  %v1836_v62 = vpop.permute.xlu1 %1835  ;;  %v3057_v51 = vmul.f32 %v18331_v42, %v21890_v30  ;;  %v21891_v30 = vld [vmem:[#allocation168_spill] sm:$0xff] }
 0x410   :  { %5366 = vrot.lane.b32.xlu1 %v18229_v8, %s13433_s21  ;;  %v18598_v18 = vpop.f32.mrb[62].mxu1  ;;  %v1898_v14 = vmul.f32 %v18427_v44, %v1836_v62  ;;  %v2325_v21 = vmul.f32 %v18331_v42, %v1836_v62  ;;  %v2202_v22 = vmax.f32 %v1409_v35, %v2141_v47  ;;  %12129 = vmatprep.mubr.msk.f32.mxu1 %vm13430_vm0, %v21563_v53  ;;  %v2934_v19 = vmax.f32 %v2873_v13, 0.0  ;;  %v13416_v13 = vld [vmem:[%s20648_s3] ss:$0 sm:$0xff] }
 0x411   :  { %v12047_v20 = vpop.f32.mrb[63].mxu1  ;;  %v2996_v4 = vmul.f32 %v18315_v61, %v1836_v62  ;;  %v3605_v29 = vadd.f32 %v18090_v7, %v3544_v34  ;;  %v1349_v34 = vadd.f32 %v18090_v7, %v1282_v43  ;;  %v21892_v7 = vld [vmem:[#allocation74_spill] sm:$0xff] }
 0x412   :  { %v18606_v57 = vpop.f32.mrb[60].mxu0  ;;  %v1959_v1 = vadd.f32 %v1898_v14, %v1593_v28  ;;  %v2386_v37 = vadd.f32 %v2325_v21, %v2264_v23  ;;  %11915 = vmatmul.mubr.f32.gmra.mrb[118].mxu0 %v2202_v22 }
 0x413   :  { %v11829_v12 = vpop.f32.mrb[61].mxu0  ;;  %4574 = vrot.lane.b32.xlu0 %v18229_v8, %s13432_s12  ;;  %v3666_v35 = vmax.f32 %v3605_v29, 0.0  ;;  %11917 = vmatprep.mubr.msk.f32.mxu0 %vm13430_vm0, %v21563_v53  ;;  %v3118_v14 = vadd.f32 %v3057_v51, %v2996_v4  ;;  %v1410_v43 = vmax.f32 %v1349_v34, 0.0 }
 0x414   :  { %4576 = vrot.lane.b32.xlu1 %v18255_v55, %s13432_s12  ;;  %v18617_v61 = vpop.f32.mrb[64].mxu1  ;;  %v2752_v47 = vadd.f32 %v2691_v0, %v2386_v37  ;;  %v3361_v23 = vpop.permute.xlu1 %3360  ;;  %v2020_v62 = vmul.f32 %v13415_v17, %v1959_v1 }
 0x415   :  { %v12050_v28 = vpop.f32.mrb[65].mxu1  ;;  %v3423_v21 = vmul.f32 %v18427_v44, %v3361_v23  ;;  %v3727_v20 = vmax.f32 %v2934_v19, %v3666_v35 }
 0x416   :  { %v18623_v42 = vpop.f32.mrb[62].mxu0  ;;  %v2081_v29 = vadd.f32 %v13416_v13, %v2020_v62  ;;  %v2813_v0 = vmul.f32 %v13415_v17, %v2752_v47 }
 0x417   :  { %v11832_v22 = vpop.f32.mrb[63].mxu0  ;;  %5123 = vrot.lane.b32.xlu0 %v21891_v30, %s13432_s12  ;;  %v3484_v37 = vadd.f32 %v3423_v21, %v3118_v14  ;;  %12130 = vmatmul.mubr.f32.gmra.mrb[118].mxu1 %v3727_v20 }
 0x418   :  { %5125 = vrot.lane.b32.xlu1 %v21892_v7, %s13432_s12  ;;  %v2142_v44 = vmax.f32 %v2081_v29, 0.0  ;;  %12132 = vmatprep.mubr.msk.f32.mxu1 %vm13430_vm0, %v21563_v53  ;;  %v2874_v12 = vadd.f32 %v13416_v13, %v2813_v0  ;;  %v5106_v34 = vpop.permute.xlu1 %5105  ;;  %v18655_v29 = vld [vmem:[%s20650_s5] ss:$0 sm:$0xff] }
 0x419   :  { %v3545_v4 = vmul.f32 %v13415_v17, %v3484_v37 }
 0x41a   :  { %v18634_v1 = vpop.f32.mrb[64].mxu0  ;;  %v2203_v19 = vmax.f32 %v1410_v43, %v2142_v44  ;;  %v2935_v17 = vmax.f32 %v2874_v12, 0.0 }
 0x41b   :  { %v11835_v51 = vpop.f32.mrb[65].mxu0  ;;  %4879 = vrot.lane.b32.xlu0 %v21891_v30, %s13433_s21  ;;  %v18638_v35 = vpop.f32.mrb[66].mxu1  ;;  %v3606_v47 = vadd.f32 %v13416_v13, %v3545_v4  ;;  %v5284_v13 = vadd.f32 %v5106_v34, %v17973_v24 }
 0x41c   :  { %21893 = vst [vmem:[#allocation63_spill] sm:$0xff] %v18638_v35  ;;  %4881 = vrot.lane.b32.xlu1 %v21892_v7, %s13433_s21  ;;  %11918 = vmatmul.mubr.f32.gmra.mrb[120].mxu0 %v2203_v19  ;;  %v12053_v23 = vpop.f32.mrb[67].mxu1 }
 0x41d   :  { %v4557_v28 = vpop.permute.xlu0 %4556  ;;  %v3667_v14 = vmax.f32 %v3606_v47, 0.0  ;;  %12143 = vmatprep.mubr.msk.f32.mxu0 %vm13430_vm0, %v21563_v53 }
 0x41e   :  { %v18642_v62 = vpop.f32.mrb[66].mxu0  ;;  %v4735_v20 = vadd.f32 %v4557_v28, %v17605_v3  ;;  %v18662_v3 = vld [vmem:[%s20651_s6] ss:$0 sm:$0xff] }
 0x41f   :  { %21894 = vst [vmem:[#allocation216_spill] sm:$0xff] %v18642_v62  ;;  %v11838_v21 = vpop.f32.mrb[67].mxu0  ;;  %5368 = vrot.lane.b32.xlu0 %v18255_v55, %s13433_s21  ;;  %v3728_v22 = vmax.f32 %v2935_v17, %v3667_v14 }
 0x420   :  { %5370 = vrot.lane.b32.xlu1 %v18282_v32, %s13433_s21 }
 0x421   :  { %v4862_v0 = vpop.permute.xlu0 %4861  ;;  %12133 = vmatmul.mubr.f32.gmra.mrb[120].mxu1 %v3728_v22  ;;  %v5351_v43 = vpop.permute.xlu1 %5350  ;;  %v10960_v22 = vld [vmem:[%s20649_s7 + $0xa0] sm:$0xff] }
 0x422   :  { %v5040_v37 = vadd.f32 %v4862_v0, %v4735_v20  ;;  %v18657_v44 = vpop.f32.mrb[68].mxu0  ;;  %v5529_v4 = vadd.f32 %v5351_v43, %v5284_v13  ;;  %v18664_v12 = vpop.f32.mrb[68].mxu1  ;;  %12154 = vmatprep.mubr.msk.f32.mxu1 %vm13430_vm0, %v21563_v53  ;;  %v10961_v13 = vld [vmem:[%s20649_s7 + $0xa8] sm:$0xff] }
 0x423   :  { %21895 = vst [vmem:[#allocation7_spill] sm:$0xff] %v18657_v44  ;;  %21896 = vst [vmem:[#allocation124_spill] sm:$0xff] %v18664_v12  ;;  %v11841_v24 = vpop.f32.mrb[69].mxu0  ;;  %4578 = vrot.lane.b32.xlu0 %v18282_v32, %s13432_s12  ;;  %v12056_v19 = vpop.f32.mrb[69].mxu1 }
 0x424   :  { %v5596_v51 = vmul.f32 %v18655_v29, %v5040_v37  ;;  %4580 = vrot.lane.b32.xlu1 %v18304_v11, %s13432_s12  ;;  %v5785_v47 = vmul.f32 %v18655_v29, %v5529_v4  ;;  %v12872_v19 = vpack.c.bf16 %v10961_v13, %v10960_v22 }
 0x425   :  { %v4559_v23 = vpop.permute.xlu0 %4558  ;;  %v5098_v34 = vpop.permute.xlu1 %5097 }
 0x426   :  { %v5663_v28 = vadd.f32 %v18662_v3, %v5596_v51  ;;  %v18675_v17 = vpop.f32.mrb[70].mxu0  ;;  %v5846_v14 = vadd.f32 %v18662_v3, %v5785_v47  ;;  %v18678_v21 = vpop.f32.mrb[70].mxu1 }
 0x427   :  { %21897 = vst [vmem:[#allocation224_spill] sm:$0xff] %v18675_v17  ;;  %21898 = vst [vmem:[#allocation165_spill] sm:$0xff] %v18678_v21  ;;  %v11844_v20 = vpop.f32.mrb[71].mxu0  ;;  %5127 = vrot.lane.b32.xlu0 %v18001_v45, %s13432_s12  ;;  %v12059_v37 = vpop.f32.mrb[71].mxu1 }
 0x428   :  { %v5724_v0 = vmax.f32 %v5663_v28, 0.0  ;;  %5129 = vrot.lane.b32.xlu1 %v18060_v41, %s13432_s12  ;;  %v5907_v43 = vmax.f32 %v5846_v14, 0.0  ;;  %v10962_v28 = vld [vmem:[%s20649_s7 + $0xb0] sm:$0xff]  ;;  %v10963_v37 = vld [vmem:[%s20649_s7 + $0xb8] sm:$0xff]  ;;  %v4736_v14 = vadd.f32 %v4559_v23, %v17634_v38  ;;  %v5280_v38 = vadd.f32 %v5098_v34, %v17870_v27 }
 0x429   :  { %v5108_v4 = vpop.permute.xlu0 %5107  ;;  %v4549_v24 = vpop.permute.xlu1 %4548  ;;  %v12875_v21 = vpack.c.bf16 %v10963_v37, %v10962_v28 }
 0x42a   :  { %v18690_v51 = vpop.f32.mrb[72].mxu0  ;;  %v5968_v47 = vmax.f32 %v5724_v0, %v5907_v43 }
 0x42b   :  { %21899 = vst [vmem:[#allocation125_spill] sm:$0xff] %v18690_v51  ;;  %v11847_v20 = vpop.f32.mrb[73].mxu0  ;;  %4883 = vrot.lane.b32.xlu0 %v18001_v45, %s13433_s21 }
 0x42c   :  { %4885 = vrot.lane.b32.xlu1 %v18060_v41, %s13433_s21  ;;  %12144 = vmatmul.mubr.msk.f32.vlgmr.msra.gmra.mrb[122].mxu0 %vm6049_vm1, %v5968_v47  ;;  %v18704_v13 = vpop.f32.mrb[72].mxu1 }
 0x42d   :  { %v4854_v22 = vpop.permute.xlu0 %4853  ;;  %21900 = vst [vmem:[#allocation8_spill] sm:$0xff] %v18704_v13  ;;  %v4864_v43 = vpop.permute.xlu1 %4863  ;;  %12873 = vmatpush3.bf16.msra.mxu0 %v12872_v19  ;;  %12165 = vmatprep.mubr.msk.f32.mxu0 %vm13430_vm0, %v21563_v53 }
 0x42e   :  { %v5036_v0 = vadd.f32 %v4854_v22, %v4549_v24  ;;  %v18706_v20 = vpop.f32.mrb[74].mxu0  ;;  %v5041_v51 = vadd.f32 %v4864_v43, %v4736_v14  ;;  %v12062_v17 = vpop.f32.mrb[73].mxu1  ;;  %12874 = vmatprep.subr.bf16.mxu0 %v21840_v54  ;;  %v21902_v24 = vld [vmem:[#allocation77_spill] sm:$0xff] }
 0x42f   :  { %21901 = vst [vmem:[#allocation184_spill] sm:$0xff] %v18706_v20  ;;  %v11850_v12 = vpop.f32.mrb[75].mxu0  ;;  %5372 = vrot.lane.b32.xlu0 %v18304_v11, %s13433_s21  ;;  %v5285_v19 = vadd.f32 %v5108_v4, %v21902_v24 }
 0x430   :  { %v5592_v23 = vmul.f32 %v18655_v29, %v5036_v0  ;;  %5374 = vrot.lane.b32.xlu1 %v18343_v50, %s13433_s21  ;;  %v5597_v47 = vmul.f32 %v18655_v29, %v5041_v51 }
 0x431   :  { %v5343_v28 = vpop.permute.xlu0 %5342  ;;  %12876 = vmatpush3.bf16.msra.mxu0 %v12875_v21 }
 0x432   :  { %v5525_v37 = vadd.f32 %v5343_v28, %v5280_v38  ;;  %v5353_v17 = vpop.permute.xlu1 %5352  ;;  %v18719_v12 = vpop.f32.mrb[76].mxu0  ;;  %12883 = vmatprep.subr.bf16.mxu0 %v21840_v54  ;;  %v5659_v27 = vadd.f32 %v18662_v3, %v5592_v23  ;;  %v5664_v51 = vadd.f32 %v18662_v3, %v5597_v47  ;;  %v10942_v23 = vld [vmem:[%s20649_s7 + $0x20] sm:$0xff]  ;;  %v10943_v28 = vld [vmem:[%s20649_s7 + $0x28] sm:$0xff] }
 0x433   :  { %21903 = vst [vmem:[#allocation116_spill] sm:$0xff] %v18719_v12  ;;  %v5530_v14 = vadd.f32 %v5353_v17, %v5285_v19  ;;  %v11853_v22 = vpop.f32.mrb[77].mxu0  ;;  %4582 = vrot.lane.b32.xlu0 %v18343_v50, %s13432_s12  ;;  %v18728_v4 = vpop.f32.mrb[74].mxu1  ;;  %v21906_v17 = vld [vmem:[#allocation84_spill] sm:$0xff]  ;;  %v12878_v13 = vpack.c.bf16 %v10943_v28, %v10942_v23  ;;  %v21910_v23 = vld [vmem:[#allocation37_spill] sm:$0xff] }
 0x434   :  { %v5781_v34 = vmul.f32 %v18655_v29, %v5525_v37  ;;  %4584 = vrot.lane.b32.xlu1 %v18363_v52, %s13432_s12  ;;  %21904 = vst [vmem:[#allocation226_spill] sm:$0xff] %v18728_v4  ;;  %v12065_v43 = vpop.f32.mrb[75].mxu1  ;;  %v10967_v22 = vld [vmem:[%s20649_s7 + $0xc8] sm:$0xff] }
 0x435   :  { %v5786_v21 = vmul.f32 %v18655_v29, %v5530_v14  ;;  %v4551_v0 = vpop.permute.xlu0 %4550  ;;  %v10966_v14 = vld [vmem:[%s20649_s7 + $0xc0] sm:$0xff] }
 0x436   :  { %v5842_v38 = vadd.f32 %v18662_v3, %v5781_v34  ;;  %v4561_v24 = vpop.permute.xlu1 %4560  ;;  %v18733_v19 = vpop.f32.mrb[78].mxu0  ;;  %v5720_v34 = vmax.f32 %v5659_v27, 0.0  ;;  %v12884_v50 = vpack.c.bf16 %v10967_v22, %v10966_v14  ;;  %v10944_v27 = vld [vmem:[%s20649_s7 + $0x30] sm:$0xff]  ;;  %v4732_v28 = vadd.f32 %v4551_v0, %v21910_v23 }
 0x437   :  { %21905 = vst [vmem:[#allocation218_spill] sm:$0xff] %v18733_v19  ;;  %v5847_v37 = vadd.f32 %v18662_v3, %v5786_v21  ;;  %v11856_v47 = vpop.f32.mrb[79].mxu0  ;;  %5131 = vrot.lane.b32.xlu0 %v21906_v17, %s13432_s12  ;;  %v21907_v19 = vld [vmem:[#allocation120_spill] sm:$0xff]  ;;  %v18752_v4 = vpop.f32.mrb[76].mxu1  ;;  %v5725_v21 = vmax.f32 %v5664_v51, 0.0  ;;  %v10969_v51 = vld [vmem:[%s20649_s7 + $0xd8] sm:$0xff] }
 0x438   :  { %v5903_v43 = vmax.f32 %v5842_v38, 0.0  ;;  %5133 = vrot.lane.b32.xlu1 %v21907_v19, %s13432_s12  ;;  %21908 = vst [vmem:[#allocation66_spill] sm:$0xff] %v18752_v4  ;;  %v12068_v20 = vpop.f32.mrb[77].mxu1  ;;  %v10945_v38 = vld [vmem:[%s20649_s7 + $0x38] sm:$0xff] }
 0x439   :  { %v5908_v47 = vmax.f32 %v5847_v37, 0.0  ;;  %v5100_v12 = vpop.permute.xlu0 %5099  ;;  %v10968_v20 = vld [vmem:[%s20649_s7 + $0xd0] sm:$0xff]  ;;  %v21911_v37 = vld [vmem:[#allocation163_spill] sm:$0xff]  ;;  %v12881_v22 = vpack.c.bf16 %v10945_v38, %v10944_v27 }
 0x43a   :  { %v5964_v35 = vmax.f32 %v5720_v34, %v5903_v43  ;;  %v5110_v44 = vpop.permute.xlu1 %5109  ;;  %v18754_v62 = vpop.f32.mrb[80].mxu0  ;;  %v12887_v0 = vpack.c.bf16 %v10969_v51, %v10968_v20 }
 0x43b   :  { %21909 = vst [vmem:[#allocation40_spill] sm:$0xff] %v18754_v62  ;;  %v5969_v41 = vmax.f32 %v5725_v21, %v5908_v47  ;;  %v11859_v4 = vpop.f32.mrb[81].mxu0  ;;  %4887 = vrot.lane.b32.xlu0 %v21906_v17, %s13433_s21  ;;  %v10948_v62 = vld [vmem:[%s20649_s7 + $0x50] sm:$0xff] }
 0x43c   :  { %4889 = vrot.lane.b32.xlu1 %v21907_v19, %s13433_s21  ;;  %12155 = vmatmul.mubr.msk.f32.vlgmr.msra.gmra.mrb[122].mxu1 %vm6049_vm1, %v5964_v35  ;;  %v4737_v4 = vadd.f32 %v4561_v24, %v21911_v37  ;;  %v21913_v35 = vld [vmem:[#allocation70_spill] sm:$0xff] }
 0x43d   :  { %12166 = vmatmul.mubr.msk.f32.vlgmr.msra.gmra.mrb[124].mxu0 %vm6049_vm1, %v5969_v41  ;;  %v4856_v14 = vpop.permute.xlu0 %4855  ;;  %12879 = vmatpush3.bf16.msra.mxu1 %v12878_v13  ;;  %v5281_v41 = vadd.f32 %v5100_v12, %v21913_v35 }
 0x43e   :  { %v5037_v34 = vadd.f32 %v4856_v14, %v4732_v28  ;;  %v4866_v43 = vpop.permute.xlu1 %4865  ;;  %v18776_v21 = vpop.f32.mrb[82].mxu0  ;;  %12885 = vmatpush3.bf16.msra.mxu0 %v12884_v50  ;;  %12880 = vmatprep.subr.bf16.mxu1 %v21840_v54  ;;  %v21915_v50 = vld [vmem:[#allocation197_spill] sm:$0xff] }
 0x43f   :  { %21912 = vst [vmem:[#allocation185_spill] sm:$0xff] %v18776_v21  ;;  %v5042_v47 = vadd.f32 %v4866_v43, %v4737_v4  ;;  %v11862_v23 = vpop.f32.mrb[83].mxu0  ;;  %5376 = vrot.lane.b32.xlu0 %v18363_v52, %s13433_s21  ;;  %12886 = vmatprep.subr.bf16.mxu0 %v21840_v54  ;;  %v5286_v27 = vadd.f32 %v5110_v44, %v21915_v50 }
 0x440   :  { %v5593_v13 = vmul.f32 %v18655_v29, %v5037_v34  ;;  %v18784_v24 = vpop.f32.mrb[78].mxu1  ;;  %5378 = vrot.lane.b32.xlu1 %v18387_v48, %s13433_s21  ;;  %12176 = vmatprep.mubr.msk.f32.mxu1 %vm13430_vm0, %v21563_v53 }
 0x441   :  { %21914 = vst [vmem:[#allocation11_spill] sm:$0xff] %v18784_v24  ;;  %v5598_v38 = vmul.f32 %v18655_v29, %v5042_v47  ;;  %v12071_v20 = vpop.f32.mrb[79].mxu1  ;;  %v5345_v51 = vpop.permute.xlu0 %5344  ;;  %12882 = vmatpush3.bf16.msra.mxu1 %v12881_v22  ;;  %12187 = vmatprep.mubr.msk.f32.mxu0 %vm13430_vm0, %v21563_v53 }
 0x442   :  { %v5526_v12 = vadd.f32 %v5345_v51, %v5281_v41  ;;  %v5355_v28 = vpop.permute.xlu1 %5354  ;;  %v18794_v37 = vpop.f32.mrb[84].mxu0  ;;  %12888 = vmatpush3.bf16.msra.mxu0 %v12887_v0  ;;  %12889 = vmatprep.subr.bf16.mxu1 %v21840_v54  ;;  %v5660_v44 = vadd.f32 %v18662_v3, %v5593_v13  ;;  %v10946_v41 = vld [vmem:[%s20649_s7 + $0x40] sm:$0xff]  ;;  %v10947_v13 = vld [vmem:[%s20649_s7 + $0x48] sm:$0xff] }
 0x443   :  { %21916 = vst [vmem:[#allocation229_spill] sm:$0xff] %v18794_v37  ;;  %v5531_v4 = vadd.f32 %v5355_v28, %v5286_v27  ;;  %v11865_v14 = vpop.f32.mrb[85].mxu0  ;;  %4586 = vrot.lane.b32.xlu0 %v18387_v48, %s13432_s12  ;;  %12895 = vmatprep.subr.bf16.mxu0 %v21840_v54  ;;  %v5665_v34 = vadd.f32 %v18662_v3, %v5598_v38  ;;  %v21918_v27 = vld [vmem:[#allocation87_spill] sm:$0xff] }
 0x444   :  { %v5782_v22 = vmul.f32 %v18655_v29, %v5526_v12  ;;  %4588 = vrot.lane.b32.xlu1 %v18404_v49, %s13432_s12  ;;  %v18807_v35 = vpop.f32.mrb[80].mxu1  ;;  %v10972_v20 = vld [vmem:[%s20649_s7 + $0xe0] sm:$0xff]  ;;  %v10973_v51 = vld [vmem:[%s20649_s7 + $0xe8] sm:$0xff]  ;;  %v5721_v12 = vmax.f32 %v5660_v44, 0.0  ;;  %v12890_v37 = vpack.c.bf16 %v10947_v13, %v10946_v41  ;;  %v10949_v44 = vld [vmem:[%s20649_s7 + $0x58] sm:$0xff] }
 0x445   :  { %v5787_v43 = vmul.f32 %v18655_v29, %v5531_v4  ;;  %v4553_v0 = vpop.permute.xlu0 %4552  ;;  %21917 = vst [vmem:[#allocation201_spill] sm:$0xff] %v18807_v35  ;;  %v12074_v38 = vpop.f32.mrb[81].mxu1  ;;  %v21919_v4 = vld [vmem:[#allocation221_spill] sm:$0xff]  ;;  %v5726_v14 = vmax.f32 %v5665_v34, 0.0  ;;  %v12896_v24 = vpack.c.bf16 %v10973_v51, %v10972_v20 }
 0x446   :  { %v5843_v47 = vadd.f32 %v18662_v3, %v5782_v22  ;;  %v4563_v23 = vpop.permute.xlu1 %4562  ;;  %v10974_v41 = vld [vmem:[%s20649_s7 + $0xf0] sm:$0xff]  ;;  %v10975_v13 = vld [vmem:[%s20649_s7 + $0xf8] sm:$0xff] }
 0x447   :  { %v5848_v50 = vadd.f32 %v18662_v3, %v5787_v43  ;;  %5135 = vrot.lane.b32.xlu0 %v21918_v27, %s13432_s12  ;;  %v21922_v51 = vld [vmem:[#allocation117_spill] sm:$0xff] }
 0x448   :  { %v5904_v28 = vmax.f32 %v5843_v47, 0.0  ;;  %5137 = vrot.lane.b32.xlu1 %v21919_v4, %s13432_s12  ;;  %v18826_v38 = vpop.f32.mrb[82].mxu1 }
 0x449   :  { %v5909_v22 = vmax.f32 %v5848_v50, 0.0  ;;  %v5102_v43 = vpop.permute.xlu0 %5101  ;;  %21920 = vst [vmem:[#allocation126_spill] sm:$0xff] %v18826_v38  ;;  %v12077_v34 = vpop.f32.mrb[83].mxu1  ;;  %v21921_v50 = vld [vmem:[#allocation167_spill] sm:$0xff]  ;;  %v12899_v38 = vpack.c.bf16 %v10975_v13, %v10974_v41 }
 0x44a   :  { %v5965_v21 = vmax.f32 %v5721_v12, %v5904_v28  ;;  %v5112_v35 = vpop.permute.xlu1 %5111  ;;  %v4733_v20 = vadd.f32 %v4553_v0, %v21921_v50  ;;  %v4738_v12 = vadd.f32 %v4563_v23, %v21922_v51 }
 0x44b   :  { %v5970_v47 = vmax.f32 %v5726_v14, %v5909_v22  ;;  %4891 = vrot.lane.b32.xlu0 %v21918_v27, %s13433_s21  ;;  %v12893_v14 = vpack.c.bf16 %v10949_v44, %v10948_v62  ;;  %v21924_v62 = vld [vmem:[#allocation81_spill] sm:$0xff] }
 0x44c   :  { %4893 = vrot.lane.b32.xlu1 %v21919_v4, %s13433_s21  ;;  %12177 = vmatmul.mubr.msk.f32.vlgmr.msra.gmra.mrb[124].mxu1 %vm6049_vm1, %v5965_v21  ;;  %v21923_v21 = vld [vmem:[#allocation171_spill] sm:$0xff] }
 0x44d   :  { %12188 = vmatmul.mubr.msk.f32.vlgmr.msra.gmra.mrb[126].mxu0 %vm6049_vm1, %v5970_v47  ;;  %v4858_v28 = vpop.permute.xlu0 %4857  ;;  %12891 = vmatpush3.bf16.msra.mxu1 %v12890_v37  ;;  %v5282_v0 = vadd.f32 %v5102_v43, %v21923_v21  ;;  %v10951_v21 = vld [vmem:[%s20649_s7 + $0x68] sm:$0xff] }
 0x44e   :  { %v5038_v22 = vadd.f32 %v4858_v28, %v4733_v20  ;;  %v4868_v34 = vpop.permute.xlu1 %4867  ;;  %12897 = vmatpush3.bf16.msra.mxu0 %v12896_v24  ;;  %12892 = vmatprep.subr.bf16.mxu1 %v21840_v54  ;;  %v5287_v24 = vadd.f32 %v5112_v35, %v21924_v62  ;;  %v10978_v62 = vld [vmem:[%s20649_s7 + $0x100] sm:$0xff] }
 0x44f   :  { %v5043_v48 = vadd.f32 %v4868_v34, %v4738_v12  ;;  %5380 = vrot.lane.b32.xlu0 %v18404_v49, %s13433_s21  ;;  %12898 = vmatprep.subr.bf16.mxu0 %v21840_v54  ;;  %v18860_v47 = vpop.f32.mrb[84].mxu1  ;;  %v10950_v34 = vld [vmem:[%s20649_s7 + $0x60] sm:$0xff] }
 0x450   :  { %v5594_v23 = vmul.f32 %v18655_v29, %v5038_v22  ;;  %5382 = vrot.lane.b32.xlu1 %v18430_v9, %s13433_s21  ;;  %12198 = vmatprep.mubr.msk.f32.mxu1 %vm13430_vm0, %v21563_v53  ;;  %21925 = vst [vmem:[#allocation170_spill] sm:$0xff] %v18860_v47  ;;  %v12080_v13 = vpop.f32.mrb[85].mxu1  ;;  %v10952_v47 = vld [vmem:[%s20649_s7 + $0x70] sm:$0xff] }
 0x451   :  { %v5599_v37 = vmul.f32 %v18655_v29, %v5043_v48  ;;  %v5347_v44 = vpop.permute.xlu0 %5346  ;;  %12894 = vmatpush3.bf16.msra.mxu1 %v12893_v14  ;;  %12209 = vmatprep.mubr.msk.f32.mxu0 %vm13430_vm0, %v21563_v53 }
 0x452   :  { %v5527_v43 = vadd.f32 %v5347_v44, %v5282_v0  ;;  %v5357_v41 = vpop.permute.xlu1 %5356  ;;  %12900 = vmatpush3.bf16.msra.mxu0 %v12899_v38  ;;  %12901 = vmatprep.subr.bf16.mxu1 %v21840_v54  ;;  %v5661_v48 = vadd.f32 %v18662_v3, %v5594_v23  ;;  %v21927_v23 = vld [vmem:[#allocation121_spill] sm:$0xff] }
 0x453   :  { %v5532_v50 = vadd.f32 %v5357_v41, %v5287_v24  ;;  %4590 = vrot.lane.b32.xlu0 %v18430_v9, %s13432_s12  ;;  %12907 = vmatprep.subr.bf16.mxu0 %v21840_v54  ;;  %v18872_v20 = vpop.f32.mrb[86].mxu0  ;;  %v5666_v51 = vadd.f32 %v18662_v3, %v5599_v37  ;;  %v10979_v24 = vld [vmem:[%s20649_s7 + $0x108] sm:$0xff]  ;;  %v10953_v9 = vld [vmem:[%s20649_s7 + $0x78] sm:$0xff] }
 0x454   :  { %v5783_v35 = vmul.f32 %v18655_v29, %v5527_v43  ;;  %4592 = vrot.lane.b32.xlu1 %v18449_v46, %s13432_s12  ;;  %21926 = vst [vmem:[#allocation182_spill] sm:$0xff] %v18872_v20  ;;  %v11868_v28 = vpop.f32.mrb[87].mxu0  ;;  %v5722_v37 = vmax.f32 %v5661_v48, 0.0  ;;  %v21928_v43 = vld [vmem:[#allocation90_spill] sm:$0xff]  ;;  %v12908_v20 = vpack.c.bf16 %v10979_v24, %v10978_v62  ;;  %v21931_v24 = vld [vmem:[#allocation123_spill] sm:$0xff] }
 0x455   :  { %v5788_v38 = vmul.f32 %v18655_v29, %v5532_v50  ;;  %v4555_v12 = vpop.permute.xlu0 %4554  ;;  %v5727_v41 = vmax.f32 %v5666_v51, 0.0  ;;  %v10980_v51 = vld [vmem:[%s20649_s7 + $0x110] sm:$0xff] }
 0x456   :  { %v5844_v14 = vadd.f32 %v18662_v3, %v5783_v35  ;;  %v4565_v22 = vpop.permute.xlu1 %4564  ;;  %v12902_v35 = vpack.c.bf16 %v10951_v21, %v10950_v34  ;;  %v10981_v34 = vld [vmem:[%s20649_s7 + $0x118] sm:$0xff] }
 0x457   :  { %v5849_v0 = vadd.f32 %v18662_v3, %v5788_v38  ;;  %5139 = vrot.lane.b32.xlu0 %v21927_v23, %s13432_s12  ;;  %v21930_v21 = vld [vmem:[#allocation158_spill] sm:$0xff] }
 0x458   :  { %v5905_v44 = vmax.f32 %v5844_v14, 0.0  ;;  %5141 = vrot.lane.b32.xlu1 %v21928_v43, %s13432_s12 }
 0x459   :  { %v5910_v13 = vmax.f32 %v5849_v0, 0.0  ;;  %v5104_v50 = vpop.permute.xlu0 %5103  ;;  %v4734_v0 = vadd.f32 %v4555_v12, %v21930_v21  ;;  %v12911_v12 = vpack.c.bf16 %v10981_v34, %v10980_v51 }
 0x45a   :  { %v5966_v38 = vmax.f32 %v5722_v37, %v5905_v44  ;;  %v5114_v28 = vpop.permute.xlu1 %5113  ;;  %v4739_v37 = vadd.f32 %v4565_v22, %v21931_v24  ;;  %v5283_v22 = vadd.f32 %v5104_v50, %v17953_v39 }
 0x45b   :  { %v5971_v48 = vmax.f32 %v5727_v41, %v5910_v13  ;;  %4895 = vrot.lane.b32.xlu0 %v21927_v23, %s13433_s21  ;;  %v18902_v14 = vpop.f32.mrb[86].mxu1  ;;  %v12905_v41 = vpack.c.bf16 %v10953_v9, %v10952_v47  ;;  %v5288_v9 = vadd.f32 %v5114_v28, %v18078_v10 }
 0x45c   :  { %21929 = vst [vmem:[#allocation72_spill] sm:$0xff] %v18902_v14  ;;  %4897 = vrot.lane.b32.xlu1 %v21928_v43, %s13433_s21  ;;  %v12083_v62 = vpop.f32.mrb[87].mxu1  ;;  %12199 = vmatmul.mubr.msk.f32.vlgmr.msra.gmra.mrb[126].mxu1 %vm6049_vm1, %v5966_v38 }
 0x45d   :  { %12210 = vmatmul.mubr.msk.f32.vlgmr.msra.gmra.mrb[128].mxu0 %vm6049_vm1, %v5971_v48  ;;  %v4860_v44 = vpop.permute.xlu0 %4859  ;;  %12903 = vmatpush3.bf16.msra.mxu1 %v12902_v35 }
 0x45e   :  { %v5039_v13 = vadd.f32 %v4860_v44, %v4734_v0  ;;  %v4870_v14 = vpop.permute.xlu1 %4869  ;;  %v18916_v23 = vpop.f32.mrb[88].mxu0  ;;  %12909 = vmatpush3.bf16.msra.mxu0 %v12908_v20  ;;  %12904 = vmatprep.subr.bf16.mxu1 %v21840_v54  ;;  %v10983_v44 = vld [vmem:[%s20649_s7 + $0x120] sm:$0xff] }
 0x45f   :  { %v5044_v21 = vadd.f32 %v4870_v14, %v4739_v37  ;;  %5384 = vrot.lane.b32.xlu0 %v18449_v46, %s13433_s21  ;;  %v11871_v38 = vpop.f32.mrb[89].mxu0  ;;  %12910 = vmatprep.subr.bf16.mxu0 %v21840_v54 }
 0x460   :  { %v5595_v35 = vmul.f32 %v18655_v29, %v5039_v13  ;;  %5386 = vrot.lane.b32.xlu1 %v18465_v16, %s13433_s21  ;;  %12220 = vmatprep.mubr.msk.f32.mxu1 %vm13430_vm0, %v21563_v53  ;;  %v10989_v38 = vld [vmem:[%s20649_s7 + $0x148] sm:$0xff] }
 0x461   :  { %v5600_v47 = vmul.f32 %v18655_v29, %v5044_v21  ;;  %v5349_v20 = vpop.permute.xlu0 %5348  ;;  %12906 = vmatpush3.bf16.msra.mxu1 %v12905_v41  ;;  %12231 = vmatprep.mubr.msk.f32.mxu0 %vm13430_vm0, %v21563_v53  ;;  %v10984_v41 = vld [vmem:[%s20649_s7 + $0x128] sm:$0xff]  ;;  %v10988_v21 = vld [vmem:[%s20649_s7 + $0x140] sm:$0xff] }
 0x462   :  { %v5528_v48 = vadd.f32 %v5349_v20, %v5283_v22  ;;  %v5359_v14 = vpop.permute.xlu1 %5358  ;;  %12912 = vmatpush3.bf16.msra.mxu0 %v12911_v12  ;;  %12913 = vmatprep.subr.bf16.mxu1 %v21840_v54  ;;  %v5662_v10 = vadd.f32 %v18662_v3, %v5595_v35  ;;  %v21933_v12 = vld [vmem:[#allocation211_spill] sm:$0xff] }
 0x463   :  { %v5533_v39 = vadd.f32 %v5359_v14, %v5288_v9  ;;  %4594 = vrot.lane.b32.xlu0 %v18465_v16, %s13432_s12  ;;  %v18935_v50 = vpop.f32.mrb[88].mxu1  ;;  %12919 = vmatprep.subr.bf16.mxu0 %v21840_v54  ;;  %v5667_v34 = vadd.f32 %v18662_v3, %v5600_v47 }
 0x464   :  { %21932 = vst [vmem:[#allocation71_spill] sm:$0xff] %v18935_v50  ;;  %v5784_v28 = vmul.f32 %v18655_v29, %v5528_v48  ;;  %4596 = vrot.lane.b32.xlu1 %v18490_v26, %s13432_s12  ;;  %v12086_v51 = vpop.f32.mrb[89].mxu1  ;;  %v5723_v22 = vmax.f32 %v5662_v10, 0.0  ;;  %v10985_v50 = vld [vmem:[%s20649_s7 + $0x130] sm:$0xff]  ;;  %v10986_v10 = vld [vmem:[%s20649_s7 + $0x138] sm:$0xff] }
 0x465   :  { %v5789_v0 = vmul.f32 %v18655_v29, %v5533_v39  ;;  %v4567_v62 = vpop.permute.xlu0 %4566  ;;  %v5728_v47 = vmax.f32 %v5667_v34, 0.0  ;;  %v12914_v39 = vpack.c.bf16 %v10984_v41, %v10983_v44  ;;  %v10990_v34 = vld [vmem:[%s20649_s7 + $0x150] sm:$0xff]  ;;  %v10991_v44 = vld [vmem:[%s20649_s7 + $0x158] sm:$0xff] }
 0x466   :  { %v5845_v24 = vadd.f32 %v18662_v3, %v5784_v28  ;;  %v4569_v37 = vpop.permute.xlu1 %4568  ;;  %v4740_v41 = vadd.f32 %v4567_v62, %v17769_v6  ;;  %v12923_v6 = vpack.c.bf16 %v10991_v44, %v10990_v34 }
 0x467   :  { %v5850_v13 = vadd.f32 %v18662_v3, %v5789_v0  ;;  %5143 = vrot.lane.b32.xlu0 %v21933_v12, %s13432_s12  ;;  %v12920_v0 = vpack.c.bf16 %v10989_v38, %v10988_v21  ;;  %v4741_v21 = vadd.f32 %v4569_v37, %v17799_v56 }
 0x468   :  { %v5906_v35 = vmax.f32 %v5845_v24, 0.0  ;;  %5145 = vrot.lane.b32.xlu1 %v18385_v5, %s13432_s12  ;;  %v18962_v9 = vpop.f32.mrb[90].mxu0 }
 0x469   :  { %v5911_v20 = vmax.f32 %v5850_v13, 0.0  ;;  %v5116_v48 = vpop.permute.xlu0 %5115  ;;  %v11874_v14 = vpop.f32.mrb[91].mxu0 }
 0x46a   :  { %v5967_v28 = vmax.f32 %v5723_v22, %v5906_v35  ;;  %v5118_v51 = vpop.permute.xlu1 %5117  ;;  %v12917_v35 = vpack.c.bf16 %v10986_v10, %v10985_v50  ;;  %v5289_v56 = vadd.f32 %v5116_v48, %v18109_v63 }
 0x46b   :  { %v5972_v24 = vmax.f32 %v5728_v47, %v5911_v20  ;;  %4899 = vrot.lane.b32.xlu0 %v21933_v12, %s13433_s21 }
 0x46c   :  { %4901 = vrot.lane.b32.xlu1 %v18385_v5, %s13433_s21  ;;  %v18981_v13 = vpop.f32.mrb[92].mxu0  ;;  %12221 = vmatmul.mubr.msk.f32.vlgmr.msra.gmra.mrb[128].mxu1 %vm6049_vm1, %v5967_v28 }
 0x46d   :  { %21934 = vst [vmem:[#allocation169_spill] sm:$0xff] %v18981_v13  ;;  %12232 = vmatmul.mubr.msk.f32.vlgmr.msra.gmra.mrb[130].mxu0 %vm6049_vm1, %v5972_v24  ;;  %v4872_v38 = vpop.permute.xlu0 %4871  ;;  %v11877_v22 = vpop.f32.mrb[93].mxu0  ;;  %12915 = vmatpush3.bf16.msra.mxu1 %v12914_v39  ;;  %v5290_v39 = vadd.f32 %v5118_v51, %v18140_v60 }
 0x46e   :  { %v5045_v47 = vadd.f32 %v4872_v38, %v4740_v41  ;;  %v18986_v20 = vpop.f32.mrb[90].mxu1  ;;  %v4874_v14 = vpop.permute.xlu1 %4873  ;;  %12921 = vmatpush3.bf16.msra.mxu0 %v12920_v0  ;;  %12916 = vmatprep.subr.bf16.mxu1 %v21840_v54  ;;  %v10993_v38 = vld [vmem:[%s20649_s7 + $0x160] sm:$0xff]  ;;  %v10994_v22 = vld [vmem:[%s20649_s7 + $0x168] sm:$0xff] }
 0x46f   :  { %v5046_v62 = vadd.f32 %v4874_v14, %v4741_v21  ;;  %v12089_v13 = vpop.f32.mrb[91].mxu1  ;;  %5388 = vrot.lane.b32.xlu0 %v18490_v26, %s13433_s21  ;;  %12922 = vmatprep.subr.bf16.mxu0 %v21840_v54  ;;  %v10999_v14 = vld [vmem:[%s20649_s7 + $0x188] sm:$0xff] }
 0x470   :  { %v5601_v37 = vmul.f32 %v18655_v29, %v5045_v47  ;;  %5390 = vrot.lane.b32.xlu1 %v18504_v2, %s13433_s21  ;;  %v18996_v50 = vpop.f32.mrb[94].mxu0  ;;  %12242 = vmatprep.mubr.msk.f32.mxu1 %vm13430_vm0, %v21563_v53  ;;  %v10998_v47 = vld [vmem:[%s20649_s7 + $0x180] sm:$0xff] }
 0x471   :  { %21935 = vst [vmem:[#allocation12_spill] sm:$0xff] %v18996_v50  ;;  %v5602_v28 = vmul.f32 %v18655_v29, %v5046_v62  ;;  %v5361_v0 = vpop.permute.xlu0 %5360  ;;  %v11880_v10 = vpop.f32.mrb[95].mxu0  ;;  %12918 = vmatpush3.bf16.msra.mxu1 %v12917_v35  ;;  %12253 = vmatprep.mubr.msk.f32.mxu0 %vm13430_vm0, %v21563_v53  ;;  %v11005_v50 = vld [vmem:[%s20649_s7 + $0x1b0] sm:$0xff] }
 0x472   :  { %v5534_v63 = vadd.f32 %v5361_v0, %v5289_v56  ;;  %v5363_v48 = vpop.permute.xlu1 %5362  ;;  %12924 = vmatpush3.bf16.msra.mxu0 %v12923_v6  ;;  %12925 = vmatprep.subr.bf16.mxu1 %v21840_v54  ;;  %v5668_v60 = vadd.f32 %v18662_v3, %v5601_v37  ;;  %v21936_v37 = vld [vmem:[#allocation180_spill] sm:$0xff] }
 0x473   :  { %v5535_v24 = vadd.f32 %v5363_v48, %v5290_v39  ;;  %4598 = vrot.lane.b32.xlu0 %v18504_v2, %s13432_s12  ;;  %12931 = vmatprep.subr.bf16.mxu0 %v21840_v54  ;;  %v5669_v34 = vadd.f32 %v18662_v3, %v5602_v28 }
 0x474   :  { %v5790_v51 = vmul.f32 %v18655_v29, %v5534_v63  ;;  %4600 = vrot.lane.b32.xlu1 %v18528_v31, %s13432_s12  ;;  %v5729_v6 = vmax.f32 %v5668_v60, 0.0  ;;  %v12926_v63 = vpack.c.bf16 %v10994_v22, %v10993_v38  ;;  %v10996_v60 = vld [vmem:[%s20649_s7 + $0x178] sm:$0xff] }
 0x475   :  { %v5791_v44 = vmul.f32 %v18655_v29, %v5535_v24  ;;  %v4571_v41 = vpop.permute.xlu0 %4570  ;;  %v5730_v39 = vmax.f32 %v5669_v34, 0.0  ;;  %v11000_v34 = vld [vmem:[%s20649_s7 + $0x190] sm:$0xff]  ;;  %v11001_v38 = vld [vmem:[%s20649_s7 + $0x198] sm:$0xff] }
 0x476   :  { %v5851_v13 = vadd.f32 %v18662_v3, %v5790_v51  ;;  %v4573_v21 = vpop.permute.xlu1 %4572  ;;  %v12932_v51 = vpack.c.bf16 %v10999_v14, %v10998_v47  ;;  %v21937_v22 = vld [vmem:[#allocation118_spill] sm:$0xff] }
 0x477   :  { %v5852_v35 = vadd.f32 %v18662_v3, %v5791_v44  ;;  %5147 = vrot.lane.b32.xlu0 %v18416_v25, %s13432_s12  ;;  %v19030_v56 = vpop.f32.mrb[92].mxu1  ;;  %v10995_v44 = vld [vmem:[%s20649_s7 + $0x170] sm:$0xff]  ;;  %v4743_v47 = vadd.f32 %v4573_v21, %v17848_v15 }
 0x478   :  { %v5912_v62 = vmax.f32 %v5851_v13, 0.0  ;;  %5149 = vrot.lane.b32.xlu1 %v21936_v37, %s13432_s12  ;;  %v12092_v0 = vpop.f32.mrb[93].mxu1 }
 0x479   :  { %v5913_v28 = vmax.f32 %v5852_v35, 0.0  ;;  %v5120_v10 = vpop.permute.xlu0 %5119  ;;  %v4742_v35 = vadd.f32 %v4571_v41, %v21937_v22 }
 0x47a   :  { %v5973_v48 = vmax.f32 %v5729_v6, %v5912_v62  ;;  %v5122_v24 = vpop.permute.xlu1 %5121  ;;  %v12929_v6 = vpack.c.bf16 %v10996_v60, %v10995_v44  ;;  %v5291_v15 = vadd.f32 %v5120_v10, %v18168_v59 }
 0x47b   :  { %v5974_v13 = vmax.f32 %v5730_v39, %v5913_v28  ;;  %4903 = vrot.lane.b32.xlu0 %v18416_v25, %s13433_s21  ;;  %v12935_v28 = vpack.c.bf16 %v11001_v38, %v11000_v34  ;;  %v21940_v38 = vld [vmem:[#allocation209_spill] sm:$0xff] }
 0x47c   :  { %4905 = vrot.lane.b32.xlu1 %v21936_v37, %s13433_s21  ;;  %12243 = vmatmul.mubr.msk.f32.vlgmr.msra.gmra.mrb[130].mxu1 %vm6049_vm1, %v5973_v48  ;;  %v5292_v48 = vadd.f32 %v5122_v24, %v18204_v40 }
 0x47d   :  { %12254 = vmatmul.mubr.msk.f32.vlgmr.msra.gmra.mrb[132].mxu0 %vm6049_vm1, %v5974_v13  ;;  %v4876_v14 = vpop.permute.xlu0 %4875  ;;  %12927 = vmatpush3.bf16.msra.mxu1 %v12926_v63 }
 0x47e   :  { %v5047_v62 = vadd.f32 %v4876_v14, %v4742_v35  ;;  %v4878_v39 = vpop.permute.xlu1 %4877  ;;  %12933 = vmatpush3.bf16.msra.mxu0 %v12932_v51  ;;  %12928 = vmatprep.subr.bf16.mxu1 %v21840_v54  ;;  %v19055_v41 = vpop.f32.mrb[94].mxu1 }
 0x47f   :  { %v5048_v0 = vadd.f32 %v4878_v39, %v4743_v47  ;;  %21938 = vst [vmem:[#allocation210_spill] sm:$0xff] %v19055_v41  ;;  %5392 = vrot.lane.b32.xlu0 %v18528_v31, %s13433_s21  ;;  %12934 = vmatprep.subr.bf16.mxu0 %v21840_v54  ;;  %v12095_v63 = vpop.f32.mrb[95].mxu1  ;;  %v11004_v39 = vld [vmem:[%s20649_s7 + $0x1a8] sm:$0xff] }
 0x480   :  { %v5603_v21 = vmul.f32 %v18655_v29, %v5047_v62  ;;  %5394 = vrot.lane.b32.xlu1 %v18547_v58, %s13433_s21  ;;  %12264 = vmatprep.mubr.msk.f32.mxu1 %vm13430_vm0, %v21563_v53  ;;  %v11003_v62 = vld [vmem:[%s20649_s7 + $0x1a0] sm:$0xff] }
 0x481   :  { %v5604_v51 = vmul.f32 %v18655_v29, %v5048_v0  ;;  %v5365_v44 = vpop.permute.xlu0 %5364  ;;  %12930 = vmatpush3.bf16.msra.mxu1 %v12929_v6  ;;  %12275 = vmatprep.mubr.msk.f32.mxu0 %vm13430_vm0, %v21563_v53  ;;  %v19070_v59 = vpop.f32.mrb[96].mxu0  ;;  %v21941_v0 = vld [vmem:[#allocation214_spill] sm:$0xff] }
 0x482   :  { %v5536_v60 = vadd.f32 %v5365_v44, %v5291_v15  ;;  %21939 = vst [vmem:[#allocation222_spill] sm:$0xff] %v19070_v59  ;;  %v5367_v10 = vpop.permute.xlu1 %5366  ;;  %12936 = vmatpush3.bf16.msra.mxu0 %v12935_v28  ;;  %12937 = vmatprep.subr.bf16.mxu1 %v21840_v54  ;;  %v11883_v34 = vpop.f32.mrb[97].mxu0  ;;  %v5670_v40 = vadd.f32 %v18662_v3, %v5603_v21  ;;  %v11008_v15 = vld [vmem:[%s20649_s7 + $0x1c0] sm:$0xff]  ;;  %v11009_v21 = vld [vmem:[%s20649_s7 + $0x1c8] sm:$0xff] }
 0x483   :  { %v5537_v13 = vadd.f32 %v5367_v10, %v5292_v48  ;;  %4602 = vrot.lane.b32.xlu0 %v18547_v58, %s13432_s12  ;;  %12943 = vmatprep.subr.bf16.mxu0 %v21840_v54  ;;  %v5671_v22 = vadd.f32 %v18662_v3, %v5604_v51  ;;  %v21942_v51 = vld [vmem:[#allocation122_spill] sm:$0xff]  ;;  %v12938_v34 = vpack.c.bf16 %v11004_v39, %v11003_v62 }
 0x484   :  { %v5792_v24 = vmul.f32 %v18655_v29, %v5536_v60  ;;  %4604 = vrot.lane.b32.xlu1 %v21940_v38, %s13432_s12  ;;  %v5731_v63 = vmax.f32 %v5670_v40, 0.0  ;;  %v12944_v59 = vpack.c.bf16 %v11009_v21, %v11008_v15  ;;  %v11006_v40 = vld [vmem:[%s20649_s7 + $0x1b8] sm:$0xff] }
 0x485   :  { %v5793_v35 = vmul.f32 %v18655_v29, %v5537_v13  ;;  %v4575_v47 = vpop.permute.xlu0 %4574  ;;  %v5732_v44 = vmax.f32 %v5671_v22, 0.0  ;;  %v11010_v22 = vld [vmem:[%s20649_s7 + $0x1d0] sm:$0xff]  ;;  %v11011_v62 = vld [vmem:[%s20649_s7 + $0x1d8] sm:$0xff] }
 0x486   :  { %v5853_v14 = vadd.f32 %v18662_v3, %v5792_v24  ;;  %v4577_v6 = vpop.permute.xlu1 %4576  ;;  %v4744_v39 = vadd.f32 %v4575_v47, %v21885_v36  ;;  %v12947_v36 = vpack.c.bf16 %v11011_v62, %v11010_v22 }
 0x487   :  { %v5854_v28 = vadd.f32 %v18662_v3, %v5793_v35  ;;  %5151 = vrot.lane.b32.xlu0 %v21941_v0, %s13432_s12  ;;  %v4745_v15 = vadd.f32 %v4577_v6, %v21891_v30 }
 0x488   :  { %v5914_v48 = vmax.f32 %v5853_v14, 0.0  ;;  %5153 = vrot.lane.b32.xlu1 %v21942_v51, %s13432_s12 }
 0x489   :  { %v5915_v60 = vmax.f32 %v5854_v28, 0.0  ;;  %v19100_v10 = vpop.f32.mrb[96].mxu1  ;;  %v5124_v13 = vpop.permute.xlu0 %5123 }
 0x48a   :  { %v5975_v24 = vmax.f32 %v5731_v63, %v5914_v48  ;;  %v12098_v35 = vpop.f32.mrb[97].mxu1  ;;  %v5126_v41 = vpop.permute.xlu1 %5125  ;;  %v12941_v48 = vpack.c.bf16 %v11006_v40, %v11005_v50  ;;  %v5293_v30 = vadd.f32 %v5124_v13, %v18229_v8 }
 0x48b   :  { %v5976_v14 = vmax.f32 %v5732_v44, %v5915_v60  ;;  %4907 = vrot.lane.b32.xlu0 %v21941_v0, %s13433_s21  ;;  %v5294_v50 = vadd.f32 %v5126_v41, %v18255_v55 }
 0x48c   :  { %v19117_v28 = vpop.f32.mrb[98].mxu0  ;;  %4909 = vrot.lane.b32.xlu1 %v21942_v51, %s13433_s21  ;;  %12265 = vmatmul.mubr.msk.f32.vlgmr.msra.gmra.mrb[132].mxu1 %vm6049_vm1, %v5975_v24 }
 0x48d   :  { %v11886_v21 = vpop.f32.mrb[99].mxu0  ;;  %12276 = vmatmul.mubr.msk.f32.vlgmr.msra.gmra.mrb[134].mxu0 %vm6049_vm1, %v5976_v14  ;;  %v4880_v63 = vpop.permute.xlu0 %4879  ;;  %12939 = vmatpush3.bf16.msra.mxu1 %v12938_v34 }
 0x48e   :  { %v5049_v44 = vadd.f32 %v4880_v63, %v4744_v39  ;;  %v4882_v60 = vpop.permute.xlu1 %4881  ;;  %12945 = vmatpush3.bf16.msra.mxu0 %v12944_v59  ;;  %12940 = vmatprep.subr.bf16.mxu1 %v21840_v54  ;;  %v11013_v63 = vld [vmem:[%s20649_s7 + $0x1e0] sm:$0xff] }
 0x48f   :  { %v5050_v47 = vadd.f32 %v4882_v60, %v4745_v15  ;;  %5396 = vrot.lane.b32.xlu0 %v21940_v38, %s13433_s21  ;;  %12946 = vmatprep.subr.bf16.mxu0 %v21840_v54 }
 0x490   :  { %v5605_v6 = vmul.f32 %v18655_v29, %v5049_v44  ;;  %5398 = vrot.lane.b32.xlu1 %v18587_v33, %s13433_s21  ;;  %12286 = vmatprep.mubr.msk.f32.mxu1 %vm13430_vm0, %v21563_v53 }
 0x491   :  { %v5606_v59 = vmul.f32 %v18655_v29, %v5050_v47  ;;  %v19136_v34 = vpop.f32.mrb[98].mxu1  ;;  %v5369_v24 = vpop.permute.xlu0 %5368  ;;  %12942 = vmatpush3.bf16.msra.mxu1 %v12941_v48  ;;  %12297 = vmatprep.mubr.msk.f32.mxu0 %vm13430_vm0, %v21563_v53  ;;  %v11014_v48 = vld [vmem:[%s20649_s7 + $0x1e8] sm:$0xff] }
 0x492   :  { %21943 = vst [vmem:[#allocation172_spill] sm:$0xff] %v19136_v34  ;;  %v5538_v8 = vadd.f32 %v5369_v24, %v5293_v30  ;;  %v12101_v13 = vpop.f32.mrb[99].mxu1  ;;  %v5371_v35 = vpop.permute.xlu1 %5370  ;;  %12948 = vmatpush3.bf16.msra.mxu0 %v12947_v36  ;;  %12949 = vmatprep.subr.bf16.mxu1 %v21840_v54  ;;  %v5672_v55 = vadd.f32 %v18662_v3, %v5605_v6  ;;  %v21944_v36 = vld [vmem:[#allocation220_spill] sm:$0xff] }
 0x493   :  { %v5539_v40 = vadd.f32 %v5371_v35, %v5294_v50  ;;  %4606 = vrot.lane.b32.xlu0 %v18587_v33, %s13432_s12  ;;  %12955 = vmatprep.subr.bf16.mxu0 %v21840_v54  ;;  %v5673_v14 = vadd.f32 %v18662_v3, %v5606_v59  ;;  %v11019_v47 = vld [vmem:[%s20649_s7 + $0x208] sm:$0xff]  ;;  %v21945_v50 = vld [vmem:[#allocation6_spill] sm:$0xff] }
 0x494   :  { %v5794_v41 = vmul.f32 %v18655_v29, %v5538_v8  ;;  %4608 = vrot.lane.b32.xlu1 %v18606_v57, %s13432_s12  ;;  %v5733_v30 = vmax.f32 %v5672_v55, 0.0  ;;  %v12950_v8 = vpack.c.bf16 %v11014_v48, %v11013_v63  ;;  %v11016_v55 = vld [vmem:[%s20649_s7 + $0x1f8] sm:$0xff] }
 0x495   :  { %v5795_v22 = vmul.f32 %v18655_v29, %v5539_v40  ;;  %v4579_v62 = vpop.permute.xlu0 %4578  ;;  %v19151_v15 = vpop.f32.mrb[100].mxu0  ;;  %v11018_v29 = vld [vmem:[%s20649_s7 + $0x200] sm:$0xff]  ;;  %v5734_v59 = vmax.f32 %v5673_v14, 0.0  ;;  %v11020_v14 = vld [vmem:[%s20649_s7 + $0x210] sm:$0xff]  ;;  %v11021_v63 = vld [vmem:[%s20649_s7 + $0x218] sm:$0xff] }
 0x496   :  { %v5855_v39 = vadd.f32 %v18662_v3, %v5794_v41  ;;  %v4581_v21 = vpop.permute.xlu1 %4580  ;;  %v11889_v60 = vpop.f32.mrb[101].mxu0  ;;  %v12956_v41 = vpack.c.bf16 %v11019_v47, %v11018_v29  ;;  %v4746_v48 = vadd.f32 %v4579_v62, %v21892_v7  ;;  %v12959_v7 = vpack.c.bf16 %v11021_v63, %v11020_v14 }
 0x497   :  { %v5856_v44 = vadd.f32 %v18662_v3, %v5795_v22  ;;  %5155 = vrot.lane.b32.xlu0 %v21944_v36, %s13432_s12  ;;  %v11015_v22 = vld [vmem:[%s20649_s7 + $0x1f0] sm:$0xff]  ;;  %v4747_v29 = vadd.f32 %v4581_v21, %v18001_v45  ;;  %v19204_v21 = vld [vmem:[%s20650_s5] ss:$0 sm:$0xff] }
 0x498   :  { %v5916_v6 = vmax.f32 %v5855_v39, 0.0  ;;  %5157 = vrot.lane.b32.xlu1 %v21945_v50, %s13432_s12 }
 0x499   :  { %v5917_v24 = vmax.f32 %v5856_v44, 0.0  ;;  %v5128_v3 = vpop.permute.xlu0 %5127  ;;  %v19170_v35 = vpop.f32.mrb[102].mxu0 }
 0x49a   :  { %v5977_v13 = vmax.f32 %v5733_v30, %v5916_v6  ;;  %21946 = vst [vmem:[#allocation232_spill] sm:$0xff] %v19170_v35  ;;  %v5130_v40 = vpop.permute.xlu1 %5129  ;;  %v11892_v60 = vpop.f32.mrb[103].mxu0  ;;  %v12953_v30 = vpack.c.bf16 %v11016_v55, %v11015_v22  ;;  %v5295_v45 = vadd.f32 %v5128_v3, %v18282_v32  ;;  %v11035_v35 = vld [vmem:[%s20649_s7 + $0x270] sm:$0xff] }
 0x49b   :  { %v5978_v39 = vmax.f32 %v5734_v59, %v5917_v24  ;;  %v19178_v34 = vpop.f32.mrb[100].mxu1  ;;  %4911 = vrot.lane.b32.xlu0 %v21944_v36, %s13433_s21 }
 0x49c   :  { %v12104_v44 = vpop.f32.mrb[101].mxu1  ;;  %4913 = vrot.lane.b32.xlu1 %v21945_v50, %s13433_s21  ;;  %12287 = vmatmul.mubr.msk.f32.vlgmr.msra.gmra.mrb[134].mxu1 %vm6049_vm1, %v5977_v13  ;;  %v5296_v13 = vadd.f32 %v5130_v40, %v18304_v11  ;;  %v19222_v11 = vld [vmem:[%s20651_s6] ss:$0 sm:$0xff] }
 0x49d   :  { %12298 = vmatmul.mubr.msk.f32.vlgmr.msra.gmra.mrb[136].mxu0 %vm6049_vm1, %v5978_v39  ;;  %v4884_v47 = vpop.permute.xlu0 %4883  ;;  %12951 = vmatpush3.bf16.msra.mxu1 %v12950_v8  ;;  %v19194_v59 = vpop.f32.mrb[104].mxu0 }
 0x49e   :  { %v5051_v6 = vadd.f32 %v4884_v47, %v4746_v48  ;;  %21947 = vst [vmem:[#allocation187_spill] sm:$0xff] %v19194_v59  ;;  %v4886_v24 = vpop.permute.xlu1 %4885  ;;  %12957 = vmatpush3.bf16.msra.mxu0 %v12956_v41  ;;  %12952 = vmatprep.subr.bf16.mxu1 %v21840_v54  ;;  %v11895_v60 = vpop.f32.mrb[105].mxu0 }
 0x49f   :  { %v5052_v62 = vadd.f32 %v4886_v24, %v4747_v29  ;;  %5400 = vrot.lane.b32.xlu0 %v18606_v57, %s13433_s21  ;;  %12958 = vmatprep.subr.bf16.mxu0 %v21840_v54  ;;  %v11024_v24 = vld [vmem:[%s20649_s7 + $0x228] sm:$0xff] }
 0x4a0   :  { %v5607_v8 = vmul.f32 %v19204_v21, %v5051_v6  ;;  %5402 = vrot.lane.b32.xlu1 %v18623_v42, %s13433_s21  ;;  %12308 = vmatprep.mubr.msk.f32.mxu1 %vm13430_vm0, %v21563_v53  ;;  %v11023_v6 = vld [vmem:[%s20649_s7 + $0x220] sm:$0xff]  ;;  %v11029_v60 = vld [vmem:[%s20649_s7 + $0x248] sm:$0xff] }
 0x4a1   :  { %v5608_v41 = vmul.f32 %v19204_v21, %v5052_v62  ;;  %v5373_v22 = vpop.permute.xlu0 %5372  ;;  %12954 = vmatpush3.bf16.msra.mxu1 %v12953_v30  ;;  %12319 = vmatprep.mubr.msk.f32.mxu0 %vm13430_vm0, %v21563_v53  ;;  %v11028_v62 = vld [vmem:[%s20649_s7 + $0x240] sm:$0xff] }
 0x4a2   :  { %v5540_v32 = vadd.f32 %v5373_v22, %v5295_v45  ;;  %v5375_v3 = vpop.permute.xlu1 %5374  ;;  %12960 = vmatpush3.bf16.msra.mxu0 %v12959_v7  ;;  %12961 = vmatprep.subr.bf16.mxu1 %v21840_v54  ;;  %v5674_v40 = vadd.f32 %v19222_v11, %v5607_v8 }
 0x4a3   :  { %v5541_v55 = vadd.f32 %v5375_v3, %v5296_v13  ;;  %4610 = vrot.lane.b32.xlu0 %v18623_v42, %s13432_s12  ;;  %12967 = vmatprep.subr.bf16.mxu0 %v21840_v54  ;;  %v5675_v14 = vadd.f32 %v19222_v11, %v5608_v41 }
 0x4a4   :  { %v5796_v39 = vmul.f32 %v19204_v21, %v5540_v32  ;;  %4612 = vrot.lane.b32.xlu1 %v18634_v1, %s13432_s12  ;;  %v19230_v48 = vpop.f32.mrb[102].mxu1  ;;  %v5735_v45 = vmax.f32 %v5674_v40, 0.0  ;;  %v12962_v32 = vpack.c.bf16 %v11024_v24, %v11023_v6  ;;  %v21949_v6 = vld [vmem:[#allocation207_spill] sm:$0xff] }
 0x4a5   :  { %v5797_v63 = vmul.f32 %v19204_v21, %v5541_v55  ;;  %21948 = vst [vmem:[#allocation234_spill] sm:$0xff] %v19230_v48  ;;  %v4583_v44 = vpop.permute.xlu0 %4582  ;;  %v12107_v47 = vpop.f32.mrb[103].mxu1  ;;  %v5736_v13 = vmax.f32 %v5675_v14, 0.0  ;;  %v11030_v14 = vld [vmem:[%s20649_s7 + $0x250] sm:$0xff] }
 0x4a6   :  { %v5857_v29 = vadd.f32 %v19222_v11, %v5796_v39  ;;  %v4585_v30 = vpop.permute.xlu1 %4584  ;;  %v12968_v39 = vpack.c.bf16 %v11029_v60, %v11028_v62  ;;  %v11026_v47 = vld [vmem:[%s20649_s7 + $0x238] sm:$0xff]  ;;  %v4748_v24 = vadd.f32 %v4583_v44, %v21949_v6 }
 0x4a7   :  { %v5858_v7 = vadd.f32 %v19222_v11, %v5797_v63  ;;  %5159 = vrot.lane.b32.xlu0 %v18598_v18, %s13432_s12  ;;  %v11025_v63 = vld [vmem:[%s20649_s7 + $0x230] sm:$0xff]  ;;  %v4749_v62 = vadd.f32 %v4585_v30, %v21906_v17  ;;  %v21952_v17 = vld [vmem:[#allocation75_spill] sm:$0xff] }
 0x4a8   :  { %v5918_v8 = vmax.f32 %v5857_v29, 0.0  ;;  %5161 = vrot.lane.b32.xlu1 %v18617_v61, %s13432_s12  ;;  %v11031_v29 = vld [vmem:[%s20649_s7 + $0x258] sm:$0xff] }
 0x4a9   :  { %v5919_v41 = vmax.f32 %v5858_v7, 0.0  ;;  %v5132_v22 = vpop.permute.xlu0 %5131  ;;  %v12971_v44 = vpack.c.bf16 %v11031_v29, %v11030_v14 }
 0x4aa   :  { %v5979_v3 = vmax.f32 %v5735_v45, %v5918_v8  ;;  %v5134_v55 = vpop.permute.xlu1 %5133  ;;  %v12965_v8 = vpack.c.bf16 %v11026_v47, %v11025_v63  ;;  %v5297_v30 = vadd.f32 %v5132_v22, %v21952_v17  ;;  %v21953_v63 = vld [vmem:[#allocation216_spill] sm:$0xff] }
 0x4ab   :  { %v5980_v40 = vmax.f32 %v5736_v13, %v5919_v41  ;;  %4915 = vrot.lane.b32.xlu0 %v18598_v18, %s13433_s21  ;;  %v19265_v7 = vpop.f32.mrb[104].mxu1 }
 0x4ac   :  { %21950 = vst [vmem:[#allocation13_spill] sm:$0xff] %v19265_v7  ;;  %4917 = vrot.lane.b32.xlu1 %v18617_v61, %s13433_s21  ;;  %12309 = vmatmul.mubr.msk.f32.vlgmr.msra.gmra.mrb[136].mxu1 %vm6049_vm1, %v5979_v3  ;;  %v12110_v60 = vpop.f32.mrb[105].mxu1 }
 0x4ad   :  { %12320 = vmatmul.mubr.msk.f32.vlgmr.msra.gmra.mrb[138].mxu0 %vm6049_vm1, %v5980_v40  ;;  %v4888_v45 = vpop.permute.xlu0 %4887  ;;  %12963 = vmatpush3.bf16.msra.mxu1 %v12962_v32 }
 0x4ae   :  { %v5053_v13 = vadd.f32 %v4888_v45, %v4748_v24  ;;  %v4890_v41 = vpop.permute.xlu1 %4889  ;;  %12969 = vmatpush3.bf16.msra.mxu0 %v12968_v39  ;;  %12964 = vmatprep.subr.bf16.mxu1 %v21840_v54  ;;  %v19273_v7 = vpop.f32.mrb[106].mxu0  ;;  %v5298_v39 = vadd.f32 %v5134_v55, %v18363_v52  ;;  %v21954_v24 = vld [vmem:[#allocation7_spill] sm:$0xff] }
 0x4af   :  { %v5054_v6 = vadd.f32 %v4890_v41, %v4749_v62  ;;  %21951 = vst [vmem:[#allocation219_spill] sm:$0xff] %v19273_v7  ;;  %5404 = vrot.lane.b32.xlu0 %v18634_v1, %s13433_s21  ;;  %12970 = vmatprep.subr.bf16.mxu0 %v21840_v54  ;;  %v11898_v32 = vpop.f32.mrb[107].mxu0 }
 0x4b0   :  { %v5609_v3 = vmul.f32 %v19204_v21, %v5053_v13  ;;  %5406 = vrot.lane.b32.xlu1 %v21953_v63, %s13433_s21  ;;  %12330 = vmatprep.mubr.msk.f32.mxu1 %vm13430_vm0, %v21563_v53  ;;  %v11038_v32 = vld [vmem:[%s20649_s7 + $0x280] sm:$0xff] }
 0x4b1   :  { %v5610_v47 = vmul.f32 %v19204_v21, %v5054_v6  ;;  %v5377_v40 = vpop.permute.xlu0 %5376  ;;  %12966 = vmatpush3.bf16.msra.mxu1 %v12965_v8  ;;  %12341 = vmatprep.mubr.msk.f32.mxu0 %vm13430_vm0, %v21563_v53  ;;  %v11034_v6 = vld [vmem:[%s20649_s7 + $0x268] sm:$0xff] }
 0x4b2   :  { %v5542_v14 = vadd.f32 %v5377_v40, %v5297_v30  ;;  %v5379_v22 = vpop.permute.xlu1 %5378  ;;  %12972 = vmatpush3.bf16.msra.mxu0 %v12971_v44  ;;  %12973 = vmatprep.subr.bf16.mxu1 %v21840_v54  ;;  %v5676_v52 = vadd.f32 %v19222_v11, %v5609_v3  ;;  %v11033_v44 = vld [vmem:[%s20649_s7 + $0x260] sm:$0xff] }
 0x4b3   :  { %v5543_v29 = vadd.f32 %v5379_v22, %v5298_v39  ;;  %4614 = vrot.lane.b32.xlu0 %v21953_v63, %s13432_s12  ;;  %12979 = vmatprep.subr.bf16.mxu0 %v21840_v54  ;;  %v5677_v62 = vadd.f32 %v19222_v11, %v5610_v47  ;;  %v21956_v3 = vld [vmem:[#allocation63_spill] sm:$0xff] }
 0x4b4   :  { %v5798_v55 = vmul.f32 %v19204_v21, %v5542_v14  ;;  %4616 = vrot.lane.b32.xlu1 %v21954_v24, %s13432_s12  ;;  %v11039_v39 = vld [vmem:[%s20649_s7 + $0x288] sm:$0xff]  ;;  %v5737_v47 = vmax.f32 %v5676_v52, 0.0  ;;  %v11036_v52 = vld [vmem:[%s20649_s7 + $0x278] sm:$0xff] }
 0x4b5   :  { %v5799_v60 = vmul.f32 %v19204_v21, %v5543_v29  ;;  %v4587_v45 = vpop.permute.xlu0 %4586  ;;  %v19299_v13 = vpop.f32.mrb[106].mxu1  ;;  %v21957_v14 = vld [vmem:[#allocation124_spill] sm:$0xff]  ;;  %v5738_v22 = vmax.f32 %v5677_v62, 0.0  ;;  %v12980_v59 = vpack.c.bf16 %v11039_v39, %v11038_v32  ;;  %v12977_v32 = vpack.c.bf16 %v11036_v52, %v11035_v35 }
 0x4b6   :  { %v5859_v8 = vadd.f32 %v19222_v11, %v5798_v55  ;;  %21955 = vst [vmem:[#allocation131_spill] sm:$0xff] %v19299_v13  ;;  %v4589_v41 = vpop.permute.xlu1 %4588  ;;  %v12113_v30 = vpop.f32.mrb[107].mxu1  ;;  %v11040_v62 = vld [vmem:[%s20649_s7 + $0x290] sm:$0xff] }
 0x4b7   :  { %v5860_v17 = vadd.f32 %v19222_v11, %v5799_v60  ;;  %5163 = vrot.lane.b32.xlu0 %v21956_v3, %s13432_s12  ;;  %v12974_v30 = vpack.c.bf16 %v11034_v6, %v11033_v44  ;;  %v4750_v44 = vadd.f32 %v4587_v45, %v21907_v19  ;;  %v4751_v6 = vadd.f32 %v4589_v41, %v21918_v27  ;;  %v21960_v27 = vld [vmem:[#allocation33_spill] sm:$0xff]  ;;  %v21961_v35 = vld [vmem:[#allocation224_spill] sm:$0xff] }
 0x4b8   :  { %v5920_v40 = vmax.f32 %v5859_v8, 0.0  ;;  %5165 = vrot.lane.b32.xlu1 %v21957_v14, %s13432_s12  ;;  %v19318_v55 = vpop.f32.mrb[108].mxu0 }
 0x4b9   :  { %v5921_v29 = vmax.f32 %v5860_v17, 0.0  ;;  %21958 = vst [vmem:[#allocation129_spill] sm:$0xff] %v19318_v55  ;;  %v5136_v60 = vpop.permute.xlu0 %5135  ;;  %v11901_v7 = vpop.f32.mrb[109].mxu0 }
 0x4ba   :  { %v5981_v13 = vmax.f32 %v5737_v47, %v5920_v40  ;;  %v5138_v48 = vpop.permute.xlu1 %5137  ;;  %v11041_v7 = vld [vmem:[%s20649_s7 + $0x298] sm:$0xff] }
 0x4bb   :  { %v5982_v8 = vmax.f32 %v5738_v22, %v5921_v29  ;;  %4919 = vrot.lane.b32.xlu0 %v21956_v3, %s13433_s21  ;;  %v12983_v19 = vpack.c.bf16 %v11041_v7, %v11040_v62 }
 0x4bc   :  { %4921 = vrot.lane.b32.xlu1 %v21957_v14, %s13433_s21  ;;  %12331 = vmatmul.mubr.msk.f32.vlgmr.msra.gmra.mrb[138].mxu1 %vm6049_vm1, %v5981_v13  ;;  %v5299_v13 = vadd.f32 %v5136_v60, %v21960_v27  ;;  %v11045_v14 = vld [vmem:[%s20649_s7 + $0x2b0] sm:$0xff] }
 0x4bd   :  { %12342 = vmatmul.mubr.msk.f32.vlgmr.msra.gmra.mrb[140].mxu0 %vm6049_vm1, %v5982_v8  ;;  %v4892_v17 = vpop.permute.xlu0 %4891  ;;  %12975 = vmatpush3.bf16.msra.mxu1 %v12974_v30  ;;  %v19340_v47 = vpop.f32.mrb[108].mxu1 }
 0x4be   :  { %v5055_v39 = vadd.f32 %v4892_v17, %v4750_v44  ;;  %21959 = vst [vmem:[#allocation89_spill] sm:$0xff] %v19340_v47  ;;  %v4894_v40 = vpop.permute.xlu1 %4893  ;;  %12981 = vmatpush3.bf16.msra.mxu0 %v12980_v59  ;;  %12976 = vmatprep.subr.bf16.mxu1 %v21840_v54  ;;  %v12116_v22 = vpop.f32.mrb[109].mxu1  ;;  %v5300_v59 = vadd.f32 %v5138_v48, %v18404_v49  ;;  %v21963_v44 = vld [vmem:[#allocation125_spill] sm:$0xff] }
 0x4bf   :  { %v5056_v45 = vadd.f32 %v4894_v40, %v4751_v6  ;;  %5408 = vrot.lane.b32.xlu0 %v21954_v24, %s13433_s21  ;;  %12982 = vmatprep.subr.bf16.mxu0 %v21840_v54 }
 0x4c0   :  { %v5611_v41 = vmul.f32 %v19204_v21, %v5055_v39  ;;  %5410 = vrot.lane.b32.xlu1 %v21961_v35, %s13433_s21  ;;  %12352 = vmatprep.mubr.msk.f32.mxu1 %vm13430_vm0, %v21563_v53 }
 0x4c1   :  { %v5612_v29 = vmul.f32 %v19204_v21, %v5056_v45  ;;  %v5381_v30 = vpop.permute.xlu0 %5380  ;;  %12978 = vmatpush3.bf16.msra.mxu1 %v12977_v32  ;;  %12363 = vmatprep.mubr.msk.f32.mxu0 %vm13430_vm0, %v21563_v53  ;;  %v11044_v45 = vld [vmem:[%s20649_s7 + $0x2a8] sm:$0xff] }
 0x4c2   :  { %v5544_v52 = vadd.f32 %v5381_v30, %v5299_v13  ;;  %v5383_v8 = vpop.permute.xlu1 %5382  ;;  %12984 = vmatpush3.bf16.msra.mxu0 %v12983_v19  ;;  %12985 = vmatprep.subr.bf16.mxu1 %v21840_v54  ;;  %v19357_v62 = vpop.f32.mrb[110].mxu0  ;;  %v5678_v49 = vadd.f32 %v19222_v11, %v5611_v41  ;;  %v11043_v19 = vld [vmem:[%s20649_s7 + $0x2a0] sm:$0xff]  ;;  %v21965_v13 = vld [vmem:[#allocation165_spill] sm:$0xff] }
 0x4c3   :  { %v5545_v60 = vadd.f32 %v5383_v8, %v5300_v59  ;;  %21962 = vst [vmem:[#allocation174_spill] sm:$0xff] %v19357_v62  ;;  %4618 = vrot.lane.b32.xlu0 %v21961_v35, %s13432_s12  ;;  %12991 = vmatprep.subr.bf16.mxu0 %v21840_v54  ;;  %v11904_v7 = vpop.f32.mrb[111].mxu0  ;;  %v5679_v6 = vadd.f32 %v19222_v11, %v5612_v29  ;;  %v11048_v41 = vld [vmem:[%s20649_s7 + $0x2c0] sm:$0xff]  ;;  %v11049_v59 = vld [vmem:[%s20649_s7 + $0x2c8] sm:$0xff] }
 0x4c4   :  { %v5800_v48 = vmul.f32 %v19204_v21, %v5544_v52  ;;  %4620 = vrot.lane.b32.xlu1 %v21963_v44, %s13432_s12  ;;  %v5739_v29 = vmax.f32 %v5678_v49, 0.0  ;;  %v12986_v62 = vpack.c.bf16 %v11044_v45, %v11043_v19  ;;  %v12992_v35 = vpack.c.bf16 %v11049_v59, %v11048_v41  ;;  %v11046_v49 = vld [vmem:[%s20649_s7 + $0x2b8] sm:$0xff] }
 0x4c5   :  { %v5801_v17 = vmul.f32 %v19204_v21, %v5545_v60  ;;  %v4591_v32 = vpop.permute.xlu0 %4590  ;;  %v21967_v60 = vld [vmem:[#allocation8_spill] sm:$0xff]  ;;  %v11051_v19 = vld [vmem:[%s20649_s7 + $0x2d8] sm:$0xff] }
 0x4c6   :  { %v5861_v39 = vadd.f32 %v19222_v11, %v5800_v48  ;;  %v4593_v40 = vpop.permute.xlu1 %4592  ;;  %v19376_v27 = vpop.f32.mrb[112].mxu0  ;;  %v5740_v48 = vmax.f32 %v5679_v6, 0.0  ;;  %v11050_v6 = vld [vmem:[%s20649_s7 + $0x2d0] sm:$0xff]  ;;  %v4752_v45 = vadd.f32 %v4591_v32, %v21919_v4 }
 0x4c7   :  { %v5862_v22 = vadd.f32 %v19222_v11, %v5801_v17  ;;  %21964 = vst [vmem:[#allocation223_spill] sm:$0xff] %v19376_v27  ;;  %5167 = vrot.lane.b32.xlu0 %v21965_v13, %s13432_s12  ;;  %v11907_v52 = vpop.f32.mrb[113].mxu0  ;;  %v19386_v8 = vpop.f32.mrb[110].mxu1  ;;  %v21969_v41 = vld [vmem:[#allocation121_spill] sm:$0xff] }
 0x4c8   :  { %v5922_v30 = vmax.f32 %v5861_v39, 0.0  ;;  %21966 = vst [vmem:[#allocation133_spill] sm:$0xff] %v19386_v8  ;;  %5169 = vrot.lane.b32.xlu1 %v21967_v60, %s13432_s12  ;;  %v12119_v17 = vpop.f32.mrb[111].mxu1  ;;  %v4753_v59 = vadd.f32 %v4593_v40, %v21969_v41 }
 0x4c9   :  { %v5923_v7 = vmax.f32 %v5862_v22, 0.0  ;;  %v5140_v27 = vpop.permute.xlu0 %5139  ;;  %v12995_v17 = vpack.c.bf16 %v11051_v19, %v11050_v6 }
 0x4ca   :  { %v5983_v47 = vmax.f32 %v5739_v29, %v5922_v30  ;;  %v5142_v55 = vpop.permute.xlu1 %5141  ;;  %v19396_v52 = vpop.f32.mrb[114].mxu0  ;;  %v12989_v30 = vpack.c.bf16 %v11046_v49, %v11045_v14 }
 0x4cb   :  { %v5984_v39 = vmax.f32 %v5740_v48, %v5923_v7  ;;  %21968 = vst [vmem:[#allocation225_spill] sm:$0xff] %v19396_v52  ;;  %4923 = vrot.lane.b32.xlu0 %v21965_v13, %s13433_s21  ;;  %v11910_v22 = vpop.f32.mrb[115].mxu0  ;;  %v5302_v14 = vadd.f32 %v5142_v55, %v18449_v46 }
 0x4cc   :  { %4925 = vrot.lane.b32.xlu1 %v21967_v60, %s13433_s21  ;;  %12353 = vmatmul.mubr.msk.f32.vlgmr.msra.gmra.mrb[140].mxu1 %vm6049_vm1, %v5983_v47  ;;  %v21970_v47 = vld [vmem:[#allocation5_spill] sm:$0xff]  ;;  %v21973_v22 = vld [vmem:[#allocation116_spill] sm:$0xff] }
 0x4cd   :  { %12364 = vmatmul.mubr.msk.f32.vlgmr.msra.gmra.mrb[142].mxu0 %vm6049_vm1, %v5984_v39  ;;  %v4896_v29 = vpop.permute.xlu0 %4895  ;;  %12987 = vmatpush3.bf16.msra.mxu1 %v12986_v62  ;;  %v5301_v32 = vadd.f32 %v5140_v27, %v21970_v47  ;;  %v21971_v39 = vld [vmem:[#allocation184_spill] sm:$0xff]  ;;  %v21974_v47 = vld [vmem:[#allocation226_spill] sm:$0xff] }
 0x4ce   :  { %v5057_v48 = vadd.f32 %v4896_v29, %v4752_v45  ;;  %v4898_v7 = vpop.permute.xlu1 %4897  ;;  %12993 = vmatpush3.bf16.msra.mxu0 %v12992_v35  ;;  %12988 = vmatprep.subr.bf16.mxu1 %v21840_v54 }
 0x4cf   :  { %v5058_v4 = vadd.f32 %v4898_v7, %v4753_v59  ;;  %5412 = vrot.lane.b32.xlu0 %v21963_v44, %s13433_s21  ;;  %12994 = vmatprep.subr.bf16.mxu0 %v21840_v54  ;;  %v11053_v7 = vld [vmem:[%s20649_s7 + $0x2e0] sm:$0xff] }
 0x4d0   :  { %v5613_v40 = vmul.f32 %v19204_v21, %v5057_v48  ;;  %5414 = vrot.lane.b32.xlu1 %v21971_v39, %s13433_s21  ;;  %12374 = vmatprep.mubr.msk.f32.mxu1 %vm13430_vm0, %v21563_v53 }
 0x4d1   :  { %v5614_v35 = vmul.f32 %v19204_v21, %v5058_v4  ;;  %v5385_v62 = vpop.permute.xlu0 %5384  ;;  %12990 = vmatpush3.bf16.msra.mxu1 %v12989_v30  ;;  %12385 = vmatprep.mubr.msk.f32.mxu0 %vm13430_vm0, %v21563_v53  ;;  %v19426_v6 = vpop.f32.mrb[112].mxu1 }
 0x4d2   :  { %v5546_v49 = vadd.f32 %v5385_v62, %v5301_v32  ;;  %21972 = vst [vmem:[#allocation14_spill] sm:$0xff] %v19426_v6  ;;  %v5387_v27 = vpop.permute.xlu1 %5386  ;;  %12996 = vmatpush3.bf16.msra.mxu0 %v12995_v17  ;;  %12997 = vmatprep.subr.bf16.mxu1 %v21840_v54  ;;  %v12122_v45 = vpop.f32.mrb[113].mxu1  ;;  %v5680_v46 = vadd.f32 %v19222_v11, %v5613_v40  ;;  %v11054_v17 = vld [vmem:[%s20649_s7 + $0x2e8] sm:$0xff]  ;;  %v11058_v32 = vld [vmem:[%s20649_s7 + $0x300] sm:$0xff] }
 0x4d3   :  { %v5547_v19 = vadd.f32 %v5387_v27, %v5302_v14  ;;  %4622 = vrot.lane.b32.xlu0 %v21971_v39, %s13432_s12  ;;  %13003 = vmatprep.subr.bf16.mxu0 %v21840_v54  ;;  %v5681_v41 = vadd.f32 %v19222_v11, %v5614_v35  ;;  %v11059_v40 = vld [vmem:[%s20649_s7 + $0x308] sm:$0xff]  ;;  %v21975_v62 = vld [vmem:[#allocation66_spill] sm:$0xff]  ;;  %v11055_v39 = vld [vmem:[%s20649_s7 + $0x2f0] sm:$0xff] }
 0x4d4   :  { %v5802_v55 = vmul.f32 %v19204_v21, %v5546_v49  ;;  %4624 = vrot.lane.b32.xlu1 %v21973_v22, %s13432_s12  ;;  %v5741_v14 = vmax.f32 %v5680_v46, 0.0  ;;  %v13004_v8 = vpack.c.bf16 %v11059_v40, %v11058_v32  ;;  %v11056_v46 = vld [vmem:[%s20649_s7 + $0x2f8] sm:$0xff] }
 0x4d5   :  { %v5803_v59 = vmul.f32 %v19204_v21, %v5547_v19  ;;  %v4595_v29 = vpop.permute.xlu0 %4594  ;;  %v5742_v49 = vmax.f32 %v5681_v41, 0.0  ;;  %v11060_v41 = vld [vmem:[%s20649_s7 + $0x310] sm:$0xff] }
 0x4d6   :  { %v5863_v30 = vadd.f32 %v19222_v11, %v5802_v55  ;;  %v4597_v48 = vpop.permute.xlu1 %4596  ;;  %v12998_v55 = vpack.c.bf16 %v11054_v17, %v11053_v7  ;;  %v4754_v7 = vadd.f32 %v4595_v29, %v21928_v43 }
 0x4d7   :  { %v5864_v4 = vadd.f32 %v19222_v11, %v5803_v59  ;;  %5171 = vrot.lane.b32.xlu0 %v21974_v47, %s13432_s12 }
 0x4d8   :  { %v5924_v35 = vmax.f32 %v5863_v30, 0.0  ;;  %5173 = vrot.lane.b32.xlu1 %v21975_v62, %s13432_s12  ;;  %v19456_v19 = vpop.f32.mrb[114].mxu1 }
 0x4d9   :  { %v5925_v27 = vmax.f32 %v5864_v4, 0.0  ;;  %21976 = vst [vmem:[#allocation139_spill] sm:$0xff] %v19456_v19  ;;  %v5144_v45 = vpop.permute.xlu0 %5143  ;;  %v12125_v52 = vpop.f32.mrb[115].mxu1  ;;  %v4755_v4 = vadd.f32 %v4597_v48, %v21933_v12  ;;  %v11066_v19 = vld [vmem:[%s20649_s7 + $0x338] sm:$0xff] }
 0x4da   :  { %v5985_v59 = vmax.f32 %v5741_v14, %v5924_v35  ;;  %v5146_v6 = vpop.permute.xlu1 %5145  ;;  %v11061_v52 = vld [vmem:[%s20649_s7 + $0x318] sm:$0xff]  ;;  %v13001_v14 = vpack.c.bf16 %v11056_v46, %v11055_v39  ;;  %v5303_v12 = vadd.f32 %v5144_v45, %v18465_v16 }
 0x4db   :  { %v5986_v30 = vmax.f32 %v5742_v49, %v5925_v27  ;;  %4927 = vrot.lane.b32.xlu0 %v21974_v47, %s13433_s21  ;;  %v19473_v17 = vpop.f32.mrb[116].mxu0  ;;  %v13007_v43 = vpack.c.bf16 %v11061_v52, %v11060_v41  ;;  %v21977_v27 = vld [vmem:[#allocation218_spill] sm:$0xff]  ;;  %v21979_v41 = vld [vmem:[#allocation40_spill] sm:$0xff] }
 0x4dc   :  { %4929 = vrot.lane.b32.xlu1 %v21975_v62, %s13433_s21  ;;  %12375 = vmatmul.mubr.msk.f32.vlgmr.msra.gmra.mrb[142].mxu1 %vm6049_vm1, %v5985_v59  ;;  %v11913_v32 = vpop.f32.mrb[117].mxu0 }
 0x4dd   :  { %12386 = vmatmul.mubr.msk.f32.vlgmr.msra.gmra.mrb[144].mxu0 %vm6049_vm1, %v5986_v30  ;;  %v4900_v40 = vpop.permute.xlu0 %4899  ;;  %12999 = vmatpush3.bf16.msra.mxu1 %v12998_v55 }
 0x4de   :  { %v5059_v35 = vadd.f32 %v4900_v40, %v4754_v7  ;;  %v4902_v49 = vpop.permute.xlu1 %4901  ;;  %13005 = vmatpush3.bf16.msra.mxu0 %v13004_v8  ;;  %13000 = vmatprep.subr.bf16.mxu1 %v21840_v54  ;;  %v5304_v8 = vadd.f32 %v5146_v6, %v18490_v26 }
 0x4df   :  { %v5060_v29 = vadd.f32 %v4902_v49, %v4755_v4  ;;  %5416 = vrot.lane.b32.xlu0 %v21973_v22, %s13433_s21  ;;  %13006 = vmatprep.subr.bf16.mxu0 %v21840_v54  ;;  %v11064_v49 = vld [vmem:[%s20649_s7 + $0x328] sm:$0xff] }
 0x4e0   :  { %v5615_v48 = vmul.f32 %v19204_v21, %v5059_v35  ;;  %5418 = vrot.lane.b32.xlu1 %v21977_v27, %s13433_s21  ;;  %12396 = vmatprep.mubr.msk.f32.mxu1 %vm13430_vm0, %v21563_v53  ;;  %v11063_v35 = vld [vmem:[%s20649_s7 + $0x320] sm:$0xff] }
 0x4e1   :  { %v5616_v39 = vmul.f32 %v19204_v21, %v5060_v29  ;;  %v5389_v55 = vpop.permute.xlu0 %5388  ;;  %13002 = vmatpush3.bf16.msra.mxu1 %v13001_v14  ;;  %12407 = vmatprep.mubr.msk.f32.mxu0 %vm13430_vm0, %v21563_v53 }
 0x4e2   :  { %v5548_v59 = vadd.f32 %v5389_v55, %v5303_v12  ;;  %v5391_v46 = vpop.permute.xlu1 %5390  ;;  %13008 = vmatpush3.bf16.msra.mxu0 %v13007_v43  ;;  %13009 = vmatprep.subr.bf16.mxu1 %v21840_v54  ;;  %v19495_v45 = vpop.f32.mrb[116].mxu1  ;;  %v5682_v26 = vadd.f32 %v19222_v11, %v5615_v48  ;;  %v21981_v12 = vld [vmem:[#allocation11_spill] sm:$0xff] }
 0x4e3   :  { %v5549_v16 = vadd.f32 %v5391_v46, %v5304_v8  ;;  %21978 = vst [vmem:[#allocation181_spill] sm:$0xff] %v19495_v45  ;;  %4626 = vrot.lane.b32.xlu0 %v21977_v27, %s13432_s12  ;;  %13015 = vmatprep.subr.bf16.mxu0 %v21840_v54  ;;  %v12128_v30 = vpop.f32.mrb[117].mxu1  ;;  %v5683_v52 = vadd.f32 %v19222_v11, %v5616_v39  ;;  %v11068_v48 = vld [vmem:[%s20649_s7 + $0x340] sm:$0xff]  ;;  %v11069_v8 = vld [vmem:[%s20649_s7 + $0x348] sm:$0xff]  ;;  %v11065_v45 = vld [vmem:[%s20649_s7 + $0x330] sm:$0xff] }
 0x4e4   :  { %v5804_v6 = vmul.f32 %v19204_v21, %v5548_v59  ;;  %4628 = vrot.lane.b32.xlu1 %v21979_v41, %s13432_s12  ;;  %v5743_v39 = vmax.f32 %v5682_v26, 0.0  ;;  %v21982_v59 = vld [vmem:[#allocation201_spill] sm:$0xff]  ;;  %v13010_v30 = vpack.c.bf16 %v11064_v49, %v11063_v35 }
 0x4e5   :  { %v5805_v7 = vmul.f32 %v19204_v21, %v5549_v16  ;;  %v4599_v4 = vpop.permute.xlu0 %4598  ;;  %v19507_v40 = vpop.f32.mrb[118].mxu0  ;;  %v5744_v46 = vmax.f32 %v5683_v52, 0.0  ;;  %v11070_v52 = vld [vmem:[%s20649_s7 + $0x350] sm:$0xff]  ;;  %v11071_v35 = vld [vmem:[%s20649_s7 + $0x358] sm:$0xff] }
 0x4e6   :  { %v5865_v32 = vadd.f32 %v19222_v11, %v5804_v6  ;;  %21980 = vst [vmem:[#allocation237_spill] sm:$0xff] %v19507_v40  ;;  %v4601_v14 = vpop.permute.xlu1 %4600  ;;  %v11916_v29 = vpop.f32.mrb[119].mxu0  ;;  %v13016_v40 = vpack.c.bf16 %v11069_v8, %v11068_v48  ;;  %v4756_v49 = vadd.f32 %v4599_v4, %v18385_v5 }
 0x4e7   :  { %v5866_v43 = vadd.f32 %v19222_v11, %v5805_v7  ;;  %5175 = vrot.lane.b32.xlu0 %v21981_v12, %s13432_s12  ;;  %v4757_v48 = vadd.f32 %v4601_v14, %v18416_v25 }
 0x4e8   :  { %v5926_v55 = vmax.f32 %v5865_v32, 0.0  ;;  %5177 = vrot.lane.b32.xlu1 %v21982_v59, %s13432_s12 }
 0x4e9   :  { %v5927_v16 = vmax.f32 %v5866_v43, 0.0  ;;  %v5148_v6 = vpop.permute.xlu0 %5147 }
 0x4ea   :  { %v5987_v7 = vmax.f32 %v5743_v39, %v5926_v55  ;;  %v5150_v29 = vpop.permute.xlu1 %5149  ;;  %v19532_v32 = vpop.f32.mrb[118].mxu1  ;;  %v13013_v39 = vpack.c.bf16 %v11066_v19, %v11065_v45  ;;  %v5305_v4 = vadd.f32 %v5148_v6, %v18504_v2  ;;  %v21985_v19 = vld [vmem:[#allocation185_spill] sm:$0xff] }
 0x4eb   :  { %v5988_v26 = vmax.f32 %v5744_v46, %v5927_v16  ;;  %21983 = vst [vmem:[#allocation235_spill] sm:$0xff] %v19532_v32  ;;  %4931 = vrot.lane.b32.xlu0 %v21981_v12, %s13433_s21  ;;  %v12131_v43 = vpop.f32.mrb[119].mxu1  ;;  %v13019_v16 = vpack.c.bf16 %v11071_v35, %v11070_v52  ;;  %v5306_v45 = vadd.f32 %v5150_v29, %v18528_v31  ;;  %v21986_v52 = vld [vmem:[#allocation229_spill] sm:$0xff] }
 0x4ec   :  { %4933 = vrot.lane.b32.xlu1 %v21982_v59, %s13433_s21  ;;  %12397 = vmatmul.mubr.msk.f32.vlgmr.msra.gmra.mrb[144].mxu1 %vm6049_vm1, %v5987_v7  ;;  %v11075_v32 = vld [vmem:[%s20649_s7 + $0x370] sm:$0xff] }
 0x4ed   :  { %12408 = vmatmul.mubr.msk.f32.vlgmr.msra.gmra.mrb[146].mxu0 %vm6049_vm1, %v5988_v26  ;;  %v4904_v8 = vpop.permute.xlu0 %4903  ;;  %13011 = vmatpush3.bf16.msra.mxu1 %v13010_v30 }
 0x4ee   :  { %v5061_v55 = vadd.f32 %v4904_v8, %v4756_v49  ;;  %v4906_v46 = vpop.permute.xlu1 %4905  ;;  %13017 = vmatpush3.bf16.msra.mxu0 %v13016_v40  ;;  %13012 = vmatprep.subr.bf16.mxu1 %v21840_v54 }
 0x4ef   :  { %v5062_v5 = vadd.f32 %v4906_v46, %v4757_v48  ;;  %5420 = vrot.lane.b32.xlu0 %v21979_v41, %s13433_s21  ;;  %13018 = vmatprep.subr.bf16.mxu0 %v21840_v54  ;;  %v19554_v14 = vpop.f32.mrb[120].mxu0  ;;  %v11073_v46 = vld [vmem:[%s20649_s7 + $0x360] sm:$0xff] }
 0x4f0   :  { %v5617_v25 = vmul.f32 %v19204_v21, %v5061_v55  ;;  %21984 = vst [vmem:[#allocation176_spill] sm:$0xff] %v19554_v14  ;;  %5422 = vrot.lane.b32.xlu1 %v21985_v19, %s13433_s21  ;;  %12418 = vmatprep.mubr.msk.f32.mxu1 %vm13430_vm0, %v21563_v53  ;;  %v11919_v30 = vpop.f32.mrb[121].mxu0  ;;  %v11076_v14 = vld [vmem:[%s20649_s7 + $0x378] sm:$0xff] }
 0x4f1   :  { %v5618_v40 = vmul.f32 %v19204_v21, %v5062_v5  ;;  %v5393_v7 = vpop.permute.xlu0 %5392  ;;  %13014 = vmatpush3.bf16.msra.mxu1 %v13013_v39  ;;  %12429 = vmatprep.mubr.msk.f32.mxu0 %vm13430_vm0, %v21563_v53 }
 0x4f2   :  { %v5550_v2 = vadd.f32 %v5393_v7, %v5305_v4  ;;  %v5395_v6 = vpop.permute.xlu1 %5394  ;;  %13020 = vmatpush3.bf16.msra.mxu0 %v13019_v16  ;;  %13021 = vmatprep.subr.bf16.mxu1 %v21840_v54  ;;  %v5684_v31 = vadd.f32 %v19222_v11, %v5617_v25  ;;  %v11074_v16 = vld [vmem:[%s20649_s7 + $0x368] sm:$0xff]  ;;  %v21988_v4 = vld [vmem:[#allocation126_spill] sm:$0xff] }
 0x4f3   :  { %v5551_v26 = vadd.f32 %v5395_v6, %v5306_v45  ;;  %4630 = vrot.lane.b32.xlu0 %v21985_v19, %s13432_s12  ;;  %13027 = vmatprep.subr.bf16.mxu0 %v21840_v54  ;;  %v5685_v35 = vadd.f32 %v19222_v11, %v5618_v40  ;;  %v11078_v25 = vld [vmem:[%s20649_s7 + $0x380] sm:$0xff]  ;;  %v11079_v45 = vld [vmem:[%s20649_s7 + $0x388] sm:$0xff] }
 0x4f4   :  { %v5806_v29 = vmul.f32 %v19204_v21, %v5550_v2  ;;  %4632 = vrot.lane.b32.xlu1 %v21986_v52, %s13432_s12  ;;  %v19574_v43 = vpop.f32.mrb[120].mxu1  ;;  %v5745_v40 = vmax.f32 %v5684_v31, 0.0  ;;  %v21989_v7 = vld [vmem:[#allocation170_spill] sm:$0xff] }
 0x4f5   :  { %v5807_v49 = vmul.f32 %v19204_v21, %v5551_v26  ;;  %21987 = vst [vmem:[#allocation69_spill] sm:$0xff] %v19574_v43  ;;  %v4603_v48 = vpop.permute.xlu0 %4602  ;;  %v12134_v39 = vpop.f32.mrb[121].mxu1  ;;  %v5746_v2 = vmax.f32 %v5685_v35, 0.0  ;;  %v13028_v43 = vpack.c.bf16 %v11079_v45, %v11078_v25  ;;  %v11080_v35 = vld [vmem:[%s20649_s7 + $0x390] sm:$0xff]  ;;  %v13025_v25 = vpack.c.bf16 %v11076_v14, %v11075_v32  ;;  %v21990_v32 = vld [vmem:[#allocation182_spill] sm:$0xff] }
 0x4f6   :  { %v5867_v8 = vadd.f32 %v19222_v11, %v5806_v29  ;;  %v4605_v55 = vpop.permute.xlu1 %4604  ;;  %v13022_v29 = vpack.c.bf16 %v11074_v16, %v11073_v46  ;;  %v4758_v46 = vadd.f32 %v4603_v48, %v21936_v37 }
 0x4f7   :  { %v5868_v5 = vadd.f32 %v19222_v11, %v5807_v49  ;;  %5179 = vrot.lane.b32.xlu0 %v21988_v4, %s13432_s12  ;;  %v4759_v16 = vadd.f32 %v4605_v55, %v21941_v0 }
 0x4f8   :  { %v5928_v30 = vmax.f32 %v5867_v8, 0.0  ;;  %5181 = vrot.lane.b32.xlu1 %v21989_v7, %s13432_s12  ;;  %v11081_v8 = vld [vmem:[%s20649_s7 + $0x398] sm:$0xff] }
 0x4f9   :  { %v5929_v6 = vmax.f32 %v5868_v5, 0.0  ;;  %v5152_v26 = vpop.permute.xlu0 %5151 }
 0x4fa   :  { %v5989_v49 = vmax.f32 %v5745_v40, %v5928_v30  ;;  %v5154_v39 = vpop.permute.xlu1 %5153  ;;  %v13031_v30 = vpack.c.bf16 %v11081_v8, %v11080_v35  ;;  %v5307_v37 = vadd.f32 %v5152_v26, %v18547_v58 }
 0x4fb   :  { %v5990_v31 = vmax.f32 %v5746_v2, %v5929_v6  ;;  %4935 = vrot.lane.b32.xlu0 %v21988_v4, %s13433_s21  ;;  %v5308_v14 = vadd.f32 %v5154_v39, %v21940_v38 }
 0x4fc   :  { %4937 = vrot.lane.b32.xlu1 %v21989_v7, %s13433_s21  ;;  %12419 = vmatmul.mubr.msk.f32.vlgmr.msra.gmra.mrb[146].mxu1 %vm6049_vm1, %v5989_v49 }
 0x4fd   :  { %12430 = vmatmul.mubr.msk.f32.vlgmr.msra.gmra.mrb[148].mxu0 %vm6049_vm1, %v5990_v31  ;;  %v4908_v5 = vpop.permute.xlu0 %4907  ;;  %13023 = vmatpush3.bf16.msra.mxu1 %v13022_v29 }
 0x4fe   :  { %v5063_v45 = vadd.f32 %v4908_v5, %v4758_v46  ;;  %v4910_v40 = vpop.permute.xlu1 %4909  ;;  %13029 = vmatpush3.bf16.msra.mxu0 %v13028_v43  ;;  %13024 = vmatprep.subr.bf16.mxu1 %v21840_v54  ;;  %v11084_v5 = vld [vmem:[%s20649_s7 + $0x3a8] sm:$0xff] }
 0x4ff   :  { %v5064_v2 = vadd.f32 %v4910_v40, %v4759_v16  ;;  %5424 = vrot.lane.b32.xlu0 %v21986_v52, %s13433_s21  ;;  %13030 = vmatprep.subr.bf16.mxu0 %v21840_v54  ;;  %v19620_v48 = vpop.f32.mrb[122].mxu0  ;;  %v11083_v16 = vld [vmem:[%s20649_s7 + $0x3a0] sm:$0xff] }
 0x500   :  { %v5619_v0 = vmul.f32 %v19204_v21, %v5063_v45  ;;  %5426 = vrot.lane.b32.xlu1 %v21990_v32, %s13433_s21  ;;  %12440 = vmatprep.mubr.msk.f32.mxu1 %vm13430_vm0, %v21563_v53  ;;  %v12145_v55 = vpop.f32.mrb[123].mxu0  ;;  %v21991_v45 = vld [vmem:[#allocation72_spill] sm:$0xff]  ;;  %v11088_v40 = vld [vmem:[%s20649_s7 + $0x3c0] sm:$0xff] }
 0x501   :  { %v5620_v43 = vmul.f32 %v19204_v21, %v5064_v2  ;;  %v5397_v6 = vpop.permute.xlu0 %5396  ;;  %13026 = vmatpush3.bf16.msra.mxu1 %v13025_v25  ;;  %12451 = vmatprep.mubr.msk.f32.mxu0 %vm13430_vm0, %v21563_v53 }
 0x502   :  { %v5552_v58 = vadd.f32 %v5397_v6, %v5307_v37  ;;  %v5399_v26 = vpop.permute.xlu1 %5398  ;;  %13032 = vmatpush3.bf16.msra.mxu0 %v13031_v30  ;;  %13033 = vmatprep.subr.bf16.mxu1 %v21840_v54  ;;  %v5686_v38 = vadd.f32 %v19222_v11, %v5619_v0  ;;  %v11089_v30 = vld [vmem:[%s20649_s7 + $0x3c8] sm:$0xff]  ;;  %v13034_v6 = vpack.c.bf16 %v11084_v5, %v11083_v16 }
 0x503   :  { %v5553_v29 = vadd.f32 %v5399_v26, %v5308_v14  ;;  %4634 = vrot.lane.b32.xlu0 %v21990_v32, %s13432_s12  ;;  %13039 = vmatprep.subr.bf16.mxu0 %v21840_v54  ;;  %v5687_v39 = vadd.f32 %v19222_v11, %v5620_v43  ;;  %v21992_v0 = vld [vmem:[#allocation71_spill] sm:$0xff] }
 0x504   :  { %v5808_v49 = vmul.f32 %v19204_v21, %v5552_v58  ;;  %4636 = vrot.lane.b32.xlu1 %v18916_v23, %s13432_s12  ;;  %v5747_v2 = vmax.f32 %v5686_v38, 0.0 }
 0x505   :  { %v5809_v31 = vmul.f32 %v19204_v21, %v5553_v29  ;;  %v4607_v35 = vpop.permute.xlu0 %4606  ;;  %v5748_v14 = vmax.f32 %v5687_v39, 0.0  ;;  %v13040_v29 = vpack.c.bf16 %v11089_v30, %v11088_v40  ;;  %v11090_v39 = vld [vmem:[%s20649_s7 + $0x3d0] sm:$0xff] }
 0x506   :  { %v5869_v8 = vadd.f32 %v19222_v11, %v5808_v49  ;;  %v4609_v46 = vpop.permute.xlu1 %4608  ;;  %v11085_v49 = vld [vmem:[%s20649_s7 + $0x3b0] sm:$0xff]  ;;  %v4760_v16 = vadd.f32 %v4607_v35, %v21942_v51 }
 0x507   :  { %v5870_v25 = vadd.f32 %v19222_v11, %v5809_v31  ;;  %5183 = vrot.lane.b32.xlu0 %v21991_v45, %s13432_s12  ;;  %v11086_v31 = vld [vmem:[%s20649_s7 + $0x3b8] sm:$0xff]  ;;  %v4761_v5 = vadd.f32 %v4609_v46, %v21944_v36 }
 0x508   :  { %v5930_v37 = vmax.f32 %v5869_v8, 0.0  ;;  %5185 = vrot.lane.b32.xlu1 %v21992_v0, %s13432_s12  ;;  %v11091_v8 = vld [vmem:[%s20649_s7 + $0x3d8] sm:$0xff]  ;;  %v13037_v40 = vpack.c.bf16 %v11086_v31, %v11085_v49 }
 0x509   :  { %v5931_v43 = vmax.f32 %v5870_v25, 0.0  ;;  %v5156_v55 = vpop.permute.xlu0 %5155 }
 0x50a   :  { %v5991_v58 = vmax.f32 %v5747_v2, %v5930_v37  ;;  %v5158_v26 = vpop.permute.xlu1 %5157  ;;  %v13043_v37 = vpack.c.bf16 %v11091_v8, %v11090_v39  ;;  %v5309_v36 = vadd.f32 %v5156_v55, %v18587_v33 }
 0x50b   :  { %v5992_v38 = vmax.f32 %v5748_v14, %v5931_v43  ;;  %4939 = vrot.lane.b32.xlu0 %v21991_v45, %s13433_s21 }
 0x50c   :  { %4941 = vrot.lane.b32.xlu1 %v21992_v0, %s13433_s21  ;;  %12441 = vmatmul.mubr.msk.f32.vlgmr.msra.gmra.mrb[148].mxu1 %vm6049_vm1, %v5991_v58  ;;  %v5310_v58 = vadd.f32 %v5158_v26, %v18606_v57 }
 0x50d   :  { %12452 = vmatmul.mubr.msk.f32.vlgmr.msra.gmra.mrb[150].mxu0 %vm6049_vm1, %v5992_v38  ;;  %v4912_v25 = vpop.permute.xlu0 %4911  ;;  %13035 = vmatpush3.bf16.msra.mxu1 %v13034_v6  ;;  %v21993_v38 = vld [vmem:[#allocation169_spill] sm:$0xff] }
 0x50e   :  { %v5065_v30 = vadd.f32 %v4912_v25, %v4760_v16  ;;  %v4914_v2 = vpop.permute.xlu1 %4913  ;;  %13041 = vmatpush3.bf16.msra.mxu0 %v13040_v29  ;;  %13036 = vmatprep.subr.bf16.mxu1 %v21840_v54 }
 0x50f   :  { %v5066_v14 = vadd.f32 %v4914_v2, %v4761_v5  ;;  %5428 = vrot.lane.b32.xlu0 %v18916_v23, %s13433_s21  ;;  %v6192_v51 = vpop.f32.mrb[122].mxu1  ;;  %13042 = vmatprep.subr.bf16.mxu0 %v21840_v54 }
 0x510   :  { %v5621_v35 = vmul.f32 %v19204_v21, %v5065_v30  ;;  %v19685_v46 = vadd.f32 %v6192_v51, %v19620_v48  ;;  %v19687_v43 = vpop.f32.mrb[124].mxu0  ;;  %5430 = vrot.lane.b32.xlu1 %v18962_v9, %s13433_s21  ;;  %v12156_v6 = vpop.f32.mrb[123].mxu1  ;;  %12462 = vmatprep.mubr.msk.f32.mxu1 %vm13430_vm0, %v21563_v53  ;;  %v11094_v30 = vld [vmem:[%s20649_s7 + $0x3e8] sm:$0xff] }
 0x511   :  { %v5622_v29 = vmul.f32 %v19204_v21, %v5066_v14  ;;  %v12167_v49 = vpop.f32.mrb[125].mxu0  ;;  %v5401_v33 = vpop.permute.xlu0 %5400  ;;  %13038 = vmatpush3.bf16.msra.mxu1 %v13037_v40  ;;  %12473 = vmatprep.mubr.msk.f32.mxu0 %vm13430_vm0, %v21563_v53  ;;  %v11093_v40 = vld [vmem:[%s20649_s7 + $0x3e0] sm:$0xff] }
 0x512   :  { %v5554_v48 = vadd.f32 %v5401_v33, %v5309_v36  ;;  %v5403_v55 = vpop.permute.xlu1 %5402  ;;  %13044 = vmatpush3.bf16.msra.mxu0 %v13043_v37  ;;  %13045 = vmatprep.subr.bf16.mxu1 %v21840_v54  ;;  %v5688_v57 = vadd.f32 %v19222_v11, %v5621_v35  ;;  %v11099_v37 = vld [vmem:[%s20649_s7 + $0x408] sm:$0xff]  ;;  %v11095_v33 = vld [vmem:[%s20649_s7 + $0x3f0] sm:$0xff] }
 0x513   :  { %v5555_v31 = vadd.f32 %v5403_v55, %v5310_v58  ;;  %4638 = vrot.lane.b32.xlu0 %v18962_v9, %s13432_s12  ;;  %13051 = vmatprep.subr.bf16.mxu0 %v21840_v54  ;;  %v5689_v39 = vadd.f32 %v19222_v11, %v5622_v29 }
 0x514   :  { %v5810_v26 = vmul.f32 %v19204_v21, %v5554_v48  ;;  %4640 = vrot.lane.b32.xlu1 %v21993_v38, %s13432_s12  ;;  %v5749_v14 = vmax.f32 %v5688_v57, 0.0  ;;  %v11096_v48 = vld [vmem:[%s20649_s7 + $0x3f8] sm:$0xff] }
 0x515   :  { %v5811_v8 = vmul.f32 %v19204_v21, %v5555_v31  ;;  %v4611_v16 = vpop.permute.xlu0 %4610  ;;  %v11098_v21 = vld [vmem:[%s20649_s7 + $0x400] sm:$0xff]  ;;  %v5750_v36 = vmax.f32 %v5689_v39, 0.0  ;;  %v11100_v31 = vld [vmem:[%s20649_s7 + $0x410] sm:$0xff]  ;;  %v11101_v57 = vld [vmem:[%s20649_s7 + $0x418] sm:$0xff]  ;;  %v16_v39 = vstv %s20652_s10 }
 0x516   :  { %v5871_v5 = vadd.f32 %v19222_v11, %v5810_v26  ;;  %v4613_v25 = vpop.permute.xlu1 %4612  ;;  %v13052_v49 = vpack.c.bf16 %v11099_v37, %v11098_v21  ;;  %v4762_v26 = vadd.f32 %v4611_v16, %v21945_v50  ;;  %17 = vst [vmem:[#allocation2] sm:$0x1] %v16_v39  ;;  %v13055_v50 = vpack.c.bf16 %v11101_v57, %v11100_v31 }
 0x517   :  { %v5872_v2 = vadd.f32 %v19222_v11, %v5811_v8  ;;  %5187 = vrot.lane.b32.xlu0 %v18986_v20, %s13432_s12  ;;  %v13046_v11 = vpack.c.bf16 %v11094_v30, %v11093_v40  ;;  %v4763_v8 = vadd.f32 %v4613_v25, %v18598_v18  ;;  %v13049_v40 = vpack.c.bf16 %v11096_v48, %v11095_v33  ;;  %v19756_v25 = vld [vmem:[%s20650_s5] ss:$0 sm:$0xff] }
 0x518   :  { %v5932_v51 = vmax.f32 %v5871_v5, 0.0  ;;  %5189 = vrot.lane.b32.xlu1 %v19030_v56, %s13432_s12 }
 0x519   :  { %v5933_v35 = vmax.f32 %v5872_v2, 0.0  ;;  %v5160_v6 = vpop.permute.xlu0 %5159 }
 0x51a   :  { %v5993_v58 = vmax.f32 %v5749_v14, %v5932_v51  ;;  %v5162_v29 = vpop.permute.xlu1 %5161  ;;  %v5311_v18 = vadd.f32 %v5160_v6, %v18623_v42 }
 0x51b   :  { %v5994_v55 = vmax.f32 %v5750_v36, %v5933_v35  ;;  %4943 = vrot.lane.b32.xlu0 %v18986_v20, %s13433_s21  ;;  %v21994_v36 = vld [vmem:[#allocation12_spill] sm:$0xff]  ;;  %v5312_v42 = vadd.f32 %v5162_v29, %v18634_v1  ;;  %v19779_v1 = vld [vmem:[%s20651_s6] ss:$0 sm:$0xff] }
 0x51c   :  { %4945 = vrot.lane.b32.xlu1 %v19030_v56, %s13433_s21  ;;  %12463 = vmatmul.mubr.msk.f32.vlgmr.msra.gmra.mrb[150].mxu1 %vm6049_vm1, %v5993_v58 }
 0x51d   :  { %12474 = vmatmul.mubr.msk.f32.vlgmr.msra.gmra.mrb[152].mxu0 %vm6049_vm1, %v5994_v55  ;;  %v4916_v5 = vpop.permute.xlu0 %4915  ;;  %13047 = vmatpush3.bf16.msra.mxu1 %v13046_v11  ;;  %v21995_v55 = vld [vmem:[#allocation222_spill] sm:$0xff] }
 0x51e   :  { %v5067_v30 = vadd.f32 %v4916_v5, %v4762_v26  ;;  %v4918_v2 = vpop.permute.xlu1 %4917  ;;  %13053 = vmatpush3.bf16.msra.mxu0 %v13052_v49  ;;  %13048 = vmatprep.subr.bf16.mxu1 %v21840_v54  ;;  %v11103_v5 = vld [vmem:[%s20649_s7 + $0x420] sm:$0xff] }
 0x51f   :  { %v5068_v16 = vadd.f32 %v4918_v2, %v4763_v8  ;;  %5432 = vrot.lane.b32.xlu0 %v21993_v38, %s13433_s21  ;;  %v6343_v21 = vpop.f32.mrb[124].mxu1  ;;  %13054 = vmatprep.subr.bf16.mxu0 %v21840_v54  ;;  %v21996_v2 = vld [vmem:[#allocation210_spill] sm:$0xff] }
 0x520   :  { %v5623_v37 = vmul.f32 %v19756_v25, %v5067_v30  ;;  %v19760_v14 = vadd.f32 %v6343_v21, %v19687_v43  ;;  %v19762_v51 = vpop.f32.mrb[126].mxu0  ;;  %5434 = vrot.lane.b32.xlu1 %v21994_v36, %s13433_s21  ;;  %v12178_v35 = vpop.f32.mrb[125].mxu1  ;;  %12484 = vmatprep.mubr.msk.f32.mxu1 %vm13430_vm0, %v21563_v53 }
 0x521   :  { %v5624_v6 = vmul.f32 %v19756_v25, %v5068_v16  ;;  %v12189_v11 = vpop.f32.mrb[127].mxu0  ;;  %v5405_v58 = vpop.permute.xlu0 %5404  ;;  %13050 = vmatpush3.bf16.msra.mxu1 %v13049_v40  ;;  %12495 = vmatprep.mubr.msk.f32.mxu0 %vm13430_vm0, %v21563_v53  ;;  %v11104_v40 = vld [vmem:[%s20649_s7 + $0x428] sm:$0xff] }
 0x522   :  { %v5556_v43 = vadd.f32 %v5405_v58, %v5311_v18  ;;  %v5407_v49 = vpop.permute.xlu1 %5406  ;;  %13056 = vmatpush3.bf16.msra.mxu0 %v13055_v50  ;;  %13057 = vmatprep.subr.bf16.mxu1 %v21840_v54  ;;  %v5690_v29 = vadd.f32 %v19779_v1, %v5623_v37  ;;  %v11108_v50 = vld [vmem:[%s20649_s7 + $0x440] sm:$0xff]  ;;  %v11109_v16 = vld [vmem:[%s20649_s7 + $0x448] sm:$0xff] }
 0x523   :  { %v5557_v33 = vadd.f32 %v5407_v49, %v5312_v42  ;;  %4642 = vrot.lane.b32.xlu0 %v21994_v36, %s13432_s12  ;;  %13063 = vmatprep.subr.bf16.mxu0 %v21840_v54  ;;  %v5691_v31 = vadd.f32 %v19779_v1, %v5624_v6  ;;  %v13058_v6 = vpack.c.bf16 %v11104_v40, %v11103_v5  ;;  %v11105_v49 = vld [vmem:[%s20649_s7 + $0x430] sm:$0xff] }
 0x524   :  { %v5812_v48 = vmul.f32 %v19756_v25, %v5556_v43  ;;  %4644 = vrot.lane.b32.xlu1 %v21995_v55, %s13432_s12  ;;  %v5751_v21 = vmax.f32 %v5690_v29, 0.0  ;;  %v13064_v43 = vpack.c.bf16 %v11109_v16, %v11108_v50 }
 0x525   :  { %v5813_v57 = vmul.f32 %v19756_v25, %v5557_v33  ;;  %v4615_v26 = vpop.permute.xlu0 %4614  ;;  %v5752_v37 = vmax.f32 %v5691_v31, 0.0  ;;  %v11106_v33 = vld [vmem:[%s20649_s7 + $0x438] sm:$0xff] }
 0x526   :  { %v5873_v39 = vadd.f32 %v19779_v1, %v5812_v48  ;;  %v4617_v8 = vpop.permute.xlu1 %4616  ;;  %v11110_v48 = vld [vmem:[%s20649_s7 + $0x450] sm:$0xff]  ;;  %v11111_v31 = vld [vmem:[%s20649_s7 + $0x458] sm:$0xff]  ;;  %v13061_v40 = vpack.c.bf16 %v11106_v33, %v11105_v49 }
 0x527   :  { %v5874_v30 = vadd.f32 %v19779_v1, %v5813_v57  ;;  %5191 = vrot.lane.b32.xlu0 %v21996_v2, %s13432_s12  ;;  %v4764_v57 = vadd.f32 %v4615_v26, %v18617_v61  ;;  %v13067_v16 = vpack.c.bf16 %v11111_v31, %v11110_v48 }
 0x528   :  { %v5934_v18 = vmax.f32 %v5873_v39, 0.0  ;;  %5193 = vrot.lane.b32.xlu1 %v19100_v10, %s13432_s12  ;;  %v4765_v39 = vadd.f32 %v4617_v8, %v21956_v3 }
 0x529   :  { %v5935_v35 = vmax.f32 %v5874_v30, 0.0  ;;  %v5164_v42 = vpop.permute.xlu0 %5163 }
 0x52a   :  { %v5995_v11 = vmax.f32 %v5751_v21, %v5934_v18  ;;  %v5166_v58 = vpop.permute.xlu1 %5165  ;;  %v5313_v3 = vadd.f32 %v5164_v42, %v21953_v63 }
 0x52b   :  { %v5996_v29 = vmax.f32 %v5752_v37, %v5935_v35  ;;  %4947 = vrot.lane.b32.xlu0 %v21996_v2, %s13433_s21  ;;  %v5314_v35 = vadd.f32 %v5166_v58, %v21954_v24 }
 0x52c   :  { %4949 = vrot.lane.b32.xlu1 %v19100_v10, %s13433_s21  ;;  %12485 = vmatmul.mubr.msk.f32.vlgmr.msra.gmra.mrb[152].mxu1 %vm6049_vm1, %v5995_v11 }
 0x52d   :  { %12496 = vmatmul.mubr.msk.f32.vlgmr.msra.gmra.mrb[154].mxu0 %vm6049_vm1, %v5996_v29  ;;  %v4920_v5 = vpop.permute.xlu0 %4919  ;;  %13059 = vmatpush3.bf16.msra.mxu1 %v13058_v6 }
 0x52e   :  { %v5069_v30 = vadd.f32 %v4920_v5, %v4764_v57  ;;  %v4922_v50 = vpop.permute.xlu1 %4921  ;;  %13065 = vmatpush3.bf16.msra.mxu0 %v13064_v43  ;;  %13060 = vmatprep.subr.bf16.mxu1 %v21840_v54  ;;  %v11113_v57 = vld [vmem:[%s20649_s7 + $0x460] sm:$0xff] }
 0x52f   :  { %v5070_v21 = vadd.f32 %v4922_v50, %v4765_v39  ;;  %5436 = vrot.lane.b32.xlu0 %v21995_v55, %s13433_s21  ;;  %v6494_v61 = vpop.f32.mrb[126].mxu1  ;;  %13066 = vmatprep.subr.bf16.mxu0 %v21840_v54  ;;  %v11114_v39 = vld [vmem:[%s20649_s7 + $0x468] sm:$0xff] }
 0x530   :  { %v5625_v26 = vmul.f32 %v19756_v25, %v5069_v30  ;;  %v19832_v8 = vadd.f32 %v6494_v61, %v19762_v51  ;;  %v19834_v18 = vpop.f32.mrb[128].mxu0  ;;  %5438 = vrot.lane.b32.xlu1 %v19117_v28, %s13433_s21  ;;  %v12200_v37 = vpop.f32.mrb[127].mxu1  ;;  %12506 = vmatprep.mubr.msk.f32.mxu1 %vm13430_vm0, %v21563_v53  ;;  %v11118_v30 = vld [vmem:[%s20649_s7 + $0x480] sm:$0xff]  ;;  %v11119_v50 = vld [vmem:[%s20649_s7 + $0x488] sm:$0xff] }
 0x531   :  { %v5626_v6 = vmul.f32 %v19756_v25, %v5070_v21  ;;  %v12211_v11 = vpop.f32.mrb[129].mxu0  ;;  %v5409_v63 = vpop.permute.xlu0 %5408  ;;  %13062 = vmatpush3.bf16.msra.mxu1 %v13061_v40  ;;  %12517 = vmatprep.mubr.msk.f32.mxu0 %vm13430_vm0, %v21563_v53  ;;  %v21997_v40 = vld [vmem:[#allocation172_spill] sm:$0xff]  ;;  %v13070_v37 = vpack.c.bf16 %v11114_v39, %v11113_v57 }
 0x532   :  { %v5558_v51 = vadd.f32 %v5409_v63, %v5313_v3  ;;  %v5411_v42 = vpop.permute.xlu1 %5410  ;;  %13068 = vmatpush3.bf16.msra.mxu0 %v13067_v16  ;;  %13069 = vmatprep.subr.bf16.mxu1 %v21840_v54  ;;  %v5692_v24 = vadd.f32 %v19779_v1, %v5625_v26  ;;  %v13076_v11 = vpack.c.bf16 %v11119_v50, %v11118_v30  ;;  %v11115_v63 = vld [vmem:[%s20649_s7 + $0x470] sm:$0xff] }
 0x533   :  { %v5559_v43 = vadd.f32 %v5411_v42, %v5314_v35  ;;  %4646 = vrot.lane.b32.xlu0 %v19117_v28, %s13432_s12  ;;  %13075 = vmatprep.subr.bf16.mxu0 %v21840_v54  ;;  %v5693_v49 = vadd.f32 %v19779_v1, %v5626_v6 }
 0x534   :  { %v5814_v58 = vmul.f32 %v19756_v25, %v5558_v51  ;;  %4648 = vrot.lane.b32.xlu1 %v19151_v15, %s13432_s12  ;;  %v5753_v16 = vmax.f32 %v5692_v24, 0.0  ;;  %v11116_v51 = vld [vmem:[%s20649_s7 + $0x478] sm:$0xff] }
 0x535   :  { %v5815_v33 = vmul.f32 %v19756_v25, %v5559_v43  ;;  %v4619_v29 = vpop.permute.xlu0 %4618  ;;  %v5754_v61 = vmax.f32 %v5693_v49, 0.0  ;;  %v11120_v43 = vld [vmem:[%s20649_s7 + $0x490] sm:$0xff]  ;;  %v11121_v24 = vld [vmem:[%s20649_s7 + $0x498] sm:$0xff]  ;;  %v13073_v57 = vpack.c.bf16 %v11116_v51, %v11115_v63 }
 0x536   :  { %v5875_v48 = vadd.f32 %v19779_v1, %v5814_v58  ;;  %v4621_v31 = vpop.permute.xlu1 %4620  ;;  %v21998_v58 = vld [vmem:[#allocation124_spill] sm:$0xff]  ;;  %v13079_v30 = vpack.c.bf16 %v11121_v24, %v11120_v43 }
 0x537   :  { %v5876_v5 = vadd.f32 %v19779_v1, %v5815_v33  ;;  %5195 = vrot.lane.b32.xlu0 %v21997_v40, %s13432_s12  ;;  %v4766_v49 = vadd.f32 %v4619_v29, %v21998_v58  ;;  %v4767_v33 = vadd.f32 %v4621_v31, %v21965_v13 }
 0x538   :  { %v5936_v21 = vmax.f32 %v5875_v48, 0.0  ;;  %5197 = vrot.lane.b32.xlu1 %v19178_v34, %s13432_s12 }
 0x539   :  { %v5937_v3 = vmax.f32 %v5876_v5, 0.0  ;;  %v5168_v26 = vpop.permute.xlu0 %5167 }
 0x53a   :  { %v5997_v35 = vmax.f32 %v5753_v16, %v5936_v21  ;;  %v5170_v6 = vpop.permute.xlu1 %5169  ;;  %v21999_v16 = vld [vmem:[#allocation224_spill] sm:$0xff] }
 0x53b   :  { %v5998_v42 = vmax.f32 %v5754_v61, %v5937_v3  ;;  %4951 = vrot.lane.b32.xlu0 %v21997_v40, %s13433_s21  ;;  %v5315_v13 = vadd.f32 %v5168_v26, %v21999_v16  ;;  %v22000_v3 = vld [vmem:[#allocation232_spill] sm:$0xff] }
 0x53c   :  { %4953 = vrot.lane.b32.xlu1 %v19178_v34, %s13433_s21  ;;  %12507 = vmatmul.mubr.msk.f32.vlgmr.msra.gmra.mrb[154].mxu1 %vm6049_vm1, %v5997_v35  ;;  %v5316_v35 = vadd.f32 %v5170_v6, %v21963_v44  ;;  %v22001_v6 = vld [vmem:[#allocation187_spill] sm:$0xff] }
 0x53d   :  { %12518 = vmatmul.mubr.msk.f32.vlgmr.msra.gmra.mrb[156].mxu0 %vm6049_vm1, %v5998_v42  ;;  %v4924_v48 = vpop.permute.xlu0 %4923  ;;  %13071 = vmatpush3.bf16.msra.mxu1 %v13070_v37 }
 0x53e   :  { %v5071_v39 = vadd.f32 %v4924_v48, %v4766_v49  ;;  %v4926_v5 = vpop.permute.xlu1 %4925  ;;  %13077 = vmatpush3.bf16.msra.mxu0 %v13076_v11  ;;  %13072 = vmatprep.subr.bf16.mxu1 %v21840_v54 }
 0x53f   :  { %v5072_v50 = vadd.f32 %v4926_v5, %v4767_v33  ;;  %5440 = vrot.lane.b32.xlu0 %v19151_v15, %s13433_s21  ;;  %v6645_v29 = vpop.f32.mrb[128].mxu1  ;;  %13078 = vmatprep.subr.bf16.mxu0 %v21840_v54 }
 0x540   :  { %v5627_v31 = vmul.f32 %v19756_v25, %v5071_v39  ;;  %v19899_v21 = vadd.f32 %v6645_v29, %v19834_v18  ;;  %v6723_v61 = vpop.f32.mrb[130].mxu0  ;;  %5442 = vrot.lane.b32.xlu1 %v22000_v3, %s13433_s21  ;;  %v12222_v37 = vpop.f32.mrb[129].mxu1  ;;  %12528 = vmatprep.mubr.msk.f32.mxu1 %vm13430_vm0, %v21563_v53  ;;  %v11124_v39 = vld [vmem:[%s20649_s7 + $0x4a8] sm:$0xff] }
 0x541   :  { %v5628_v11 = vmul.f32 %v19756_v25, %v5072_v50  ;;  %v19908_v63 = vadd.f32 %v6723_v61, %v19685_v46  ;;  %v12233_v26 = vpop.f32.mrb[131].mxu0  ;;  %v5413_v51 = vpop.permute.xlu0 %5412  ;;  %13074 = vmatpush3.bf16.msra.mxu1 %v13073_v57  ;;  %12539 = vmatprep.mubr.msk.f32.mxu0 %vm13430_vm0, %v21563_v53  ;;  %v11123_v57 = vld [vmem:[%s20649_s7 + $0x4a0] sm:$0xff]  ;;  %v11129_v29 = vld [vmem:[%s20649_s7 + $0x4c8] sm:$0xff] }
 0x542   :  { %v5560_v18 = vadd.f32 %v5413_v51, %v5315_v13  ;;  %v5415_v42 = vpop.permute.xlu1 %5414  ;;  %13080 = vmatpush3.bf16.msra.mxu0 %v13079_v30  ;;  %13081 = vmatprep.subr.bf16.mxu1 %v21840_v54  ;;  %v5694_v44 = vadd.f32 %v19779_v1, %v5627_v31  ;;  %v22002_v30 = vld [vmem:[#allocation234_spill] sm:$0xff]  ;;  %v22003_v31 = vld [vmem:[#allocation13_spill] sm:$0xff] }
 0x543   :  { %v5561_v43 = vadd.f32 %v5415_v42, %v5316_v35  ;;  %4650 = vrot.lane.b32.xlu0 %v22000_v3, %s13432_s12  ;;  %13087 = vmatprep.subr.bf16.mxu0 %v21840_v54  ;;  %v5695_v24 = vadd.f32 %v19779_v1, %v5628_v11  ;;  %v11128_v50 = vld [vmem:[%s20649_s7 + $0x4c0] sm:$0xff]  ;;  %v13082_v11 = vpack.c.bf16 %v11124_v39, %v11123_v57  ;;  %v11125_v42 = vld [vmem:[%s20649_s7 + $0x4b0] sm:$0xff] }
 0x544   :  { %v5816_v46 = vmul.f32 %v19756_v25, %v5560_v18  ;;  %4652 = vrot.lane.b32.xlu1 %v22001_v6, %s13432_s12  ;;  %v5755_v16 = vmax.f32 %v5694_v44, 0.0  ;;  %v13088_v18 = vpack.c.bf16 %v11129_v29, %v11128_v50 }
 0x545   :  { %v5817_v58 = vmul.f32 %v19756_v25, %v5561_v43  ;;  %v4623_v49 = vpop.permute.xlu0 %4622  ;;  %v5756_v61 = vmax.f32 %v5695_v24, 0.0  ;;  %v11126_v43 = vld [vmem:[%s20649_s7 + $0x4b8] sm:$0xff] }
 0x546   :  { %v5877_v33 = vadd.f32 %v19779_v1, %v5816_v46  ;;  %v4625_v48 = vpop.permute.xlu1 %4624  ;;  %v11130_v46 = vld [vmem:[%s20649_s7 + $0x4d0] sm:$0xff]  ;;  %v11131_v24 = vld [vmem:[%s20649_s7 + $0x4d8] sm:$0xff]  ;;  %v13085_v39 = vpack.c.bf16 %v11126_v43, %v11125_v42 }
 0x547   :  { %v5878_v5 = vadd.f32 %v19779_v1, %v5817_v58  ;;  %5199 = vrot.lane.b32.xlu0 %v22002_v30, %s13432_s12  ;;  %v4768_v58 = vadd.f32 %v4623_v49, %v21967_v60  ;;  %v13091_v29 = vpack.c.bf16 %v11131_v24, %v11130_v46  ;;  %v22004_v49 = vld [vmem:[#allocation184_spill] sm:$0xff] }
 0x548   :  { %v5938_v13 = vmax.f32 %v5877_v33, 0.0  ;;  %5201 = vrot.lane.b32.xlu1 %v22003_v31, %s13432_s12  ;;  %v4769_v33 = vadd.f32 %v4625_v48, %v21974_v47 }
 0x549   :  { %v5939_v37 = vmax.f32 %v5878_v5, 0.0  ;;  %v5172_v35 = vpop.permute.xlu0 %5171 }
 0x54a   :  { %v5999_v26 = vmax.f32 %v5755_v16, %v5938_v13  ;;  %v5174_v51 = vpop.permute.xlu1 %5173  ;;  %v5317_v47 = vadd.f32 %v5172_v35, %v22004_v49  ;;  %v11139_v49 = vld [vmem:[%s20649_s7 + $0x508] sm:$0xff] }
 0x54b   :  { %v6000_v44 = vmax.f32 %v5756_v61, %v5939_v37  ;;  %4955 = vrot.lane.b32.xlu0 %v22002_v30, %s13433_s21  ;;  %v22005_v37 = vld [vmem:[#allocation219_spill] sm:$0xff] }
 0x54c   :  { %4957 = vrot.lane.b32.xlu1 %v22003_v31, %s13433_s21  ;;  %12529 = vmatmul.mubr.msk.f32.vlgmr.msra.gmra.mrb[156].mxu1 %vm6049_vm1, %v5999_v26  ;;  %v5318_v26 = vadd.f32 %v5174_v51, %v21973_v22  ;;  %v22006_v51 = vld [vmem:[#allocation129_spill] sm:$0xff] }
 0x54d   :  { %12540 = vmatmul.mubr.msk.f32.vlgmr.msra.gmra.mrb[158].mxu0 %vm6049_vm1, %v6000_v44  ;;  %v4928_v57 = vpop.permute.xlu0 %4927  ;;  %13083 = vmatpush3.bf16.msra.mxu1 %v13082_v11 }
 0x54e   :  { %v5073_v5 = vadd.f32 %v4928_v57, %v4768_v58  ;;  %v4930_v50 = vpop.permute.xlu1 %4929  ;;  %13089 = vmatpush3.bf16.msra.mxu0 %v13088_v18  ;;  %13084 = vmatprep.subr.bf16.mxu1 %v21840_v54 }
 0x54f   :  { %v5074_v16 = vadd.f32 %v4930_v50, %v4769_v33  ;;  %5444 = vrot.lane.b32.xlu0 %v22001_v6, %s13433_s21  ;;  %v6802_v60 = vpop.f32.mrb[130].mxu1  ;;  %13090 = vmatprep.subr.bf16.mxu0 %v21840_v54  ;;  %v11134_v50 = vld [vmem:[%s20649_s7 + $0x4e8] sm:$0xff] }
 0x550   :  { %v5629_v48 = vmul.f32 %v19756_v25, %v5073_v5  ;;  %v19967_v13 = vadd.f32 %v6802_v60, %v19760_v14  ;;  %v6881_v61 = vpop.f32.mrb[132].mxu0  ;;  %5446 = vrot.lane.b32.xlu1 %v22005_v37, %s13433_s21  ;;  %v12244_v11 = vpop.f32.mrb[131].mxu1  ;;  %12550 = vmatprep.mubr.msk.f32.mxu1 %vm13430_vm0, %v21563_v53  ;;  %v11133_v5 = vld [vmem:[%s20649_s7 + $0x4e0] sm:$0xff] }
 0x551   :  { %v5630_v18 = vmul.f32 %v19756_v25, %v5074_v16  ;;  %v19976_v42 = vadd.f32 %v6881_v61, %v19832_v8  ;;  %v12255_v35 = vpop.f32.mrb[133].mxu0  ;;  %v5417_v43 = vpop.permute.xlu0 %5416  ;;  %13086 = vmatpush3.bf16.msra.mxu1 %v13085_v39  ;;  %12561 = vmatprep.mubr.msk.f32.mxu0 %vm13430_vm0, %v21563_v53  ;;  %v22007_v16 = vld [vmem:[#allocation131_spill] sm:$0xff]  ;;  %v22008_v61 = vld [vmem:[#allocation89_spill] sm:$0xff] }
 0x552   :  { %v5562_v14 = vadd.f32 %v5417_v43, %v5317_v47  ;;  %v5419_v44 = vpop.permute.xlu1 %5418  ;;  %13092 = vmatpush3.bf16.msra.mxu0 %v13091_v29  ;;  %13093 = vmatprep.subr.bf16.mxu1 %v21840_v54  ;;  %v5696_v22 = vadd.f32 %v19779_v1, %v5629_v48  ;;  %v11138_v60 = vld [vmem:[%s20649_s7 + $0x500] sm:$0xff]  ;;  %v13094_v35 = vpack.c.bf16 %v11134_v50, %v11133_v5 }
 0x553   :  { %v5563_v46 = vadd.f32 %v5419_v44, %v5318_v26  ;;  %4654 = vrot.lane.b32.xlu0 %v22005_v37, %s13432_s12  ;;  %13099 = vmatprep.subr.bf16.mxu0 %v21840_v54  ;;  %v5697_v24 = vadd.f32 %v19779_v1, %v5630_v18  ;;  %v13100_v44 = vpack.c.bf16 %v11139_v49, %v11138_v60 }
 0x554   :  { %v5818_v8 = vmul.f32 %v19756_v25, %v5562_v14  ;;  %4656 = vrot.lane.b32.xlu1 %v22006_v51, %s13432_s12  ;;  %v5757_v47 = vmax.f32 %v5696_v22, 0.0 }
 0x555   :  { %v5819_v58 = vmul.f32 %v19756_v25, %v5563_v46  ;;  %v4627_v33 = vpop.permute.xlu0 %4626  ;;  %v5758_v11 = vmax.f32 %v5697_v24, 0.0  ;;  %v11135_v46 = vld [vmem:[%s20649_s7 + $0x4f0] sm:$0xff] }
 0x556   :  { %v5879_v57 = vadd.f32 %v19779_v1, %v5818_v8  ;;  %v4629_v39 = vpop.permute.xlu1 %4628  ;;  %v11136_v8 = vld [vmem:[%s20649_s7 + $0x4f8] sm:$0xff]  ;;  %v11140_v24 = vld [vmem:[%s20649_s7 + $0x510] sm:$0xff] }
 0x557   :  { %v5880_v29 = vadd.f32 %v19779_v1, %v5819_v58  ;;  %5203 = vrot.lane.b32.xlu0 %v22007_v16, %s13432_s12  ;;  %v11141_v58 = vld [vmem:[%s20649_s7 + $0x518] sm:$0xff]  ;;  %v4771_v5 = vadd.f32 %v4629_v39, %v21981_v12 }
 0x558   :  { %v5940_v48 = vmax.f32 %v5879_v57, 0.0  ;;  %5205 = vrot.lane.b32.xlu1 %v22008_v61, %s13432_s12  ;;  %v4770_v57 = vadd.f32 %v4627_v33, %v21975_v62 }
 0x559   :  { %v5941_v26 = vmax.f32 %v5880_v29, 0.0  ;;  %v5176_v18 = vpop.permute.xlu0 %5175  ;;  %v13097_v29 = vpack.c.bf16 %v11136_v8, %v11135_v46 }
 0x55a   :  { %v6001_v43 = vmax.f32 %v5757_v47, %v5940_v48  ;;  %v5178_v14 = vpop.permute.xlu1 %5177  ;;  %v13103_v47 = vpack.c.bf16 %v11141_v58, %v11140_v24  ;;  %v5319_v12 = vadd.f32 %v5176_v18, %v21977_v27 }
 0x55b   :  { %v6002_v22 = vmax.f32 %v5758_v11, %v5941_v26  ;;  %4959 = vrot.lane.b32.xlu0 %v22007_v16, %s13433_s21  ;;  %v22009_v26 = vld [vmem:[#allocation174_spill] sm:$0xff] }
 0x55c   :  { %4961 = vrot.lane.b32.xlu1 %v22008_v61, %s13433_s21  ;;  %12551 = vmatmul.mubr.msk.f32.vlgmr.msra.gmra.mrb[158].mxu1 %vm6049_vm1, %v6001_v43  ;;  %v5320_v43 = vadd.f32 %v5178_v14, %v21979_v41  ;;  %v22010_v14 = vld [vmem:[#allocation223_spill] sm:$0xff] }
 0x55d   :  { %12562 = vmatmul.mubr.msk.f32.vlgmr.msra.gmra.mrb[160].mxu0 %vm6049_vm1, %v6002_v22  ;;  %v4932_v50 = vpop.permute.xlu0 %4931  ;;  %13095 = vmatpush3.bf16.msra.mxu1 %v13094_v35 }
 0x55e   :  { %v5075_v60 = vadd.f32 %v4932_v50, %v4770_v57  ;;  %v4934_v49 = vpop.permute.xlu1 %4933  ;;  %13101 = vmatpush3.bf16.msra.mxu0 %v13100_v44  ;;  %13096 = vmatprep.subr.bf16.mxu1 %v21840_v54 }
 0x55f   :  { %v5076_v48 = vadd.f32 %v4934_v49, %v4771_v5  ;;  %5448 = vrot.lane.b32.xlu0 %v22006_v51, %s13433_s21  ;;  %v6960_v62 = vpop.f32.mrb[132].mxu1  ;;  %13102 = vmatprep.subr.bf16.mxu0 %v21840_v54 }
 0x560   :  { %v5631_v33 = vmul.f32 %v19756_v25, %v5075_v60  ;;  %v20035_v39 = vadd.f32 %v6960_v62, %v19899_v21  ;;  %v7039_v11 = vpop.f32.mrb[134].mxu0  ;;  %5450 = vrot.lane.b32.xlu1 %v22009_v26, %s13433_s21  ;;  %v12266_v35 = vpop.f32.mrb[133].mxu1  ;;  %12572 = vmatprep.mubr.msk.f32.mxu1 %vm13430_vm0, %v21563_v53  ;;  %v11144_v60 = vld [vmem:[%s20649_s7 + $0x528] sm:$0xff] }
 0x561   :  { %v5632_v44 = vmul.f32 %v19756_v25, %v5076_v48  ;;  %v20044_v46 = vadd.f32 %v7039_v11, %v19908_v63  ;;  %v12277_v27 = vpop.f32.mrb[135].mxu0  ;;  %v5421_v18 = vpop.permute.xlu0 %5420  ;;  %13098 = vmatpush3.bf16.msra.mxu1 %v13097_v29  ;;  %12583 = vmatprep.mubr.msk.f32.mxu0 %vm13430_vm0, %v21563_v53  ;;  %v11143_v29 = vld [vmem:[%s20649_s7 + $0x520] sm:$0xff]  ;;  %v11149_v62 = vld [vmem:[%s20649_s7 + $0x548] sm:$0xff] }
 0x562   :  { %v5564_v21 = vadd.f32 %v5421_v18, %v5319_v12  ;;  %v5423_v8 = vpop.permute.xlu1 %5422  ;;  %13104 = vmatpush3.bf16.msra.mxu0 %v13103_v47  ;;  %13105 = vmatprep.subr.bf16.mxu1 %v21840_v54  ;;  %v5698_v41 = vadd.f32 %v19779_v1, %v5631_v33  ;;  %v22011_v47 = vld [vmem:[#allocation133_spill] sm:$0xff]  ;;  %v11148_v48 = vld [vmem:[%s20649_s7 + $0x540] sm:$0xff]  ;;  %v13106_v27 = vpack.c.bf16 %v11144_v60, %v11143_v29 }
 0x563   :  { %v5565_v22 = vadd.f32 %v5423_v8, %v5320_v43  ;;  %4658 = vrot.lane.b32.xlu0 %v22009_v26, %s13432_s12  ;;  %13111 = vmatprep.subr.bf16.mxu0 %v21840_v54  ;;  %v5699_v24 = vadd.f32 %v19779_v1, %v5632_v44  ;;  %v22012_v11 = vld [vmem:[#allocation14_spill] sm:$0xff]  ;;  %v13112_v8 = vpack.c.bf16 %v11149_v62, %v11148_v48 }
 0x564   :  { %v5820_v63 = vmul.f32 %v19756_v25, %v5564_v21  ;;  %4660 = vrot.lane.b32.xlu1 %v22010_v14, %s13432_s12  ;;  %v5759_v12 = vmax.f32 %v5698_v41, 0.0 }
 0x565   :  { %v5821_v58 = vmul.f32 %v19756_v25, %v5565_v22  ;;  %v4631_v57 = vpop.permute.xlu0 %4630  ;;  %v5760_v35 = vmax.f32 %v5699_v24, 0.0  ;;  %v11145_v22 = vld [vmem:[%s20649_s7 + $0x530] sm:$0xff] }
 0x566   :  { %v5881_v5 = vadd.f32 %v19779_v1, %v5820_v63  ;;  %v4633_v50 = vpop.permute.xlu1 %4632  ;;  %v11146_v63 = vld [vmem:[%s20649_s7 + $0x538] sm:$0xff]  ;;  %v11150_v24 = vld [vmem:[%s20649_s7 + $0x550] sm:$0xff] }
 0x567   :  { %v5882_v49 = vadd.f32 %v19779_v1, %v5821_v58  ;;  %5207 = vrot.lane.b32.xlu0 %v22011_v47, %s13432_s12  ;;  %v11151_v58 = vld [vmem:[%s20649_s7 + $0x558] sm:$0xff]  ;;  %v4773_v29 = vadd.f32 %v4633_v50, %v21988_v4 }
 0x568   :  { %v5942_v33 = vmax.f32 %v5881_v5, 0.0  ;;  %5209 = vrot.lane.b32.xlu1 %v22012_v11, %s13432_s12  ;;  %v4772_v5 = vadd.f32 %v4631_v57, %v21982_v59 }
 0x569   :  { %v5943_v43 = vmax.f32 %v5882_v49, 0.0  ;;  %v5180_v44 = vpop.permute.xlu0 %5179  ;;  %v13109_v49 = vpack.c.bf16 %v11146_v63, %v11145_v22 }
 0x56a   :  { %v6003_v18 = vmax.f32 %v5759_v12, %v5942_v33  ;;  %v5182_v21 = vpop.permute.xlu1 %5181  ;;  %v13115_v12 = vpack.c.bf16 %v11151_v58, %v11150_v24  ;;  %v5321_v4 = vadd.f32 %v5180_v44, %v21985_v19 }
 0x56b   :  { %v6004_v41 = vmax.f32 %v5760_v35, %v5943_v43  ;;  %4963 = vrot.lane.b32.xlu0 %v22011_v47, %s13433_s21  ;;  %v22013_v43 = vld [vmem:[#allocation225_spill] sm:$0xff] }
 0x56c   :  { %4965 = vrot.lane.b32.xlu1 %v22012_v11, %s13433_s21  ;;  %12573 = vmatmul.mubr.msk.f32.vlgmr.msra.gmra.mrb[160].mxu1 %vm6049_vm1, %v6003_v18  ;;  %v5322_v18 = vadd.f32 %v5182_v21, %v21986_v52 }
 0x56d   :  { %12584 = vmatmul.mubr.msk.f32.vlgmr.msra.gmra.mrb[162].mxu0 %vm6049_vm1, %v6004_v41  ;;  %v4936_v60 = vpop.permute.xlu0 %4935  ;;  %13107 = vmatpush3.bf16.msra.mxu1 %v13106_v27 }
 0x56e   :  { %v5077_v48 = vadd.f32 %v4936_v60, %v4772_v5  ;;  %v4938_v62 = vpop.permute.xlu1 %4937  ;;  %13113 = vmatpush3.bf16.msra.mxu0 %v13112_v8  ;;  %13108 = vmatprep.subr.bf16.mxu1 %v21840_v54  ;;  %v11153_v60 = vld [vmem:[%s20649_s7 + $0x560] sm:$0xff] }
 0x56f   :  { %v5078_v33 = vadd.f32 %v4938_v62, %v4773_v29  ;;  %5452 = vrot.lane.b32.xlu0 %v22010_v14, %s13433_s21  ;;  %v7118_v59 = vpop.f32.mrb[134].mxu1  ;;  %13114 = vmatprep.subr.bf16.mxu0 %v21840_v54  ;;  %v22014_v62 = vld [vmem:[#allocation139_spill] sm:$0xff] }
 0x570   :  { %v5633_v57 = vmul.f32 %v19756_v25, %v5077_v48  ;;  %v20103_v50 = vadd.f32 %v7118_v59, %v19967_v13  ;;  %v7197_v35 = vpop.f32.mrb[136].mxu0  ;;  %5454 = vrot.lane.b32.xlu1 %v22013_v43, %s13433_s21  ;;  %v12288_v27 = vpop.f32.mrb[135].mxu1  ;;  %12594 = vmatprep.mubr.msk.f32.mxu1 %vm13430_vm0, %v21563_v53 }
 0x571   :  { %v5634_v8 = vmul.f32 %v19756_v25, %v5078_v33  ;;  %v20112_v22 = vadd.f32 %v7197_v35, %v19976_v42  ;;  %v12299_v19 = vpop.f32.mrb[137].mxu0  ;;  %v5425_v44 = vpop.permute.xlu0 %5424  ;;  %13110 = vmatpush3.bf16.msra.mxu1 %v13109_v49  ;;  %12605 = vmatprep.mubr.msk.f32.mxu0 %vm13430_vm0, %v21563_v53  ;;  %v11154_v49 = vld [vmem:[%s20649_s7 + $0x568] sm:$0xff] }
 0x572   :  { %v5566_v13 = vadd.f32 %v5425_v44, %v5321_v4  ;;  %v5427_v63 = vpop.permute.xlu1 %5426  ;;  %13116 = vmatpush3.bf16.msra.mxu0 %v13115_v12  ;;  %13117 = vmatprep.subr.bf16.mxu1 %v21840_v54  ;;  %v5700_v52 = vadd.f32 %v19779_v1, %v5633_v57  ;;  %v11158_v12 = vld [vmem:[%s20649_s7 + $0x580] sm:$0xff]  ;;  %v11159_v33 = vld [vmem:[%s20649_s7 + $0x588] sm:$0xff]  ;;  %v22015_v57 = vld [vmem:[#allocation181_spill] sm:$0xff] }
 0x573   :  { %v5567_v41 = vadd.f32 %v5427_v63, %v5322_v18  ;;  %4662 = vrot.lane.b32.xlu0 %v22013_v43, %s13432_s12  ;;  %13123 = vmatprep.subr.bf16.mxu0 %v21840_v54  ;;  %v5701_v21 = vadd.f32 %v19779_v1, %v5634_v8  ;;  %v13118_v8 = vpack.c.bf16 %v11154_v49, %v11153_v60  ;;  %v11155_v63 = vld [vmem:[%s20649_s7 + $0x570] sm:$0xff] }
 0x574   :  { %v5822_v42 = vmul.f32 %v19756_v25, %v5566_v13  ;;  %4664 = vrot.lane.b32.xlu1 %v19473_v17, %s13432_s12  ;;  %v5761_v59 = vmax.f32 %v5700_v52, 0.0  ;;  %v13124_v13 = vpack.c.bf16 %v11159_v33, %v11158_v12 }
 0x575   :  { %v5823_v24 = vmul.f32 %v19756_v25, %v5567_v41  ;;  %v4635_v58 = vpop.permute.xlu0 %4634  ;;  %v5762_v35 = vmax.f32 %v5701_v21, 0.0  ;;  %v11156_v41 = vld [vmem:[%s20649_s7 + $0x578] sm:$0xff] }
 0x576   :  { %v5883_v5 = vadd.f32 %v19779_v1, %v5822_v42  ;;  %v4637_v29 = vpop.permute.xlu1 %4636  ;;  %v11160_v42 = vld [vmem:[%s20649_s7 + $0x590] sm:$0xff]  ;;  %v11161_v21 = vld [vmem:[%s20649_s7 + $0x598] sm:$0xff]  ;;  %v13121_v49 = vpack.c.bf16 %v11156_v41, %v11155_v63 }
 0x577   :  { %v5884_v48 = vadd.f32 %v19779_v1, %v5823_v24  ;;  %5211 = vrot.lane.b32.xlu0 %v22014_v62, %s13432_s12  ;;  %v4774_v24 = vadd.f32 %v4635_v58, %v21989_v7  ;;  %v13127_v33 = vpack.c.bf16 %v11161_v21, %v11160_v42 }
 0x578   :  { %v5944_v4 = vmax.f32 %v5883_v5, 0.0  ;;  %5213 = vrot.lane.b32.xlu1 %v22015_v57, %s13432_s12  ;;  %v4775_v5 = vadd.f32 %v4637_v29, %v21991_v45 }
 0x579   :  { %v5945_v27 = vmax.f32 %v5884_v48, 0.0  ;;  %v5184_v18 = vpop.permute.xlu0 %5183 }
 0x57a   :  { %v6005_v19 = vmax.f32 %v5761_v59, %v5944_v4  ;;  %v5186_v44 = vpop.permute.xlu1 %5185  ;;  %v5323_v45 = vadd.f32 %v5184_v18, %v21990_v32 }
 0x57b   :  { %v6006_v52 = vmax.f32 %v5762_v35, %v5945_v27  ;;  %4967 = vrot.lane.b32.xlu0 %v22014_v62, %s13433_s21  ;;  %v22016_v35 = vld [vmem:[#allocation237_spill] sm:$0xff] }
 0x57c   :  { %4969 = vrot.lane.b32.xlu1 %v22015_v57, %s13433_s21  ;;  %12595 = vmatmul.mubr.msk.f32.vlgmr.msra.gmra.mrb[162].mxu1 %vm6049_vm1, %v6005_v19 }
 0x57d   :  { %12606 = vmatmul.mubr.msk.f32.vlgmr.msra.gmra.mrb[164].mxu0 %vm6049_vm1, %v6006_v52  ;;  %v4940_v60 = vpop.permute.xlu0 %4939  ;;  %13119 = vmatpush3.bf16.msra.mxu1 %v13118_v8  ;;  %v5324_v8 = vadd.f32 %v5186_v44, %v18916_v23  ;;  %v22017_v44 = vld [vmem:[#allocation176_spill] sm:$0xff] }
 0x57e   :  { %v5079_v48 = vadd.f32 %v4940_v60, %v4774_v24  ;;  %v4942_v12 = vpop.permute.xlu1 %4941  ;;  %13125 = vmatpush3.bf16.msra.mxu0 %v13124_v13  ;;  %13120 = vmatprep.subr.bf16.mxu1 %v21840_v54  ;;  %v11163_v60 = vld [vmem:[%s20649_s7 + $0x5a0] sm:$0xff] }
 0x57f   :  { %v5080_v59 = vadd.f32 %v4942_v12, %v4775_v5  ;;  %5456 = vrot.lane.b32.xlu0 %v19473_v17, %s13433_s21  ;;  %v7276_v7 = vpop.f32.mrb[136].mxu1  ;;  %13126 = vmatprep.subr.bf16.mxu0 %v21840_v54  ;;  %v22018_v12 = vld [vmem:[#allocation235_spill] sm:$0xff] }
 0x580   :  { %v5635_v58 = vmul.f32 %v19756_v25, %v5079_v48  ;;  %v20171_v29 = vadd.f32 %v7276_v7, %v20035_v39  ;;  %v7355_v4 = vpop.f32.mrb[138].mxu0  ;;  %5458 = vrot.lane.b32.xlu1 %v22016_v35, %s13433_s21  ;;  %v12310_v27 = vpop.f32.mrb[137].mxu1  ;;  %12616 = vmatprep.mubr.msk.f32.mxu1 %vm13430_vm0, %v21563_v53 }
 0x581   :  { %v5636_v19 = vmul.f32 %v19756_v25, %v5080_v59  ;;  %v20180_v13 = vadd.f32 %v7355_v4, %v20044_v46  ;;  %v12321_v32 = vpop.f32.mrb[139].mxu0  ;;  %v5429_v18 = vpop.permute.xlu0 %5428  ;;  %13122 = vmatpush3.bf16.msra.mxu1 %v13121_v49  ;;  %12627 = vmatprep.mubr.msk.f32.mxu0 %vm13430_vm0, %v21563_v53  ;;  %v11164_v49 = vld [vmem:[%s20649_s7 + $0x5a8] sm:$0xff] }
 0x582   :  { %v5568_v39 = vadd.f32 %v5429_v18, %v5323_v45  ;;  %v5431_v63 = vpop.permute.xlu1 %5430  ;;  %13128 = vmatpush3.bf16.msra.mxu0 %v13127_v33  ;;  %13129 = vmatprep.subr.bf16.mxu1 %v21840_v54  ;;  %v5702_v23 = vadd.f32 %v19779_v1, %v5635_v58  ;;  %v11168_v33 = vld [vmem:[%s20649_s7 + $0x5c0] sm:$0xff]  ;;  %v11169_v59 = vld [vmem:[%s20649_s7 + $0x5c8] sm:$0xff]  ;;  %v22019_v58 = vld [vmem:[#allocation69_spill] sm:$0xff] }
 0x583   :  { %v5569_v41 = vadd.f32 %v5431_v63, %v5324_v8  ;;  %4666 = vrot.lane.b32.xlu0 %v22016_v35, %s13432_s12  ;;  %13135 = vmatprep.subr.bf16.mxu0 %v21840_v54  ;;  %v5703_v52 = vadd.f32 %v19779_v1, %v5636_v19  ;;  %v13130_v19 = vpack.c.bf16 %v11164_v49, %v11163_v60  ;;  %v11165_v63 = vld [vmem:[%s20649_s7 + $0x5b0] sm:$0xff] }
 0x584   :  { %v5824_v46 = vmul.f32 %v19756_v25, %v5568_v39  ;;  %4668 = vrot.lane.b32.xlu1 %v22017_v44, %s13432_s12  ;;  %v5763_v7 = vmax.f32 %v5702_v23, 0.0  ;;  %v13136_v39 = vpack.c.bf16 %v11169_v59, %v11168_v33 }
 0x585   :  { %v5825_v42 = vmul.f32 %v19756_v25, %v5569_v41  ;;  %v4639_v21 = vpop.permute.xlu0 %4638  ;;  %v5764_v4 = vmax.f32 %v5703_v52, 0.0  ;;  %v11166_v41 = vld [vmem:[%s20649_s7 + $0x5b8] sm:$0xff] }
 0x586   :  { %v5885_v24 = vadd.f32 %v19779_v1, %v5824_v46  ;;  %v4641_v5 = vpop.permute.xlu1 %4640  ;;  %v11170_v46 = vld [vmem:[%s20649_s7 + $0x5d0] sm:$0xff]  ;;  %v11171_v52 = vld [vmem:[%s20649_s7 + $0x5d8] sm:$0xff]  ;;  %v13133_v49 = vpack.c.bf16 %v11166_v41, %v11165_v63 }
 0x587   :  { %v5886_v48 = vadd.f32 %v19779_v1, %v5825_v42  ;;  %5215 = vrot.lane.b32.xlu0 %v22018_v12, %s13432_s12  ;;  %v4776_v42 = vadd.f32 %v4639_v21, %v21992_v0  ;;  %v13139_v59 = vpack.c.bf16 %v11171_v52, %v11170_v46 }
 0x588   :  { %v5946_v45 = vmax.f32 %v5885_v24, 0.0  ;;  %5217 = vrot.lane.b32.xlu1 %v22019_v58, %s13432_s12  ;;  %v4777_v24 = vadd.f32 %v4641_v5, %v18986_v20 }
 0x589   :  { %v5947_v27 = vmax.f32 %v5886_v48, 0.0  ;;  %v5188_v8 = vpop.permute.xlu0 %5187 }
 0x58a   :  { %v6007_v32 = vmax.f32 %v5763_v7, %v5946_v45  ;;  %v5190_v18 = vpop.permute.xlu1 %5189  ;;  %v5325_v20 = vadd.f32 %v5188_v8, %v18962_v9 }
 0x58b   :  { %v6008_v23 = vmax.f32 %v5764_v4, %v5947_v27  ;;  %4971 = vrot.lane.b32.xlu0 %v22018_v12, %s13433_s21  ;;  %v10849_v4 = vld [vmem:[#allocation2] sm:$0x1]  ;;  %v5326_v27 = vadd.f32 %v5190_v18, %v21993_v38 }
 0x58c   :  { %4973 = vrot.lane.b32.xlu1 %v22019_v58, %s13433_s21  ;;  %12617 = vmatmul.mubr.msk.f32.vlgmr.msra.gmra.mrb[164].mxu1 %vm6049_vm1, %v6007_v32 }
 0x58d   :  { %12628 = vmatmul.mubr.msk.f32.vlgmr.msra.gmra.mrb[166].mxu0 %vm6049_vm1, %v6008_v23  ;;  %v4944_v60 = vpop.permute.xlu0 %4943  ;;  %13131 = vmatpush3.bf16.msra.mxu1 %v13130_v19 }
 0x58e   :  { %v5081_v48 = vadd.f32 %v4944_v60, %v4776_v42  ;;  %v4946_v33 = vpop.permute.xlu1 %4945  ;;  %13137 = vmatpush3.bf16.msra.mxu0 %v13136_v39  ;;  %13132 = vmatprep.subr.bf16.mxu1 %v21840_v54  ;;  %v11173_v42 = vld [vmem:[%s20649_s7 + $0x5e0] sm:$0xff] }
 0x58f   :  { %v5082_v7 = vadd.f32 %v4946_v33, %v4777_v24  ;;  %5460 = vrot.lane.b32.xlu0 %v22017_v44, %s13433_s21  ;;  %v7434_v0 = vpop.f32.mrb[138].mxu1  ;;  %13138 = vmatprep.subr.bf16.mxu0 %v21840_v54  ;;  %v11174_v24 = vld [vmem:[%s20649_s7 + $0x5e8] sm:$0xff] }
 0x590   :  { %v5637_v21 = vmul.f32 %v19756_v25, %v5081_v48  ;;  %v20239_v5 = vadd.f32 %v7434_v0, %v20103_v50  ;;  %v7513_v45 = vpop.f32.mrb[140].mxu0  ;;  %5462 = vrot.lane.b32.xlu1 %v21563_v53, %s13433_s21  ;;  %v12332_v58 = vpop.f32.mrb[139].mxu1  ;;  %12638 = vmatprep.mubr.msk.f32.mxu1 %vm13430_vm0, %v21563_v53 }
 0x591   :  { %v5638_v19 = vmul.f32 %v19756_v25, %v5082_v7  ;;  %v20248_v9 = vadd.f32 %v7513_v45, %v20112_v22  ;;  %v12343_v8 = vpop.f32.mrb[141].mxu0  ;;  %v5433_v32 = vpop.permute.xlu0 %5432  ;;  %13134 = vmatpush3.bf16.msra.mxu1 %v13133_v49  ;;  %12649 = vmatprep.mubr.msk.f32.mxu0 %vm13430_vm0, %v21563_v53  ;;  %v11178_v49 = vld [vmem:[%s20649_s7 + $0x600] sm:$0xff] }
 0x592   :  { %v5570_v50 = vadd.f32 %v5433_v32, %v5325_v20  ;;  %v5435_v39 = vpop.permute.xlu1 %5434  ;;  %13140 = vmatpush3.bf16.msra.mxu0 %v13139_v59  ;;  %13141 = vmatprep.subr.bf16.mxu1 %v21840_v54  ;;  %v5704_v38 = vadd.f32 %v19779_v1, %v5637_v21  ;;  %v13142_v20 = vpack.c.bf16 %v11174_v24, %v11173_v42  ;;  %v11181_v8 = vld [vmem:[%s20649_s7 + $0x618] sm:$0xff] }
 0x593   :  { %v5571_v63 = vadd.f32 %v5435_v39, %v5326_v27  ;;  %10852 = vperm.xlu0 %13306, %v10849_v4   ;;  %13147 = vmatprep.subr.bf16.mxu0 %v21840_v54  ;;  %v5705_v18 = vadd.f32 %v19779_v1, %v5638_v19  ;;  %v11176_v4 = vld [vmem:[%s20649_s7 + $0x5f8] sm:$0xff]  ;;  %v11180_v19 = vld [vmem:[%s20649_s7 + $0x610] sm:$0xff] }
 0x594   :  { %v5826_v22 = vmul.f32 %v19756_v25, %v5570_v50  ;;  %v5765_v48 = vmax.f32 %v5704_v38, 0.0 }
 0x595   :  { %v5827_v41 = vmul.f32 %v19756_v25, %v5571_v63  ;;  %v4643_v23 = vpop.permute.xlu0 %4642  ;;  %v11179_v25 = vld [vmem:[%s20649_s7 + $0x608] sm:$0xff]  ;;  %v5766_v59 = vmax.f32 %v5705_v18, 0.0  ;;  %v13151_v18 = vpack.c.bf16 %v11181_v8, %v11180_v19  ;;  %v11188_v19 = vld [vmem:[%s20649_s7 + $0x640] sm:$0xff] }
 0x596   :  { %v5887_v46 = vadd.f32 %v19779_v1, %v5826_v22  ;;  %v4645_v52 = vpop.permute.xlu1 %4644  ;;  %v13148_v58 = vpack.c.bf16 %v11179_v25, %v11178_v49  ;;  %v4778_v32 = vadd.f32 %v4643_v23, %v19030_v56  ;;  %v11189_v8 = vld [vmem:[%s20649_s7 + $0x648] sm:$0xff] }
 0x597   :  { %v5888_v60 = vadd.f32 %v19779_v1, %v5827_v41  ;;  %v11175_v1 = vld [vmem:[%s20649_s7 + $0x5f0] sm:$0xff]  ;;  %v4779_v50 = vadd.f32 %v4645_v52, %v21996_v2  ;;  %v20296_v2 = vld [vmem:[%s20650_s5] ss:$0 sm:$0xff] }
 0x598   :  { %v5948_v33 = vmax.f32 %v5887_v46, 0.0  ;;  %v13145_v63 = vpack.c.bf16 %v11176_v4, %v11175_v1  ;;  %v11183_v1 = vld [vmem:[%s20649_s7 + $0x620] sm:$0xff]  ;;  %v11184_v4 = vld [vmem:[%s20649_s7 + $0x628] sm:$0xff] }
 0x599   :  { %v5949_v7 = vmax.f32 %v5888_v60, 0.0  ;;  %v5192_v0 = vpop.permute.xlu0 %5191 }
 0x59a   :  { %v6009_v21 = vmax.f32 %v5765_v48, %v5948_v33  ;;  %v5194_v45 = vpop.permute.xlu1 %5193  ;;  %v5327_v56 = vadd.f32 %v5192_v0, %v21994_v36 }
 0x59b   :  { %v6010_v27 = vmax.f32 %v5766_v59, %v5949_v7  ;;  %v5328_v60 = vadd.f32 %v5194_v45, %v21995_v55  ;;  %v20314_v55 = vld [vmem:[%s20651_s6] ss:$0 sm:$0xff] }
 0x59c   :  { %12639 = vmatmul.mubr.msk.f32.vlgmr.msra.gmra.mrb[166].mxu1 %vm6049_vm1, %v6009_v21 }
 0x59d   :  { %12650 = vmatmul.mubr.msk.f32.vlgmr.msra.gmra.mrb[168].mxu0 %vm6049_vm1, %v6010_v27  ;;  %v4948_v39 = vpop.permute.xlu0 %4947  ;;  %13143 = vmatpush3.bf16.msra.mxu1 %v13142_v20 }
 0x59e   :  { %v5083_v38 = vadd.f32 %v4948_v39, %v4778_v32  ;;  %v4950_v22 = vpop.permute.xlu1 %4949  ;;  %13149 = vmatpush3.bf16.msra.mxu0 %v13148_v58  ;;  %13144 = vmatprep.subr.bf16.mxu1 %v21840_v54 }
 0x59f   :  { %v5084_v41 = vadd.f32 %v4950_v22, %v4779_v50  ;;  %v7592_v46 = vpop.f32.mrb[140].mxu1  ;;  %13150 = vmatprep.subr.bf16.mxu0 %v21840_v54  ;;  %12660 = vmatprep.mubr.msk.f32.mxu1 %vm13430_vm0, %v21563_v53  ;;  %v13154_v22 = vpack.c.bf16 %v11184_v4, %v11183_v1 }
 0x5a0   :  { %v5639_v23 = vmul.f32 %v20296_v2, %v5083_v38  ;;  %v20300_v52 = vadd.f32 %v7592_v46, %v20171_v29  ;;  %v7671_v42 = vpop.f32.mrb[142].mxu0  ;;  %v12354_v24 = vpop.f32.mrb[141].mxu1  ;;  %12671 = vmatprep.mubr.msk.f32.mxu0 %vm13430_vm0, %v21563_v53  ;;  %v13160_v46 = vpack.c.bf16 %v11189_v8, %v11188_v19 }
 0x5a1   :  { %v5640_v49 = vmul.f32 %v20296_v2, %v5084_v41  ;;  %v20307_v36 = vadd.f32 %v7671_v42, %v20180_v13  ;;  %v12365_v25 = vpop.f32.mrb[143].mxu0  ;;  %v5437_v48 = vpop.permute.xlu0 %5436  ;;  %13146 = vmatpush3.bf16.msra.mxu1 %v13145_v63  ;;  %v11190_v24 = vld [vmem:[%s20649_s7 + $0x650] sm:$0xff] }
 0x5a2   :  { %v5572_v33 = vadd.f32 %v5437_v48, %v5327_v56  ;;  %v5439_v59 = vpop.permute.xlu1 %5438  ;;  %13152 = vmatpush3.bf16.msra.mxu0 %v13151_v18  ;;  %13153 = vmatprep.subr.bf16.mxu1 %v21840_v54  ;;  %v5706_v7 = vadd.f32 %v20314_v55, %v5639_v23  ;;  %v11185_v56 = vld [vmem:[%s20649_s7 + $0x630] sm:$0xff]  ;;  %v11186_v23 = vld [vmem:[%s20649_s7 + $0x638] sm:$0xff] }
 0x5a3   :  { %v5573_v29 = vadd.f32 %v5439_v59, %v5328_v60  ;;  %13159 = vmatprep.subr.bf16.mxu0 %v21840_v54  ;;  %v5707_v0 = vadd.f32 %v20314_v55, %v5640_v49  ;;  %v11191_v60 = vld [vmem:[%s20649_s7 + $0x658] sm:$0xff] }
 0x5a4   :  { %v5828_v13 = vmul.f32 %v20296_v2, %v5572_v33  ;;  %v5767_v32 = vmax.f32 %v5706_v7, 0.0  ;;  %v13157_v33 = vpack.c.bf16 %v11186_v23, %v11185_v56  ;;  %v13163_v7 = vpack.c.bf16 %v11191_v60, %v11190_v24  ;;  %v11199_v56 = vld [vmem:[%s20649_s7 + $0x688] sm:$0xff] }
 0x5a5   :  { %v5829_v20 = vmul.f32 %v20296_v2, %v5573_v29  ;;  %v4647_v21 = vpop.permute.xlu0 %4646  ;;  %v5768_v39 = vmax.f32 %v5707_v0, 0.0 }
 0x5a6   :  { %v5889_v45 = vadd.f32 %v20314_v55, %v5828_v13  ;;  %v4649_v58 = vpop.permute.xlu1 %4648  ;;  %v4780_v49 = vadd.f32 %v4647_v21, %v19100_v10 }
 0x5a7   :  { %v5890_v27 = vadd.f32 %v20314_v55, %v5829_v20  ;;  %v4781_v25 = vadd.f32 %v4649_v58, %v21997_v40 }
 0x5a8   :  { %v5950_v50 = vmax.f32 %v5889_v45, 0.0 }
 0x5a9   :  { %v5951_v63 = vmax.f32 %v5890_v27, 0.0  ;;  %v5196_v38 = vpop.permute.xlu0 %5195 }
 0x5aa   :  { %v6011_v18 = vmax.f32 %v5767_v32, %v5950_v50  ;;  %v5198_v41 = vpop.permute.xlu1 %5197  ;;  %v5329_v10 = vadd.f32 %v5196_v38, %v19117_v28 }
 0x5ab   :  { %v6012_v42 = vmax.f32 %v5768_v39, %v5951_v63  ;;  %v5330_v58 = vadd.f32 %v5198_v41, %v19151_v15 }
 0x5ac   :  { %12661 = vmatmul.mubr.msk.f32.vlgmr.msra.gmra.mrb[168].mxu1 %vm6049_vm1, %v6011_v18  ;;  %v11194_v18 = vld [vmem:[%s20649_s7 + $0x668] sm:$0xff] }
 0x5ad   :  { %12672 = vmatmul.mubr.msk.f32.vlgmr.msra.gmra.mrb[170].mxu0 %vm6049_vm1, %v6012_v42  ;;  %v4952_v48 = vpop.permute.xlu0 %4951  ;;  %13155 = vmatpush3.bf16.msra.mxu1 %v13154_v22  ;;  %v11193_v22 = vld [vmem:[%s20649_s7 + $0x660] sm:$0xff] }
 0x5ae   :  { %v5085_v59 = vadd.f32 %v4952_v48, %v4780_v49  ;;  %v4954_v29 = vpop.permute.xlu1 %4953  ;;  %13161 = vmatpush3.bf16.msra.mxu0 %v13160_v46  ;;  %13156 = vmatprep.subr.bf16.mxu1 %v21840_v54  ;;  %v11198_v46 = vld [vmem:[%s20649_s7 + $0x680] sm:$0xff] }
 0x5af   :  { %v5086_v13 = vadd.f32 %v4954_v29, %v4781_v25  ;;  %v7750_v0 = vpop.f32.mrb[142].mxu1  ;;  %13162 = vmatprep.subr.bf16.mxu0 %v21840_v54  ;;  %12682 = vmatprep.mubr.msk.f32.mxu1 %vm13430_vm0, %v21563_v53  ;;  %v13166_v25 = vpack.c.bf16 %v11194_v18, %v11193_v22  ;;  %v11195_v29 = vld [vmem:[%s20649_s7 + $0x670] sm:$0xff] }
 0x5b0   :  { %v5641_v40 = vmul.f32 %v20296_v2, %v5085_v59  ;;  %v20357_v20 = vadd.f32 %v7750_v0, %v20239_v5  ;;  %v7829_v21 = vpop.f32.mrb[144].mxu0  ;;  %v12376_v45 = vpop.f32.mrb[143].mxu1  ;;  %12693 = vmatprep.mubr.msk.f32.mxu0 %vm13430_vm0, %v21563_v53  ;;  %v13172_v59 = vpack.c.bf16 %v11199_v56, %v11198_v46  ;;  %v11200_v0 = vld [vmem:[%s20649_s7 + $0x690] sm:$0xff] }
 0x5b1   :  { %v5642_v1 = vmul.f32 %v20296_v2, %v5086_v13  ;;  %v20364_v4 = vadd.f32 %v7829_v21, %v20248_v9  ;;  %v12387_v27 = vpop.f32.mrb[145].mxu0  ;;  %v5441_v19 = vpop.permute.xlu0 %5440  ;;  %13158 = vmatpush3.bf16.msra.mxu1 %v13157_v33 }
 0x5b2   :  { %v5574_v28 = vadd.f32 %v5441_v19, %v5329_v10  ;;  %v5443_v8 = vpop.permute.xlu1 %5442  ;;  %13164 = vmatpush3.bf16.msra.mxu0 %v13163_v7  ;;  %13165 = vmatprep.subr.bf16.mxu1 %v21840_v54  ;;  %v5708_v32 = vadd.f32 %v20314_v55, %v5641_v40  ;;  %v11196_v7 = vld [vmem:[%s20649_s7 + $0x678] sm:$0xff] }
 0x5b3   :  { %v5575_v5 = vadd.f32 %v5443_v8, %v5330_v58  ;;  %13171 = vmatprep.subr.bf16.mxu0 %v21840_v54  ;;  %v5709_v50 = vadd.f32 %v20314_v55, %v5642_v1  ;;  %v11201_v10 = vld [vmem:[%s20649_s7 + $0x698] sm:$0xff]  ;;  %v13169_v58 = vpack.c.bf16 %v11196_v7, %v11195_v29 }
 0x5b4   :  { %v5830_v15 = vmul.f32 %v20296_v2, %v5574_v28  ;;  %v5769_v23 = vmax.f32 %v5708_v32, 0.0  ;;  %v13175_v19 = vpack.c.bf16 %v11201_v10, %v11200_v0 }
 0x5b5   :  { %v5831_v9 = vmul.f32 %v20296_v2, %v5575_v5  ;;  %v4651_v39 = vpop.permute.xlu0 %4650  ;;  %v5770_v24 = vmax.f32 %v5709_v50, 0.0 }
 0x5b6   :  { %v5891_v63 = vadd.f32 %v20314_v55, %v5830_v15  ;;  %v4653_v38 = vpop.permute.xlu1 %4652  ;;  %v4782_v40 = vadd.f32 %v4651_v39, %v19178_v34 }
 0x5b7   :  { %v5892_v41 = vadd.f32 %v20314_v55, %v5831_v9  ;;  %v4783_v21 = vadd.f32 %v4653_v38, %v22002_v30 }
 0x5b8   :  { %v5952_v42 = vmax.f32 %v5891_v63, 0.0 }
 0x5b9   :  { %v5953_v60 = vmax.f32 %v5892_v41, 0.0  ;;  %v5200_v49 = vpop.permute.xlu0 %5199 }
 0x5ba   :  { %v6013_v48 = vmax.f32 %v5769_v23, %v5952_v42  ;;  %v5202_v33 = vpop.permute.xlu1 %5201  ;;  %v5331_v34 = vadd.f32 %v5200_v49, %v22000_v3  ;;  %v11203_v42 = vld [vmem:[%s20649_s7 + $0x6a0] sm:$0xff] }
 0x5bb   :  { %v6014_v13 = vmax.f32 %v5770_v24, %v5953_v60  ;;  %v5332_v50 = vadd.f32 %v5202_v33, %v22001_v6  ;;  %v11204_v24 = vld [vmem:[%s20649_s7 + $0x6a8] sm:$0xff]  ;;  %v11208_v49 = vld [vmem:[%s20649_s7 + $0x6c0] sm:$0xff] }
 0x5bc   :  { %12683 = vmatmul.mubr.msk.f32.vlgmr.msra.gmra.mrb[170].mxu1 %vm6049_vm1, %v6013_v48 }
 0x5bd   :  { %12694 = vmatmul.mubr.msk.f32.vlgmr.msra.gmra.mrb[172].mxu0 %vm6049_vm1, %v6014_v13  ;;  %v4956_v45 = vpop.permute.xlu0 %4955  ;;  %13167 = vmatpush3.bf16.msra.mxu1 %v13166_v25  ;;  %v11209_v25 = vld [vmem:[%s20649_s7 + $0x6c8] sm:$0xff]  ;;  %v13178_v13 = vpack.c.bf16 %v11204_v24, %v11203_v42 }
 0x5be   :  { %v5087_v1 = vadd.f32 %v4956_v45, %v4782_v40  ;;  %v4958_v27 = vpop.permute.xlu1 %4957  ;;  %13173 = vmatpush3.bf16.msra.mxu0 %v13172_v59  ;;  %13168 = vmatprep.subr.bf16.mxu1 %v21840_v54  ;;  %v13184_v40 = vpack.c.bf16 %v11209_v25, %v11208_v49  ;;  %v11206_v45 = vld [vmem:[%s20649_s7 + $0x6b8] sm:$0xff]  ;;  %v11214_v49 = vld [vmem:[%s20649_s7 + $0x6e8] sm:$0xff] }
 0x5bf   :  { %v5088_v28 = vadd.f32 %v4958_v27, %v4783_v21  ;;  %v7908_v8 = vpop.f32.mrb[144].mxu1  ;;  %13174 = vmatprep.subr.bf16.mxu0 %v21840_v54  ;;  %12704 = vmatprep.mubr.msk.f32.mxu1 %vm13430_vm0, %v21563_v53  ;;  %v11205_v21 = vld [vmem:[%s20649_s7 + $0x6b0] sm:$0xff]  ;;  %v11211_v27 = vld [vmem:[%s20649_s7 + $0x6d8] sm:$0xff] }
 0x5c0   :  { %v5643_v30 = vmul.f32 %v20296_v2, %v5087_v1  ;;  %v20409_v5 = vadd.f32 %v7908_v8, %v20300_v52  ;;  %v7987_v32 = vpop.f32.mrb[146].mxu0  ;;  %v12398_v15 = vpop.f32.mrb[145].mxu1  ;;  %12715 = vmatprep.mubr.msk.f32.mxu0 %vm13430_vm0, %v21563_v53  ;;  %v11210_v1 = vld [vmem:[%s20649_s7 + $0x6d0] sm:$0xff] }
 0x5c1   :  { %v5644_v9 = vmul.f32 %v20296_v2, %v5088_v28  ;;  %v20416_v39 = vadd.f32 %v7987_v32, %v20307_v36  ;;  %v12409_v63 = vpop.f32.mrb[147].mxu0  ;;  %v5445_v38 = vpop.permute.xlu0 %5444  ;;  %13170 = vmatpush3.bf16.msra.mxu1 %v13169_v58  ;;  %v13187_v15 = vpack.c.bf16 %v11211_v27, %v11210_v1  ;;  %v11216_v1 = vld [vmem:[%s20649_s7 + $0x6f8] sm:$0xff] }
 0x5c2   :  { %v5576_v3 = vadd.f32 %v5445_v38, %v5331_v34  ;;  %v5447_v22 = vpop.permute.xlu1 %5446  ;;  %13176 = vmatpush3.bf16.msra.mxu0 %v13175_v19  ;;  %13177 = vmatprep.subr.bf16.mxu1 %v21840_v54  ;;  %v5710_v18 = vadd.f32 %v20314_v55, %v5643_v30  ;;  %v13181_v34 = vpack.c.bf16 %v11206_v45, %v11205_v21 }
 0x5c3   :  { %v5577_v52 = vadd.f32 %v5447_v22, %v5332_v50  ;;  %13183 = vmatprep.subr.bf16.mxu0 %v21840_v54  ;;  %v5711_v41 = vadd.f32 %v20314_v55, %v5644_v9 }
 0x5c4   :  { %v5832_v6 = vmul.f32 %v20296_v2, %v5576_v3  ;;  %v5771_v48 = vmax.f32 %v5710_v18, 0.0 }
 0x5c5   :  { %v5833_v36 = vmul.f32 %v20296_v2, %v5577_v52  ;;  %v4655_v46 = vpop.permute.xlu0 %4654  ;;  %v5772_v59 = vmax.f32 %v5711_v41, 0.0 }
 0x5c6   :  { %v5893_v56 = vadd.f32 %v20314_v55, %v5832_v6  ;;  %v4657_v23 = vpop.permute.xlu1 %4656  ;;  %v4784_v19 = vadd.f32 %v4655_v46, %v22003_v31 }
 0x5c7   :  { %v5894_v60 = vadd.f32 %v20314_v55, %v5833_v36  ;;  %v4785_v28 = vadd.f32 %v4657_v23, %v22007_v16 }
 0x5c8   :  { %v5954_v33 = vmax.f32 %v5893_v56, 0.0 }
 0x5c9   :  { %v5955_v29 = vmax.f32 %v5894_v60, 0.0  ;;  %v5204_v7 = vpop.permute.xlu0 %5203  ;;  %v11213_v60 = vld [vmem:[%s20649_s7 + $0x6e0] sm:$0xff] }
 0x5ca   :  { %v6015_v0 = vmax.f32 %v5771_v48, %v5954_v33  ;;  %v5206_v10 = vpop.permute.xlu1 %5205  ;;  %v5333_v31 = vadd.f32 %v5204_v7, %v22005_v37  ;;  %v11218_v48 = vld [vmem:[%s20649_s7 + $0x700] sm:$0xff]  ;;  %v11219_v33 = vld [vmem:[%s20649_s7 + $0x708] sm:$0xff] }
 0x5cb   :  { %v6016_v58 = vmax.f32 %v5772_v59, %v5955_v29  ;;  %v5334_v22 = vadd.f32 %v5206_v10, %v22006_v51  ;;  %v13190_v10 = vpack.c.bf16 %v11214_v49, %v11213_v60  ;;  %v13196_v45 = vpack.c.bf16 %v11219_v33, %v11218_v48  ;;  %v11228_v49 = vld [vmem:[%s20649_s7 + $0x740] sm:$0xff] }
 0x5cc   :  { %12705 = vmatmul.mubr.msk.f32.vlgmr.msra.gmra.mrb[172].mxu1 %vm6049_vm1, %v6015_v0 }
 0x5cd   :  { %12716 = vmatmul.mubr.msk.f32.vlgmr.msra.gmra.mrb[174].mxu0 %vm6049_vm1, %v6016_v58  ;;  %v4960_v8 = vpop.permute.xlu0 %4959  ;;  %13179 = vmatpush3.bf16.msra.mxu1 %v13178_v13  ;;  %v11215_v58 = vld [vmem:[%s20649_s7 + $0x6f0] sm:$0xff] }
 0x5ce   :  { %v5089_v30 = vadd.f32 %v4960_v8, %v4784_v19  ;;  %v4962_v32 = vpop.permute.xlu1 %4961  ;;  %13185 = vmatpush3.bf16.msra.mxu0 %v13184_v40  ;;  %13180 = vmatprep.subr.bf16.mxu1 %v21840_v54  ;;  %v11220_v19 = vld [vmem:[%s20649_s7 + $0x710] sm:$0xff] }
 0x5cf   :  { %v5090_v50 = vadd.f32 %v4962_v32, %v4785_v28  ;;  %v8066_v9 = vpop.f32.mrb[146].mxu1  ;;  %13186 = vmatprep.subr.bf16.mxu0 %v21840_v54  ;;  %12726 = vmatprep.mubr.msk.f32.mxu1 %vm13430_vm0, %v21563_v53  ;;  %v11221_v28 = vld [vmem:[%s20649_s7 + $0x718] sm:$0xff]  ;;  %v13193_v32 = vpack.c.bf16 %v11216_v1, %v11215_v58  ;;  %v11230_v1 = vld [vmem:[%s20649_s7 + $0x750] sm:$0xff] }
 0x5d0   :  { %v5645_v16 = vmul.f32 %v20296_v2, %v5089_v30  ;;  %v20461_v63 = vadd.f32 %v8066_v9, %v20357_v20  ;;  %v8145_v38 = vpop.f32.mrb[148].mxu0  ;;  %v12420_v3 = vpop.f32.mrb[147].mxu1  ;;  %12737 = vmatprep.mubr.msk.f32.mxu0 %vm13430_vm0, %v21563_v53  ;;  %v13199_v9 = vpack.c.bf16 %v11221_v28, %v11220_v19 }
 0x5d1   :  { %v5646_v52 = vmul.f32 %v20296_v2, %v5090_v50  ;;  %v20468_v18 = vadd.f32 %v8145_v38, %v20364_v4  ;;  %v12431_v6 = vpop.f32.mrb[149].mxu0  ;;  %v5449_v41 = vpop.permute.xlu0 %5448  ;;  %13182 = vmatpush3.bf16.msra.mxu1 %v13181_v34 }
 0x5d2   :  { %v5578_v37 = vadd.f32 %v5449_v41, %v5333_v31  ;;  %v5451_v36 = vpop.permute.xlu1 %5450  ;;  %13188 = vmatpush3.bf16.msra.mxu0 %v13187_v15  ;;  %13189 = vmatprep.subr.bf16.mxu1 %v21840_v54  ;;  %v5712_v46 = vadd.f32 %v20314_v55, %v5645_v16 }
 0x5d3   :  { %v5579_v20 = vadd.f32 %v5451_v36, %v5334_v22  ;;  %13195 = vmatprep.subr.bf16.mxu0 %v21840_v54  ;;  %v5713_v56 = vadd.f32 %v20314_v55, %v5646_v52 }
 0x5d4   :  { %v5834_v51 = vmul.f32 %v20296_v2, %v5578_v37  ;;  %v5773_v59 = vmax.f32 %v5712_v46, 0.0 }
 0x5d5   :  { %v5835_v4 = vmul.f32 %v20296_v2, %v5579_v20  ;;  %v4659_v23 = vpop.permute.xlu0 %4658  ;;  %v5774_v7 = vmax.f32 %v5713_v56, 0.0 }
 0x5d6   :  { %v5895_v42 = vadd.f32 %v20314_v55, %v5834_v51  ;;  %v4661_v24 = vpop.permute.xlu1 %4660  ;;  %v4786_v8 = vadd.f32 %v4659_v23, %v22008_v61 }
 0x5d7   :  { %v5896_v25 = vadd.f32 %v20314_v55, %v5835_v4  ;;  %v4787_v34 = vadd.f32 %v4661_v24, %v22011_v47  ;;  %v11224_v24 = vld [vmem:[%s20649_s7 + $0x728] sm:$0xff] }
 0x5d8   :  { %v5956_v29 = vmax.f32 %v5895_v42, 0.0  ;;  %v11223_v42 = vld [vmem:[%s20649_s7 + $0x720] sm:$0xff] }
 0x5d9   :  { %v5957_v13 = vmax.f32 %v5896_v25, 0.0  ;;  %v5208_v0 = vpop.permute.xlu0 %5207  ;;  %v11229_v25 = vld [vmem:[%s20649_s7 + $0x748] sm:$0xff] }
 0x5da   :  { %v6017_v40 = vmax.f32 %v5773_v59, %v5956_v29  ;;  %v5210_v21 = vpop.permute.xlu1 %5209  ;;  %v5335_v61 = vadd.f32 %v5208_v0, %v22009_v26 }
 0x5db   :  { %v6018_v27 = vmax.f32 %v5774_v7, %v5957_v13  ;;  %v5336_v52 = vadd.f32 %v5210_v21, %v22010_v14  ;;  %v13202_v13 = vpack.c.bf16 %v11224_v24, %v11223_v42  ;;  %v11225_v21 = vld [vmem:[%s20649_s7 + $0x730] sm:$0xff] }
 0x5dc   :  { %12727 = vmatmul.mubr.msk.f32.vlgmr.msra.gmra.mrb[174].mxu1 %vm6049_vm1, %v6017_v40  ;;  %v13208_v40 = vpack.c.bf16 %v11229_v25, %v11228_v49 }
 0x5dd   :  { %12738 = vmatmul.mubr.msk.f32.vlgmr.msra.gmra.mrb[176].mxu0 %vm6049_vm1, %v6018_v27  ;;  %v4964_v30 = vpop.permute.xlu0 %4963  ;;  %13191 = vmatpush3.bf16.msra.mxu1 %v13190_v10  ;;  %v11231_v27 = vld [vmem:[%s20649_s7 + $0x758] sm:$0xff] }
 0x5de   :  { %v5091_v15 = vadd.f32 %v4964_v30, %v4786_v8  ;;  %v4966_v50 = vpop.permute.xlu1 %4965  ;;  %13197 = vmatpush3.bf16.msra.mxu0 %v13196_v45  ;;  %13192 = vmatprep.subr.bf16.mxu1 %v21840_v54  ;;  %v11226_v45 = vld [vmem:[%s20649_s7 + $0x738] sm:$0xff] }
 0x5df   :  { %v5092_v31 = vadd.f32 %v4966_v50, %v4787_v34  ;;  %v8224_v16 = vpop.f32.mrb[148].mxu1  ;;  %13198 = vmatprep.subr.bf16.mxu0 %v21840_v54  ;;  %12748 = vmatprep.mubr.msk.f32.mxu1 %vm13430_vm0, %v21563_v53  ;;  %v13205_v34 = vpack.c.bf16 %v11226_v45, %v11225_v21 }
 0x5e0   :  { %v5647_v47 = vmul.f32 %v20296_v2, %v5091_v15  ;;  %v20513_v38 = vadd.f32 %v8224_v16, %v20409_v5  ;;  %v8303_v3 = vpop.f32.mrb[150].mxu0  ;;  %v12442_v22 = vpop.f32.mrb[149].mxu1  ;;  %12759 = vmatprep.mubr.msk.f32.mxu0 %vm13430_vm0, %v21563_v53  ;;  %v13211_v15 = vpack.c.bf16 %v11231_v27, %v11230_v1 }
 0x5e1   :  { %v5648_v6 = vmul.f32 %v20296_v2, %v5092_v31  ;;  %v20520_v41 = vadd.f32 %v8303_v3, %v20416_v39  ;;  %v12453_v37 = vpop.f32.mrb[151].mxu0  ;;  %v5453_v36 = vpop.permute.xlu0 %5452  ;;  %13194 = vmatpush3.bf16.msra.mxu1 %v13193_v32 }
 0x5e2   :  { %v5580_v26 = vadd.f32 %v5453_v36, %v5335_v61  ;;  %v5455_v20 = vpop.permute.xlu1 %5454  ;;  %13200 = vmatpush3.bf16.msra.mxu0 %v13199_v9  ;;  %13201 = vmatprep.subr.bf16.mxu1 %v21840_v54  ;;  %v5714_v46 = vadd.f32 %v20314_v55, %v5647_v47 }
 0x5e3   :  { %v5581_v5 = vadd.f32 %v5455_v20, %v5336_v52  ;;  %13207 = vmatprep.subr.bf16.mxu0 %v21840_v54  ;;  %v5715_v51 = vadd.f32 %v20314_v55, %v5648_v6 }
 0x5e4   :  { %v5836_v14 = vmul.f32 %v20296_v2, %v5580_v26  ;;  %v5775_v48 = vmax.f32 %v5714_v46, 0.0 }
 0x5e5   :  { %v5837_v39 = vmul.f32 %v20296_v2, %v5581_v5  ;;  %v4663_v56 = vpop.permute.xlu0 %4662  ;;  %v5776_v59 = vmax.f32 %v5715_v51, 0.0  ;;  %v11234_v51 = vld [vmem:[%s20649_s7 + $0x768] sm:$0xff] }
 0x5e6   :  { %v5897_v4 = vadd.f32 %v20314_v55, %v5836_v14  ;;  %v4665_v23 = vpop.permute.xlu1 %4664  ;;  %v4788_v19 = vadd.f32 %v4663_v56, %v22012_v11  ;;  %v11233_v14 = vld [vmem:[%s20649_s7 + $0x760] sm:$0xff] }
 0x5e7   :  { %v5898_v60 = vadd.f32 %v20314_v55, %v5837_v39  ;;  %v4789_v28 = vadd.f32 %v4665_v23, %v22014_v62  ;;  %v11238_v56 = vld [vmem:[%s20649_s7 + $0x780] sm:$0xff]  ;;  %v13214_v25 = vpack.c.bf16 %v11234_v51, %v11233_v14 }
 0x5e8   :  { %v5958_v33 = vmax.f32 %v5897_v4, 0.0  ;;  %v11239_v4 = vld [vmem:[%s20649_s7 + $0x788] sm:$0xff] }
 0x5e9   :  { %v5959_v29 = vmax.f32 %v5898_v60, 0.0  ;;  %v5212_v7 = vpop.permute.xlu0 %5211 }
 0x5ea   :  { %v6019_v0 = vmax.f32 %v5775_v48, %v5958_v33  ;;  %v5214_v10 = vpop.permute.xlu1 %5213  ;;  %v5337_v11 = vadd.f32 %v5212_v7, %v22013_v43  ;;  %v11236_v7 = vld [vmem:[%s20649_s7 + $0x778] sm:$0xff] }
 0x5eb   :  { %v6020_v58 = vmax.f32 %v5776_v59, %v5959_v29  ;;  %v5338_v47 = vadd.f32 %v5214_v10, %v19473_v17  ;;  %v13220_v59 = vpack.c.bf16 %v11239_v4, %v11238_v56  ;;  %v11235_v29 = vld [vmem:[%s20649_s7 + $0x770] sm:$0xff]  ;;  %v11241_v10 = vld [vmem:[%s20649_s7 + $0x798] sm:$0xff] }
 0x5ec   :  { %12749 = vmatmul.mubr.msk.f32.vlgmr.msra.gmra.mrb[176].mxu1 %vm6049_vm1, %v6019_v0  ;;  %v11240_v0 = vld [vmem:[%s20649_s7 + $0x790] sm:$0xff] }
 0x5ed   :  { %12760 = vmatmul.mubr.msk.f32.vlgmr.msra.gmra.mrb[178].mxu0 %vm6049_vm1, %v6020_v58  ;;  %v4968_v8 = vpop.permute.xlu0 %4967  ;;  %13203 = vmatpush3.bf16.msra.mxu1 %v13202_v13  ;;  %v13217_v58 = vpack.c.bf16 %v11236_v7, %v11235_v29 }
 0x5ee   :  { %v5093_v30 = vadd.f32 %v4968_v8, %v4788_v19  ;;  %v4970_v32 = vpop.permute.xlu1 %4969  ;;  %13209 = vmatpush3.bf16.msra.mxu0 %v13208_v40  ;;  %13204 = vmatprep.subr.bf16.mxu1 %v21840_v54  ;;  %v13223_v19 = vpack.c.bf16 %v11241_v10, %v11240_v0 }
 0x5ef   :  { %v5094_v50 = vadd.f32 %v4970_v32, %v4789_v28  ;;  %v8382_v9 = vpop.f32.mrb[150].mxu1  ;;  %13210 = vmatprep.subr.bf16.mxu0 %v21840_v54  ;;  %12770 = vmatprep.mubr.msk.f32.mxu1 %vm13430_vm0, %v21563_v53 }
 0x5f0   :  { %v5649_v62 = vmul.f32 %v20296_v2, %v5093_v30  ;;  %v20565_v31 = vadd.f32 %v8382_v9, %v20461_v63  ;;  %v8461_v16 = vpop.f32.mrb[152].mxu0  ;;  %v12464_v61 = vpop.f32.mrb[151].mxu1  ;;  %12781 = vmatprep.mubr.msk.f32.mxu0 %vm13430_vm0, %v21563_v53 }
 0x5f1   :  { %v5650_v3 = vmul.f32 %v20296_v2, %v5094_v50  ;;  %v20572_v22 = vadd.f32 %v8461_v16, %v20468_v18  ;;  %v12475_v52 = vpop.f32.mrb[153].mxu0  ;;  %v5457_v6 = vpop.permute.xlu0 %5456  ;;  %13206 = vmatpush3.bf16.msra.mxu1 %v13205_v34 }
 0x5f2   :  { %v5582_v43 = vadd.f32 %v5457_v6, %v5337_v11  ;;  %v5459_v37 = vpop.permute.xlu1 %5458  ;;  %13212 = vmatpush3.bf16.msra.mxu0 %v13211_v15  ;;  %13213 = vmatprep.subr.bf16.mxu1 %v21840_v54  ;;  %v5716_v36 = vadd.f32 %v20314_v55, %v5649_v62 }
 0x5f3   :  { %v5583_v63 = vadd.f32 %v5459_v37, %v5338_v47  ;;  %13219 = vmatprep.subr.bf16.mxu0 %v21840_v54  ;;  %v5717_v26 = vadd.f32 %v20314_v55, %v5650_v3 }
 0x5f4   :  { %v5838_v17 = vmul.f32 %v20296_v2, %v5582_v43  ;;  %v5777_v23 = vmax.f32 %v5716_v36, 0.0 }
 0x5f5   :  { %v5839_v18 = vmul.f32 %v20296_v2, %v5583_v63  ;;  %v4667_v20 = vpop.permute.xlu0 %4666  ;;  %v5778_v24 = vmax.f32 %v5717_v26, 0.0 }
 0x5f6   :  { %v5899_v5 = vadd.f32 %v20314_v55, %v5838_v17  ;;  %v4669_v46 = vpop.permute.xlu1 %4668  ;;  %v4790_v40 = vadd.f32 %v4667_v20, %v22015_v57 }
 0x5f7   :  { %v5900_v39 = vadd.f32 %v20314_v55, %v5839_v18  ;;  %v4791_v21 = vadd.f32 %v4669_v46, %v22018_v12 }
 0x5f8   :  { %v5960_v42 = vmax.f32 %v5899_v5, 0.0 }
 0x5f9   :  { %v5961_v60 = vmax.f32 %v5900_v39, 0.0  ;;  %v5216_v49 = vpop.permute.xlu0 %5215 }
 0x5fa   :  { %v6021_v48 = vmax.f32 %v5777_v23, %v5960_v42  ;;  %v5218_v33 = vpop.permute.xlu1 %5217  ;;  %v5339_v57 = vadd.f32 %v5216_v49, %v22016_v35 }
 0x5fb   :  { %v6022_v13 = vmax.f32 %v5778_v24, %v5961_v60  ;;  %v5340_v15 = vadd.f32 %v5218_v33, %v22017_v44 }
 0x5fc   :  { %12771 = vmatmul.mubr.msk.f32.vlgmr.msra.gmra.mrb[178].mxu1 %vm6049_vm1, %v6021_v48 }
 0x5fd   :  { %12782 = vmatmul.mubr.msk.f32.vlgmr.msra.gmra.mrb[180].mxu0 %vm6049_vm1, %v6022_v13  ;;  %v4972_v45 = vpop.permute.xlu0 %4971  ;;  %13215 = vmatpush3.bf16.msra.mxu1 %v13214_v25 }
 0x5fe   :  { %v5095_v1 = vadd.f32 %v4972_v45, %v4790_v40  ;;  %v4974_v27 = vpop.permute.xlu1 %4973  ;;  %13221 = vmatpush3.bf16.msra.mxu0 %v13220_v59  ;;  %13216 = vmatprep.subr.bf16.mxu1 %v21840_v54 }
 0x5ff   :  { %v5096_v28 = vadd.f32 %v4974_v27, %v4791_v21  ;;  %v8540_v8 = vpop.f32.mrb[152].mxu1  ;;  %13222 = vmatprep.subr.bf16.mxu0 %v21840_v54  ;;  %12792 = vmatprep.mubr.msk.f32.mxu1 %vm13430_vm0, %v21563_v53 }
 0x600   :  { %v5651_v12 = vmul.f32 %v20296_v2, %v5095_v1  ;;  %v8544_v34 = vadd.f32 %v8540_v8, %v20513_v38  ;;  %v8619_v30 = vpop.f32.mrb[154].mxu0  ;;  %v12486_v32 = vpop.f32.mrb[153].mxu1  ;;  %12803 = vmatprep.mubr.msk.f32.mxu0 %vm13430_vm0, %v21563_v53 }
 0x601   :  { %v5652_v50 = vmul.f32 %v20296_v2, %v5096_v28  ;;  %v8623_v54 = vadd.f32 %v8619_v30, %v20520_v41  ;;  %v12497_v9 = vpop.f32.mrb[155].mxu0  ;;  %v5461_v11 = vpop.permute.xlu0 %5460  ;;  %13218 = vmatpush3.bf16.msra.mxu1 %v13217_v58 }
 0x602   :  { %v5584_v62 = vadd.f32 %v5461_v11, %v5339_v57  ;;  %v5463_v35 = vpop.permute.xlu1 %5462  ;;  %13224 = vmatpush3.bf16.msra.mxu0 %v13223_v19  ;;  %12806 = vmatprep.subr.mxu1 %v21563_v53  ;;  %v5718_v16 = vadd.f32 %v20314_v55, %v5651_v12 }
 0x603   :  { %v5585_v38 = vadd.f32 %v5463_v35, %v5340_v15  ;;  %v5719_v47 = vadd.f32 %v20314_v55, %v5652_v50 }
 0x604   :  { %v5840_v61 = vmul.f32 %v20296_v2, %v5584_v62  ;;  %v5779_v52 = vmax.f32 %v5718_v16, 0.0 }
 0x605   :  { %v5841_v44 = vmul.f32 %v20296_v2, %v5585_v38  ;;  %v5780_v43 = vmax.f32 %v5719_v47, 0.0 }
 0x606   :  { %v5901_v3 = vadd.f32 %v20314_v55, %v5840_v61 }
 0x607   :  { %v5902_v41 = vadd.f32 %v20314_v55, %v5841_v44 }
 0x608   :  { %v5962_v6 = vmax.f32 %v5901_v3, 0.0 }
 0x609   :  { %v5963_v37 = vmax.f32 %v5902_v41, 0.0 }
 0x60a   :  { %v6023_v63 = vmax.f32 %v5779_v52, %v5962_v6 }
 0x60b   :  { %v6024_v36 = vmax.f32 %v5780_v43, %v5963_v37 }
 0x60c   :  { %12793 = vmatmul.mubr.msk.f32.vlgmr.msra.gmra.mrb[180].mxu1 %vm6049_vm1, %v6023_v63 }
 0x60d   :  { %12804 = vmatmul.mubr.msk.f32.vlgmr.msra.gmra.mrb[182].mxu0 %vm6049_vm1, %v6024_v36  ;;  %12808 = vmatprep.mubr.msk.f32.mxu1 %vm13430_vm0, %v21563_v53 }
 0x60f   :  { %v8698_v17 = vpop.f32.mrb[154].mxu1 }
 0x610   :  { %v8702_v2 = vadd.f32 %v8698_v17, %v20565_v31  ;;  %v8777_v26 = vpop.f32.mrb[156].mxu0  ;;  %v12508_v18 = vpop.f32.mrb[155].mxu1 }
 0x611   :  { %v8781_v55 = vadd.f32 %v8777_v26, %v20572_v22  ;;  %v12519_v20 = vpop.f32.mrb[157].mxu0 }
 0x61f   :  { %v8856_v5 = vpop.f32.mrb[156].mxu1 }
 0x620   :  { %v8860_v46 = vadd.f32 %v8856_v5, %v8544_v34  ;;  %v8935_v14 = vpop.f32.mrb[158].mxu0  ;;  %v12530_v51 = vpop.f32.mrb[157].mxu1 }
 0x621   :  { %v8939_v39 = vadd.f32 %v8935_v14, %v8623_v54  ;;  %v12541_v56 = vpop.f32.mrb[159].mxu0 }
 0x62f   :  { %v9014_v4 = vpop.f32.mrb[158].mxu1 }
 0x630   :  { %v9018_v23 = vadd.f32 %v9014_v4, %v8702_v2  ;;  %v9093_v42 = vpop.f32.mrb[160].mxu0  ;;  %v12552_v24 = vpop.f32.mrb[159].mxu1 }
 0x631   :  { %v9097_v60 = vadd.f32 %v9093_v42, %v8781_v55  ;;  %v12563_v53 = vpop.f32.mrb[161].mxu0 }
 0x63f   :  { %v9172_v49 = vpop.f32.mrb[160].mxu1 }
 0x640   :  { %v9176_v25 = vadd.f32 %v9172_v49, %v8860_v46  ;;  %v9251_v31 = vpop.f32.mrb[162].mxu0  ;;  %v12574_v48 = vpop.f32.mrb[161].mxu1 }
 0x641   :  { %v9255_v33 = vadd.f32 %v9251_v31, %v8939_v39  ;;  %v12585_v59 = vpop.f32.mrb[163].mxu0 }
 0x64f   :  { %v9330_v22 = vpop.f32.mrb[162].mxu1 }
 0x650   :  { %v9334_v29 = vadd.f32 %v9330_v22, %v9018_v23  ;;  %v9409_v7 = vpop.f32.mrb[164].mxu0  ;;  %v12596_v13 = vpop.f32.mrb[163].mxu1 }
 0x651   :  { %v9413_v0 = vadd.f32 %v9409_v7, %v9097_v60  ;;  %v12607_v10 = vpop.f32.mrb[165].mxu0  ;;  %v10848_v7 = vld [vmem:[%s20654_s9] sm:$0x1]  ;;  %v10855_v13 = vlaneseq }
 0x65f   :  { %v9488_v40 = vpop.f32.mrb[164].mxu1 }
 0x660   :  { %v9492_v21 = vadd.f32 %v9488_v40, %v9176_v25  ;;  %v9567_v45 = vpop.f32.mrb[166].mxu0  ;;  %v12618_v58 = vpop.f32.mrb[165].mxu1 }
 0x661   :  { %v9571_v1 = vadd.f32 %v9567_v45, %v9255_v33  ;;  %v12629_v27 = vpop.f32.mrb[167].mxu0  ;;  %v11243_v33 = vld [vmem:[%s20653_s8] ss:$0 sm:$0xff]  ;;  %v10853_v40 = vpop.permute.xlu0 %10852 }
 0x66f   :  { %v9646_v19 = vpop.f32.mrb[166].mxu1 }
 0x670   :  { %v9650_v28 = vadd.f32 %v9646_v19, %v9334_v29  ;;  %v9725_v8 = vpop.f32.mrb[168].mxu0  ;;  %v12640_v57 = vpop.f32.mrb[167].mxu1 }
 0x671   :  { %v9729_v12 = vadd.f32 %v9725_v8, %v9413_v0  ;;  %v12651_v34 = vpop.f32.mrb[169].mxu0  ;;  %v10856_v0 = vshrl.u32 %v10855_v13, 7 }
 0x673   :  { %v10857_v10 = vsub.s32 0, %v10856_v0 }
 0x67f   :  { %v9804_v30 = vpop.f32.mrb[168].mxu1 }
 0x680   :  { %v9808_v32 = vadd.f32 %v9804_v30, %v9492_v21  ;;  %v9883_v15 = vpop.f32.mrb[170].mxu0  ;;  %v12662_v50 = vpop.f32.mrb[169].mxu1  ;;  %v10858_v21 = vrot.slane %v10853_v40, %v10857_v10 }
 0x681   :  { %v9887_v54 = vadd.f32 %v9883_v15, %v9571_v1  ;;  %v12673_v9 = vpop.f32.mrb[171].mxu0 }
 0x68f   :  { %v9962_v11 = vpop.f32.mrb[170].mxu1 }
 0x690   :  { %v9966_v62 = vadd.f32 %v9962_v11, %v9650_v28  ;;  %v10041_v35 = vpop.f32.mrb[172].mxu0  ;;  %v12684_v38 = vpop.f32.mrb[171].mxu1 }
 0x691   :  { %v10045_v16 = vadd.f32 %v10041_v35, %v9729_v12  ;;  %v12695_v61 = vpop.f32.mrb[173].mxu0 }
 0x69f   :  { %v10120_v47 = vpop.f32.mrb[172].mxu1 }
 0x6a0   :  { %v10124_v44 = vadd.f32 %v10120_v47, %v9808_v32  ;;  %v10199_v3 = vpop.f32.mrb[174].mxu0  ;;  %v12706_v41 = vpop.f32.mrb[173].mxu1 }
 0x6a1   :  { %v10203_v52 = vadd.f32 %v10199_v3, %v9887_v54  ;;  %v12717_v6 = vpop.f32.mrb[175].mxu0 }
 0x6af   :  { %v10278_v43 = vpop.f32.mrb[174].mxu1 }
 0x6b0   :  { %v10282_v37 = vadd.f32 %v10278_v43, %v9966_v62  ;;  %v10357_v63 = vpop.f32.mrb[176].mxu0  ;;  %v12728_v36 = vpop.f32.mrb[175].mxu1 }
 0x6b1   :  { %v10361_v17 = vadd.f32 %v10357_v63, %v10045_v16  ;;  %v12739_v2 = vpop.f32.mrb[177].mxu0 }
 0x6bf   :  { %v10436_v26 = vpop.f32.mrb[176].mxu1 }
 0x6c0   :  { %v10440_v18 = vadd.f32 %v10436_v26, %v10124_v44  ;;  %v10515_v55 = vpop.f32.mrb[178].mxu0  ;;  %v12750_v20 = vpop.f32.mrb[177].mxu1 }
 0x6c1   :  { %v10519_v5 = vadd.f32 %v10515_v55, %v10203_v52  ;;  %v12761_v46 = vpop.f32.mrb[179].mxu0 }
 0x6cf   :  { %v10594_v14 = vpop.f32.mrb[178].mxu1 }
 0x6d0   :  { %v10598_v51 = vadd.f32 %v10594_v14, %v10282_v37  ;;  %v10673_v39 = vpop.f32.mrb[180].mxu0  ;;  %v12772_v56 = vpop.f32.mrb[179].mxu1 }
 0x6d1   :  { %v10677_v4 = vadd.f32 %v10673_v39, %v10361_v17  ;;  %v12783_v23 = vpop.f32.mrb[181].mxu0 }
 0x6df   :  { %v10752_v42 = vpop.f32.mrb[180].mxu1 }
 0x6e0   :  { %v10756_v24 = vadd.f32 %v10752_v42, %v10440_v18  ;;  %v10831_v60 = vpop.f32.mrb[182].mxu0  ;;  %v12794_v53 = vpop.f32.mrb[181].mxu1 }
 0x6e1   :  { %v10835_v49 = vadd.f32 %v10831_v60, %v10519_v5  ;;  %v12805_v25 = vpop.f32.mrb[183].mxu0 }
 0x6e2   :  { %v10837_v31 = vadd.f32 %v10756_v24, %v10677_v4 }
 0x6e3   :  { %v10836_v48 = vadd.f32 %v10835_v49, %v10598_v51 }
 0x6e5   :  { %v10838_v59 = vadd.f32 %v10837_v31, %v10836_v48 }
 0x6e7   :  { %v10846_v22 = vadd.f32 %v11243_v33, %v10838_v59 }
 0x6e9   :  { %v10847_v29 = vmax.f32 %v10846_v22, 0.0 }
 0x6eb   :  { %12807 = vmatpush3.xpose.msra.mxu1 %v10847_v29 }
 0x6ee   :  { %12809 = vmatmul.mubr.f32.vlgmr.msra.gmra.mrb[182].mxu1 %v10848_v7 }
 0x7c1   :  { %v10925_v45 = vpop.f32.mrb[182].mxu1 }
 0x7c2   :  { %v10926_v58 = vadd.f32 %v10925_v45, %v10858_v21  ;;  %v12810_v1 = vpop.f32.mrb[183].mxu1 }
 0x7c4   :  { %10930 = vst.msk [vmem:[%s20655_s11] sm:$0x1] %vm10929_vm2, %v10926_v58 }

</bundles_post_ra>
